<compile_context>
chip_gen: v7x
topology: tpu7x:2x2x1
jax: 0.10.0
libtpu: 0.0.40
codegen_flags: <defaults>
</compile_context>

<pallas_src>
import functools

import jax
import jax.numpy as jnp
import numpy as np
from jax.experimental import pallas as pl
from jax.experimental.pallas import tpu as pltpu


# ----------------------------------------------------------------------------
# Pallas kernels
# ----------------------------------------------------------------------------
def _conv_tile_acc(rows, w, bias, relu):
    """3x3 conv on one haloed row tile via a single im2col MXU dot.

    rows: (th+2, W+2, Cin) bf16   (row/col zero halos included)
    w   : (9*Cin, Cout)    bf16   (taps ordered (dy, dx), channel-minor)
    bias: (1, Cout)        f32
    returns (th*W, Cout) f32 accumulator (bias and optional ReLU applied).
    """
    thp2, wpad, cin = rows.shape
    th, w_img = thp2 - 2, wpad - 2
    cols = [rows[dy:dy + th, dx:dx + w_img, :] for dy in range(3) for dx in range(3)]
    patch = jnp.concatenate(cols, axis=-1).reshape(th * w_img, 9 * cin)   # bf16
    acc = jnp.dot(patch, w, preferred_element_type=jnp.float32) + bias
    if relu:
        acc = jnp.maximum(acc, 0.0)
    return acc


def conv3x3_pad_kernel(x_ref, top_ref, bot_ref, w_ref, b_ref, o_ref, *, relu):
    """conv1/conv2: 3x3 conv (+bias, +ReLU) on a th-row tile of one batch item.

    x_ref  : (1, th, W+2, Cin) bf16 width-zero-padded input tile
    top_ref: (1, 1,  W+2, Cin) bf16 row above tile (zeros at image top)
    bot_ref: (1, 1,  W+2, Cin) bf16 row below tile (zeros at image bottom)
    w_ref  : (9*Cin, Cout) bf16 ; b_ref: (1, Cout) f32
    o_ref  : (1, th, W+2, Cout) bf16 -- output written ALREADY width-padded so
             the next conv layer consumes it with no HBM re-pad.
    """
    th, wpad = x_ref.shape[1], x_ref.shape[2]
    w_img = wpad - 2
    cout = w_ref.shape[1]
    rows = jnp.concatenate([top_ref[0], x_ref[0], bot_ref[0]], axis=0)   # (th+2,W+2,Cin)
    acc = _conv_tile_acc(rows, w_ref[...], b_ref[...], relu)
    y = acc.reshape(th, w_img, cout).astype(o_ref.dtype)
    zcol = jnp.zeros((th, 1, cout), o_ref.dtype)
    o_ref[0] = jnp.concatenate([zcol, y, zcol], axis=1)                  # (th,W+2,Cout)


def conv3x3_tokens_kernel(x_ref, top_ref, bot_ref, w_ref, b_ref, o_ref, pool_ref,
                          *, inv_hw):
    """conv3: 3x3 conv (no ReLU), all B batches per tile, lane-dense token out.

    x_ref  : (B, th, W+2, Cin) bf16 ; top/bot: (B, 1, W+2, Cin) bf16
    w_ref  : (9*Cin, Cout) bf16     ; b_ref  : (1, Cout) f32
    o_ref  : (th*W, B*Cout) bf16  -- batch b occupies lane block [b*Cout,(b+1)*Cout)
    pool_ref: (B, 1, Cout) f32    -- running global average, accumulated over t
    """
    batch = x_ref.shape[0]
    t = pl.program_id(0)

    @pl.when(t == 0)
    def _():
        pool_ref[...] = jnp.zeros_like(pool_ref)

    outs, sums = [], []
    for bb in range(batch):                                # static unroll (B small)
        rows = jnp.concatenate([top_ref[bb], x_ref[bb], bot_ref[bb]], axis=0)
        acc = _conv_tile_acc(rows, w_ref[...], b_ref[...], relu=False)   # (th*W,Cout) f32
        outs.append(acc.astype(o_ref.dtype))
        sums.append(jnp.sum(acc, axis=0, keepdims=True) * inv_hw)        # (1, Cout)
    o_ref[...] = jnp.concatenate(outs, axis=-1)            # (th*W, B*Cout) lane-dense
    pool_ref[...] += jnp.stack(sums, axis=0)               # (B, 1, Cout)


def se_mlp_kernel(p_ref, wa1_ref, ba1_ref, wa2_ref, ba2_ref,
                  wm1_ref, bm1_ref, wm2_ref, bm2_ref,
                  att_ref, g_ref):
    """SE attention branch (two 1x1 convs on pooled feature) + MLP branch."""
    B, _, C = p_ref.shape
    p = p_ref[...].reshape(B, C)
    h = jnp.dot(p, wa1_ref[...], preferred_element_type=jnp.float32) + ba1_ref[...]
    h = jnp.maximum(h, 0.0)
    a = jnp.dot(h, wa2_ref[...], preferred_element_type=jnp.float32) + ba2_ref[...]
    att = jax.nn.sigmoid(a)                                              # (B, C)
    # pooled(x * att) == pooled(x) * att (att constant over spatial dims)
    p_att = p * att
    m = jnp.dot(p_att, wm1_ref[...], preferred_element_type=jnp.float32) + bm1_ref[...]
    m = jnp.maximum(m, 0.0)
    g = jnp.dot(m, wm2_ref[...], preferred_element_type=jnp.float32) + bm2_ref[...]
    att_ref[...] = att[:, None, :]
    g_ref[...] = g[:, None, :]


def final_proj_kernel(x_ref, w_ref, att_ref, g_ref, b_ref, o_ref, acc_ref):
    """out[b,c,:] = att[b,c] * (x[:, b*C+c] . Wp) + bp + g[b,:], K-tiled over H*W.

    x_ref (tk, B*C) bf16 ; w_ref (tk, T) bf16 ; att_ref (B, C, 1) f32
    g_ref (B, 1, T) f32  ; b_ref (1, T) f32   ; o_ref (B, C, T) f32
    acc_ref (B*C, T) f32 scratch.  Single M=B*C dot per K step; wp is streamed
    exactly once per forward.
    """
    k = pl.program_id(0)

    @pl.when(k == 0)
    def _():
        acc_ref[...] = jnp.zeros_like(acc_ref)

    # transposed-LHS matmul: contract the H*W axis (dim 0 of both operands)
    acc_ref[...] += jax.lax.dot_general(
        x_ref[...], w_ref[...],
        dimension_numbers=(((0,), (0,)), ((), ())),
        preferred_element_type=jnp.float32)

    @pl.when(k == pl.num_programs(0) - 1)
    def _():
        Bc, Cc, Tc = o_ref.shape
        acc = acc_ref[...].reshape(Bc, Cc, Tc)
        # att*(x . wp) + bp + g  ==  (att*x) . wp + bp + g  (att folded as row scale)
        o_ref[...] = acc * att_ref[...] + b_ref[...] + g_ref[...]


# ----------------------------------------------------------------------------
# Wrappers (thin JAX glue + pallas_call plumbing)
# ----------------------------------------------------------------------------
def _halo_rows(x_pad, th):
    """Per-tile halo row strips (tiny: nt rows per image) for a W-padded NHWC x."""
    B, H, Wp, C = x_pad.shape
    zrow = jnp.zeros((B, 1, Wp, C), x_pad.dtype)
    top = jnp.concatenate([zrow, x_pad[:, th - 1:H - 1:th]], axis=1)   # (B, nt, Wp, C)
    bot = jnp.concatenate([x_pad[:, th:H:th], zrow], axis=1)           # (B, nt, Wp, C)
    return top, bot


def conv3x3_padded(x_pad, w, b, *, relu, th):
    """3x3 conv (pad=1) on width-padded NHWC input; output is width-padded too.

    x_pad: (B, H, W+2, Cin) bf16 ; w: (9*Cin, Cout) bf16 ; b: (Cout,) f32
    returns (B, H, W+2, Cout) bf16.
    """
    B, H, Wp, Cin = x_pad.shape
    Cout = w.shape[1]
    assert w.shape[0] == 9 * Cin and H % th == 0
    nt = H // th
    top, bot = _halo_rows(x_pad, th)
    kernel = functools.partial(conv3x3_pad_kernel, relu=relu)
    return pl.pallas_call(
        kernel,
        out_shape=jax.ShapeDtypeStruct((B, H, Wp, Cout), jnp.bfloat16),
        grid_spec=pltpu.PrefetchScalarGridSpec(
            num_scalar_prefetch=0, grid=(B, nt),
            in_specs=[
                pl.BlockSpec((1, th, Wp, Cin), lambda bb, t: (bb, t, 0, 0)),
                pl.BlockSpec((1, 1, Wp, Cin), lambda bb, t: (bb, t, 0, 0)),
                pl.BlockSpec((1, 1, Wp, Cin), lambda bb, t: (bb, t, 0, 0)),
                pl.BlockSpec((9 * Cin, Cout), lambda bb, t: (0, 0)),
                pl.BlockSpec((1, Cout), lambda bb, t: (0, 0)),
            ],
            out_specs=pl.BlockSpec((1, th, Wp, Cout), lambda bb, t: (bb, t, 0, 0))),
        compiler_params=pltpu.CompilerParams(
            dimension_semantics=("parallel", "arbitrary")),
    )(x_pad, top, bot, w, b.reshape(1, Cout))


def conv3x3_tokens(x_pad, w, b, *, th):
    """Final conv: lane-dense (H*W, B*Cout) token output + fused global avg pool."""
    B, H, Wp, Cin = x_pad.shape
    W = Wp - 2
    Cout = w.shape[1]
    assert w.shape[0] == 9 * Cin and H % th == 0
    nt = H // th
    top, bot = _halo_rows(x_pad, th)
    kernel = functools.partial(conv3x3_tokens_kernel, inv_hw=1.0 / (H * W))
    return pl.pallas_call(
        kernel,
        out_shape=(jax.ShapeDtypeStruct((H * W, B * Cout), jnp.bfloat16),
                   jax.ShapeDtypeStruct((B, 1, Cout), jnp.float32)),
        grid_spec=pltpu.PrefetchScalarGridSpec(
            num_scalar_prefetch=0, grid=(nt,),
            in_specs=[
                pl.BlockSpec((B, th, Wp, Cin), lambda t: (0, t, 0, 0)),
                pl.BlockSpec((B, 1, Wp, Cin), lambda t: (0, t, 0, 0)),
                pl.BlockSpec((B, 1, Wp, Cin), lambda t: (0, t, 0, 0)),
                pl.BlockSpec((9 * Cin, Cout), lambda t: (0, 0)),
                pl.BlockSpec((1, Cout), lambda t: (0, 0)),
            ],
            out_specs=(pl.BlockSpec((th * W, B * Cout), lambda t: (t, 0)),
                       pl.BlockSpec((B, 1, Cout), lambda t: (0, 0, 0)))),
        compiler_params=pltpu.CompilerParams(
            dimension_semantics=("arbitrary",)),   # pool accumulates across t
    )(x_pad, top, bot, w, b.reshape(1, Cout))


def se_mlp(pooled, wa1, ba1, wa2, ba2, wm1, bm1, wm2, bm2):
    B, _, C = pooled.shape
    Cr = wa1.shape[1]
    T = wm1.shape[1]

    def full(shape):
        return pl.BlockSpec(shape, lambda i, _s=shape: (0,) * len(_s))

    att, g = pl.pallas_call(
        se_mlp_kernel,
        out_shape=(jax.ShapeDtypeStruct((B, 1, C), jnp.float32),
                   jax.ShapeDtypeStruct((B, 1, T), jnp.float32)),
        grid_spec=pltpu.PrefetchScalarGridSpec(
            num_scalar_prefetch=0, grid=(1,),
            in_specs=[full((B, 1, C)),
                      full((C, Cr)), full((1, Cr)),
                      full((Cr, C)), full((1, C)),
                      full((C, T)), full((1, T)),
                      full((T, T)), full((1, T))],
            out_specs=(full((B, 1, C)), full((B, 1, T)))),
    )(pooled, wa1, ba1.reshape(1, -1), wa2, ba2.reshape(1, -1),
      wm1, bm1.reshape(1, -1), wm2, bm2.reshape(1, -1))
    return att, g


def final_proj(x_tok, wp, bp, att_col, g, *, batch, channels, tk=8192):
    """x_tok (HW, B*C) bf16 ; wp (HW, T) bf16 ; bp (T,) f32 ;
    att_col (B, C, 1) f32 ; g (B, 1, T) f32  ->  (B, C, T) f32."""
    HW, BC = x_tok.shape
    T = wp.shape[1]
    assert BC == batch * channels
    tk = min(tk, HW)
    assert HW % tk == 0
    # Single "arbitrary" K axis: wp (dominant HBM tensor) is read exactly once.
    # tk=8192 keeps double-buffered wp+x within v7x's 32 MiB scoped VMEM default;
    # on v5e/v6e it can be raised with vmem_limit_bytes if desired.
    return pl.pallas_call(
        final_proj_kernel,
        out_shape=jax.ShapeDtypeStruct((batch, channels, T), jnp.float32),
        grid_spec=pltpu.PrefetchScalarGridSpec(
            num_scalar_prefetch=0, grid=(HW // tk,),
            in_specs=[
                pl.BlockSpec((tk, BC), lambda k: (k, 0)),
                pl.BlockSpec((tk, T), lambda k: (k, 0)),
                pl.BlockSpec((batch, channels, 1), lambda k: (0, 0, 0)),
                pl.BlockSpec((batch, 1, T), lambda k: (0, 0, 0)),
                pl.BlockSpec((1, T), lambda k: (0, 0)),
            ],
            out_specs=pl.BlockSpec((batch, channels, T), lambda k: (0, 0, 0)),
            scratch_shapes=[pltpu.VMEM((BC, T), jnp.float32)]),
        compiler_params=pltpu.CompilerParams(
            dimension_semantics=("arbitrary",)),
    )(x_tok, wp, att_col, g, bp.reshape(1, T))


def polarization_forward(x_nchw, p, *, th=32, tk=8192):
    """Pallas implementation of PolarizationPreprocessCombined.forward.

    At full scale (H=W=256) use th=32 on v5e/v6e (th=16 for the tokens conv on
    v7x) and tk=8192; the small self-test below uses th=8.
    """
    B, Cin, H, W = x_nchw.shape
    C = p['w3'].shape[2]                                          # 64
    th = min(th, H)
    assert H % th == 0

    # NCHW -> NHWC, pad Cin up to 8 (packing-friendly), pre-pad width, cast bf16.
    cin_p = 8
    x = jnp.transpose(x_nchw, (0, 2, 3, 1))
    x = jnp.pad(x, ((0, 0), (0, 0), (1, 1), (0, cin_p - Cin))).astype(jnp.bfloat16)

    # conv weights as (9*Cin, Cout) bf16 im2col matrices (taps ordered (dy, dx)).
    w1 = jnp.pad(p['w1'], ((0, 0), (0, cin_p - Cin), (0, 0))
                 ).reshape(9 * cin_p, C).astype(jnp.bfloat16)
    w2 = p['w2'].reshape(9 * C, C).astype(jnp.bfloat16)
    w3 = p['w3'].reshape(9 * C, C).astype(jnp.bfloat16)

    y1 = conv3x3_padded(x, w1, p['b1'], relu=True, th=th)          # (B,H,W+2,C) bf16
    y2 = conv3x3_padded(y1, w2, p['b2'], relu=True, th=th)         # (B,H,W+2,C) bf16
    x_tok, pooled = conv3x3_tokens(y2, w3, p['b3'], th=th)         # (HW,B*C) bf16, (B,1,C) f32

    att, g = se_mlp(pooled, p['wa1'], p['ba1'], p['wa2'], p['ba2'],
                    p['wm1'], p['bm1'], p['wm2'], p['bm2'])        # (B,1,C), (B,1,T)
    att_col = jnp.transpose(att, (0, 2, 1))                        # (B, C, 1)

    return final_proj(x_tok, p['wp'].astype(jnp.bfloat16), p['bp'], att_col, g,
                      batch=B, channels=C, tk=tk)


# ----------------------------------------------------------------------------
# Deterministic parameter init + pure-JAX (f32) reference
# ----------------------------------------------------------------------------
def init_params(key, in_channels=6, out_channels=64, token_dim=480, hw=256 * 256):
    ks = jax.random.split(key, 16)

    def rnd(k, fan_in, shape):
        return jax.random.normal(k, shape, jnp.float32) / np.sqrt(fan_in)

    c, t, cr = out_channels, token_dim, out_channels // 8
    return {
        'w1': rnd(ks[0], 9 * in_channels, (9, in_channels, c)),
        'b1': rnd(ks[1], 9 * in_channels, (c,)),
        'w2': rnd(ks[2], 9 * c, (9, c, c)), 'b2': rnd(ks[3], 9 * c, (c,)),
        'w3': rnd(ks[4], 9 * c, (9, c, c)), 'b3': rnd(ks[5], 9 * c, (c,)),
        'wa1': rnd(ks[6], c, (c, cr)),      'ba1': rnd(ks[7], c, (cr,)),
        'wa2': rnd(ks[8], cr, (cr, c)),     'ba2': rnd(ks[9], cr, (c,)),
        'wm1': rnd(ks[10], c, (c, t)),      'bm1': rnd(ks[11], c, (t,)),
        'wm2': rnd(ks[12], t, (t, t)),      'bm2': rnd(ks[13], t, (t,)),
        'wp': rnd(ks[14], hw, (hw, t)),     'bp': rnd(ks[15], hw, (t,)),
    }


def im2col_3x3(x):  # (B, H, W, C) -> (B*H*W, 9*C), padding=1, taps ordered (dy, dx)
    B, H, W, C = x.shape
    xp = jnp.pad(x, ((0, 0), (1, 1), (1, 1), (0, 0)))
    cols = [xp[:, dy:dy + H, dx:dx + W, :] for dy in range(3) for dx in range(3)]
    return jnp.concatenate(cols, axis=-1).reshape(B * H * W, 9 * C)


def reference_forward(x_nchw, p):
    """Pure-JAX f32 reference mirroring the PyTorch forward."""
    B, Cin, H, W = x_nchw.shape
    C = p['w3'].shape[2]
    x = jnp.transpose(x_nchw, (0, 2, 3, 1))

    def conv(x, w9, b, relu):
        wmat = w9.reshape(-1, w9.shape[2])                        # (9*Cin, Cout)
        y = im2col_3x3(x) @ wmat + b
        if relu:
            y = jnp.maximum(y, 0.0)
        return y.reshape(B, H, W, -1)

    x = conv(x, p['w1'], p['b1'], True)
    x = conv(x, p['w2'], p['b2'], True)
    x = conv(x, p['w3'], p['b3'], False)
    pooled = x.mean(axis=(1, 2))                                  # (B, C)
    h = jnp.maximum(pooled @ p['wa1'] + p['ba1'], 0.0)
    att = jax.nn.sigmoid(h @ p['wa2'] + p['ba2'])                 # (B, C)
    x_att = x * att[:, None, None, :]
    p2 = x_att.mean(axis=(1, 2))
    g = jnp.maximum(p2 @ p['wm1'] + p['bm1'], 0.0) @ p['wm2'] + p['bm2']
    x_tok = jnp.transpose(x_att, (0, 3, 1, 2)).reshape(B, C, H * W)
    return x_tok @ p['wp'] + p['bp'] + g[:, None, :]


# ----------------------------------------------------------------------------
if __name__ == "__main__":
    # Small shapes consistent with the module's structure (the real module uses
    # H = W = 256 per its hard-coded Linear(256*256, 480) and view(B, 64, -1)).
    B, Cin, H, W = 2, 6, 32, 32
    C, T = 64, 480
    k_x, k_p = jax.random.split(jax.random.PRNGKey(0))
    x = jax.random.normal(k_x, (B, Cin, H, W), jnp.float32)
    params = init_params(k_p, in_channels=Cin, out_channels=C,
                         token_dim=T, hw=H * W)

    fwd = jax.jit(functools.partial(polarization_forward, th=8, tk=8192))
    out = jax.block_until_ready(fwd(x, params))
    assert out.shape == (B, C, T) and out.dtype == jnp.float32

    ref = jax.block_until_ready(jax.jit(reference_forward)(x, params))
    err = float(jnp.max(jnp.abs(out - ref)))
    # bf16 MXU inputs with f32 accumulation; outputs are O(1), expected err ~2e-2.
    assert np.isfinite(err) and err < 0.15, f"max abs err {err}"

    print("KERNEL_OK")
</pallas_src>

<mosaic_0001>
module attributes {stable_mosaic.version = 11 : i64} {
  func.func @conv3x3_pad_kernel(%arg0: i32, %arg1: i32, %arg2: memref<1x8x34x8xbf16, #tpu.memory_space<vmem>>, %arg3: memref<1x1x34x8xbf16, #tpu.memory_space<vmem>>, %arg4: memref<1x1x34x8xbf16, #tpu.memory_space<vmem>>, %arg5: memref<72x64xbf16, #tpu.memory_space<vmem>>, %arg6: memref<1x64xf32, #tpu.memory_space<vmem>>, %arg7: memref<1x8x34x64xbf16, #tpu.memory_space<vmem>>) attributes {dimension_semantics = [#tpu.dimension_semantics<parallel>, #tpu.dimension_semantics<arbitrary>], iteration_bounds = array<i64: 2, 4>, scalar_prefetch = 0 : i64, scratch_operands = 0 : i64, tpu.core_type = #tpu.core_type<tc>, window_params = [{transform_indices = @transform_0, window_bounds = array<i64: 1, 8, 34, 8>}, {transform_indices = @transform_1, window_bounds = array<i64: 1, 1, 34, 8>}, {transform_indices = @transform_2, window_bounds = array<i64: 1, 1, 34, 8>}, {pipeline_mode = #tpu.pipeline_mode<synchronous>, transform_indices = @transform_3, window_bounds = array<i64: 72, 64>}, {pipeline_mode = #tpu.pipeline_mode<synchronous>, transform_indices = @transform_4, window_bounds = array<i64: 1, 64>}, {transform_indices = @transform_5, window_bounds = array<i64: 1, 8, 34, 64>}]} {
    %c0 = arith.constant 0 : index
    %c0_0 = arith.constant 0 : index
    %c0_1 = arith.constant 0 : index
    %c0_2 = arith.constant 0 : index
    %0 = vector.load %arg3[%c0, %c0_0, %c0_1, %c0_2] : memref<1x1x34x8xbf16, #tpu.memory_space<vmem>>, vector<1x1x34x8xbf16>
    %1 = vector.shape_cast %0 : vector<1x1x34x8xbf16> to vector<1x34x8xbf16>
    %c0_3 = arith.constant 0 : index
    %c0_4 = arith.constant 0 : index
    %c0_5 = arith.constant 0 : index
    %c0_6 = arith.constant 0 : index
    %2 = vector.load %arg2[%c0_3, %c0_4, %c0_5, %c0_6] : memref<1x8x34x8xbf16, #tpu.memory_space<vmem>>, vector<1x8x34x8xbf16>
    %3 = vector.shape_cast %2 : vector<1x8x34x8xbf16> to vector<8x34x8xbf16>
    %c0_7 = arith.constant 0 : index
    %c0_8 = arith.constant 0 : index
    %c0_9 = arith.constant 0 : index
    %c0_10 = arith.constant 0 : index
    %4 = vector.load %arg4[%c0_7, %c0_8, %c0_9, %c0_10] : memref<1x1x34x8xbf16, #tpu.memory_space<vmem>>, vector<1x1x34x8xbf16>
    %5 = vector.shape_cast %4 : vector<1x1x34x8xbf16> to vector<1x34x8xbf16>
    %6 = tpu.concatenate %1, %3, %5 in 0 : vector<1x34x8xbf16>, vector<8x34x8xbf16>, vector<1x34x8xbf16> -> vector<10x34x8xbf16>
    %c0_11 = arith.constant 0 : index
    %c0_12 = arith.constant 0 : index
    %7 = vector.load %arg5[%c0_11, %c0_12] : memref<72x64xbf16, #tpu.memory_space<vmem>>, vector<72x64xbf16>
    %c0_13 = arith.constant 0 : index
    %c0_14 = arith.constant 0 : index
    %8 = vector.load %arg6[%c0_13, %c0_14] : memref<1x64xf32, #tpu.memory_space<vmem>>, vector<1x64xf32>
    %9 = vector.extract_strided_slice %6 {offsets = [0, 0, 0], sizes = [8, 32, 8], strides = [1, 1, 1]} : vector<10x34x8xbf16> to vector<8x32x8xbf16>
    %10 = vector.extract_strided_slice %6 {offsets = [0, 1, 0], sizes = [8, 32, 8], strides = [1, 1, 1]} : vector<10x34x8xbf16> to vector<8x32x8xbf16>
    %11 = vector.extract_strided_slice %6 {offsets = [0, 2, 0], sizes = [8, 32, 8], strides = [1, 1, 1]} : vector<10x34x8xbf16> to vector<8x32x8xbf16>
    %12 = vector.extract_strided_slice %6 {offsets = [1, 0, 0], sizes = [8, 32, 8], strides = [1, 1, 1]} : vector<10x34x8xbf16> to vector<8x32x8xbf16>
    %13 = vector.extract_strided_slice %6 {offsets = [1, 1, 0], sizes = [8, 32, 8], strides = [1, 1, 1]} : vector<10x34x8xbf16> to vector<8x32x8xbf16>
    %14 = vector.extract_strided_slice %6 {offsets = [1, 2, 0], sizes = [8, 32, 8], strides = [1, 1, 1]} : vector<10x34x8xbf16> to vector<8x32x8xbf16>
    %15 = vector.extract_strided_slice %6 {offsets = [2, 0, 0], sizes = [8, 32, 8], strides = [1, 1, 1]} : vector<10x34x8xbf16> to vector<8x32x8xbf16>
    %16 = vector.extract_strided_slice %6 {offsets = [2, 1, 0], sizes = [8, 32, 8], strides = [1, 1, 1]} : vector<10x34x8xbf16> to vector<8x32x8xbf16>
    %17 = vector.extract_strided_slice %6 {offsets = [2, 2, 0], sizes = [8, 32, 8], strides = [1, 1, 1]} : vector<10x34x8xbf16> to vector<8x32x8xbf16>
    %18 = tpu.concatenate %9, %10, %11, %12, %13, %14, %15, %16, %17 in 2 : vector<8x32x8xbf16>, vector<8x32x8xbf16>, vector<8x32x8xbf16>, vector<8x32x8xbf16>, vector<8x32x8xbf16>, vector<8x32x8xbf16>, vector<8x32x8xbf16>, vector<8x32x8xbf16>, vector<8x32x8xbf16> -> vector<8x32x72xbf16>
    %19 = vector.shape_cast %18 : vector<8x32x72xbf16> to vector<256x72xbf16>
    %cst = arith.constant dense<0.000000e+00> : vector<256x64xf32>
    %20 = tpu.matmul %19, %7, %cst {dimension_numbers = #tpu.dot_dimension_numbers<[1], [0], [0], [1], [0, 0, 1, 1], [], []>} : vector<256x72xbf16>, vector<72x64xbf16>, vector<256x64xf32> -> vector<256x64xf32>
    %21 = vector.broadcast %8 : vector<1x64xf32> to vector<256x64xf32>
    %22 = arith.addf %20, %21 : vector<256x64xf32>
    %cst_15 = arith.constant 0.000000e+00 : f32
    %23 = vector.broadcast %cst_15 : f32 to vector<256x64xf32>
    %24 = arith.maximumf %22, %23 : vector<256x64xf32>
    %25 = vector.shape_cast %24 : vector<256x64xf32> to vector<8x32x64xf32>
    %26 = arith.truncf %25 : vector<8x32x64xf32> to vector<8x32x64xbf16>
    %cst_16 = arith.constant 0.000000e+00 : bf16
    %27 = vector.broadcast %cst_16 : bf16 to vector<8x1x64xbf16>
    %28 = tpu.concatenate %27, %26, %27 in 1 : vector<8x1x64xbf16>, vector<8x32x64xbf16>, vector<8x1x64xbf16> -> vector<8x34x64xbf16>
    %c0_17 = arith.constant 0 : index
    %c0_18 = arith.constant 0 : index
    %c0_19 = arith.constant 0 : index
    %c0_20 = arith.constant 0 : index
    %29 = vector.load %arg7[%c0_17, %c0_18, %c0_19, %c0_20] : memref<1x8x34x64xbf16, #tpu.memory_space<vmem>>, vector<1x8x34x64xbf16>
    %30 = vector.shape_cast %29 : vector<1x8x34x64xbf16> to vector<8x34x64xbf16>
    %31 = vector.shape_cast %28 : vector<8x34x64xbf16> to vector<1x8x34x64xbf16>
    tpu.vector_store %arg7[%c0_17, %c0_18, %c0_19, %c0_20], %31 {strides = array<i32>} : memref<1x8x34x64xbf16, #tpu.memory_space<vmem>>, vector<1x8x34x64xbf16>,
    return
  }
  func.func @transform_0(%arg0: i32, %arg1: i32) -> (i32, i32, i32, i32) {
    %c0_i32 = arith.constant 0 : i32
    %c0_i32_0 = arith.constant 0 : i32
    %c0_i32_1 = arith.constant 0 : i32
    return %arg0, %arg1, %c0_i32, %c0_i32_0 : i32, i32, i32, i32
  }
  func.func @transform_1(%arg0: i32, %arg1: i32) -> (i32, i32, i32, i32) {
    %c0_i32 = arith.constant 0 : i32
    %c0_i32_0 = arith.constant 0 : i32
    %c0_i32_1 = arith.constant 0 : i32
    return %arg0, %arg1, %c0_i32, %c0_i32_0 : i32, i32, i32, i32
  }
  func.func @transform_2(%arg0: i32, %arg1: i32) -> (i32, i32, i32, i32) {
    %c0_i32 = arith.constant 0 : i32
    %c0_i32_0 = arith.constant 0 : i32
    %c0_i32_1 = arith.constant 0 : i32
    return %arg0, %arg1, %c0_i32, %c0_i32_0 : i32, i32, i32, i32
  }
  func.func @transform_3(%arg0: i32, %arg1: i32) -> (i32, i32) {
    %c0_i32 = arith.constant 0 : i32
    %c0_i32_0 = arith.constant 0 : i32
    %c0_i32_1 = arith.constant 0 : i32
    return %c0_i32, %c0_i32_0 : i32, i32
  }
  func.func @transform_4(%arg0: i32, %arg1: i32) -> (i32, i32) {
    %c0_i32 = arith.constant 0 : i32
    %c0_i32_0 = arith.constant 0 : i32
    %c0_i32_1 = arith.constant 0 : i32
    return %c0_i32, %c0_i32_0 : i32, i32
  }
  func.func @transform_5(%arg0: i32, %arg1: i32) -> (i32, i32, i32, i32) {
    %c0_i32 = arith.constant 0 : i32
    %c0_i32_0 = arith.constant 0 : i32
    %c0_i32_1 = arith.constant 0 : i32
    return %arg0, %arg1, %c0_i32, %c0_i32_0 : i32, i32, i32, i32
  }
}

module attributes {stable_mosaic.version = 11 : i64} {
  func.func @conv3x3_pad_kernel(%arg0: i32, %arg1: i32, %arg2: memref<1x8x34x64xbf16, #tpu.memory_space<vmem>>, %arg3: memref<1x1x34x64xbf16, #tpu.memory_space<vmem>>, %arg4: memref<1x1x34x64xbf16, #tpu.memory_space<vmem>>, %arg5: memref<576x64xbf16, #tpu.memory_space<vmem>>, %arg6: memref<1x64xf32, #tpu.memory_space<vmem>>, %arg7: memref<1x8x34x64xbf16, #tpu.memory_space<vmem>>) attributes {dimension_semantics = [#tpu.dimension_semantics<parallel>, #tpu.dimension_semantics<arbitrary>], iteration_bounds = array<i64: 2, 4>, scalar_prefetch = 0 : i64, scratch_operands = 0 : i64, tpu.core_type = #tpu.core_type<tc>, window_params = [{transform_indices = @transform_0, window_bounds = array<i64: 1, 8, 34, 64>}, {transform_indices = @transform_1, window_bounds = array<i64: 1, 1, 34, 64>}, {transform_indices = @transform_2, window_bounds = array<i64: 1, 1, 34, 64>}, {pipeline_mode = #tpu.pipeline_mode<synchronous>, transform_indices = @transform_3, window_bounds = array<i64: 576, 64>}, {pipeline_mode = #tpu.pipeline_mode<synchronous>, transform_indices = @transform_4, window_bounds = array<i64: 1, 64>}, {transform_indices = @transform_5, window_bounds = array<i64: 1, 8, 34, 64>}]} {
    %c0 = arith.constant 0 : index
    %c0_0 = arith.constant 0 : index
    %c0_1 = arith.constant 0 : index
    %c0_2 = arith.constant 0 : index
    %0 = vector.load %arg3[%c0, %c0_0, %c0_1, %c0_2] : memref<1x1x34x64xbf16, #tpu.memory_space<vmem>>, vector<1x1x34x64xbf16>
    %1 = vector.shape_cast %0 : vector<1x1x34x64xbf16> to vector<1x34x64xbf16>
    %c0_3 = arith.constant 0 : index
    %c0_4 = arith.constant 0 : index
    %c0_5 = arith.constant 0 : index
    %c0_6 = arith.constant 0 : index
    %2 = vector.load %arg2[%c0_3, %c0_4, %c0_5, %c0_6] : memref<1x8x34x64xbf16, #tpu.memory_space<vmem>>, vector<1x8x34x64xbf16>
    %3 = vector.shape_cast %2 : vector<1x8x34x64xbf16> to vector<8x34x64xbf16>
    %c0_7 = arith.constant 0 : index
    %c0_8 = arith.constant 0 : index
    %c0_9 = arith.constant 0 : index
    %c0_10 = arith.constant 0 : index
    %4 = vector.load %arg4[%c0_7, %c0_8, %c0_9, %c0_10] : memref<1x1x34x64xbf16, #tpu.memory_space<vmem>>, vector<1x1x34x64xbf16>
    %5 = vector.shape_cast %4 : vector<1x1x34x64xbf16> to vector<1x34x64xbf16>
    %6 = tpu.concatenate %1, %3, %5 in 0 : vector<1x34x64xbf16>, vector<8x34x64xbf16>, vector<1x34x64xbf16> -> vector<10x34x64xbf16>
    %c0_11 = arith.constant 0 : index
    %c0_12 = arith.constant 0 : index
    %7 = vector.load %arg5[%c0_11, %c0_12] : memref<576x64xbf16, #tpu.memory_space<vmem>>, vector<576x64xbf16>
    %c0_13 = arith.constant 0 : index
    %c0_14 = arith.constant 0 : index
    %8 = vector.load %arg6[%c0_13, %c0_14] : memref<1x64xf32, #tpu.memory_space<vmem>>, vector<1x64xf32>
    %9 = vector.extract_strided_slice %6 {offsets = [0, 0, 0], sizes = [8, 32, 64], strides = [1, 1, 1]} : vector<10x34x64xbf16> to vector<8x32x64xbf16>
    %10 = vector.extract_strided_slice %6 {offsets = [0, 1, 0], sizes = [8, 32, 64], strides = [1, 1, 1]} : vector<10x34x64xbf16> to vector<8x32x64xbf16>
    %11 = vector.extract_strided_slice %6 {offsets = [0, 2, 0], sizes = [8, 32, 64], strides = [1, 1, 1]} : vector<10x34x64xbf16> to vector<8x32x64xbf16>
    %12 = vector.extract_strided_slice %6 {offsets = [1, 0, 0], sizes = [8, 32, 64], strides = [1, 1, 1]} : vector<10x34x64xbf16> to vector<8x32x64xbf16>
    %13 = vector.extract_strided_slice %6 {offsets = [1, 1, 0], sizes = [8, 32, 64], strides = [1, 1, 1]} : vector<10x34x64xbf16> to vector<8x32x64xbf16>
    %14 = vector.extract_strided_slice %6 {offsets = [1, 2, 0], sizes = [8, 32, 64], strides = [1, 1, 1]} : vector<10x34x64xbf16> to vector<8x32x64xbf16>
    %15 = vector.extract_strided_slice %6 {offsets = [2, 0, 0], sizes = [8, 32, 64], strides = [1, 1, 1]} : vector<10x34x64xbf16> to vector<8x32x64xbf16>
    %16 = vector.extract_strided_slice %6 {offsets = [2, 1, 0], sizes = [8, 32, 64], strides = [1, 1, 1]} : vector<10x34x64xbf16> to vector<8x32x64xbf16>
    %17 = vector.extract_strided_slice %6 {offsets = [2, 2, 0], sizes = [8, 32, 64], strides = [1, 1, 1]} : vector<10x34x64xbf16> to vector<8x32x64xbf16>
    %18 = tpu.concatenate %9, %10, %11, %12, %13, %14, %15, %16, %17 in 2 : vector<8x32x64xbf16>, vector<8x32x64xbf16>, vector<8x32x64xbf16>, vector<8x32x64xbf16>, vector<8x32x64xbf16>, vector<8x32x64xbf16>, vector<8x32x64xbf16>, vector<8x32x64xbf16>, vector<8x32x64xbf16> -> vector<8x32x576xbf16>
    %19 = vector.shape_cast %18 : vector<8x32x576xbf16> to vector<256x576xbf16>
    %cst = arith.constant dense<0.000000e+00> : vector<256x64xf32>
    %20 = tpu.matmul %19, %7, %cst {dimension_numbers = #tpu.dot_dimension_numbers<[1], [0], [0], [1], [0, 0, 1, 1], [], []>} : vector<256x576xbf16>, vector<576x64xbf16>, vector<256x64xf32> -> vector<256x64xf32>
    %21 = vector.broadcast %8 : vector<1x64xf32> to vector<256x64xf32>
    %22 = arith.addf %20, %21 : vector<256x64xf32>
    %cst_15 = arith.constant 0.000000e+00 : f32
    %23 = vector.broadcast %cst_15 : f32 to vector<256x64xf32>
    %24 = arith.maximumf %22, %23 : vector<256x64xf32>
    %25 = vector.shape_cast %24 : vector<256x64xf32> to vector<8x32x64xf32>
    %26 = arith.truncf %25 : vector<8x32x64xf32> to vector<8x32x64xbf16>
    %cst_16 = arith.constant 0.000000e+00 : bf16
    %27 = vector.broadcast %cst_16 : bf16 to vector<8x1x64xbf16>
    %28 = tpu.concatenate %27, %26, %27 in 1 : vector<8x1x64xbf16>, vector<8x32x64xbf16>, vector<8x1x64xbf16> -> vector<8x34x64xbf16>
    %c0_17 = arith.constant 0 : index
    %c0_18 = arith.constant 0 : index
    %c0_19 = arith.constant 0 : index
    %c0_20 = arith.constant 0 : index
    %29 = vector.load %arg7[%c0_17, %c0_18, %c0_19, %c0_20] : memref<1x8x34x64xbf16, #tpu.memory_space<vmem>>, vector<1x8x34x64xbf16>
    %30 = vector.shape_cast %29 : vector<1x8x34x64xbf16> to vector<8x34x64xbf16>
    %31 = vector.shape_cast %28 : vector<8x34x64xbf16> to vector<1x8x34x64xbf16>
    tpu.vector_store %arg7[%c0_17, %c0_18, %c0_19, %c0_20], %31 {strides = array<i32>} : memref<1x8x34x64xbf16, #tpu.memory_space<vmem>>, vector<1x8x34x64xbf16>,
    return
  }
  func.func @transform_0(%arg0: i32, %arg1: i32) -> (i32, i32, i32, i32) {
    %c0_i32 = arith.constant 0 : i32
    %c0_i32_0 = arith.constant 0 : i32
    %c0_i32_1 = arith.constant 0 : i32
    return %arg0, %arg1, %c0_i32, %c0_i32_0 : i32, i32, i32, i32
  }
  func.func @transform_1(%arg0: i32, %arg1: i32) -> (i32, i32, i32, i32) {
    %c0_i32 = arith.constant 0 : i32
    %c0_i32_0 = arith.constant 0 : i32
    %c0_i32_1 = arith.constant 0 : i32
    return %arg0, %arg1, %c0_i32, %c0_i32_0 : i32, i32, i32, i32
  }
  func.func @transform_2(%arg0: i32, %arg1: i32) -> (i32, i32, i32, i32) {
    %c0_i32 = arith.constant 0 : i32
    %c0_i32_0 = arith.constant 0 : i32
    %c0_i32_1 = arith.constant 0 : i32
    return %arg0, %arg1, %c0_i32, %c0_i32_0 : i32, i32, i32, i32
  }
  func.func @transform_3(%arg0: i32, %arg1: i32) -> (i32, i32) {
    %c0_i32 = arith.constant 0 : i32
    %c0_i32_0 = arith.constant 0 : i32
    %c0_i32_1 = arith.constant 0 : i32
    return %c0_i32, %c0_i32_0 : i32, i32
  }
  func.func @transform_4(%arg0: i32, %arg1: i32) -> (i32, i32) {
    %c0_i32 = arith.constant 0 : i32
    %c0_i32_0 = arith.constant 0 : i32
    %c0_i32_1 = arith.constant 0 : i32
    return %c0_i32, %c0_i32_0 : i32, i32
  }
  func.func @transform_5(%arg0: i32, %arg1: i32) -> (i32, i32, i32, i32) {
    %c0_i32 = arith.constant 0 : i32
    %c0_i32_0 = arith.constant 0 : i32
    %c0_i32_1 = arith.constant 0 : i32
    return %arg0, %arg1, %c0_i32, %c0_i32_0 : i32, i32, i32, i32
  }
}

module attributes {stable_mosaic.version = 11 : i64} {
  func.func @conv3x3_tokens_kernel(%arg0: i32, %arg1: memref<2x8x34x64xbf16, #tpu.memory_space<vmem>>, %arg2: memref<2x1x34x64xbf16, #tpu.memory_space<vmem>>, %arg3: memref<2x1x34x64xbf16, #tpu.memory_space<vmem>>, %arg4: memref<576x64xbf16, #tpu.memory_space<vmem>>, %arg5: memref<1x64xf32, #tpu.memory_space<vmem>>, %arg6: memref<256x128xbf16, #tpu.memory_space<vmem>>, %arg7: memref<2x1x64xf32, #tpu.memory_space<vmem>>) attributes {dimension_semantics = [#tpu.dimension_semantics<arbitrary>], iteration_bounds = array<i64: 4>, scalar_prefetch = 0 : i64, scratch_operands = 0 : i64, tpu.core_type = #tpu.core_type<tc>, window_params = [{transform_indices = @transform_0, window_bounds = array<i64: 2, 8, 34, 64>}, {transform_indices = @transform_1, window_bounds = array<i64: 2, 1, 34, 64>}, {transform_indices = @transform_2, window_bounds = array<i64: 2, 1, 34, 64>}, {pipeline_mode = #tpu.pipeline_mode<synchronous>, transform_indices = @transform_3, window_bounds = array<i64: 576, 64>}, {pipeline_mode = #tpu.pipeline_mode<synchronous>, transform_indices = @transform_4, window_bounds = array<i64: 1, 64>}, {transform_indices = @transform_5, window_bounds = array<i64: 256, 128>}, {pipeline_mode = #tpu.pipeline_mode<synchronous>, transform_indices = @transform_6, window_bounds = array<i64: 2, 1, 64>}]} {
    %c0_i32 = arith.constant 0 : i32
    %0 = arith.cmpi eq, %arg0, %c0_i32 : i32
    %1 = arith.extui %0 : i1 to i32
    %c0_i32_0 = arith.constant 0 : i32
    %2 = arith.cmpi ne, %1, %c0_i32_0 : i32
    scf.if %2 {
      %cst_44 = arith.constant 0.000000e+00 : f32
      %67 = vector.broadcast %cst_44 : f32 to vector<2x1x64xf32>
      %c0_45 = arith.constant 0 : index
      %c0_46 = arith.constant 0 : index
      %c0_47 = arith.constant 0 : index
      %68 = vector.load %arg7[%c0_45, %c0_46, %c0_47] : memref<2x1x64xf32, #tpu.memory_space<vmem>>, vector<2x1x64xf32>
      tpu.vector_store %arg7[%c0_45, %c0_46, %c0_47], %67 {strides = array<i32>} : memref<2x1x64xf32, #tpu.memory_space<vmem>>, vector<2x1x64xf32>,
    } else {
    }
    %c0 = arith.constant 0 : index
    %c0_1 = arith.constant 0 : index
    %c0_2 = arith.constant 0 : index
    %c0_3 = arith.constant 0 : index
    %3 = vector.load %arg2[%c0, %c0_1, %c0_2, %c0_3] : memref<2x1x34x64xbf16, #tpu.memory_space<vmem>>, vector<1x1x34x64xbf16>
    %4 = vector.shape_cast %3 : vector<1x1x34x64xbf16> to vector<1x34x64xbf16>
    %c0_4 = arith.constant 0 : index
    %c0_5 = arith.constant 0 : index
    %c0_6 = arith.constant 0 : index
    %c0_7 = arith.constant 0 : index
    %5 = vector.load %arg1[%c0_4, %c0_5, %c0_6, %c0_7] : memref<2x8x34x64xbf16, #tpu.memory_space<vmem>>, vector<1x8x34x64xbf16>
    %6 = vector.shape_cast %5 : vector<1x8x34x64xbf16> to vector<8x34x64xbf16>
    %c0_8 = arith.constant 0 : index
    %c0_9 = arith.constant 0 : index
    %c0_10 = arith.constant 0 : index
    %c0_11 = arith.constant 0 : index
    %7 = vector.load %arg3[%c0_8, %c0_9, %c0_10, %c0_11] : memref<2x1x34x64xbf16, #tpu.memory_space<vmem>>, vector<1x1x34x64xbf16>
    %8 = vector.shape_cast %7 : vector<1x1x34x64xbf16> to vector<1x34x64xbf16>
    %9 = tpu.concatenate %4, %6, %8 in 0 : vector<1x34x64xbf16>, vector<8x34x64xbf16>, vector<1x34x64xbf16> -> vector<10x34x64xbf16>
    %c0_12 = arith.constant 0 : index
    %c0_13 = arith.constant 0 : index
    %10 = vector.load %arg4[%c0_12, %c0_13] : memref<576x64xbf16, #tpu.memory_space<vmem>>, vector<576x64xbf16>
    %c0_14 = arith.constant 0 : index
    %c0_15 = arith.constant 0 : index
    %11 = vector.load %arg5[%c0_14, %c0_15] : memref<1x64xf32, #tpu.memory_space<vmem>>, vector<1x64xf32>
    %12 = vector.extract_strided_slice %9 {offsets = [0, 0, 0], sizes = [8, 32, 64], strides = [1, 1, 1]} : vector<10x34x64xbf16> to vector<8x32x64xbf16>
    %13 = vector.extract_strided_slice %9 {offsets = [0, 1, 0], sizes = [8, 32, 64], strides = [1, 1, 1]} : vector<10x34x64xbf16> to vector<8x32x64xbf16>
    %14 = vector.extract_strided_slice %9 {offsets = [0, 2, 0], sizes = [8, 32, 64], strides = [1, 1, 1]} : vector<10x34x64xbf16> to vector<8x32x64xbf16>
    %15 = vector.extract_strided_slice %9 {offsets = [1, 0, 0], sizes = [8, 32, 64], strides = [1, 1, 1]} : vector<10x34x64xbf16> to vector<8x32x64xbf16>
    %16 = vector.extract_strided_slice %9 {offsets = [1, 1, 0], sizes = [8, 32, 64], strides = [1, 1, 1]} : vector<10x34x64xbf16> to vector<8x32x64xbf16>
    %17 = vector.extract_strided_slice %9 {offsets = [1, 2, 0], sizes = [8, 32, 64], strides = [1, 1, 1]} : vector<10x34x64xbf16> to vector<8x32x64xbf16>
    %18 = vector.extract_strided_slice %9 {offsets = [2, 0, 0], sizes = [8, 32, 64], strides = [1, 1, 1]} : vector<10x34x64xbf16> to vector<8x32x64xbf16>
    %19 = vector.extract_strided_slice %9 {offsets = [2, 1, 0], sizes = [8, 32, 64], strides = [1, 1, 1]} : vector<10x34x64xbf16> to vector<8x32x64xbf16>
    %20 = vector.extract_strided_slice %9 {offsets = [2, 2, 0], sizes = [8, 32, 64], strides = [1, 1, 1]} : vector<10x34x64xbf16> to vector<8x32x64xbf16>
    %21 = tpu.concatenate %12, %13, %14, %15, %16, %17, %18, %19, %20 in 2 : vector<8x32x64xbf16>, vector<8x32x64xbf16>, vector<8x32x64xbf16>, vector<8x32x64xbf16>, vector<8x32x64xbf16>, vector<8x32x64xbf16>, vector<8x32x64xbf16>, vector<8x32x64xbf16>, vector<8x32x64xbf16> -> vector<8x32x576xbf16>
    %22 = vector.shape_cast %21 : vector<8x32x576xbf16> to vector<256x576xbf16>
    %cst = arith.constant dense<0.000000e+00> : vector<256x64xf32>
    %23 = tpu.matmul %22, %10, %cst {dimension_numbers = #tpu.dot_dimension_numbers<[1], [0], [0], [1], [0, 0, 1, 1], [], []>} : vector<256x576xbf16>, vector<576x64xbf16>, vector<256x64xf32> -> vector<256x64xf32>
    %24 = vector.broadcast %11 : vector<1x64xf32> to vector<256x64xf32>
    %25 = arith.addf %23, %24 : vector<256x64xf32>
    %26 = arith.truncf %25 : vector<256x64xf32> to vector<256x64xbf16>
    %cst_16 = arith.constant dense<0.000000e+00> : vector<64xf32>
    %27 = vector.multi_reduction <add>, %25, %cst_16 [0] : vector<256x64xf32> to vector<64xf32>
    %28 = vector.shape_cast %27 : vector<64xf32> to vector<1x64xf32>
    %cst_17 = arith.constant 9.765625E-4 : f32
    %29 = vector.broadcast %cst_17 : f32 to vector<1x64xf32>
    %30 = arith.mulf %28, %29 : vector<1x64xf32>
    %c1 = arith.constant 1 : index
    %c0_18 = arith.constant 0 : index
    %c0_19 = arith.constant 0 : index
    %c0_20 = arith.constant 0 : index
    %31 = vector.load %arg2[%c1, %c0_18, %c0_19, %c0_20] : memref<2x1x34x64xbf16, #tpu.memory_space<vmem>>, vector<1x1x34x64xbf16>
    %32 = vector.shape_cast %31 : vector<1x1x34x64xbf16> to vector<1x34x64xbf16>
    %c1_21 = arith.constant 1 : index
    %c0_22 = arith.constant 0 : index
    %c0_23 = arith.constant 0 : index
    %c0_24 = arith.constant 0 : index
    %33 = vector.load %arg1[%c1_21, %c0_22, %c0_23, %c0_24] : memref<2x8x34x64xbf16, #tpu.memory_space<vmem>>, vector<1x8x34x64xbf16>
    %34 = vector.shape_cast %33 : vector<1x8x34x64xbf16> to vector<8x34x64xbf16>
    %c1_25 = arith.constant 1 : index
    %c0_26 = arith.constant 0 : index
    %c0_27 = arith.constant 0 : index
    %c0_28 = arith.constant 0 : index
    %35 = vector.load %arg3[%c1_25, %c0_26, %c0_27, %c0_28] : memref<2x1x34x64xbf16, #tpu.memory_space<vmem>>, vector<1x1x34x64xbf16>
    %36 = vector.shape_cast %35 : vector<1x1x34x64xbf16> to vector<1x34x64xbf16>
    %37 = tpu.concatenate %32, %34, %36 in 0 : vector<1x34x64xbf16>, vector<8x34x64xbf16>, vector<1x34x64xbf16> -> vector<10x34x64xbf16>
    %c0_29 = arith.constant 0 : index
    %c0_30 = arith.constant 0 : index
    %38 = vector.load %arg4[%c0_29, %c0_30] : memref<576x64xbf16, #tpu.memory_space<vmem>>, vector<576x64xbf16>
    %c0_31 = arith.constant 0 : index
    %c0_32 = arith.constant 0 : index
    %39 = vector.load %arg5[%c0_31, %c0_32] : memref<1x64xf32, #tpu.memory_space<vmem>>, vector<1x64xf32>
    %40 = vector.extract_strided_slice %37 {offsets = [0, 0, 0], sizes = [8, 32, 64], strides = [1, 1, 1]} : vector<10x34x64xbf16> to vector<8x32x64xbf16>
    %41 = vector.extract_strided_slice %37 {offsets = [0, 1, 0], sizes = [8, 32, 64], strides = [1, 1, 1]} : vector<10x34x64xbf16> to vector<8x32x64xbf16>
    %42 = vector.extract_strided_slice %37 {offsets = [0, 2, 0], sizes = [8, 32, 64], strides = [1, 1, 1]} : vector<10x34x64xbf16> to vector<8x32x64xbf16>
    %43 = vector.extract_strided_slice %37 {offsets = [1, 0, 0], sizes = [8, 32, 64], strides = [1, 1, 1]} : vector<10x34x64xbf16> to vector<8x32x64xbf16>
    %44 = vector.extract_strided_slice %37 {offsets = [1, 1, 0], sizes = [8, 32, 64], strides = [1, 1, 1]} : vector<10x34x64xbf16> to vector<8x32x64xbf16>
    %45 = vector.extract_strided_slice %37 {offsets = [1, 2, 0], sizes = [8, 32, 64], strides = [1, 1, 1]} : vector<10x34x64xbf16> to vector<8x32x64xbf16>
    %46 = vector.extract_strided_slice %37 {offsets = [2, 0, 0], sizes = [8, 32, 64], strides = [1, 1, 1]} : vector<10x34x64xbf16> to vector<8x32x64xbf16>
    %47 = vector.extract_strided_slice %37 {offsets = [2, 1, 0], sizes = [8, 32, 64], strides = [1, 1, 1]} : vector<10x34x64xbf16> to vector<8x32x64xbf16>
    %48 = vector.extract_strided_slice %37 {offsets = [2, 2, 0], sizes = [8, 32, 64], strides = [1, 1, 1]} : vector<10x34x64xbf16> to vector<8x32x64xbf16>
    %49 = tpu.concatenate %40, %41, %42, %43, %44, %45, %46, %47, %48 in 2 : vector<8x32x64xbf16>, vector<8x32x64xbf16>, vector<8x32x64xbf16>, vector<8x32x64xbf16>, vector<8x32x64xbf16>, vector<8x32x64xbf16>, vector<8x32x64xbf16>, vector<8x32x64xbf16>, vector<8x32x64xbf16> -> vector<8x32x576xbf16>
    %50 = vector.shape_cast %49 : vector<8x32x576xbf16> to vector<256x576xbf16>
    %cst_33 = arith.constant dense<0.000000e+00> : vector<256x64xf32>
    %51 = tpu.matmul %50, %38, %cst_33 {dimension_numbers = #tpu.dot_dimension_numbers<[1], [0], [0], [1], [0, 0, 1, 1], [], []>} : vector<256x576xbf16>, vector<576x64xbf16>, vector<256x64xf32> -> vector<256x64xf32>
    %52 = vector.broadcast %39 : vector<1x64xf32> to vector<256x64xf32>
    %53 = arith.addf %51, %52 : vector<256x64xf32>
    %54 = arith.truncf %53 : vector<256x64xf32> to vector<256x64xbf16>
    %cst_34 = arith.constant dense<0.000000e+00> : vector<64xf32>
    %55 = vector.multi_reduction <add>, %53, %cst_34 [0] : vector<256x64xf32> to vector<64xf32>
    %56 = vector.shape_cast %55 : vector<64xf32> to vector<1x64xf32>
    %cst_35 = arith.constant 9.765625E-4 : f32
    %57 = vector.broadcast %cst_35 : f32 to vector<1x64xf32>
    %58 = arith.mulf %56, %57 : vector<1x64xf32>
    %59 = tpu.concatenate %26, %54 in 1 : vector<256x64xbf16>, vector<256x64xbf16> -> vector<256x128xbf16>
    %c0_36 = arith.constant 0 : index
    %c0_37 = arith.constant 0 : index
    %60 = vector.load %arg6[%c0_36, %c0_37] : memref<256x128xbf16, #tpu.memory_space<vmem>>, vector<256x128xbf16>
    tpu.vector_store %arg6[%c0_36, %c0_37], %59 {strides = array<i32>} : memref<256x128xbf16, #tpu.memory_space<vmem>>, vector<256x128xbf16>,
    %c0_38 = arith.constant 0 : index
    %c0_39 = arith.constant 0 : index
    %c0_40 = arith.constant 0 : index
    %61 = vector.load %arg7[%c0_38, %c0_39, %c0_40] : memref<2x1x64xf32, #tpu.memory_space<vmem>>, vector<2x1x64xf32>
    %62 = vector.shape_cast %30 : vector<1x64xf32> to vector<1x1x64xf32>
    %63 = vector.shape_cast %58 : vector<1x64xf32> to vector<1x1x64xf32>
    %64 = tpu.concatenate %62, %63 in 0 : vector<1x1x64xf32>, vector<1x1x64xf32> -> vector<2x1x64xf32>
    %65 = arith.addf %61, %64 : vector<2x1x64xf32>
    %c0_41 = arith.constant 0 : index
    %c0_42 = arith.constant 0 : index
    %c0_43 = arith.constant 0 : index
    %66 = vector.load %arg7[%c0_41, %c0_42, %c0_43] : memref<2x1x64xf32, #tpu.memory_space<vmem>>, vector<2x1x64xf32>
    tpu.vector_store %arg7[%c0_41, %c0_42, %c0_43], %65 {strides = array<i32>} : memref<2x1x64xf32, #tpu.memory_space<vmem>>, vector<2x1x64xf32>,
    return
  }
  func.func @transform_0(%arg0: i32) -> (i32, i32, i32, i32) {
    %c0_i32 = arith.constant 0 : i32
    %c0_i32_0 = arith.constant 0 : i32
    %c0_i32_1 = arith.constant 0 : i32
    %c0_i32_2 = arith.constant 0 : i32
    return %c0_i32, %arg0, %c0_i32_0, %c0_i32_1 : i32, i32, i32, i32
  }
  func.func @transform_1(%arg0: i32) -> (i32, i32, i32, i32) {
    %c0_i32 = arith.constant 0 : i32
    %c0_i32_0 = arith.constant 0 : i32
    %c0_i32_1 = arith.constant 0 : i32
    %c0_i32_2 = arith.constant 0 : i32
    return %c0_i32, %arg0, %c0_i32_0, %c0_i32_1 : i32, i32, i32, i32
  }
  func.func @transform_2(%arg0: i32) -> (i32, i32, i32, i32) {
    %c0_i32 = arith.constant 0 : i32
    %c0_i32_0 = arith.constant 0 : i32
    %c0_i32_1 = arith.constant 0 : i32
    %c0_i32_2 = arith.constant 0 : i32
    return %c0_i32, %arg0, %c0_i32_0, %c0_i32_1 : i32, i32, i32, i32
  }
  func.func @transform_3(%arg0: i32) -> (i32, i32) {
    %c0_i32 = arith.constant 0 : i32
    %c0_i32_0 = arith.constant 0 : i32
    %c0_i32_1 = arith.constant 0 : i32
    return %c0_i32, %c0_i32_0 : i32, i32
  }
  func.func @transform_4(%arg0: i32) -> (i32, i32) {
    %c0_i32 = arith.constant 0 : i32
    %c0_i32_0 = arith.constant 0 : i32
    %c0_i32_1 = arith.constant 0 : i32
    return %c0_i32, %c0_i32_0 : i32, i32
  }
  func.func @transform_5(%arg0: i32) -> (i32, i32) {
    %c0_i32 = arith.constant 0 : i32
    %c0_i32_0 = arith.constant 0 : i32
    return %arg0, %c0_i32 : i32, i32
  }
  func.func @transform_6(%arg0: i32) -> (i32, i32, i32) {
    %c0_i32 = arith.constant 0 : i32
    %c0_i32_0 = arith.constant 0 : i32
    %c0_i32_1 = arith.constant 0 : i32
    %c0_i32_2 = arith.constant 0 : i32
    return %c0_i32, %c0_i32_0, %c0_i32_1 : i32, i32, i32
  }
}

module attributes {stable_mosaic.version = 11 : i64} {
  func.func @se_mlp_kernel(%arg0: i32, %arg1: memref<2x1x64xf32, #tpu.memory_space<vmem>>, %arg2: memref<64x8xf32, #tpu.memory_space<vmem>>, %arg3: memref<1x8xf32, #tpu.memory_space<vmem>>, %arg4: memref<8x64xf32, #tpu.memory_space<vmem>>, %arg5: memref<1x64xf32, #tpu.memory_space<vmem>>, %arg6: memref<64x480xf32, #tpu.memory_space<vmem>>, %arg7: memref<1x480xf32, #tpu.memory_space<vmem>>, %arg8: memref<480x480xf32, #tpu.memory_space<vmem>>, %arg9: memref<1x480xf32, #tpu.memory_space<vmem>>, %arg10: memref<2x1x64xf32, #tpu.memory_space<vmem>>, %arg11: memref<2x1x480xf32, #tpu.memory_space<vmem>>) attributes {dimension_semantics = [#tpu.dimension_semantics<arbitrary>], iteration_bounds = array<i64: 1>, scalar_prefetch = 0 : i64, scratch_operands = 0 : i64, tpu.core_type = #tpu.core_type<tc>, window_params = [{pipeline_mode = #tpu.pipeline_mode<synchronous>, transform_indices = @transform_0, window_bounds = array<i64: 2, 1, 64>}, {pipeline_mode = #tpu.pipeline_mode<synchronous>, transform_indices = @transform_1, window_bounds = array<i64: 64, 8>}, {pipeline_mode = #tpu.pipeline_mode<synchronous>, transform_indices = @transform_2, window_bounds = array<i64: 1, 8>}, {pipeline_mode = #tpu.pipeline_mode<synchronous>, transform_indices = @transform_3, window_bounds = array<i64: 8, 64>}, {pipeline_mode = #tpu.pipeline_mode<synchronous>, transform_indices = @transform_4, window_bounds = array<i64: 1, 64>}, {pipeline_mode = #tpu.pipeline_mode<synchronous>, transform_indices = @transform_5, window_bounds = array<i64: 64, 480>}, {pipeline_mode = #tpu.pipeline_mode<synchronous>, transform_indices = @transform_6, window_bounds = array<i64: 1, 480>}, {pipeline_mode = #tpu.pipeline_mode<synchronous>, transform_indices = @transform_7, window_bounds = array<i64: 480, 480>}, {pipeline_mode = #tpu.pipeline_mode<synchronous>, transform_indices = @transform_8, window_bounds = array<i64: 1, 480>}, {pipeline_mode = #tpu.pipeline_mode<synchronous>, transform_indices = @transform_9, window_bounds = array<i64: 2, 1, 64>}, {pipeline_mode = #tpu.pipeline_mode<synchronous>, transform_indices = @transform_10, window_bounds = array<i64: 2, 1, 480>}]} {
    %c0 = arith.constant 0 : index
    %c0_0 = arith.constant 0 : index
    %c0_1 = arith.constant 0 : index
    %0 = vector.load %arg1[%c0, %c0_0, %c0_1] : memref<2x1x64xf32, #tpu.memory_space<vmem>>, vector<2x1x64xf32>
    %1 = vector.shape_cast %0 : vector<2x1x64xf32> to vector<2x64xf32>
    %c0_2 = arith.constant 0 : index
    %c0_3 = arith.constant 0 : index
    %2 = vector.load %arg2[%c0_2, %c0_3] : memref<64x8xf32, #tpu.memory_space<vmem>>, vector<64x8xf32>
    %cst = arith.constant dense<0.000000e+00> : vector<2x8xf32>
    %3 = tpu.matmul %1, %2, %cst {dimension_numbers = #tpu.dot_dimension_numbers<[1], [0], [0], [1], [0, 0, 1, 1], [], []>} : vector<2x64xf32>, vector<64x8xf32>, vector<2x8xf32> -> vector<2x8xf32>
    %c0_4 = arith.constant 0 : index
    %c0_5 = arith.constant 0 : index
    %4 = vector.load %arg3[%c0_4, %c0_5] : memref<1x8xf32, #tpu.memory_space<vmem>>, vector<1x8xf32>
    %5 = vector.broadcast %4 : vector<1x8xf32> to vector<2x8xf32>
    %6 = arith.addf %3, %5 : vector<2x8xf32>
    %cst_6 = arith.constant 0.000000e+00 : f32
    %7 = vector.broadcast %cst_6 : f32 to vector<2x8xf32>
    %8 = arith.maximumf %6, %7 : vector<2x8xf32>
    %c0_7 = arith.constant 0 : index
    %c0_8 = arith.constant 0 : index
    %9 = vector.load %arg4[%c0_7, %c0_8] : memref<8x64xf32, #tpu.memory_space<vmem>>, vector<8x64xf32>
    %cst_9 = arith.constant dense<0.000000e+00> : vector<2x64xf32>
    %10 = tpu.matmul %8, %9, %cst_9 {dimension_numbers = #tpu.dot_dimension_numbers<[1], [0], [0], [1], [0, 0, 1, 1], [], []>} : vector<2x8xf32>, vector<8x64xf32>, vector<2x64xf32> -> vector<2x64xf32>
    %c0_10 = arith.constant 0 : index
    %c0_11 = arith.constant 0 : index
    %11 = vector.load %arg5[%c0_10, %c0_11] : memref<1x64xf32, #tpu.memory_space<vmem>>, vector<1x64xf32>
    %12 = vector.broadcast %11 : vector<1x64xf32> to vector<2x64xf32>
    %13 = arith.addf %10, %12 : vector<2x64xf32>
    %14 = arith.negf %13 : vector<2x64xf32>
    %15 = math.exp %14 : vector<2x64xf32>
    %cst_12 = arith.constant 1.000000e+00 : f32
    %16 = vector.broadcast %cst_12 : f32 to vector<2x64xf32>
    %17 = arith.addf %16, %15 : vector<2x64xf32>
    %18 = arith.divf %16, %17 : vector<2x64xf32>
    %19 = arith.mulf %1, %18 : vector<2x64xf32>
    %c0_13 = arith.constant 0 : index
    %c0_14 = arith.constant 0 : index
    %20 = vector.load %arg6[%c0_13, %c0_14] : memref<64x480xf32, #tpu.memory_space<vmem>>, vector<64x480xf32>
    %cst_15 = arith.constant dense<0.000000e+00> : vector<2x480xf32>
    %21 = tpu.matmul %19, %20, %cst_15 {dimension_numbers = #tpu.dot_dimension_numbers<[1], [0], [0], [1], [0, 0, 1, 1], [], []>} : vector<2x64xf32>, vector<64x480xf32>, vector<2x480xf32> -> vector<2x480xf32>
    %c0_16 = arith.constant 0 : index
    %c0_17 = arith.constant 0 : index
    %22 = vector.load %arg7[%c0_16, %c0_17] : memref<1x480xf32, #tpu.memory_space<vmem>>, vector<1x480xf32>
    %23 = vector.broadcast %22 : vector<1x480xf32> to vector<2x480xf32>
    %24 = arith.addf %21, %23 : vector<2x480xf32>
    %cst_18 = arith.constant 0.000000e+00 : f32
    %25 = vector.broadcast %cst_18 : f32 to vector<2x480xf32>
    %26 = arith.maximumf %24, %25 : vector<2x480xf32>
    %c0_19 = arith.constant 0 : index
    %c0_20 = arith.constant 0 : index
    %27 = vector.load %arg8[%c0_19, %c0_20] : memref<480x480xf32, #tpu.memory_space<vmem>>, vector<480x480xf32>
    %cst_21 = arith.constant dense<0.000000e+00> : vector<2x480xf32>
    %28 = tpu.matmul %26, %27, %cst_21 {dimension_numbers = #tpu.dot_dimension_numbers<[1], [0], [0], [1], [0, 0, 1, 1], [], []>} : vector<2x480xf32>, vector<480x480xf32>, vector<2x480xf32> -> vector<2x480xf32>
    %c0_22 = arith.constant 0 : index
    %c0_23 = arith.constant 0 : index
    %29 = vector.load %arg9[%c0_22, %c0_23] : memref<1x480xf32, #tpu.memory_space<vmem>>, vector<1x480xf32>
    %30 = vector.broadcast %29 : vector<1x480xf32> to vector<2x480xf32>
    %31 = arith.addf %28, %30 : vector<2x480xf32>
    %32 = vector.shape_cast %18 : vector<2x64xf32> to vector<2x1x64xf32>
    %c0_24 = arith.constant 0 : index
    %c0_25 = arith.constant 0 : index
    %c0_26 = arith.constant 0 : index
    %33 = vector.load %arg10[%c0_24, %c0_25, %c0_26] : memref<2x1x64xf32, #tpu.memory_space<vmem>>, vector<2x1x64xf32>
    tpu.vector_store %arg10[%c0_24, %c0_25, %c0_26], %32 {strides = array<i32>} : memref<2x1x64xf32, #tpu.memory_space<vmem>>, vector<2x1x64xf32>,
    %34 = vector.shape_cast %31 : vector<2x480xf32> to vector<2x1x480xf32>
    %c0_27 = arith.constant 0 : index
    %c0_28 = arith.constant 0 : index
    %c0_29 = arith.constant 0 : index
    %35 = vector.load %arg11[%c0_27, %c0_28, %c0_29] : memref<2x1x480xf32, #tpu.memory_space<vmem>>, vector<2x1x480xf32>
    tpu.vector_store %arg11[%c0_27, %c0_28, %c0_29], %34 {strides = array<i32>} : memref<2x1x480xf32, #tpu.memory_space<vmem>>, vector<2x1x480xf32>,
    return
  }
  func.func @transform_0(%arg0: i32) -> (i32, i32, i32) {
    %c0_i32 = arith.constant 0 : i32
    %c0_i32_0 = arith.constant 0 : i32
    %c0_i32_1 = arith.constant 0 : i32
    %c0_i32_2 = arith.constant 0 : i32
    return %c0_i32, %c0_i32_0, %c0_i32_1 : i32, i32, i32
  }
  func.func @transform_1(%arg0: i32) -> (i32, i32) {
    %c0_i32 = arith.constant 0 : i32
    %c0_i32_0 = arith.constant 0 : i32
    %c0_i32_1 = arith.constant 0 : i32
    return %c0_i32, %c0_i32_0 : i32, i32
  }
  func.func @transform_2(%arg0: i32) -> (i32, i32) {
    %c0_i32 = arith.constant 0 : i32
    %c0_i32_0 = arith.constant 0 : i32
    %c0_i32_1 = arith.constant 0 : i32
    return %c0_i32, %c0_i32_0 : i32, i32
  }
  func.func @transform_3(%arg0: i32) -> (i32, i32) {
    %c0_i32 = arith.constant 0 : i32
    %c0_i32_0 = arith.constant 0 : i32
    %c0_i32_1 = arith.constant 0 : i32
    return %c0_i32, %c0_i32_0 : i32, i32
  }
  func.func @transform_4(%arg0: i32) -> (i32, i32) {
    %c0_i32 = arith.constant 0 : i32
    %c0_i32_0 = arith.constant 0 : i32
    %c0_i32_1 = arith.constant 0 : i32
    return %c0_i32, %c0_i32_0 : i32, i32
  }
  func.func @transform_5(%arg0: i32) -> (i32, i32) {
    %c0_i32 = arith.constant 0 : i32
    %c0_i32_0 = arith.constant 0 : i32
    %c0_i32_1 = arith.constant 0 : i32
    return %c0_i32, %c0_i32_0 : i32, i32
  }
  func.func @transform_6(%arg0: i32) -> (i32, i32) {
    %c0_i32 = arith.constant 0 : i32
    %c0_i32_0 = arith.constant 0 : i32
    %c0_i32_1 = arith.constant 0 : i32
    return %c0_i32, %c0_i32_0 : i32, i32
  }
  func.func @transform_7(%arg0: i32) -> (i32, i32) {
    %c0_i32 = arith.constant 0 : i32
    %c0_i32_0 = arith.constant 0 : i32
    %c0_i32_1 = arith.constant 0 : i32
    return %c0_i32, %c0_i32_0 : i32, i32
  }
  func.func @transform_8(%arg0: i32) -> (i32, i32) {
    %c0_i32 = arith.constant 0 : i32
    %c0_i32_0 = arith.constant 0 : i32
    %c0_i32_1 = arith.constant 0 : i32
    return %c0_i32, %c0_i32_0 : i32, i32
  }
  func.func @transform_9(%arg0: i32) -> (i32, i32, i32) {
    %c0_i32 = arith.constant 0 : i32
    %c0_i32_0 = arith.constant 0 : i32
    %c0_i32_1 = arith.constant 0 : i32
    %c0_i32_2 = arith.constant 0 : i32
    return %c0_i32, %c0_i32_0, %c0_i32_1 : i32, i32, i32
  }
  func.func @transform_10(%arg0: i32) -> (i32, i32, i32) {
    %c0_i32 = arith.constant 0 : i32
    %c0_i32_0 = arith.constant 0 : i32
    %c0_i32_1 = arith.constant 0 : i32
    %c0_i32_2 = arith.constant 0 : i32
    return %c0_i32, %c0_i32_0, %c0_i32_1 : i32, i32, i32
  }
}

module attributes {stable_mosaic.version = 11 : i64} {
  func.func @final_proj_kernel(%arg0: i32, %arg1: memref<1024x128xbf16, #tpu.memory_space<vmem>>, %arg2: memref<1024x480xbf16, #tpu.memory_space<vmem>>, %arg3: memref<2x64x1xf32, #tpu.memory_space<vmem>>, %arg4: memref<2x1x480xf32, #tpu.memory_space<vmem>>, %arg5: memref<1x480xf32, #tpu.memory_space<vmem>>, %arg6: memref<2x64x480xf32, #tpu.memory_space<vmem>>, %arg7: memref<128x480xf32, #tpu.memory_space<vmem>>) attributes {dimension_semantics = [#tpu.dimension_semantics<arbitrary>], iteration_bounds = array<i64: 1>, scalar_prefetch = 0 : i64, scratch_operands = 1 : i64, tpu.core_type = #tpu.core_type<tc>, window_params = [{transform_indices = @transform_0, window_bounds = array<i64: 1024, 128>}, {transform_indices = @transform_1, window_bounds = array<i64: 1024, 480>}, {pipeline_mode = #tpu.pipeline_mode<synchronous>, transform_indices = @transform_2, window_bounds = array<i64: 2, 64, 1>}, {pipeline_mode = #tpu.pipeline_mode<synchronous>, transform_indices = @transform_3, window_bounds = array<i64: 2, 1, 480>}, {pipeline_mode = #tpu.pipeline_mode<synchronous>, transform_indices = @transform_4, window_bounds = array<i64: 1, 480>}, {pipeline_mode = #tpu.pipeline_mode<synchronous>, transform_indices = @transform_5, window_bounds = array<i64: 2, 64, 480>}]} {
    %c0_i32 = arith.constant 0 : i32
    %0 = arith.cmpi eq, %arg0, %c0_i32 : i32
    %1 = arith.extui %0 : i1 to i32
    %c0_i32_0 = arith.constant 0 : i32
    %2 = arith.cmpi ne, %1, %c0_i32_0 : i32
    scf.if %2 {
      %cst_10 = arith.constant 0.000000e+00 : f32
      %12 = vector.broadcast %cst_10 : f32 to vector<128x480xf32>
      %c0_11 = arith.constant 0 : index
      %c0_12 = arith.constant 0 : index
      %13 = vector.load %arg7[%c0_11, %c0_12] : memref<128x480xf32, #tpu.memory_space<vmem>>, vector<128x480xf32>
      tpu.vector_store %arg7[%c0_11, %c0_12], %12 {strides = array<i32>} : memref<128x480xf32, #tpu.memory_space<vmem>>, vector<128x480xf32>,
    } else {
    }
    %c0 = arith.constant 0 : index
    %c0_1 = arith.constant 0 : index
    %3 = vector.load %arg7[%c0, %c0_1] : memref<128x480xf32, #tpu.memory_space<vmem>>, vector<128x480xf32>
    %c0_2 = arith.constant 0 : index
    %c0_3 = arith.constant 0 : index
    %4 = vector.load %arg1[%c0_2, %c0_3] : memref<1024x128xbf16, #tpu.memory_space<vmem>>, vector<1024x128xbf16>
    %c0_4 = arith.constant 0 : index
    %c0_5 = arith.constant 0 : index
    %5 = vector.load %arg2[%c0_4, %c0_5] : memref<1024x480xbf16, #tpu.memory_space<vmem>>, vector<1024x480xbf16>
    %cst = arith.constant dense<0.000000e+00> : vector<128x480xf32>
    %6 = tpu.matmul %4, %5, %cst {dimension_numbers = #tpu.dot_dimension_numbers<[0], [0], [1], [1], [0, 1, 1, 1], [], []>} : vector<1024x128xbf16>, vector<1024x480xbf16>, vector<128x480xf32> -> vector<128x480xf32>
    %7 = arith.addf %3, %6 : vector<128x480xf32>
    %c0_6 = arith.constant 0 : index
    %c0_7 = arith.constant 0 : index
    %8 = vector.load %arg7[%c0_6, %c0_7] : memref<128x480xf32, #tpu.memory_space<vmem>>, vector<128x480xf32>
    tpu.vector_store %arg7[%c0_6, %c0_7], %7 {strides = array<i32>} : memref<128x480xf32, #tpu.memory_space<vmem>>, vector<128x480xf32>,
    %c0_i32_8 = arith.constant 0 : i32
    %9 = arith.cmpi eq, %arg0, %c0_i32_8 : i32
    %10 = arith.extui %9 : i1 to i32
    %c0_i32_9 = arith.constant 0 : i32
    %11 = arith.cmpi ne, %10, %c0_i32_9 : i32
    scf.if %11 {
      %c0_10 = arith.constant 0 : index
      %c0_11 = arith.constant 0 : index
      %12 = vector.load %arg7[%c0_10, %c0_11] : memref<128x480xf32, #tpu.memory_space<vmem>>, vector<128x480xf32>
      %13 = vector.shape_cast %12 : vector<128x480xf32> to vector<2x64x480xf32>
      %c0_12 = arith.constant 0 : index
      %c0_13 = arith.constant 0 : index
      %c0_14 = arith.constant 0 : index
      %14 = vector.load %arg3[%c0_12, %c0_13, %c0_14] : memref<2x64x1xf32, #tpu.memory_space<vmem>>, vector<2x64x1xf32>
      %15 = vector.broadcast %14 : vector<2x64x1xf32> to vector<2x64x480xf32>
      %16 = arith.mulf %13, %15 : vector<2x64x480xf32>
      %c0_15 = arith.constant 0 : index
      %c0_16 = arith.constant 0 : index
      %17 = vector.load %arg5[%c0_15, %c0_16] : memref<1x480xf32, #tpu.memory_space<vmem>>, vector<1x480xf32>
      %18 = vector.shape_cast %17 : vector<1x480xf32> to vector<1x1x480xf32>
      %19 = vector.broadcast %18 : vector<1x1x480xf32> to vector<2x64x480xf32>
      %20 = arith.addf %16, %19 : vector<2x64x480xf32>
      %c0_17 = arith.constant 0 : index
      %c0_18 = arith.constant 0 : index
      %c0_19 = arith.constant 0 : index
      %21 = vector.load %arg4[%c0_17, %c0_18, %c0_19] : memref<2x1x480xf32, #tpu.memory_space<vmem>>, vector<2x1x480xf32>
      %22 = vector.broadcast %21 : vector<2x1x480xf32> to vector<2x64x480xf32>
      %23 = arith.addf %20, %22 : vector<2x64x480xf32>
      %c0_20 = arith.constant 0 : index
      %c0_21 = arith.constant 0 : index
      %c0_22 = arith.constant 0 : index
      %24 = vector.load %arg6[%c0_20, %c0_21, %c0_22] : memref<2x64x480xf32, #tpu.memory_space<vmem>>, vector<2x64x480xf32>
      tpu.vector_store %arg6[%c0_20, %c0_21, %c0_22], %23 {strides = array<i32>} : memref<2x64x480xf32, #tpu.memory_space<vmem>>, vector<2x64x480xf32>,
    } else {
    }
    return
  }
  func.func @transform_0(%arg0: i32) -> (i32, i32) {
    %c0_i32 = arith.constant 0 : i32
    %c0_i32_0 = arith.constant 0 : i32
    return %arg0, %c0_i32 : i32, i32
  }
  func.func @transform_1(%arg0: i32) -> (i32, i32) {
    %c0_i32 = arith.constant 0 : i32
    %c0_i32_0 = arith.constant 0 : i32
    return %arg0, %c0_i32 : i32, i32
  }
  func.func @transform_2(%arg0: i32) -> (i32, i32, i32) {
    %c0_i32 = arith.constant 0 : i32
    %c0_i32_0 = arith.constant 0 : i32
    %c0_i32_1 = arith.constant 0 : i32
    %c0_i32_2 = arith.constant 0 : i32
    return %c0_i32, %c0_i32_0, %c0_i32_1 : i32, i32, i32
  }
  func.func @transform_3(%arg0: i32) -> (i32, i32, i32) {
    %c0_i32 = arith.constant 0 : i32
    %c0_i32_0 = arith.constant 0 : i32
    %c0_i32_1 = arith.constant 0 : i32
    %c0_i32_2 = arith.constant 0 : i32
    return %c0_i32, %c0_i32_0, %c0_i32_1 : i32, i32, i32
  }
  func.func @transform_4(%arg0: i32) -> (i32, i32) {
    %c0_i32 = arith.constant 0 : i32
    %c0_i32_0 = arith.constant 0 : i32
    %c0_i32_1 = arith.constant 0 : i32
    return %c0_i32, %c0_i32_0 : i32, i32
  }
  func.func @transform_5(%arg0: i32) -> (i32, i32, i32) {
    %c0_i32 = arith.constant 0 : i32
    %c0_i32_0 = arith.constant 0 : i32
    %c0_i32_1 = arith.constant 0 : i32
    %c0_i32_2 = arith.constant 0 : i32
    return %c0_i32, %c0_i32_0, %c0_i32_1 : i32, i32, i32
  }
}

</mosaic_0001>

<bundles_post_ra>
// kernel: polarization_forward.5
= control target key start
LH: loop header
LB: loop body
LE: loop exit
PB: predicated region body
PF: predicated region fallthrough
CT: control target
= control target key end

     0   :  { %s2400_s18 = smov 0   ;;  %s2402_s19 = smov 0   ;;  %s3381_s0 = inlined_call_operand.vmem [shape: bf16[2,32,34,8], index: 0, kind: input, shape index: {}]   ;;  %s3382_s1 = inlined_call_operand.vmem [shape: bf16[2,4,34,8], index: 1, kind: input, shape index: {}]   ;;  %s3383_s2 = inlined_call_operand.vmem [shape: bf16[2,4,34,8], index: 2, kind: input, shape index: {}]   ;;  %s3384_s3 = inlined_call_operand.vmem [shape: bf16[72,64], index: 3, kind: input, shape index: {}]   ;;  %s3385_s4 = inlined_call_operand.vmem [shape: f32[1,64], index: 4, kind: input, shape index: {}]   ;;  %s3386_s5 = inlined_call_operand.vmem [shape: bf16[2,32,34,64], index: 5, kind: output, shape index: {}]  }
   0x1   :  { %s2404_s20 = smov 0   ;;  %s2406_s21 = smov 0  }
   0x2   :  { %s2408_s22 = smov 0  }
   0x3 LB: > { %s24_s23 = sadd.s32 1, %s2352_s20  ;;  %s27_s24 = sadd.s32 1, %s2356_s21  ;;  %s2360_s22 = sphi %s2408_s22, %s15_s22   ;;  %s2356_s21 = sphi %s2406_s21, %s3410_s21   ;;  %s2352_s20 = sphi %s2404_s20, %s3409_s20   ;;  %s2348_s19 = sphi %s2402_s19, %s3408_s19   ;;  %s2344_s18 = sphi %s2400_s18, %s3407_s18  }
   0x4   : > { %p25_p0 = scmp.ge.s32.totalorder %s24_s23, 4  ;;  %p2057_p1 = scmp.ge.s32.totalorder %s2360_s22, 1 }
   0x5   : > { %p241_p2 = scmp.lt.s32.totalorder %s2360_s22, 9 }
   0x6   : > { %s3412_s23 = smov (%p25_p0, %s24_s23), 0  ;;  %s3414_s24 = smov (!%p25_p0, %s27_s24), %s2356_s21 }
   0x7   : > { %p242_p3 = pnand %p2057_p1, %p241_p2  ;;  %p29_p4 = scmp.ge.s32.totalorder %s3414_s24, 2 }
   0x9   : > { %s3416_s24 = smov (%p29_p4, %s3414_s24), 0  ;;  %245 = sbr.rel (%p242_p3) target bundleno = 627 (0x273), region = 40 }
  0x10   : > { %s2058_s25 = sshll.u32 %s2344_s18, 3  ;;  %p298_p5 = scmp.lt.s32.totalorder %s2348_s19, 1  ;;  %vm695_vm0 = vcmask 1046528   ;;  %vm502_vm1 = vsmask.f32 7424  ;;  %vm1366_vm2 = vcmask 1043456  }
  0x11   : > { %p300_p6 = scmp.lt.s32.totalorder %s2058_s25, 31  ;;  %p310_p7 = scmp.lt.s32.totalorder %s2344_s18, 3  ;;  %vm1036_vm3 = vcmask 64512   ;;  %vm1069_vm4 = vcmask 130048   ;;  %vm1102_vm5 = vcmask 195584   ;;  %vm1135_vm6 = vcmask 261120  }
  0x12   : > { %s3418_s19 = smov (!%p298_p5, %s2348_s19), 1  ;;  %s2362_s12 = smov 24   ;;  %vm1168_vm7 = vcmask 326656   ;;  %vm1201_vm8 = vcmask 392192   ;;  %vm1234_vm9 = vcmask 457728   ;;  %vm1267_vm10 = vcmask 523264  }
  0x13   : > { %s3420_s25 = smov (!%p300_p6, %s2058_s25), 31  ;;  %s2234_s26 = smul.u32 160, %s3418_s19  ;;  %vm1333_vm11 = vcmask 588800   ;;  %vm1579_vm12 = vsmask.f32 256  ;;  %vm1716_vm13 = vcmask 1040384  }
  0x14   : > { %s2233_s27 = smul.u32 5, %s3420_s25  ;;  %s3422_s18 = smov (!%p310_p7, %s2344_s18), 3  ;;  %vm3211_vm14 = vmand %vm1716_vm13, %vm1579_vm12  ;;  %vm1875_vm15 = vcmask 516096  }
  0x15   : > { %s2236_s29 = smul.u32 20, %s3418_s19  ;;  %s2363_s16 = smov 16  }
  0x16   : > { %s2430_s28 = sadd.s32 %s2234_s26, %s2233_s27  ;;  %s2235_s6 = smul.u32 5, %s3422_s18 }
  0x17   : > { %s2059_s30 = sshll.u32 %s2430_s28, 2  ;;  %s2364_s17 = smov 8  }
  0x18   : > { %s2438_s9 = scalar_lea.vmem %s3381_s0, %s2059_s30  ;;  %s2443_s10 = sadd.s32 %s2236_s29, %s2235_s6 }
  0x19   : > { %v2441_v0 = vld [vmem:[%s2438_s9 + $0x50] sm:$0xff]   ;;  %v2446_v1 = vld [vmem:[%s2438_s9] sm:$0xff]   ;;  %s2060_s11 = sshll.u32 %s2443_s10, 2  ;;  %v2452_v2 = vld [vmem:[%s2438_s9 + $0x58] sm:$0xff]   ;;  %s2365_s18 = smov 32  }
  0x1a   : > { %794 = vrot.lane.b32.xlu1 %v2441_v0, %s2362_s12  ;;  %s316_s15 = scalar_lea.vmem %s3382_s1, %s2060_s11  ;;  %778 = vrot.lane.b32.xlu0 %v2446_v1, %s2362_s12  ;;  %v604_v5 = vshrl.u32 %v2441_v0, 16  ;;  %v2471_v8 = vld [vmem:[%s2438_s9 + $0x3c] sm:$0xff]   ;;  %v2474_v9 = vld [vmem:[%s2438_s9 + $0x44] sm:$0xff]   ;;  %v606_v11 = vshll.u32 %v2441_v0, 16  ;;  %v611_v33 = vshll.u32 %v2452_v2, 16  ;;  %v526_v46 = vshll.u32 %v2446_v1, 16  ;;  %s2736_s8 = scalar_lea.vmem %s3383_s2, %s2060_s11 }
  0x1b   : > { %v2461_v3 = vld [vmem:[%s316_s15] sm:$0xff]   ;;  %v2463_v4 = vld [vmem:[%s316_s15 + $0x8] sm:$0xff]   ;;  %v2292_v10 = vld [vmem:[%s316_s15 + $0x10] ss:$0 sps:$4 sm:$0x11]   ;;  %v716_v13 = vrot.slane %v2471_v8, 1 }
  0x1c   : > { %v696_v6 = vrot.slane %v2461_v3, 1  ;;  %v697_v7 = vrot.slane %v2463_v4, 1  ;;  %v717_v14 = vrot.slane %v2474_v9, 1  ;;  %v699_v15 = vrot.slane %v2292_v10, 1  ;;  %v2499_v30 = vld [vmem:[%s2438_s9 + $0x8] sm:$0xff]   ;;  %s2366_s19 = smov 40  }
  0x1d   : > { %v2293_v16 = vld [vmem:[%s2438_s9 + $0x4c] ss:$0 sps:$4 sm:$0x11]   ;;  %v511_v18 = vshll.u32 %v2463_v4, 16  ;;  %v515_v19 = vshrl.u32 %v2463_v4, 16  ;;  %v519_v20 = vshll.u32 %v2292_v10, 16 }
  0x1e   : > { %796 = vrot.lane.b32.xlu1 %v2452_v2, %s2362_s12  ;;  %v698_v12 = vsel %vm695_vm0, %v696_v6, %v697_v7  ;;  %v2483_v17 = vsel %vm695_vm0, %v716_v13, %v717_v14  ;;  %v700_v21 = vsel %vm695_vm0, %v697_v7, %v699_v15  ;;  %v719_v22 = vrot.slane %v2293_v16, 1  ;;  %v2295_v40 = vld [vmem:[%s2438_s9 + $0x60] ss:$0 sps:$4 sm:$0x11]   ;;  %s2367_s6 = smov 48   ;;  %s2368_s15 = smov 56  }
  0x1f   : > { %736 = vrot.lane.b32.xlu0 %v698_v12, %s2363_s16  ;;  %v504_v23 = vshrl.u32 %v2461_v3, 16  ;;  %v506_v24 = vshll.u32 %v2461_v3, 16  ;;  %v513_v25 = vrot.slane %v511_v18, 1  ;;  %v521_v26 = vrot.slane %v519_v20, 1  ;;  %v2555_v20 = vld [vmem:[%s2438_s9 + $0x64] sm:$0xff]   ;;  %s2369_s27 = smov 64  }
  0x20   : > { %v591_v27 = vshll.u32 %v2474_v9, 16  ;;  %v595_v28 = vshrl.u32 %v2474_v9, 16  ;;  %v2496_v29 = vsel %vm695_vm0, %v717_v14, %v719_v22  ;;  %v599_v32 = vshll.u32 %v2293_v16, 16  ;;  %v2296_v45 = vld [vmem:[%s2438_s9 + $0x10] ss:$0 sps:$4 sm:$0x11]  }
  0x21   : > { %v508_v31 = vrot.slane %v506_v24, 1  ;;  %v517_v34 = vor.u32 %v515_v19, %v513_v25  ;;  %v584_v36 = vshrl.u32 %v2471_v8, 16  ;;  %v586_v37 = vshll.u32 %v2471_v8, 16  ;;  %v2309_v24 = vld [vmem:[%s3384_s3] sm:$0xff]  }
  0x22   : > { %752 = vrot.lane.b32.xlu1 %v2483_v17, %s2363_s16  ;;  %v593_v35 = vrot.slane %v591_v27, 1  ;;  %v608_v39 = vrot.slane %v606_v11, 1  ;;  %v601_v43 = vrot.slane %v599_v32, 1  ;;  %v531_v47 = vshll.u32 %v2499_v30, 16  ;;  %2179 = vmatprep.subr.bf16.mxu0 %v2309_v24 }
  0x23   : > { %738 = vrot.lane.b32.xlu0 %v700_v21, %s2363_s16  ;;  %v509_v38 = vor.u32 %v508_v31, %v504_v23  ;;  %v522_v41 = vsel %vm502_vm1, %v517_v34, %v521_v26  ;;  %v588_v44 = vrot.slane %v586_v37, 1  ;;  %v524_v50 = vshrl.u32 %v2446_v1, 16  ;;  %v2563_v23 = vld [vmem:[%s2438_s9 + $0x14] sm:$0xff]   ;;  %v2574_v26 = vld [vmem:[%s2438_s9 + $0x6c] sm:$0xff]   ;;  %v2583_v31 = vld [vmem:[%s2438_s9 + $0x1c] sm:$0xff]   ;;  %2221 = vmatprep.subr.bf16.mxu1 %v2309_v24 }
  0x24   : > { %v597_v42 = vor.u32 %v595_v28, %v593_v35  ;;  %v613_v51 = vrot.slane %v611_v33, 1  ;;  %v528_v52 = vrot.slane %v526_v46, 1  ;;  %v609_v54 = vor.u32 %v608_v39, %v604_v5  ;;  %3393 = vst [vmem:[#allocation2_spill] sm:$0xff] %v2574_v26  ;;  %3394 = vst [vmem:[#allocation3_spill] sm:$0xff] %v2583_v31  ;;  %2180 = vmatpush3.bf16.msra.mxu0 %v2309_v24  ;;  %v2310_v33 = vld [vmem:[%s3384_s3 + $0x8] sm:$0xff]  }
  0x25   : > { %v514_v48 = vsel %vm502_vm1, %v509_v38, %v513_v25  ;;  %v589_v49 = vor.u32 %v588_v44, %v584_v36  ;;  %v615_v55 = vshrl.u32 %v2452_v2, 16  ;;  %v619_v56 = vshll.u32 %v2295_v40, 16  ;;  %2226 = vmatpush3.bf16.msra.mxu1 %v2309_v24  ;;  %v2594_v37 = vld [vmem:[%s2438_s9 + $0x74] ss:$0 sps:$4 sm:$0x11]   ;;  %2181 = vmatprep.subr.bf16.mxu0 %v2310_v33 }
  0x26   : > { %754 = vrot.lane.b32.xlu1 %v2496_v29, %s2363_s16  ;;  %v2517_v53 = vsel %vm502_vm1, %v597_v42, %v601_v43  ;;  %v533_v57 = vrot.slane %v531_v47, 1  ;;  %v529_v59 = vor.u32 %v528_v52, %v524_v50  ;;  %v535_v60 = vshrl.u32 %v2499_v30, 16  ;;  %2222 = vmatprep.subr.bf16.mxu1 %v2310_v33  ;;  %v2311_v42 = vld [vmem:[%s3384_s3 + $0x10] sm:$0xff]  }
  0x27   : > { %780 = vrot.lane.b32.xlu0 %v2499_v30, %s2362_s12  ;;  %v2522_v58 = vsel %vm502_vm1, %v589_v49, %v593_v35  ;;  %v539_v61 = vshll.u32 %v2296_v45, 16  ;;  %v2528_v62 = vsel %vm502_vm1, %v609_v54, %v613_v51  ;;  %v617_v63 = vor.u32 %v615_v55, %v613_v51  ;;  %v2313_v51 = vld [vmem:[%s3384_s3 + $0x18] sm:$0xff]  }
  0x28   : > { %v621_v5 = vrot.slane %v619_v56, 1  ;;  %v2533_v6 = vsel %vm502_vm1, %v529_v59, %v533_v57  ;;  %v537_v7 = vor.u32 %v535_v60, %v533_v57  ;;  %v721_v12 = vrot.slane %v2441_v0, 1  ;;  %2182 = vmatpush3.bf16.msra.mxu0 %v2310_v33  ;;  %v2315_v60 = vld [vmem:[%s3384_s3 + $0x20] ss:$0 sps:$4 sm:$0xff]  }
  0x29   : > { %v541_v10 = vrot.slane %v539_v61, 1  ;;  %v722_v13 = vrot.slane %v2452_v2, 1  ;;  %v701_v15 = vrot.slane %v2446_v1, 1  ;;  %v702_v16 = vrot.slane %v2499_v30, 1  ;;  %2227 = vmatpush3.bf16.msra.mxu1 %v2310_v33  ;;  %2183 = vmatprep.subr.bf16.mxu0 %v2311_v42 }
  0x2a   : > { %665 = vrot.lane.b32.xlu1 %v522_v41, %s2364_s17  ;;  %v2538_v11 = vsel %vm502_vm1, %v617_v63, %v621_v5  ;;  %v724_v19 = vrot.slane %v2295_v40, 1  ;;  %v704_v22 = vrot.slane %v2296_v45, 1  ;;  %v626_v27 = vshll.u32 %v2555_v20, 16  ;;  %v2601_v41 = vld [vmem:[%s2438_s9 + $0x24] ss:$0 sps:$4 sm:$0x11]   ;;  %2223 = vmatprep.subr.bf16.mxu1 %v2311_v42 }
  0x2b   : > { %663 = vrot.lane.b32.xlu0 %v514_v48, %s2364_s17  ;;  %v2545_v14 = vsel %vm502_vm1, %v537_v7, %v541_v10  ;;  %v2552_v18 = vsel %vm695_vm0, %v721_v12, %v722_v13  ;;  %v2560_v21 = vsel %vm695_vm0, %v701_v15, %v702_v16  ;;  %v546_v32 = vshll.u32 %v2563_v23, 16 }
  0x2c   : > { %v2571_v25 = vsel %vm695_vm0, %v722_v13, %v724_v19  ;;  %v2580_v28 = vsel %vm695_vm0, %v702_v16, %v704_v22  ;;  %v624_v34 = vshrl.u32 %v2555_v20, 16  ;;  %v628_v35 = vrot.slane %v626_v27, 1  ;;  %2184 = vmatpush3.bf16.msra.mxu0 %v2311_v42 }
  0x2d   : > { %v631_v36 = vshll.u32 %v2574_v26, 16  ;;  %v544_v38 = vshrl.u32 %v2563_v23, 16  ;;  %v548_v39 = vrot.slane %v546_v32, 1  ;;  %v551_v40 = vshll.u32 %v2583_v31, 16  ;;  %2228 = vmatpush3.bf16.msra.mxu1 %v2311_v42  ;;  %2185 = vmatprep.subr.bf16.mxu0 %v2313_v51  ;;  %v2717_v32 = vld [vmem:[%s2438_s9 + $0x30] sm:$0xff]  }
  0x2e   : > { %681 = vrot.lane.b32.xlu1 %v2517_v53, %s2364_s17  ;;  %v629_v43 = vor.u32 %v628_v35, %v624_v34  ;;  %v635_v45 = vshrl.u32 %v2574_v26, 16  ;;  %v639_v46 = vshll.u32 %v2594_v37, 16  ;;  %v555_v49 = vshrl.u32 %v2583_v31, 16  ;;  %2224 = vmatprep.subr.bf16.mxu1 %v2313_v51  ;;  %3398 = vst [vmem:[#allocation7_spill] sm:$0xff] %v2717_v32 }
  0x2f   : > { %679 = vrot.lane.b32.xlu0 %v2522_v58, %s2364_s17  ;;  %v633_v44 = vrot.slane %v631_v36, 1  ;;  %v549_v47 = vor.u32 %v548_v39, %v544_v38  ;;  %v553_v48 = vrot.slane %v551_v40, 1  ;;  %v559_v50 = vshll.u32 %v2601_v41, 16  ;;  %v2307_v35 = vld [vmem:[%s2438_s9 + $0x88] ss:$0 sps:$4 sm:$0x11]  }
  0x30   : > { %v641_v55 = vrot.slane %v639_v46, 1  ;;  %2186 = vmatpush3.bf16.msra.mxu0 %v2313_v51  ;;  %v726_v63 = vrot.slane %v2555_v20, 1  ;;  %v727_v5 = vrot.slane %v2574_v26, 1  ;;  %v1368_v7 = vsel %vm1366_vm2, %v2315_v60, 0 }
  0x31   : > { %v2620_v52 = vsel %vm502_vm1, %v629_v43, %v633_v44  ;;  %v637_v54 = vor.u32 %v635_v45, %v633_v44  ;;  %v2625_v56 = vsel %vm502_vm1, %v549_v47, %v553_v48  ;;  %v557_v57 = vor.u32 %v555_v49, %v553_v48  ;;  %2229 = vmatpush3.bf16.msra.mxu1 %v2313_v51  ;;  %v2308_v38 = vld [vmem:[%s2438_s9 + $0x38] ss:$0 sps:$4 sm:$0x11]  }
  0x32   : > { %849 = vrot.lane.b32.xlu1 %v2528_v62, %s2365_s18  ;;  %v561_v59 = vrot.slane %v559_v50, 1  ;;  %2231 = vmatprep.subr.msk.bf16.mxu0 %vm1366_vm2, %v2315_v60  ;;  %v706_v12 = vrot.slane %v2563_v23, 1  ;;  %v707_v13 = vrot.slane %v2583_v31, 1  ;;  %v2647_v15 = vsel %vm695_vm0, %v726_v63, %v727_v5 }
  0x33   : > { %833 = vrot.lane.b32.xlu0 %v2533_v6, %s2365_s18  ;;  %v2633_v61 = vsel %vm502_vm1, %v637_v54, %v641_v55  ;;  %2232 = vmatprep.subr.msk.bf16.mxu1 %vm1366_vm2, %v2315_v60  ;;  %v729_v19 = vrot.slane %v2594_v37, 1  ;;  %v709_v22 = vrot.slane %v2601_v41, 1  ;;  %v571_v41 = vshll.u32 %v2717_v32, 16 }
  0x34   : > { %v2640_v10 = vsel %vm502_vm1, %v557_v57, %v561_v59  ;;  %2188 = vmatpush3.bf16.msra.mxu0 %v1368_v7  ;;  %v2652_v16 = vsel %vm695_vm0, %v706_v12, %v707_v13  ;;  %v659_v44 = vshll.u32 %v2307_v35, 16  ;;  %v575_v48 = vshrl.u32 %v2717_v32, 16 }
  0x35   : > { %2230 = vmatpush3.bf16.msra.mxu1 %v1368_v7  ;;  %v2663_v24 = vsel %vm695_vm0, %v727_v5, %v729_v19  ;;  %v2668_v27 = vsel %vm695_vm0, %v707_v13, %v709_v22  ;;  %v573_v47 = vrot.slane %v571_v41, 1  ;;  %v579_v49 = vshll.u32 %v2308_v38, 16 }
  0x36   : > { %851 = vrot.lane.b32.xlu1 %v2538_v11, %s2365_s18  ;;  %v661_v54 = vrot.slane %v659_v44, 1  ;;  %v712_v22 = vrot.slane %v2717_v32, 1 }
  0x37   : > { %835 = vrot.lane.b32.xlu0 %v2545_v14, %s2365_s18  ;;  %v577_v57 = vor.u32 %v575_v48, %v573_v47  ;;  %v581_v59 = vrot.slane %v579_v49, 1 }
  0x39   : > { %v2767_v13 = vsel %vm502_vm1, %v577_v57, %v581_v59 }
  0x3a   : > { %886 = vrot.lane.b32.xlu1 %v2552_v18, %s2366_s19 }
  0x3b   : > { %870 = vrot.lane.b32.xlu0 %v2560_v21, %s2366_s19 }
  0x3e   : > { %888 = vrot.lane.b32.xlu1 %v2571_v25, %s2366_s19 }
  0x3f   : > { %872 = vrot.lane.b32.xlu0 %v2580_v28, %s2366_s19 }
  0x42   : > { %928 = vrot.lane.b32.xlu1 %v2555_v20, %s2367_s6 }
  0x43   : > { %912 = vrot.lane.b32.xlu0 %v2563_v23, %s2367_s6 }
  0x46   : > { %930 = vrot.lane.b32.xlu1 %v2574_v26, %s2367_s6 }
  0x47   : > { %914 = vrot.lane.b32.xlu0 %v2583_v31, %s2367_s6 }
  0x4a   : > { %983 = vrot.lane.b32.xlu1 %v2620_v52, %s2368_s15 }
  0x4b   : > { %967 = vrot.lane.b32.xlu0 %v2625_v56, %s2368_s15 }
  0x4e   : > { %985 = vrot.lane.b32.xlu1 %v2633_v61, %s2368_s15 }
  0x4f   : > { %969 = vrot.lane.b32.xlu0 %v2640_v10, %s2368_s15 }
  0x52   : > { %1020 = vrot.lane.b32.xlu1 %v2647_v15, %s2369_s27 }
  0x53   : > { %1004 = vrot.lane.b32.xlu0 %v2652_v16, %s2369_s27 }
  0x56   : > { %683 = vrot.lane.b32.xlu1 %v2528_v62, %s2364_s17 }
  0x57   : > { %667 = vrot.lane.b32.xlu0 %v2533_v6, %s2364_s17  ;;  %v2701_v6 = vld [vmem:[%s2438_s9 + $0x78] sm:$0xff]  }
  0x58   : > { %3395 = vst [vmem:[#allocation4_spill] sm:$0xff] %v2701_v6  ;;  %v644_v36 = vshrl.u32 %v2701_v6, 16  ;;  %v731_v5 = vrot.slane %v2701_v6, 1 }
  0x5a   : > { %1022 = vrot.lane.b32.xlu1 %v2663_v24, %s2369_s27 }
  0x5b   : > { %1006 = vrot.lane.b32.xlu0 %v2668_v27, %s2369_s27 }
  0x5e   : > { %685 = vrot.lane.b32.xlu1 %v2538_v11, %s2364_s17 }
  0x5f   : > { %669 = vrot.lane.b32.xlu0 %v2545_v14, %s2364_s17  ;;  %v2706_v14 = vld [vmem:[%s2438_s9 + $0x28] sm:$0xff]  }
  0x60   : > { %3396 = vst [vmem:[#allocation5_spill] sm:$0xff] %v2706_v14  ;;  %v566_v33 = vshll.u32 %v2706_v14, 16  ;;  %v564_v39 = vshrl.u32 %v2706_v14, 16  ;;  %v711_v19 = vrot.slane %v2706_v14, 1 }
  0x62   : > { %756 = vrot.lane.b32.xlu1 %v2552_v18, %s2363_s16  ;;  %v568_v40 = vrot.slane %v566_v33, 1 }
  0x63   : > { %740 = vrot.lane.b32.xlu0 %v2560_v21, %s2363_s16  ;;  %v2711_v21 = vld [vmem:[%s2438_s9 + $0x80] sm:$0xff]  }
  0x64   : > { %3397 = vst [vmem:[#allocation6_spill] sm:$0xff] %v2711_v21  ;;  %v651_v34 = vshll.u32 %v2711_v21, 16  ;;  %v655_v42 = vshrl.u32 %v2711_v21, 16  ;;  %v569_v46 = vor.u32 %v568_v40, %v564_v39  ;;  %v732_v7 = vrot.slane %v2711_v21, 1 }
  0x65   : > { %v714_v40 = vrot.slane %v2308_v38, 1 }
  0x66   : > { %758 = vrot.lane.b32.xlu1 %v2571_v25, %s2363_s16  ;;  %v653_v43 = vrot.slane %v651_v34, 1  ;;  %v2751_v55 = vsel %vm502_vm1, %v569_v46, %v573_v47  ;;  %v2776_v33 = vsel %vm695_vm0, %v731_v5, %v732_v7  ;;  %v2781_v34 = vsel %vm695_vm0, %v711_v19, %v712_v22 }
  0x67   : > { %742 = vrot.lane.b32.xlu0 %v2580_v28, %s2363_s16  ;;  %v646_v28 = vshll.u32 %v2701_v6, 16 }
  0x68   : > { %v657_v51 = vor.u32 %v655_v42, %v653_v43 }
  0x69   : > { %v648_v37 = vrot.slane %v646_v28, 1 }
  0x6a   : > { %798 = vrot.lane.b32.xlu1 %v2555_v20, %s2362_s12  ;;  %v2758_v63 = vsel %vm502_vm1, %v657_v51, %v661_v54  ;;  %v2846_v51 = vld [vmem:[%s2438_s9 + $0x8c] sm:$0xff]  }
  0x6b   : > { %782 = vrot.lane.b32.xlu0 %v2563_v23, %s2362_s12  ;;  %v649_v45 = vor.u32 %v648_v37, %v644_v36  ;;  %v734_v37 = vrot.slane %v2307_v35, 1  ;;  %v2801_v35 = vsel %vm695_vm0, %v712_v22, %v714_v40  ;;  %v816_v19 = vshll.u32 %v2846_v51, 16 }
  0x6d   : > { %v2746_v50 = vsel %vm502_vm1, %v649_v45, %v653_v43  ;;  %v2794_v42 = vsel %vm695_vm0, %v732_v7, %v734_v37  ;;  %v2860_v7 = vld [vmem:[%s2438_s9 + $0x94] sm:$0xff]  }
  0x6e   : > { %800 = vrot.lane.b32.xlu1 %v2574_v26, %s2362_s12 }
  0x6f   : > { %784 = vrot.lane.b32.xlu0 %v2583_v31, %s2362_s12 }
  0x72   : > { %853 = vrot.lane.b32.xlu1 %v2620_v52, %s2365_s18 }
  0x73   : > { %837 = vrot.lane.b32.xlu0 %v2625_v56, %s2365_s18 }
  0x76   : > { %855 = vrot.lane.b32.xlu1 %v2633_v61, %s2365_s18 }
  0x77   : > { %839 = vrot.lane.b32.xlu0 %v2640_v10, %s2365_s18 }
  0x7a   : > { %890 = vrot.lane.b32.xlu1 %v2647_v15, %s2366_s19 }
  0x7b   : > { %874 = vrot.lane.b32.xlu0 %v2652_v16, %s2366_s19 }
  0x7e   : > { %892 = vrot.lane.b32.xlu1 %v2663_v24, %s2366_s19 }
  0x7f   : > { %876 = vrot.lane.b32.xlu0 %v2668_v27, %s2366_s19 }
  0x82   : > { %932 = vrot.lane.b32.xlu1 %v2701_v6, %s2367_s6 }
  0x83   : > { %916 = vrot.lane.b32.xlu0 %v2706_v14, %s2367_s6 }
  0x86   : > { %934 = vrot.lane.b32.xlu1 %v2711_v21, %s2367_s6 }
  0x87   : > { %918 = vrot.lane.b32.xlu0 %v2717_v32, %s2367_s6 }
  0x8a   : > { %987 = vrot.lane.b32.xlu1 %v2746_v50, %s2368_s15 }
  0x8b   : > { %971 = vrot.lane.b32.xlu0 %v2751_v55, %s2368_s15 }
  0x8c   : > { %v2755_v60 = vpop.permute.xlu1 %794  ;;  %v2764_v12 = vpop.permute.xlu0 %778 }
  0x8e   : > { %989 = vrot.lane.b32.xlu1 %v2758_v63, %s2368_s15 }
  0x8f   : > { %973 = vrot.lane.b32.xlu0 %v2767_v13, %s2368_s15 }
  0x90   : > { %v2773_v28 = vpop.permute.xlu1 %796 }
  0x91   : > { %v2783_v36 = vpop.permute.xlu0 %736 }
  0x92   : > { %1024 = vrot.lane.b32.xlu1 %v2776_v33, %s2369_s27 }
  0x93   : > { %1008 = vrot.lane.b32.xlu0 %v2781_v34, %s2369_s27 }
  0x94   : > { %v753_v39 = vpop.permute.xlu1 %752 }
  0x95   : > { %v2789_v41 = vpop.permute.xlu0 %738 }
  0x96   : > { %687 = vrot.lane.b32.xlu1 %v2620_v52, %s2364_s17 }
  0x97   : > { %671 = vrot.lane.b32.xlu0 %v2625_v56, %s2364_s17 }
  0x98   : > { %v2798_v43 = vpop.permute.xlu1 %754 }
  0x99   : > { %v2803_v44 = vpop.permute.xlu0 %780 }
  0x9a   : > { %1026 = vrot.lane.b32.xlu1 %v2794_v42, %s2369_s27 }
  0x9b   : > { %1010 = vrot.lane.b32.xlu0 %v2801_v35, %s2369_s27 }
  0x9c   : > { %v2809_v52 = vpop.permute.xlu1 %665 }
  0x9d   : > { %v664_v38 = vpop.permute.xlu0 %663 }
  0x9e   : > { %689 = vrot.lane.b32.xlu1 %v2633_v61, %s2364_s17  ;;  %v1038_v22 = vsel %vm1036_vm3, %v2461_v3, %v664_v38  ;;  %v814_v3 = vshrl.u32 %v2846_v51, 16  ;;  %v818_v38 = vrot.slane %v816_v19, 1 }
  0x9f   : > { %673 = vrot.lane.b32.xlu0 %v2640_v10, %s2364_s17 }
  0xa0   : > { %v682_v56 = vpop.permute.xlu1 %681  ;;  %v819_v31 = vor.u32 %v818_v38, %v814_v3 }
  0xa1   : > { %v680_v45 = vpop.permute.xlu0 %679 }
  0xa2   : > { %760 = vrot.lane.b32.xlu1 %v2647_v15, %s2363_s16  ;;  %v1054_v54 = vsel %vm1036_vm3, %v2471_v8, %v680_v45 }
  0xa3   : > { %744 = vrot.lane.b32.xlu0 %v2652_v16, %s2363_s16  ;;  %v1087_v5 = vsel %vm1069_vm4, %v1054_v54, %v753_v39  ;;  %v2872_v39 = vld [vmem:[%s2438_s9 + $0x9c] ss:$0 sps:$4 sm:$0x11]   ;;  %v1071_v54 = vsel %vm1069_vm4, %v1038_v22, %v2783_v36  ;;  %v1056_v36 = vsel %vm1036_vm3, %v2474_v9, %v682_v56  ;;  %v1040_v56 = vsel %vm1036_vm3, %v2463_v4, %v2809_v52 }
  0xa4   : > { %v850_v46 = vpop.permute.xlu1 %849  ;;  %v1120_v40 = vsel %vm1102_vm5, %v1087_v5, %v2755_v60  ;;  %v1104_v19 = vsel %vm1102_vm5, %v1071_v54, %v2764_v12 }
  0xa5   : > { %v834_v47 = vpop.permute.xlu0 %833  ;;  %v1153_v5 = vsel %vm1135_vm6, %v1120_v40, %v850_v46 }
  0xa6   : > { %762 = vrot.lane.b32.xlu1 %v2663_v24, %s2363_s16  ;;  %v1137_v46 = vsel %vm1135_vm6, %v1104_v19, %v834_v47 }
  0xa7   : > { %746 = vrot.lane.b32.xlu0 %v2668_v27, %s2363_s16 }
  0xa8   : > { %v2823_v61 = vpop.permute.xlu1 %851 }
  0xa9   : > { %v2825_v10 = vpop.permute.xlu0 %835 }
  0xaa   : > { %802 = vrot.lane.b32.xlu1 %v2701_v6, %s2362_s12  ;;  %v829_v6 = vshll.u32 %v2872_v39, 16 }
  0xab   : > { %786 = vrot.lane.b32.xlu0 %v2706_v14, %s2362_s12 }
  0xac   : > { %v887_v15 = vpop.permute.xlu1 %886  ;;  %v831_v52 = vrot.slane %v829_v6, 1 }
  0xad   : > { %v871_v16 = vpop.permute.xlu0 %870  ;;  %v1186_v22 = vsel %vm1168_vm7, %v1153_v5, %v887_v15  ;;  %v1089_v5 = vsel %vm1069_vm4, %v1056_v36, %v2798_v43 }
  0xae   : > { %804 = vrot.lane.b32.xlu1 %v2711_v21, %s2362_s12  ;;  %v825_v21 = vshrl.u32 %v2860_v7, 16  ;;  %v1170_v12 = vsel %vm1168_vm7, %v1137_v46, %v871_v16  ;;  %v1073_v16 = vsel %vm1069_vm4, %v1040_v56, %v2789_v41 }
  0xaf   : > { %788 = vrot.lane.b32.xlu0 %v2717_v32, %s2362_s12  ;;  %v821_v32 = vshll.u32 %v2860_v7, 16 }
  0xb0   : > { %v2835_v24 = vpop.permute.xlu1 %888 }
  0xb1   : > { %v2837_v27 = vpop.permute.xlu0 %872  ;;  %v823_v26 = vrot.slane %v821_v32, 1 }
  0xb2   : > { %857 = vrot.lane.b32.xlu1 %v2746_v50, %s2365_s18 }
  0xb3   : > { %841 = vrot.lane.b32.xlu0 %v2751_v55, %s2365_s18  ;;  %v827_v4 = vor.u32 %v825_v21, %v823_v26  ;;  %v2911_v43 = vsel %vm502_vm1, %v819_v31, %v823_v26  ;;  %v1106_v21 = vsel %vm1102_vm5, %v1073_v16, %v2803_v44  ;;  %v866_v44 = vrot.slane %v2860_v7, 1 }
  0xb4   : > { %v929_v48 = vpop.permute.xlu1 %928  ;;  %v1139_v41 = vsel %vm1135_vm6, %v1106_v21, %v2825_v10 }
  0xb5   : > { %v913_v49 = vpop.permute.xlu0 %912  ;;  %v1219_v40 = vsel %vm1201_vm8, %v1186_v22, %v929_v48 }
  0xb6   : > { %859 = vrot.lane.b32.xlu1 %v2758_v63, %s2365_s18  ;;  %v1203_v47 = vsel %vm1201_vm8, %v1170_v12, %v913_v49  ;;  %v1122_v49 = vsel %vm1102_vm5, %v1089_v5, %v2773_v28  ;;  %v832_v28 = vsel %vm502_vm1, %v827_v4, %v831_v52  ;;  %v3021_v4 = vld [vmem:[%s2736_s8 + $0x8] sm:$0xff]  }
  0xb7   : > { %843 = vrot.lane.b32.xlu0 %v2767_v13, %s2365_s18  ;;  %v1155_v6 = vsel %vm1135_vm6, %v1122_v49, %v2823_v61  ;;  %v865_v61 = vrot.slane %v2846_v51, 1  ;;  %v955_v21 = vshll.u32 %v3021_v4, 16 }
  0xb8   : > { %v2852_v57 = vpop.permute.xlu1 %930  ;;  %v1188_v26 = vsel %vm1168_vm7, %v1155_v6, %v2835_v24  ;;  %v1172_v24 = vsel %vm1168_vm7, %v1139_v41, %v2837_v27 }
  0xb9   : > { %v2854_v59 = vpop.permute.xlu0 %914  ;;  %v1221_v38 = vsel %vm1201_vm8, %v1188_v26, %v2852_v57 }
  0xba   : > { %894 = vrot.lane.b32.xlu1 %v2776_v33, %s2366_s19  ;;  %v1205_v22 = vsel %vm1201_vm8, %v1172_v24, %v2854_v59 }
  0xbb   : > { %878 = vrot.lane.b32.xlu0 %v2781_v34, %s2366_s19 }
  0xbc   : > { %v984_v37 = vpop.permute.xlu1 %983 }
  0xbd   : > { %v968_v45 = vpop.permute.xlu0 %967  ;;  %v1252_v15 = vsel %vm1234_vm9, %v1219_v40, %v984_v37 }
  0xbe   : > { %896 = vrot.lane.b32.xlu1 %v2794_v42, %s2366_s19  ;;  %v1236_v32 = vsel %vm1234_vm9, %v1203_v47, %v968_v45 }
  0xbf   : > { %880 = vrot.lane.b32.xlu0 %v2801_v35, %s2366_s19 }
  0xc0   : > { %v986_v60 = vpop.permute.xlu1 %985 }
  0xc1   : > { %v970_v14 = vpop.permute.xlu0 %969  ;;  %v1254_v36 = vsel %vm1234_vm9, %v1221_v38, %v986_v60  ;;  %v867_v60 = vsel %vm695_vm0, %v865_v61, %v866_v44 }
  0xc2   : > { %936 = vrot.lane.b32.xlu1 %v2846_v51, %s2367_s6  ;;  %v1238_v57 = vsel %vm1234_vm9, %v1205_v22, %v970_v14  ;;  %v868_v14 = vrot.slane %v2872_v39, 1 }
  0xc3   : > { %920 = vrot.lane.b32.xlu0 %v2471_v8, %s2367_s6 }
  0xc4   : > { %v1021_v54 = vpop.permute.xlu1 %1020 }
  0xc5   : > { %v1285_v48 = vsel %vm1267_vm10, %v1252_v15, %v1021_v54  ;;  %v1005_v3 = vpop.permute.xlu0 %1004  ;;  %v869_v15 = vsel %vm695_vm0, %v866_v44, %v868_v14 }
  0xc6   : > { %938 = vrot.lane.b32.xlu1 %v2860_v7, %s2367_s6  ;;  %2205 = vmatprep.mubr.msk.bf16.mxu1 %vm1333_vm11, %v1285_v48  ;;  %v1269_v37 = vsel %vm1267_vm10, %v1236_v32, %v1005_v3  ;;  %v3011_v3 = vld [vmem:[%s2736_s8] sm:$0xff]  }
  0xc7   : > { %922 = vrot.lane.b32.xlu0 %v2474_v9, %s2367_s6  ;;  %2189 = vmatprep.mubr.msk.bf16.mxu0 %vm1333_vm11, %v1269_v37  ;;  %v948_v49 = vshrl.u32 %v3011_v3, 16 }
  0xc8   : > { %v2918_v45 = vpop.permute.xlu1 %683 }
  0xc9   : > { %v2926_v31 = vpop.permute.xlu0 %667  ;;  %v1058_v16 = vsel %vm1036_vm3, %v2441_v0, %v2918_v45 }
  0xca   : > { %991 = vrot.lane.b32.xlu1 %v2911_v43, %s2368_s15 }
  0xcb   : > { %975 = vrot.lane.b32.xlu0 %v2522_v58, %s2368_s15 }
  0xcc   : > { %v1023_v19 = vpop.permute.xlu1 %1022 }
  0xcd   : > { %v1287_v10 = vsel %vm1267_vm10, %v1254_v36, %v1023_v19  ;;  %v1007_v46 = vpop.permute.xlu0 %1006  ;;  %v957_v36 = vrot.slane %v955_v21, 1 }
  0xce   : > { %993 = vrot.lane.b32.xlu1 %v832_v28, %s2368_s15  ;;  %2206 = vmatmul.mubr.msk.bf16.vlgmr.msra.gmra.mrb[0].mxu1 %vm1333_vm11, %v1287_v10  ;;  %v1271_v27 = vsel %vm1267_vm10, %v1238_v57, %v1007_v46  ;;  %v2320_v10 = vld [vmem:[%s2438_s9 + $0x50] sm:$0xff]  }
  0xcf   : > { %977 = vrot.lane.b32.xlu0 %v2517_v53, %s2368_s15  ;;  %2190 = vmatmul.mubr.msk.bf16.vlgmr.msra.gmra.mrb[0].mxu0 %vm1333_vm11, %v1271_v27 }
  0xd0   : > { %v2953_v40 = vpop.permute.xlu1 %685 }
  0xd1   : > { %v2955_v59 = vpop.permute.xlu0 %669 }
  0xd2   : > { %1028 = vrot.lane.b32.xlu1 %v867_v60, %s2369_s27 }
  0xd3   : > { %1012 = vrot.lane.b32.xlu0 %v2483_v17, %s2369_s27 }
  0xd4   : > { %v757_v56 = vpop.permute.xlu1 %756 }
  0xd5   : > { %v741_v12 = vpop.permute.xlu0 %740 }
  0xd6   : > { %691 = vrot.lane.b32.xlu1 %v2746_v50, %s2364_s17 }
  0xd7   : > { %675 = vrot.lane.b32.xlu0 %v2751_v55, %s2364_s17 }
  0xd8   : > { %v2966_v54 = vpop.permute.xlu1 %758 }
  0xd9   : > { %v2968_v5 = vpop.permute.xlu0 %742 }
  0xda   : > { %1030 = vrot.lane.b32.xlu1 %v869_v15, %s2369_s27 }
  0xdb   : > { %1014 = vrot.lane.b32.xlu0 %v2496_v29, %s2369_s27 }
  0xdc   : > { %v799_v39 = vpop.permute.xlu1 %798 }
  0xdd   : > { %v783_v47 = vpop.permute.xlu0 %782 }
  0xde   : > { %693 = vrot.lane.b32.xlu1 %v2758_v63, %s2364_s17 }
  0xdf   : > { %677 = vrot.lane.b32.xlu0 %v2767_v13, %s2364_s17 }
  0xe0   : > { %v2977_v50 = vpop.permute.xlu1 %800 }
  0xe1   : > { %v2979_v55 = vpop.permute.xlu0 %784 }
  0xe2   : > { %764 = vrot.lane.b32.xlu1 %v2776_v33, %s2363_s16 }
  0xe3   : > { %748 = vrot.lane.b32.xlu0 %v2781_v34, %s2363_s16 }
  0xe4   : > { %v854_v48 = vpop.permute.xlu1 %853 }
  0xe5   : > { %v838_v32 = vpop.permute.xlu0 %837 }
  0xe6   : > { %766 = vrot.lane.b32.xlu1 %v2794_v42, %s2363_s16 }
  0xe7   : > { %750 = vrot.lane.b32.xlu0 %v2801_v35, %s2363_s16  ;;  %s3220_s16 = scalar_lea.vmem %s3386_s5, %s2059_s30 }
  0xe8   : > { %v2989_v63 = vpop.permute.xlu1 %855 }
  0xe9   : > { %v2991_v13 = vpop.permute.xlu0 %839 }
  0xea   : > { %806 = vrot.lane.b32.xlu1 %v2846_v51, %s2362_s12 }
  0xeb   : > { %790 = vrot.lane.b32.xlu0 %v2471_v8, %s2362_s12 }
  0xec   : > { %v891_v33 = vpop.permute.xlu1 %890 }
  0xed   : > { %v875_v34 = vpop.permute.xlu0 %874 }
  0xee   : > { %808 = vrot.lane.b32.xlu1 %v2860_v7, %s2362_s12 }
  0xef   : > { %792 = vrot.lane.b32.xlu0 %v2474_v9, %s2362_s12 }
  0xf0   : > { %v3001_v42 = vpop.permute.xlu1 %892 }
  0xf1   : > { %v3003_v35 = vpop.permute.xlu0 %876 }
  0xf2   : > { %861 = vrot.lane.b32.xlu1 %v2911_v43, %s2365_s18  ;;  %v1091_v43 = vsel %vm1069_vm4, %v1058_v16, %v757_v56 }
  0xf3   : > { %845 = vrot.lane.b32.xlu0 %v2522_v58, %s2365_s18  ;;  %v950_v58 = vshll.u32 %v3011_v3, 16  ;;  %v1124_v26 = vsel %vm1102_vm5, %v1091_v43, %v799_v39 }
  0xf4   : > { %v933_v8 = vpop.permute.xlu1 %932 }
  0xf5   : > { %v917_v51 = vpop.permute.xlu0 %916  ;;  %v952_v6 = vrot.slane %v950_v58, 1  ;;  %v999_v58 = vrot.slane %v3011_v3, 1 }
  0xf6   : > { %863 = vrot.lane.b32.xlu1 %v832_v28, %s2365_s18  ;;  %v1157_v28 = vsel %vm1135_vm6, %v1124_v26, %v854_v48 }
  0xf7   : > { %847 = vrot.lane.b32.xlu0 %v2517_v53, %s2365_s18  ;;  %v3031_v53 = vld [vmem:[%s2736_s8 + $0x10] ss:$0 sps:$4 sm:$0x11]   ;;  %v1190_v38 = vsel %vm1168_vm7, %v1157_v28, %v891_v33  ;;  %v953_v24 = vor.u32 %v952_v6, %v948_v49 }
  0xf8   : > { %v3015_v9 = vpop.permute.xlu1 %934  ;;  %v1223_v44 = vsel %vm1201_vm8, %v1190_v38, %v933_v8 }
  0xf9   : > { %v3017_v7 = vpop.permute.xlu0 %918  ;;  %v958_v48 = vsel %vm502_vm1, %v953_v24, %v957_v36 }
  0xfa   : > { %898 = vrot.lane.b32.xlu1 %v867_v60, %s2366_s19  ;;  %v1060_v60 = vsel %vm1036_vm3, %v2452_v2, %v2953_v40  ;;  %v1044_v2 = vsel %vm1036_vm3, %v2499_v30, %v2955_v59 }
  0xfb   : > { %882 = vrot.lane.b32.xlu0 %v2483_v17, %s2366_s19  ;;  %v1042_v17 = vsel %vm1036_vm3, %v2446_v1, %v2926_v31  ;;  %v959_v1 = vshrl.u32 %v3021_v4, 16  ;;  %v963_v31 = vshll.u32 %v3031_v53, 16  ;;  %v1093_v39 = vsel %vm1069_vm4, %v1060_v60, %v2966_v54 }
  0xfc   : > { %v988_v52 = vpop.permute.xlu1 %987  ;;  %v1075_v45 = vsel %vm1069_vm4, %v1042_v17, %v741_v12  ;;  %v1126_v40 = vsel %vm1102_vm5, %v1093_v39, %v2977_v50  ;;  %v1077_v54 = vsel %vm1069_vm4, %v1044_v2, %v2968_v5 }
  0xfd   : > { %v972_v37 = vpop.permute.xlu0 %971  ;;  %v1108_v41 = vsel %vm1102_vm5, %v1075_v45, %v783_v47  ;;  %v1256_v22 = vsel %vm1234_vm9, %v1223_v44, %v988_v52  ;;  %v961_v12 = vor.u32 %v959_v1, %v957_v36  ;;  %v1110_v8 = vsel %vm1102_vm5, %v1077_v54, %v2979_v55 }
  0xfe   : > { %900 = vrot.lane.b32.xlu1 %v869_v15, %s2366_s19  ;;  %v965_v15 = vrot.slane %v963_v31, 1 }
  0xff   : > { %884 = vrot.lane.b32.xlu0 %v2496_v29, %s2366_s19  ;;  %v1141_v29 = vsel %vm1135_vm6, %v1108_v41, %v838_v32  ;;  %v2321_v32 = vld [vmem:[%s2438_s9 + $0x58] sm:$0xff]  }
 0x100   : > { %v990_v0 = vpop.permute.xlu1 %989  ;;  %v1174_v19 = vsel %vm1168_vm7, %v1141_v29, %v875_v34  ;;  %v1159_v34 = vsel %vm1135_vm6, %v1126_v40, %v2989_v63  ;;  %v966_v50 = vsel %vm502_vm1, %v961_v12, %v965_v15  ;;  %v1000_v63 = vrot.slane %v3021_v4, 1 }
 0x101   : > { %v974_v61 = vpop.permute.xlu0 %973  ;;  %v1207_v46 = vsel %vm1201_vm8, %v1174_v19, %v917_v51  ;;  %v1192_v30 = vsel %vm1168_vm7, %v1159_v34, %v3001_v42  ;;  %v1143_v51 = vsel %vm1135_vm6, %v1110_v8, %v2991_v13 }
 0x102   : > { %940 = vrot.lane.b32.xlu1 %v3011_v3, %s2367_s6  ;;  %v1240_v14 = vsel %vm1234_vm9, %v1207_v46, %v972_v37  ;;  %v1225_v5 = vsel %vm1201_vm8, %v1192_v30, %v3015_v9  ;;  %v1176_v55 = vsel %vm1168_vm7, %v1143_v51, %v3003_v35  ;;  %v1001_v3 = vsel %vm695_vm0, %v999_v58, %v1000_v63 }
 0x103   : > { %924 = vrot.lane.b32.xlu0 %v2320_v10, %s2367_s6  ;;  %v1258_v42 = vsel %vm1234_vm9, %v1225_v5, %v990_v0  ;;  %v1209_v16 = vsel %vm1201_vm8, %v1176_v55, %v3017_v7 }
 0x104   : > { %v1025_v57 = vpop.permute.xlu1 %1024  ;;  %v1242_v9 = vsel %vm1234_vm9, %v1209_v16, %v974_v61 }
 0x105   : > { %v1289_v27 = vsel %vm1267_vm10, %v1256_v22, %v1025_v57  ;;  %v1009_v56 = vpop.permute.xlu0 %1008 }
 0x106   : > { %942 = vrot.lane.b32.xlu1 %v3021_v4, %s2367_s6  ;;  %2209 = vmatprep.mubr.msk.bf16.mxu1 %vm1333_vm11, %v1289_v27  ;;  %v1273_v47 = vsel %vm1267_vm10, %v1240_v14, %v1009_v56  ;;  %v1002_v4 = vrot.slane %v3031_v53, 1 }
 0x107   : > { %926 = vrot.lane.b32.xlu0 %v2321_v32, %s2367_s6  ;;  %2193 = vmatprep.mubr.msk.bf16.mxu0 %vm1333_vm11, %v1273_v47  ;;  %v3399_v32 = vld [vmem:[#allocation2_spill] sm:$0xff] }
 0x108   : > { %v688_v33 = vpop.permute.xlu1 %687  ;;  %v1003_v43 = vsel %vm695_vm0, %v1000_v63, %v1002_v4  ;;  %vm1870_vm0 = vcmask 519168  }
 0x109   : > { %v672_v59 = vpop.permute.xlu0 %671 }
 0x10a   : > { %995 = vrot.lane.b32.xlu1 %v958_v48, %s2368_s15  ;;  %v1046_v57 = vsel %vm1036_vm3, %v2563_v23, %v672_v59  ;;  %v3400_v59 = vld [vmem:[#allocation3_spill] sm:$0xff] }
 0x10b   : > { %979 = vrot.lane.b32.xlu0 %v2528_v62, %s2368_s15 }
 0x10c   : > { %v1027_v52 = vpop.permute.xlu1 %1026 }
 0x10d   : > { %v1291_v13 = vsel %vm1267_vm10, %v1258_v42, %v1027_v52  ;;  %v1011_v37 = vpop.permute.xlu0 %1010 }
 0x10e   : > { %997 = vrot.lane.b32.xlu1 %v966_v50, %s2368_s15  ;;  %2210 = vmatmul.mubr.msk.bf16.gmra.mrb[4].mxu1 %vm1333_vm11, %v1291_v13  ;;  %v1275_v35 = vsel %vm1267_vm10, %v1242_v9, %v1011_v37 }
 0x10f   : > { %981 = vrot.lane.b32.xlu0 %v2538_v11, %s2368_s15  ;;  %2194 = vmatmul.mubr.msk.bf16.gmra.mrb[4].mxu0 %vm1333_vm11, %v1275_v35 }
 0x110   : > { %v690_v62 = vpop.permute.xlu1 %689 }
 0x111   : > { %v674_v7 = vpop.permute.xlu0 %673 }
 0x112   : > { %1032 = vrot.lane.b32.xlu1 %v1001_v3, %s2369_s27  ;;  %v1048_v50 = vsel %vm1036_vm3, %v3400_v59, %v674_v7 }
 0x113   : > { %1016 = vrot.lane.b32.xlu0 %v2552_v18, %s2369_s27 }
 0x114   : > { %v761_v49 = vpop.permute.xlu1 %760 }
 0x115   : > { %v745_v6 = vpop.permute.xlu0 %744 }
 0x116   : > { %1034 = vrot.lane.b32.xlu1 %v1003_v43, %s2369_s27  ;;  %v1079_v60 = vsel %vm1069_vm4, %v1046_v57, %v745_v6 }
 0x117   : > { %1018 = vrot.lane.b32.xlu0 %v2571_v25, %s2369_s27  ;;  %v1062_v25 = vsel %vm1036_vm3, %v2555_v20, %v688_v33  ;;  %v1064_v33 = vsel %vm1036_vm3, %v3399_v32, %v690_v62 }
 0x118   : > { %v763_v53 = vpop.permute.xlu1 %762  ;;  %v1095_v10 = vsel %vm1069_vm4, %v1062_v25, %v761_v49 }
 0x119   : > { %v747_v11 = vpop.permute.xlu0 %746  ;;  %v1097_v8 = vsel %vm1069_vm4, %v1064_v33, %v763_v53 }
 0x11a   : > { %v1081_v58 = vsel %vm1069_vm4, %v1048_v50, %v747_v11 }
 0x11c   : > { %v803_v21 = vpop.permute.xlu1 %802 }
 0x11d   : > { %v787_v17 = vpop.permute.xlu0 %786  ;;  %v1128_v46 = vsel %vm1102_vm5, %v1095_v10, %v803_v21  ;;  %v3401_v10 = vld [vmem:[#allocation4_spill] sm:$0xff] }
 0x11e   : > { %v1112_v56 = vsel %vm1102_vm5, %v1079_v60, %v787_v17  ;;  %v3402_v60 = vld [vmem:[#allocation5_spill] sm:$0xff] }
 0x120   : > { %v805_v26 = vpop.permute.xlu1 %804 }
 0x121   : > { %v789_v0 = vpop.permute.xlu0 %788  ;;  %v1130_v51 = vsel %vm1102_vm5, %v1097_v8, %v805_v26 }
 0x122   : > { %v1114_v55 = vsel %vm1102_vm5, %v1081_v58, %v789_v0 }
 0x124   : > { %v858_v45 = vpop.permute.xlu1 %857 }
 0x125   : > { %v842_v28 = vpop.permute.xlu0 %841  ;;  %v1161_v14 = vsel %vm1135_vm6, %v1128_v46, %v858_v45 }
 0x126   : > { %v1145_v20 = vsel %vm1135_vm6, %v1112_v56, %v842_v28 }
 0x128   : > { %v860_v41 = vpop.permute.xlu1 %859 }
 0x129   : > { %v844_v38 = vpop.permute.xlu0 %843  ;;  %v1163_v63 = vsel %vm1135_vm6, %v1130_v51, %v860_v41 }
 0x12a   : > { %v1147_v16 = vsel %vm1135_vm6, %v1114_v55, %v844_v38 }
 0x12c   : > { %v895_v61 = vpop.permute.xlu1 %894 }
 0x12d   : > { %v879_v1 = vpop.permute.xlu0 %878  ;;  %v1194_v12 = vsel %vm1168_vm7, %v1161_v14, %v895_v61 }
 0x12e   : > { %v1178_v47 = vsel %vm1168_vm7, %v1145_v20, %v879_v1 }
 0x130   : > { %v897_v18 = vpop.permute.xlu1 %896 }
 0x131   : > { %v881_v31 = vpop.permute.xlu0 %880  ;;  %v1196_v42 = vsel %vm1168_vm7, %v1163_v63, %v897_v18 }
 0x132   : > { %v1180_v9 = vsel %vm1168_vm7, %v1147_v16, %v881_v31 }
 0x134   : > { %v937_v29 = vpop.permute.xlu1 %936 }
 0x135   : > { %v921_v44 = vpop.permute.xlu0 %920  ;;  %v1227_v39 = vsel %vm1201_vm8, %v1194_v12, %v937_v29 }
 0x136   : > { %v1211_v2 = vsel %vm1201_vm8, %v1178_v47, %v921_v44 }
 0x138   : > { %v939_v24 = vpop.permute.xlu1 %938 }
 0x139   : > { %v923_v36 = vpop.permute.xlu0 %922  ;;  %v1229_v13 = vsel %vm1201_vm8, %v1196_v42, %v939_v24 }
 0x13a   : > { %v1213_v3 = vsel %vm1201_vm8, %v1180_v9, %v923_v36 }
 0x13c   : > { %v992_v19 = vpop.permute.xlu1 %991 }
 0x13d   : > { %v976_v22 = vpop.permute.xlu0 %975  ;;  %v1260_v23 = vsel %vm1234_vm9, %v1227_v39, %v992_v19  ;;  %v3403_v39 = vld [vmem:[#allocation6_spill] sm:$0xff] }
 0x13e   : > { %v1244_v54 = vsel %vm1234_vm9, %v1211_v2, %v976_v22 }
 0x140   : > { %v994_v27 = vpop.permute.xlu1 %993 }
 0x141   : > { %v978_v15 = vpop.permute.xlu0 %977  ;;  %v1262_v37 = vsel %vm1234_vm9, %v1229_v13, %v994_v27 }
 0x142   : > { %v1246_v62 = vsel %vm1234_vm9, %v1213_v3, %v978_v15 }
 0x144   : > { %v1029_v48 = vpop.permute.xlu1 %1028 }
 0x145   : > { %v1293_v40 = vsel %vm1267_vm10, %v1260_v23, %v1029_v48  ;;  %v1013_v34 = vpop.permute.xlu0 %1012 }
 0x146   : > { %2213 = vmatprep.mubr.msk.bf16.mxu1 %vm1333_vm11, %v1293_v40  ;;  %v1277_v30 = vsel %vm1267_vm10, %v1244_v54, %v1013_v34  ;;  %v3404_v54 = vld [vmem:[#allocation7_spill] sm:$0xff] }
 0x147   : > { %2197 = vmatprep.mubr.msk.bf16.mxu0 %vm1333_vm11, %v1277_v30 }
 0x148   : > { %v692_v5 = vpop.permute.xlu1 %691 }
 0x149   : > { %v676_v52 = vpop.permute.xlu0 %675  ;;  %v1066_v57 = vsel %vm1036_vm3, %v3401_v10, %v692_v5 }
 0x14a   : > { %v1050_v14 = vsel %vm1036_vm3, %v3402_v60, %v676_v52 }
 0x14c   : > { %v1031_v35 = vpop.permute.xlu1 %1030 }
 0x14d   : > { %v1295_v4 = vsel %vm1267_vm10, %v1262_v37, %v1031_v35  ;;  %v1015_v7 = vpop.permute.xlu0 %1014 }
 0x14e   : > { %2214 = vmatmul.mubr.msk.bf16.gmra.mrb[8].mxu1 %vm1333_vm11, %v1295_v4  ;;  %v1279_v43 = vsel %vm1267_vm10, %v1246_v62, %v1015_v7 }
 0x14f   : > { %2198 = vmatmul.mubr.msk.bf16.gmra.mrb[8].mxu0 %vm1333_vm11, %v1279_v43 }
 0x150   : > { %v694_v49 = vpop.permute.xlu1 %693 }
 0x151   : > { %v678_v6 = vpop.permute.xlu0 %677  ;;  %v1068_v47 = vsel %vm1036_vm3, %v3403_v39, %v694_v49 }
 0x152   : > { %v1052_v34 = vsel %vm1036_vm3, %v3404_v54, %v678_v6 }
 0x154   : > { %v765_v53 = vpop.permute.xlu1 %764 }
 0x155   : > { %v749_v11 = vpop.permute.xlu0 %748  ;;  %v1099_v27 = vsel %vm1069_vm4, %v1066_v57, %v765_v53  ;;  %v3200_v53 = vld [vmem:[%s3385_s4] ss:$0 sm:$0xff] }
 0x156   : > { %v1083_v15 = vsel %vm1069_vm4, %v1050_v14, %v749_v11 }
 0x158   : > { %v767_v21 = vpop.permute.xlu1 %766 }
 0x159   : > { %v751_v17 = vpop.permute.xlu0 %750  ;;  %v1101_v40 = vsel %vm1069_vm4, %v1068_v47, %v767_v21 }
 0x15a   : > { %v1085_v51 = vsel %vm1069_vm4, %v1052_v34, %v751_v17 }
 0x15c   : > { %v807_v26 = vpop.permute.xlu1 %806 }
 0x15d   : > { %v791_v0 = vpop.permute.xlu0 %790  ;;  %v1132_v56 = vsel %vm1102_vm5, %v1099_v27, %v807_v26 }
 0x15e   : > { %v1116_v23 = vsel %vm1102_vm5, %v1083_v15, %v791_v0 }
 0x160   : > { %v809_v45 = vpop.permute.xlu1 %808 }
 0x161   : > { %v793_v28 = vpop.permute.xlu0 %792  ;;  %v1134_v8 = vsel %vm1102_vm5, %v1101_v40, %v809_v45 }
 0x162   : > { %v1118_v55 = vsel %vm1102_vm5, %v1085_v51, %v793_v28 }
 0x164   : > { %v862_v41 = vpop.permute.xlu1 %861 }
 0x165   : > { %v846_v38 = vpop.permute.xlu0 %845  ;;  %v1165_v20 = vsel %vm1135_vm6, %v1132_v56, %v862_v41 }
 0x166   : > { %v1149_v32 = vsel %vm1135_vm6, %v1116_v23, %v846_v38 }
 0x168   : > { %v864_v61 = vpop.permute.xlu1 %863 }
 0x169   : > { %v848_v1 = vpop.permute.xlu0 %847  ;;  %v1167_v5 = vsel %vm1135_vm6, %v1134_v8, %v864_v61 }
 0x16a   : > { %v1151_v13 = vsel %vm1135_vm6, %v1118_v55, %v848_v1 }
 0x16c   : > { %v899_v18 = vpop.permute.xlu1 %898 }
 0x16d   : > { %v883_v31 = vpop.permute.xlu0 %882  ;;  %v1198_v48 = vsel %vm1168_vm7, %v1165_v20, %v899_v18 }
 0x16e   : > { %v1182_v30 = vsel %vm1168_vm7, %v1149_v32, %v883_v31 }
 0x170   : > { %v901_v29 = vpop.permute.xlu1 %900 }
 0x171   : > { %v885_v44 = vpop.permute.xlu0 %884  ;;  %v1200_v42 = vsel %vm1168_vm7, %v1167_v5, %v901_v29 }
 0x172   : > { %v1184_v35 = vsel %vm1168_vm7, %v1151_v13, %v885_v44 }
 0x174   : > { %v941_v24 = vpop.permute.xlu1 %940 }
 0x175   : > { %v925_v36 = vpop.permute.xlu0 %924  ;;  %v1231_v33 = vsel %vm1201_vm8, %v1198_v48, %v941_v24 }
 0x176   : > { %v1215_v58 = vsel %vm1201_vm8, %v1182_v30, %v925_v36 }
 0x178   : > { %v943_v19 = vpop.permute.xlu1 %942 }
 0x179   : > { %v927_v25 = vpop.permute.xlu0 %926  ;;  %v1233_v9 = vsel %vm1201_vm8, %v1200_v42, %v943_v19 }
 0x17a   : > { %v1217_v62 = vsel %vm1201_vm8, %v1184_v35, %v927_v25 }
 0x17c   : > { %v996_v22 = vpop.permute.xlu1 %995 }
 0x17d   : > { %v980_v46 = vpop.permute.xlu0 %979  ;;  %v1264_v59 = vsel %vm1234_vm9, %v1231_v33, %v996_v22 }
 0x17e   : > { %v1248_v52 = vsel %vm1234_vm9, %v1215_v58, %v980_v46 }
 0x180   : > { %v998_v12 = vpop.permute.xlu1 %997 }
 0x181   : > { %v982_v2 = vpop.permute.xlu0 %981  ;;  %v1266_v3 = vsel %vm1234_vm9, %v1233_v9, %v998_v12 }
 0x182   : > { %v1250_v43 = vsel %vm1234_vm9, %v1217_v62, %v982_v2 }
 0x184   : > { %v1033_v50 = vpop.permute.xlu1 %1032 }
 0x185   : > { %v1297_v63 = vsel %vm1267_vm10, %v1264_v59, %v1033_v50  ;;  %v1017_v16 = vpop.permute.xlu0 %1016 }
 0x186   : > { %2217 = vmatprep.mubr.msk.bf16.mxu1 %vm1333_vm11, %v1297_v63  ;;  %v1281_v37 = vsel %vm1267_vm10, %v1248_v52, %v1017_v16 }
 0x187   : > { %2201 = vmatprep.mubr.msk.bf16.mxu0 %vm1333_vm11, %v1281_v37 }
 0x188   : > { %v1035_v4 = vpop.permute.xlu1 %1034 }
 0x189   : > { %v1299_v7 = vsel %vm1267_vm10, %v1266_v3, %v1035_v4  ;;  %v1019_v49 = vpop.permute.xlu0 %1018 }
 0x18a   : > { %2218 = vmatmul.mubr.msk.bf16.gmra.mrb[12].mxu1 %vm1333_vm11, %v1299_v7  ;;  %v1283_v6 = vsel %vm1267_vm10, %v1250_v43, %v1019_v49 }
 0x18b   : > { %2202 = vmatmul.mubr.msk.bf16.gmra.mrb[12].mxu0 %vm1333_vm11, %v1283_v6 }
 0x1a1   : > { %v2207_v11 = vpop.f32.mrb[0].mxu1 }
 0x1a2   : > { %v1477_v21 = vadd.f32 %v2207_v11, %v3200_v53  ;;  %v1468_v17 = vpop.f32.mrb[1].mxu1  ;;  %v2191_v26 = vpop.f32.mrb[0].mxu0 }
 0x1a3   : > { %v1469_v0 = vadd.f32 %v3200_v53, %v1468_v17  ;;  %v2208_v45 = vpop.f32.mrb[2].mxu1  ;;  %v1413_v28 = vadd.f32 %v2191_v26, %v3200_v53  ;;  %v1404_v41 = vpop.f32.mrb[1].mxu0 }
 0x1a4   : > { %v1480_v38 = vadd.f32 %v2208_v45, %v3200_v53  ;;  %v1471_v61 = vpop.f32.mrb[3].mxu1  ;;  %v1405_v1 = vadd.f32 %v3200_v53, %v1404_v41  ;;  %v2192_v18 = vpop.f32.mrb[2].mxu0  ;;  %v1549_v29 = vmax.f32 %v1477_v21, 0.0 }
 0x1a5   : > { %v1472_v31 = vadd.f32 %v3200_v53, %v1471_v61  ;;  %v1416_v44 = vadd.f32 %v2192_v18, %v3200_v53  ;;  %v1407_v36 = vpop.f32.mrb[3].mxu0  ;;  %v1547_v19 = vmax.f32 %v1469_v0, 0.0  ;;  %v1533_v10 = vmax.f32 %v1413_v28, 0.0 }
 0x1a6   : > { %v1550_v24 = vmax.f32 %v1480_v38, 0.0  ;;  %v1408_v25 = vadd.f32 %v3200_v53, %v1407_v36  ;;  %v1531_v27 = vmax.f32 %v1405_v1, 0.0 }
 0x1a7   : > { %v1548_v22 = vmax.f32 %v1472_v31, 0.0  ;;  %v1534_v57 = vmax.f32 %v1416_v44, 0.0 }
 0x1a8   : > { %v1572_v46 = vpack.c.bf16 %v1550_v24, %v1549_v29  ;;  %v1532_v60 = vmax.f32 %v1408_v25, 0.0 }
 0x1a9   : > { %v1571_v14 = vpack.c.bf16 %v1548_v22, %v1547_v19  ;;  %v1564_v56 = vpack.c.bf16 %v1534_v57, %v1533_v10 }
 0x1aa   : > { %v1648_v12 = vshrl.u32 %v1572_v46, 16  ;;  %v1563_v20 = vpack.c.bf16 %v1532_v60, %v1531_v27  ;;  %v1651_v48 = vshll.u32 %v1572_v46, 16 }
 0x1ab   : > { %v1641_v39 = vshrl.u32 %v1571_v14, 16  ;;  %v1588_v47 = vshrl.u32 %v1564_v56, 16  ;;  %v1644_v32 = vshll.u32 %v1571_v14, 16  ;;  %v1591_v54 = vshll.u32 %v1564_v56, 16 }
 0x1ac   : > { %v1650_v23 = vrot.slane %v1648_v12, 7  ;;  %v1581_v2 = vshrl.u32 %v1563_v20, 16  ;;  %v1584_v50 = vshll.u32 %v1563_v20, 16 }
 0x1ad   : > { %v1643_v40 = vrot.slane %v1641_v39, 7  ;;  %v1590_v33 = vrot.slane %v1588_v47, 7 }
 0x1ae   : > { %v1653_v34 = vor.u32 %v1651_v48, %v1650_v23  ;;  %v1730_v8 = vsel %vm3211_vm14, %v1650_v23, 0  ;;  %v1583_v59 = vrot.slane %v1581_v2, 7 }
 0x1af   : > { %v2140_v30 = vcombine.low %v1730_v8, %v1730_v8  ;;  %v1646_v51 = vor.u32 %v1644_v32, %v1643_v40  ;;  %v1593_v5 = vor.u32 %v1591_v54, %v1590_v33  ;;  %v1726_v58 = vsel %vm3211_vm14, %v1590_v33, 0 }
 0x1b0   : > { %v1654_v63 = vsel %vm1579_vm12, %v1643_v40, %v1653_v34  ;;  %v2120_v55 = vcombine.low %v1726_v58, %v1726_v58  ;;  %v1586_v42 = vor.u32 %v1584_v50, %v1583_v59 }
 0x1b1   : > { %1896 = vst.msk [vmem:[%s3220_s16 + $0x60] sm:$0x1] %vm1875_vm15, %v2140_v30  ;;  %v1722_v52 = vsel %vm3211_vm14, 0, %v1646_v51  ;;  %v2138_v16 = vcombine.low %v1654_v63, %v1654_v63  ;;  %v1594_v13 = vsel %vm1579_vm12, %v1583_v59, %v1593_v5  ;;  %v2139_v35 = vcombine.high %v1654_v63, %v1654_v63 }
 0x1b2   : > { %v2136_v9 = vcombine.low %v1722_v52, %v1722_v52  ;;  %v2137_v37 = vcombine.high %v1722_v52, %v1722_v52  ;;  %1876 = vst.msk [vmem:[%s3220_s16 + $0x10] sm:$0x1] %vm1875_vm15, %v2120_v55  ;;  %v1718_v3 = vsel %vm3211_vm14, 0, %v1586_v42  ;;  %v2118_v4 = vcombine.low %v1594_v13, %v1594_v13 }
 0x1b3   : > { %v2119_v62 = vcombine.high %v1594_v13, %v1594_v13  ;;  %1894 = vst.msk [vmem:[%s3220_s16 + $0x58] sm:$0xf] %vm1870_vm0, %v2138_v16  ;;  %v2116_v7 = vcombine.low %v1718_v3, %v1718_v3  ;;  %v2117_v43 = vcombine.high %v1718_v3, %v1718_v3  ;;  %1895 = vst.msk [vmem:[%s3220_s16 + $0x5c] sm:$0xf] %vm1870_vm0, %v2139_v35 }
 0x1b4   : > { %1892 = vst.msk [vmem:[%s3220_s16 + $0x50] sm:$0xf] %vm1870_vm0, %v2136_v9  ;;  %1893 = vst.msk [vmem:[%s3220_s16 + $0x54] sm:$0xf] %vm1870_vm0, %v2137_v37 }
 0x1b5   : > { %1873 = vst.msk [vmem:[%s3220_s16 + $0x8] sm:$0xf] %vm1870_vm0, %v2118_v4  ;;  %1874 = vst.msk [vmem:[%s3220_s16 + $0xc] sm:$0xf] %vm1870_vm0, %v2119_v62 }
 0x1b6   : > { %1871 = vst.msk [vmem:[%s3220_s16] sm:$0xf] %vm1870_vm0, %v2116_v7  ;;  %1872 = vst.msk [vmem:[%s3220_s16 + $0x4] sm:$0xf] %vm1870_vm0, %v2117_v43 }
 0x1e1   : > { %v2211_v49 = vpop.f32.mrb[4].mxu1 }
 0x1e2   : > { %v1493_v6 = vadd.f32 %v2211_v49, %v3200_v53  ;;  %v1484_v11 = vpop.f32.mrb[5].mxu1  ;;  %v2195_v21 = vpop.f32.mrb[4].mxu0 }
 0x1e3   : > { %v1485_v17 = vadd.f32 %v3200_v53, %v1484_v11  ;;  %v2212_v26 = vpop.f32.mrb[6].mxu1  ;;  %v1429_v0 = vadd.f32 %v2195_v21, %v3200_v53  ;;  %v1420_v45 = vpop.f32.mrb[5].mxu0 }
 0x1e4   : > { %v1496_v28 = vadd.f32 %v2212_v26, %v3200_v53  ;;  %v1487_v41 = vpop.f32.mrb[7].mxu1  ;;  %v1421_v38 = vadd.f32 %v3200_v53, %v1420_v45  ;;  %v2196_v61 = vpop.f32.mrb[6].mxu0  ;;  %v1553_v18 = vmax.f32 %v1493_v6, 0.0 }
 0x1e5   : > { %v1488_v1 = vadd.f32 %v3200_v53, %v1487_v41  ;;  %v1432_v31 = vadd.f32 %v2196_v61, %v3200_v53  ;;  %v1423_v44 = vpop.f32.mrb[7].mxu0  ;;  %v1551_v24 = vmax.f32 %v1485_v17, 0.0  ;;  %v1537_v25 = vmax.f32 %v1429_v0, 0.0 }
 0x1e6   : > { %v1554_v29 = vmax.f32 %v1496_v28, 0.0  ;;  %v1424_v36 = vadd.f32 %v3200_v53, %v1423_v44  ;;  %v1535_v57 = vmax.f32 %v1421_v38, 0.0 }
 0x1e7   : > { %v1552_v19 = vmax.f32 %v1488_v1, 0.0  ;;  %v1538_v22 = vmax.f32 %v1432_v31, 0.0 }
 0x1e8   : > { %v1574_v10 = vpack.c.bf16 %v1554_v29, %v1553_v18  ;;  %v1536_v46 = vmax.f32 %v1424_v36, 0.0 }
 0x1e9   : > { %v1573_v27 = vpack.c.bf16 %v1552_v19, %v1551_v24  ;;  %v1566_v60 = vpack.c.bf16 %v1538_v22, %v1537_v25 }
 0x1ea   : > { %v1663_v14 = vshrl.u32 %v1574_v10, 16  ;;  %v1565_v56 = vpack.c.bf16 %v1536_v46, %v1535_v57  ;;  %v1666_v47 = vshll.u32 %v1574_v10, 16 }
 0x1eb   : > { %v1656_v12 = vshrl.u32 %v1573_v27, 16  ;;  %v1603_v20 = vshrl.u32 %v1566_v60, 16  ;;  %v1659_v2 = vshll.u32 %v1573_v27, 16  ;;  %v1606_v32 = vshll.u32 %v1566_v60, 16 }
 0x1ec   : > { %v1665_v39 = vrot.slane %v1663_v14, 7  ;;  %v1596_v23 = vshrl.u32 %v1565_v56, 16  ;;  %v1599_v30 = vshll.u32 %v1565_v56, 16 }
 0x1ed   : > { %v1658_v48 = vrot.slane %v1656_v12, 7  ;;  %v1605_v40 = vrot.slane %v1603_v20, 7 }
 0x1ee   : > { %v1668_v33 = vor.u32 %v1666_v47, %v1665_v39  ;;  %v1731_v54 = vsel %vm3211_vm14, %v1665_v39, 0  ;;  %v1598_v8 = vrot.slane %v1596_v23, 7 }
 0x1ef   : > { %v2145_v34 = vcombine.low %v1731_v54, %v1731_v54  ;;  %v1661_v59 = vor.u32 %v1659_v2, %v1658_v48  ;;  %v1608_v50 = vor.u32 %v1606_v32, %v1605_v40  ;;  %v1727_v51 = vsel %vm3211_vm14, %v1605_v40, 0 }
 0x1f0   : > { %v1669_v5 = vsel %vm1579_vm12, %v1658_v48, %v1668_v33  ;;  %v2125_v58 = vcombine.low %v1727_v51, %v1727_v51  ;;  %v1601_v63 = vor.u32 %v1599_v30, %v1598_v8 }
 0x1f1   : > { %1901 = vst.msk [vmem:[%s3220_s16 + $0x74] sm:$0x1] %vm1875_vm15, %v2145_v34  ;;  %v1723_v55 = vsel %vm3211_vm14, 0, %v1661_v59  ;;  %v2143_v42 = vcombine.low %v1669_v5, %v1669_v5  ;;  %v1609_v52 = vsel %vm1579_vm12, %v1598_v8, %v1608_v50  ;;  %v2144_v9 = vcombine.high %v1669_v5, %v1669_v5 }
 0x1f2   : > { %v2141_v16 = vcombine.low %v1723_v55, %v1723_v55  ;;  %v2142_v13 = vcombine.high %v1723_v55, %v1723_v55  ;;  %1881 = vst.msk [vmem:[%s3220_s16 + $0x24] sm:$0x1] %vm1875_vm15, %v2125_v58  ;;  %v1719_v37 = vsel %vm3211_vm14, 0, %v1601_v63  ;;  %v2123_v35 = vcombine.low %v1609_v52, %v1609_v52 }
 0x1f3   : > { %v2124_v3 = vcombine.high %v1609_v52, %v1609_v52  ;;  %1899 = vst.msk [vmem:[%s3220_s16 + $0x6c] sm:$0xf] %vm1870_vm0, %v2143_v42  ;;  %v2121_v4 = vcombine.low %v1719_v37, %v1719_v37  ;;  %v2122_v62 = vcombine.high %v1719_v37, %v1719_v37  ;;  %1900 = vst.msk [vmem:[%s3220_s16 + $0x70] sm:$0xf] %vm1870_vm0, %v2144_v9 }
 0x1f4   : > { %1897 = vst.msk [vmem:[%s3220_s16 + $0x64] sm:$0xf] %vm1870_vm0, %v2141_v16  ;;  %1898 = vst.msk [vmem:[%s3220_s16 + $0x68] sm:$0xf] %vm1870_vm0, %v2142_v13 }
 0x1f5   : > { %1879 = vst.msk [vmem:[%s3220_s16 + $0x1c] sm:$0xf] %vm1870_vm0, %v2123_v35  ;;  %1880 = vst.msk [vmem:[%s3220_s16 + $0x20] sm:$0xf] %vm1870_vm0, %v2124_v3 }
 0x1f6   : > { %1877 = vst.msk [vmem:[%s3220_s16 + $0x14] sm:$0xf] %vm1870_vm0, %v2121_v4  ;;  %1878 = vst.msk [vmem:[%s3220_s16 + $0x18] sm:$0xf] %vm1870_vm0, %v2122_v62 }
 0x221   : > { %v2215_v7 = vpop.f32.mrb[8].mxu1 }
 0x222   : > { %v1509_v43 = vadd.f32 %v2215_v7, %v3200_v53  ;;  %v1500_v49 = vpop.f32.mrb[9].mxu1  ;;  %v2199_v6 = vpop.f32.mrb[8].mxu0 }
 0x223   : > { %v1501_v11 = vadd.f32 %v3200_v53, %v1500_v49  ;;  %v2216_v21 = vpop.f32.mrb[10].mxu1  ;;  %v1445_v17 = vadd.f32 %v2199_v6, %v3200_v53  ;;  %v1436_v26 = vpop.f32.mrb[9].mxu0 }
 0x224   : > { %v1512_v0 = vadd.f32 %v2216_v21, %v3200_v53  ;;  %v1503_v45 = vpop.f32.mrb[11].mxu1  ;;  %v1437_v28 = vadd.f32 %v3200_v53, %v1436_v26  ;;  %v2200_v41 = vpop.f32.mrb[10].mxu0  ;;  %v1557_v61 = vmax.f32 %v1509_v43, 0.0 }
 0x225   : > { %v1504_v38 = vadd.f32 %v3200_v53, %v1503_v45  ;;  %v1448_v1 = vadd.f32 %v2200_v41, %v3200_v53  ;;  %v1439_v31 = vpop.f32.mrb[11].mxu0  ;;  %v1555_v29 = vmax.f32 %v1501_v11, 0.0  ;;  %v1541_v36 = vmax.f32 %v1445_v17, 0.0 }
 0x226   : > { %v1558_v18 = vmax.f32 %v1512_v0, 0.0  ;;  %v1440_v44 = vadd.f32 %v3200_v53, %v1439_v31  ;;  %v1539_v22 = vmax.f32 %v1437_v28, 0.0 }
 0x227   : > { %v1556_v24 = vmax.f32 %v1504_v38, 0.0  ;;  %v1542_v19 = vmax.f32 %v1448_v1, 0.0 }
 0x228   : > { %v1576_v25 = vpack.c.bf16 %v1558_v18, %v1557_v61  ;;  %v1540_v10 = vmax.f32 %v1440_v44, 0.0 }
 0x229   : > { %v1575_v57 = vpack.c.bf16 %v1556_v24, %v1555_v29  ;;  %v1568_v46 = vpack.c.bf16 %v1542_v19, %v1541_v36 }
 0x22a   : > { %v1678_v27 = vshrl.u32 %v1576_v25, 16  ;;  %v1567_v60 = vpack.c.bf16 %v1540_v10, %v1539_v22  ;;  %v1681_v20 = vshll.u32 %v1576_v25, 16 }
 0x22b   : > { %v1671_v14 = vshrl.u32 %v1575_v57, 16  ;;  %v1618_v56 = vshrl.u32 %v1568_v46, 16  ;;  %v1674_v23 = vshll.u32 %v1575_v57, 16  ;;  %v1621_v2 = vshll.u32 %v1568_v46, 16 }
 0x22c   : > { %v1680_v12 = vrot.slane %v1678_v27, 7  ;;  %v1611_v39 = vshrl.u32 %v1567_v60, 16  ;;  %v1614_v34 = vshll.u32 %v1567_v60, 16 }
 0x22d   : > { %v1673_v47 = vrot.slane %v1671_v14, 7  ;;  %v1620_v48 = vrot.slane %v1618_v56, 7 }
 0x22e   : > { %v1683_v40 = vor.u32 %v1681_v20, %v1680_v12  ;;  %v1732_v32 = vsel %vm3211_vm14, %v1680_v12, 0  ;;  %v1613_v54 = vrot.slane %v1611_v39, 7 }
 0x22f   : > { %v2150_v33 = vcombine.low %v1732_v32, %v1732_v32  ;;  %v1676_v8 = vor.u32 %v1674_v23, %v1673_v47  ;;  %v1623_v30 = vor.u32 %v1621_v2, %v1620_v48  ;;  %v1728_v59 = vsel %vm3211_vm14, %v1620_v48, 0 }
 0x230   : > { %v1684_v50 = vsel %vm1579_vm12, %v1673_v47, %v1683_v40  ;;  %v2130_v51 = vcombine.low %v1728_v59, %v1728_v59  ;;  %v1616_v5 = vor.u32 %v1614_v34, %v1613_v54 }
 0x231   : > { %1906 = vst.msk [vmem:[%s3220_s16 + $0x88] sm:$0x1] %vm1875_vm15, %v2150_v33  ;;  %v1724_v58 = vsel %vm3211_vm14, 0, %v1676_v8  ;;  %v2148_v63 = vcombine.low %v1684_v50, %v1684_v50  ;;  %v1624_v55 = vsel %vm1579_vm12, %v1613_v54, %v1623_v30  ;;  %v2149_v16 = vcombine.high %v1684_v50, %v1684_v50 }
 0x232   : > { %v2146_v42 = vcombine.low %v1724_v58, %v1724_v58  ;;  %v2147_v52 = vcombine.high %v1724_v58, %v1724_v58  ;;  %1886 = vst.msk [vmem:[%s3220_s16 + $0x38] sm:$0x1] %vm1875_vm15, %v2130_v51  ;;  %v1720_v13 = vsel %vm3211_vm14, 0, %v1616_v5  ;;  %v2128_v9 = vcombine.low %v1624_v55, %v1624_v55 }
 0x233   : > { %v2129_v37 = vcombine.high %v1624_v55, %v1624_v55  ;;  %1904 = vst.msk [vmem:[%s3220_s16 + $0x80] sm:$0xf] %vm1870_vm0, %v2148_v63  ;;  %v2126_v35 = vcombine.low %v1720_v13, %v1720_v13  ;;  %v2127_v3 = vcombine.high %v1720_v13, %v1720_v13  ;;  %1905 = vst.msk [vmem:[%s3220_s16 + $0x84] sm:$0xf] %vm1870_vm0, %v2149_v16 }
 0x234   : > { %1902 = vst.msk [vmem:[%s3220_s16 + $0x78] sm:$0xf] %vm1870_vm0, %v2146_v42  ;;  %1903 = vst.msk [vmem:[%s3220_s16 + $0x7c] sm:$0xf] %vm1870_vm0, %v2147_v52 }
 0x235   : > { %1884 = vst.msk [vmem:[%s3220_s16 + $0x30] sm:$0xf] %vm1870_vm0, %v2128_v9  ;;  %1885 = vst.msk [vmem:[%s3220_s16 + $0x34] sm:$0xf] %vm1870_vm0, %v2129_v37 }
 0x236   : > { %1882 = vst.msk [vmem:[%s3220_s16 + $0x28] sm:$0xf] %vm1870_vm0, %v2126_v35  ;;  %1883 = vst.msk [vmem:[%s3220_s16 + $0x2c] sm:$0xf] %vm1870_vm0, %v2127_v3 }
 0x25d   : > { %v2219_v4 = vpop.f32.mrb[12].mxu1 }
 0x25e   : > { %v1525_v62 = vadd.f32 %v2219_v4, %v3200_v53  ;;  %v1516_v7 = vpop.f32.mrb[13].mxu1  ;;  %v2203_v43 = vpop.f32.mrb[12].mxu0 }
 0x25f   : > { %v1517_v49 = vadd.f32 %v3200_v53, %v1516_v7  ;;  %v2220_v6 = vpop.f32.mrb[14].mxu1  ;;  %v1461_v11 = vadd.f32 %v2203_v43, %v3200_v53  ;;  %v1452_v21 = vpop.f32.mrb[13].mxu0 }
 0x260   : > { %v1528_v17 = vadd.f32 %v2220_v6, %v3200_v53  ;;  %v1519_v26 = vpop.f32.mrb[15].mxu1  ;;  %v1453_v0 = vadd.f32 %v3200_v53, %v1452_v21  ;;  %v2204_v45 = vpop.f32.mrb[14].mxu0  ;;  %v1561_v41 = vmax.f32 %v1525_v62, 0.0 }
 0x261   : > { %v1520_v28 = vadd.f32 %v3200_v53, %v1519_v26  ;;  %v1464_v38 = vadd.f32 %v2204_v45, %v3200_v53  ;;  %v1455_v1 = vpop.f32.mrb[15].mxu0  ;;  %v1559_v18 = vmax.f32 %v1517_v49, 0.0  ;;  %v1545_v44 = vmax.f32 %v1461_v11, 0.0 }
 0x262   : > { %v1562_v61 = vmax.f32 %v1528_v17, 0.0  ;;  %v1456_v31 = vadd.f32 %v3200_v53, %v1455_v1  ;;  %v1543_v19 = vmax.f32 %v1453_v0, 0.0 }
 0x263   : > { %v1560_v29 = vmax.f32 %v1520_v28, 0.0  ;;  %v1546_v24 = vmax.f32 %v1464_v38, 0.0 }
 0x264   : > { %v1578_v36 = vpack.c.bf16 %v1562_v61, %v1561_v41  ;;  %v1544_v25 = vmax.f32 %v1456_v31, 0.0 }
 0x265   : > { %v1577_v22 = vpack.c.bf16 %v1560_v29, %v1559_v18  ;;  %v1570_v10 = vpack.c.bf16 %v1546_v24, %v1545_v44 }
 0x266   : > { %v1693_v57 = vshrl.u32 %v1578_v36, 16  ;;  %v1569_v46 = vpack.c.bf16 %v1544_v25, %v1543_v19  ;;  %v1696_v56 = vshll.u32 %v1578_v36, 16 }
 0x267   : > { %v1686_v27 = vshrl.u32 %v1577_v22, 16  ;;  %v1633_v60 = vshrl.u32 %v1570_v10, 16  ;;  %v1689_v39 = vshll.u32 %v1577_v22, 16  ;;  %v1636_v53 = vshll.u32 %v1570_v10, 16 }
 0x268   : > { %v1695_v14 = vrot.slane %v1693_v57, 7  ;;  %v1626_v12 = vshrl.u32 %v1569_v46, 16  ;;  %v1629_v32 = vshll.u32 %v1569_v46, 16 }
 0x269   : > { %v1688_v20 = vrot.slane %v1686_v27, 7  ;;  %v1635_v47 = vrot.slane %v1633_v60, 7 }
 0x26a   : > { %v1698_v23 = vor.u32 %v1696_v56, %v1695_v14  ;;  %v1733_v48 = vsel %vm3211_vm14, %v1695_v14, 0  ;;  %v1628_v40 = vrot.slane %v1626_v12, 7 }
 0x26b   : > { %v2155_v2 = vcombine.low %v1733_v48, %v1733_v48  ;;  %v1691_v33 = vor.u32 %v1689_v39, %v1688_v20  ;;  %v1638_v54 = vor.u32 %v1636_v53, %v1635_v47  ;;  %v1729_v34 = vsel %vm3211_vm14, %v1635_v47, 0 }
 0x26c   : > { %v1699_v8 = vsel %vm1579_vm12, %v1688_v20, %v1698_v23  ;;  %v2135_v30 = vcombine.low %v1729_v34, %v1729_v34  ;;  %v1631_v59 = vor.u32 %v1629_v32, %v1628_v40 }
 0x26d   : > { %1911 = vst.msk [vmem:[%s3220_s16 + $0x9c] sm:$0x1] %vm1875_vm15, %v2155_v2  ;;  %v1725_v50 = vsel %vm3211_vm14, 0, %v1691_v33  ;;  %v2153_v51 = vcombine.low %v1699_v8, %v1699_v8  ;;  %v1639_v5 = vsel %vm1579_vm12, %v1628_v40, %v1638_v54  ;;  %v2154_v55 = vcombine.high %v1699_v8, %v1699_v8 }
 0x26e   : > { %v2151_v58 = vcombine.low %v1725_v50, %v1725_v50  ;;  %v2152_v63 = vcombine.high %v1725_v50, %v1725_v50  ;;  %1891 = vst.msk [vmem:[%s3220_s16 + $0x4c] sm:$0x1] %vm1875_vm15, %v2135_v30  ;;  %v1721_v42 = vsel %vm3211_vm14, 0, %v1631_v59  ;;  %v2133_v52 = vcombine.low %v1639_v5, %v1639_v5 }
 0x26f   : > { %v2134_v16 = vcombine.high %v1639_v5, %v1639_v5  ;;  %1909 = vst.msk [vmem:[%s3220_s16 + $0x94] sm:$0xf] %vm1870_vm0, %v2153_v51  ;;  %v2131_v13 = vcombine.low %v1721_v42, %v1721_v42  ;;  %v2132_v9 = vcombine.high %v1721_v42, %v1721_v42  ;;  %1910 = vst.msk [vmem:[%s3220_s16 + $0x98] sm:$0xf] %vm1870_vm0, %v2154_v55 }
 0x270   : > { %1907 = vst.msk [vmem:[%s3220_s16 + $0x8c] sm:$0xf] %vm1870_vm0, %v2151_v58  ;;  %1908 = vst.msk [vmem:[%s3220_s16 + $0x90] sm:$0xf] %vm1870_vm0, %v2152_v63 }
 0x271   : > { %1889 = vst.msk [vmem:[%s3220_s16 + $0x44] sm:$0xf] %vm1870_vm0, %v2133_v52  ;;  %1890 = vst.msk [vmem:[%s3220_s16 + $0x48] sm:$0xf] %vm1870_vm0, %v2134_v16 }
 0x272   : > { %1887 = vst.msk [vmem:[%s3220_s16 + $0x3c] sm:$0xf] %vm1870_vm0, %v2131_v13  ;;  %1888 = vst.msk [vmem:[%s3220_s16 + $0x40] sm:$0xf] %vm1870_vm0, %v2132_v9 }
 0x273 PF: > { %s15_s22 = sadd.s32 1, %s2360_s22   ;;  %s3407_s18 = smov %s2352_s20 }
 0x274   : > { %p12_p8 = scmp.ge.s32.totalorder %s15_s22, 10   ;;  %s3408_s19 = smov %s2356_s21 }
 0x275   : > { %s3409_s20 = smov %s3412_s23  ;;  %s3410_s21 = smov %s3416_s24 }
 0x276   :  { %14 = sbr.rel (!%p12_p8) target bundleno = 3 (0x3), region = 76 }

// kernel: polarization_forward.6
= control target key start
LH: loop header
LB: loop body
LE: loop exit
PB: predicated region body
PF: predicated region fallthrough
CT: control target
= control target key end

     0   :  { %s3017_s18 = smov 0   ;;  %s3019_s19 = smov 0   ;;  %s4025_s0 = inlined_call_operand.vmem [shape: bf16[2,32,34,64], index: 0, kind: input, shape index: {}]   ;;  %s4026_s1 = inlined_call_operand.vmem [shape: bf16[2,4,34,64], index: 1, kind: input, shape index: {}]   ;;  %s4027_s2 = inlined_call_operand.vmem [shape: bf16[2,4,34,64], index: 2, kind: input, shape index: {}]   ;;  %s4028_s3 = inlined_call_operand.vmem [shape: bf16[576,64], index: 3, kind: input, shape index: {}]   ;;  %s4029_s4 = inlined_call_operand.vmem [shape: f32[1,64], index: 4, kind: input, shape index: {}]   ;;  %s4030_s5 = inlined_call_operand.vmem [shape: bf16[2,32,34,64], index: 5, kind: output, shape index: {}]  }
   0x1   :  { %s3021_s20 = smov 0   ;;  %s3023_s21 = smov 0  }
   0x2   :  { %s3025_s22 = smov 0  }
   0x3 LB: > { %s24_s23 = sadd.s32 1, %s2976_s20  ;;  %s27_s24 = sadd.s32 1, %s2980_s21  ;;  %s2984_s22 = sphi %s3025_s22, %s15_s22   ;;  %s2980_s21 = sphi %s3023_s21, %s4046_s21   ;;  %s2976_s20 = sphi %s3021_s20, %s4045_s20   ;;  %s2972_s19 = sphi %s3019_s19, %s4044_s19   ;;  %s2968_s18 = sphi %s3017_s18, %s4043_s18  }
   0x4   : > { %p25_p0 = scmp.ge.s32.totalorder %s24_s23, 4  ;;  %p2403_p1 = scmp.ge.s32.totalorder %s2984_s22, 1 }
   0x5   : > { %p241_p2 = scmp.lt.s32.totalorder %s2984_s22, 9 }
   0x6   : > { %s4048_s23 = smov (%p25_p0, %s24_s23), 0  ;;  %s4050_s24 = smov (!%p25_p0, %s27_s24), %s2980_s21 }
   0x7   : > { %p242_p3 = pnand %p2403_p1, %p241_p2  ;;  %p29_p4 = scmp.ge.s32.totalorder %s4050_s24, 2 }
   0x9   : > { %s4052_s24 = smov (%p29_p4, %s4050_s24), 0  ;;  %245 = sbr.rel (%p242_p3) target bundleno = 537 (0x219), region = 40 }
  0x10   : > { %s2404_s25 = sshll.u32 %s2968_s18, 3  ;;  %p298_p5 = scmp.lt.s32.totalorder %s2972_s19, 1  ;;  %v2905_v0 = vld [vmem:[%s4028_s3 + $0x40] sm:$0xff]   ;;  %v2908_v2 = vld [vmem:[%s4028_s3 + $0x48] sm:$0xff]   ;;  %v2910_v4 = vld [vmem:[%s4028_s3 + $0x50] sm:$0xff]   ;;  %vm758_vm1 = vcmask 1046528  }
  0x11   : > { %p300_p6 = scmp.lt.s32.totalorder %s2404_s25, 31  ;;  %2819 = vmatprep.subr.bf16.mxu1 %v2905_v0  ;;  %v2906_v1 = vld [vmem:[%s4028_s3] sm:$0xff]   ;;  %2535 = vmatprep.subr.bf16.mxu0 %v2905_v0  ;;  %p310_p7 = scmp.lt.s32.totalorder %s2968_s18, 3  ;;  %v2909_v3 = vld [vmem:[%s4028_s3 + $0x8] sm:$0xff]   ;;  %v2911_v5 = vld [vmem:[%s4028_s3 + $0x10] sm:$0xff]   ;;  %vm947_vm2 = vcmask 523264  }
  0x12   : > { %s4054_s19 = smov (!%p298_p5, %s2972_s19), 1  ;;  %2827 = vmatpush3.bf16.msra.mxu1 %v2906_v1  ;;  %2536 = vmatpush3.bf16.msra.mxu0 %v2906_v1  ;;  %v2912_v6 = vld [vmem:[%s4028_s3 + $0x58] sm:$0xff]   ;;  %vm565_vm0 = vsmask.f32 7424  ;;  %vm1925_vm3 = vsmask.f32 256 }
  0x13   : > { %s4056_s25 = smov (!%p300_p6, %s2404_s25), 31  ;;  %s2836_s7 = smul.u32 160, %s4054_s19  ;;  %2820 = vmatprep.subr.bf16.mxu1 %v2908_v2  ;;  %2537 = vmatprep.subr.bf16.mxu0 %v2908_v2  ;;  %v2913_v8 = vld [vmem:[%s4028_s3 + $0x18] sm:$0xff]   ;;  %vm2062_vm4 = vcmask 1040384   ;;  %vm2221_vm5 = vcmask 516096   ;;  %vm2216_vm6 = vcmask 519168  }
  0x14   : > { %s2835_s8 = smul.u32 5, %s4056_s25  ;;  %s4058_s18 = smov (!%p310_p7, %s2968_s18), 3  ;;  %vm3818_vm7 = vmand %vm2062_vm4, %vm1925_vm3 }
  0x15   : > { %s2838_s14 = smul.u32 20, %s4054_s19 }
  0x16   : > { %s3070_s13 = sadd.s32 %s2836_s7, %s2835_s8  ;;  %s2837_s16 = smul.u32 5, %s4058_s18  ;;  %2828 = vmatpush3.bf16.msra.mxu1 %v2909_v3  ;;  %2538 = vmatpush3.bf16.msra.mxu0 %v2909_v3 }
  0x17   : > { %s2405_s15 = sshll.u32 %s3070_s13, 2  ;;  %2821 = vmatprep.subr.bf16.mxu1 %v2910_v4  ;;  %2539 = vmatprep.subr.bf16.mxu0 %v2910_v4  ;;  %s2986_s8 = smov 64  }
  0x18   : > { %s3085_s30 = scalar_lea.vmem %s4025_s0, %s2405_s15  ;;  %s3090_s18 = sadd.s32 %s2838_s14, %s2837_s16 }
  0x19   : > { %v3088_v7 = vld [vmem:[%s3085_s30 + $0x78] sm:$0xff]   ;;  %v3096_v9 = vld [vmem:[%s3085_s30] sm:$0xff]   ;;  %s2406_s7 = sshll.u32 %s3090_s18, 2  ;;  %v3114_v11 = vld [vmem:[%s3085_s30 + $0x6c] sm:$0xff]   ;;  %s3834_s19 = scalar_lea.vmem %s4030_s5, %s2405_s15 }
  0x1a   : > { %833 = vrot.lane.b32.xlu0 %v3088_v7, %s2986_s8  ;;  %s3106_s11 = scalar_lea.vmem %s4026_s1, %s2406_s7  ;;  %2829 = vmatpush3.bf16.msra.mxu1 %v2911_v5  ;;  %v3111_v10 = vld [vmem:[%s3085_s30 + $0x64] sm:$0xff]   ;;  %v694_v14 = vshll.u32 %v3114_v11, 16  ;;  %v698_v17 = vshrl.u32 %v3114_v11, 16  ;;  %v3130_v23 = vld [vmem:[%s3085_s30 + $0x74] ss:$0 sps:$4 sm:$0x11]   ;;  %s3364_s29 = scalar_lea.vmem %s4027_s2, %s2406_s7 }
  0x1b   : > { %809 = vrot.lane.b32.xlu1 %v3096_v9, %s2986_s8  ;;  %2540 = vmatpush3.bf16.msra.mxu0 %v2911_v5  ;;  %v687_v12 = vshrl.u32 %v3111_v10, 16  ;;  %v689_v13 = vshll.u32 %v3111_v10, 16  ;;  %v3120_v15 = vld [vmem:[%s3106_s11] sm:$0xff]   ;;  %v3123_v16 = vld [vmem:[%s3106_s11 + $0x8] sm:$0xff]   ;;  %v702_v28 = vshll.u32 %v3130_v23, 16  ;;  %v709_v33 = vshll.u32 %v3088_v7, 16 }
  0x1c   : > { %2822 = vmatprep.subr.bf16.mxu1 %v2912_v6  ;;  %2541 = vmatprep.subr.bf16.mxu0 %v2912_v6  ;;  %v696_v19 = vrot.slane %v694_v14, 1  ;;  %v567_v20 = vshrl.u32 %v3120_v15, 16  ;;  %v569_v21 = vshll.u32 %v3120_v15, 16  ;;  %v574_v22 = vshll.u32 %v3123_v16, 16  ;;  %v3144_v34 = vld [vmem:[%s3085_s30 + $0x80] sm:$0xff]   ;;  %v3158_v45 = vld [vmem:[%s3085_s30 + $0x8] sm:$0xff]  }
  0x1d   : > { %v691_v18 = vrot.slane %v689_v13, 1  ;;  %v578_v26 = vshrl.u32 %v3123_v16, 16  ;;  %v3138_v32 = vld [vmem:[%s3106_s11 + $0x10] ss:$0 sps:$4 sm:$0x11]   ;;  %v704_v35 = vrot.slane %v702_v28, 1 }
  0x1e   : > { %2830 = vmatpush3.bf16.msra.mxu1 %v2913_v8  ;;  %v571_v25 = vrot.slane %v569_v21, 1  ;;  %v576_v27 = vrot.slane %v574_v22, 1  ;;  %v700_v31 = vor.u32 %v698_v17, %v696_v19  ;;  %v582_v37 = vshll.u32 %v3138_v32, 16  ;;  %v3164_v48 = vld [vmem:[%s3085_s30 + $0x88] ss:$0 sps:$4 sm:$0x11]  }
  0x1f   : > { %2542 = vmatpush3.bf16.msra.mxu0 %v2913_v8  ;;  %v692_v24 = vor.u32 %v691_v18, %v687_v12  ;;  %v707_v39 = vshrl.u32 %v3088_v7, 16  ;;  %v714_v40 = vshll.u32 %v3144_v34, 16  ;;  %v711_v43 = vrot.slane %v709_v33, 1  ;;  %v3171_v53 = vld [vmem:[%s3085_s30 + $0x8c] sm:$0xff]   ;;  %v3178_v55 = vld [vmem:[%s3085_s30 + $0x14] sm:$0xff]   ;;  %v3188_v61 = vld [vmem:[%s3085_s30 + $0x1c] sm:$0xff]  }
  0x20   : > { %v572_v30 = vor.u32 %v571_v25, %v567_v20  ;;  %v580_v38 = vor.u32 %v578_v26, %v576_v27  ;;  %v3152_v41 = vsel %vm565_vm0, %v700_v31, %v704_v35  ;;  %v584_v42 = vrot.slane %v582_v37, 1  ;;  %v3174_v54 = vld [vmem:[%s3085_s30 + $0x10] ss:$0 sps:$4 sm:$0x11]   ;;  %v3201_v4 = vld [vmem:[%s3085_s30 + $0x94] sm:$0xff]   ;;  %v3222_v22 = vld [vmem:[%s3085_s30 + $0x28] sm:$0xff]  }
  0x21   : > { %v3135_v29 = vsel %vm565_vm0, %v692_v24, %v696_v19  ;;  %v589_v44 = vshll.u32 %v3096_v9, 16  ;;  %v716_v46 = vrot.slane %v714_v40, 1  ;;  %v587_v47 = vshrl.u32 %v3096_v9, 16  ;;  %v3208_v12 = vld [vmem:[%s3085_s30 + $0x24] ss:$0 sps:$4 sm:$0x11]  }
  0x22   : > { %750 = vrot.lane.b32.xlu0 %v3135_v29, %s2986_s8  ;;  %v577_v36 = vsel %vm565_vm0, %v572_v30, %v576_v27  ;;  %v585_v49 = vsel %vm565_vm0, %v580_v38, %v584_v42  ;;  %v712_v50 = vor.u32 %v711_v43, %v707_v39  ;;  %v594_v52 = vshll.u32 %v3158_v45, 16  ;;  %v3214_v18 = vld [vmem:[%s3085_s30 + $0x58] sm:$0xff]   ;;  %v2914_v19 = vld [vmem:[%s4028_s3 + $0x60] sm:$0xff]   ;;  %v2916_v38 = vld [vmem:[%s4028_s3 + $0x68] sm:$0xff]  }
  0x23   : > { %726 = vrot.lane.b32.xlu1 %v577_v36, %s2986_s8  ;;  %v591_v51 = vrot.slane %v589_v44, 1  ;;  %v718_v56 = vshrl.u32 %v3144_v34, 16  ;;  %v722_v60 = vshll.u32 %v3164_v48, 16  ;;  %v609_v62 = vshll.u32 %v3178_v55, 16  ;;  %2823 = vmatprep.subr.bf16.mxu1 %v2914_v19  ;;  %v2915_v31 = vld [vmem:[%s4028_s3 + $0x20] sm:$0xff]   ;;  %v3251_v40 = vld [vmem:[%s3085_s30 + $0x30] sm:$0xff]  }
  0x24   : > { %v3182_v57 = vsel %vm565_vm0, %v712_v50, %v716_v46  ;;  %v596_v59 = vrot.slane %v594_v52, 1  ;;  %v598_v63 = vshrl.u32 %v3158_v45, 16  ;;  %v602_v3 = vshll.u32 %v3174_v54, 16  ;;  %v3227_v26 = vld [vmem:[%s3085_s30 + $0x60] ss:$0 sps:$4 sm:$0x11]   ;;  %2543 = vmatprep.subr.bf16.mxu0 %v2914_v19  ;;  %2831 = vmatpush3.bf16.msra.mxu1 %v2915_v31 }
  0x25   : > { %v592_v58 = vor.u32 %v591_v51, %v587_v47  ;;  %v720_v1 = vor.u32 %v718_v56, %v716_v46  ;;  %v724_v2 = vrot.slane %v722_v60, 1  ;;  %v607_v5 = vshrl.u32 %v3178_v55, 16  ;;  %2544 = vmatpush3.bf16.msra.mxu0 %v2915_v31  ;;  %2824 = vmatprep.subr.bf16.mxu1 %v2916_v38  ;;  %v2917_v47 = vld [vmem:[%s4028_s3 + $0x28] sm:$0xff]   ;;  %v2919_v60 = vld [vmem:[%s4028_s3 + $0x30] sm:$0xff]  }
  0x26   : > { %835 = vrot.lane.b32.xlu0 %v3144_v34, %s2986_s8  ;;  %v611_v6 = vrot.slane %v609_v62, 1  ;;  %v614_v8 = vshll.u32 %v3188_v61, 16  ;;  %v600_v14 = vor.u32 %v598_v63, %v596_v59  ;;  %v604_v17 = vrot.slane %v602_v3, 1  ;;  %2545 = vmatprep.subr.bf16.mxu0 %v2916_v38  ;;  %v2920_v63 = vld [vmem:[%s4028_s3 + $0x78] sm:$0xff]  }
  0x27   : > { %752 = vrot.lane.b32.xlu1 %v3152_v41, %s2986_s8  ;;  %v3195_v0 = vsel %vm565_vm0, %v592_v58, %v596_v59  ;;  %v3211_v13 = vsel %vm565_vm0, %v720_v1, %v724_v2  ;;  %v764_v24 = vrot.slane %v3096_v9, 1  ;;  %v674_v25 = vshll.u32 %v3214_v18, 16  ;;  %v3277_v59 = vld [vmem:[%s3085_s30 + $0x38] ss:$0 sps:$4 sm:$0x11]  }
  0x28   : > { %4035 = vst [vmem:[#allocation2_spill] sm:$0xff] %v3211_v13  ;;  %v612_v20 = vor.u32 %v611_v6, %v607_v5  ;;  %v616_v21 = vrot.slane %v614_v8, 1  ;;  %v765_v27 = vrot.slane %v3158_v45, 1  ;;  %v618_v28 = vshrl.u32 %v3188_v61, 16  ;;  %2832 = vmatpush3.bf16.msra.mxu1 %v2917_v47  ;;  %v2921_v3 = vld [vmem:[%s4028_s3 + $0x38] sm:$0xff]  }
  0x29   : > { %v678_v30 = vshrl.u32 %v3214_v18, 16  ;;  %v3238_v33 = vsel %vm565_vm0, %v600_v14, %v604_v17  ;;  %v622_v35 = vshll.u32 %v3208_v12, 16  ;;  %v3241_v36 = vrot.slane %v674_v25, 1  ;;  %2546 = vmatpush3.bf16.msra.mxu0 %v2917_v47  ;;  %v3300_v14 = vld [vmem:[%s3085_s30 + $0x3c] sm:$0xff]  }
  0x2a   : > { %811 = vrot.lane.b32.xlu0 %v3158_v45, %s2986_s8  ;;  %v682_v37 = vshll.u32 %v3227_v26, 16  ;;  %v767_v39 = vrot.slane %v3174_v54, 1  ;;  %v3254_v42 = vsel %vm565_vm0, %v612_v20, %v616_v21  ;;  %v629_v43 = vshll.u32 %v3222_v22, 16  ;;  %v2922_v17 = vld [vmem:[%s4028_s3 + $0xc0] sm:$0xff]  }
  0x2b   : > { %728 = vrot.lane.b32.xlu1 %v585_v49, %s2986_s8  ;;  %v680_v44 = vor.u32 %v678_v30, %v3241_v36  ;;  %v2918_v49 = vld [vmem:[%s4028_s3 + $0x70] sm:$0xff]   ;;  %v3267_v50 = vsel %vm758_vm1, %v764_v24, %v765_v27  ;;  %v620_v51 = vor.u32 %v618_v28, %v616_v21  ;;  %v624_v52 = vrot.slane %v622_v35, 1  ;;  %v3311_v20 = vld [vmem:[%s4028_s3 + $0x100] sm:$0xff]  }
  0x2c   : > { %v684_v46 = vrot.slane %v682_v37, 1  ;;  %v627_v54 = vshrl.u32 %v3222_v22, 16  ;;  %v634_v58 = vshll.u32 %v3251_v40, 16  ;;  %v631_v62 = vrot.slane %v629_v43, 1  ;;  %2825 = vmatprep.subr.bf16.mxu1 %v2918_v49  ;;  %2547 = vmatprep.subr.bf16.mxu0 %v2918_v49 }
  0x2d   : > { %v3288_v1 = vsel %vm565_vm0, %v620_v51, %v624_v52  ;;  %v769_v2 = vrot.slane %v3178_v55, 1  ;;  %2833 = vmatpush3.bf16.msra.mxu1 %v2919_v60  ;;  %v3297_v5 = vsel %vm758_vm1, %v765_v27, %v767_v39  ;;  %2548 = vmatpush3.bf16.msra.mxu0 %v2919_v60  ;;  %v642_v19 = vshll.u32 %v3277_v59, 16  ;;  %v3321_v27 = vld [vmem:[%s3085_s30 + $0x44] sm:$0xff]   ;;  %v3343_v49 = vld [vmem:[%s3085_s30 + $0x9c] ss:$0 sps:$4 sm:$0x11]  }
  0x2e   : > { %837 = vrot.lane.b32.xlu0 %v3171_v53, %s2986_s8  ;;  %v3271_v56 = vsel %vm565_vm0, %v680_v44, %v684_v46  ;;  %v632_v6 = vor.u32 %v631_v62, %v627_v54  ;;  %v636_v8 = vrot.slane %v634_v58, 1  ;;  %2826 = vmatprep.subr.bf16.mxu1 %v2920_v63  ;;  %v770_v21 = vrot.slane %v3188_v61, 1  ;;  %v2903_v46 = vld [vmem:[%s3085_s30 + $0x4c] ss:$0 sps:$4 sm:$0x11]  }
  0x2f   : > { %754 = vrot.lane.b32.xlu1 %v3182_v57, %s2986_s8  ;;  %2549 = vmatprep.subr.bf16.mxu0 %v2920_v63  ;;  %v638_v24 = vshrl.u32 %v3251_v40, 16  ;;  %v649_v28 = vshll.u32 %v3300_v14, 16  ;;  %v644_v30 = vrot.slane %v642_v19, 1  ;;  %v772_v31 = vrot.slane %v3208_v12, 1  ;;  %v3356_v63 = vld [vmem:[%s3085_s30 + $0x50] sm:$0xff]  }
  0x30   : > { %v3318_v25 = vsel %vm565_vm0, %v632_v6, %v636_v8  ;;  %v852_v35 = vshll.u32 %v3201_v4, 16  ;;  %v3330_v37 = vsel %vm758_vm1, %v769_v2, %v770_v21  ;;  %v647_v39 = vshrl.u32 %v3300_v14, 16 }
  0x31   : > { %2834 = vmatpush3.bf16.msra.mxu1 %v2921_v3  ;;  %2550 = vmatpush3.bf16.msra.mxu0 %v2921_v3  ;;  %v640_v38 = vor.u32 %v638_v24, %v636_v8  ;;  %v856_v43 = vshrl.u32 %v3201_v4, 16  ;;  %v651_v44 = vrot.slane %v649_v28, 1  ;;  %v654_v12 = vshll.u32 %v3321_v27, 16 }
  0x32   : > { %813 = vrot.lane.b32.xlu0 %v3178_v55, %s2986_s8  ;;  %2647 = vmatprep.subr.bf16.mxu1 %v2922_v17  ;;  %v3340_v47 = vrot.slane %v852_v35, 1  ;;  %v860_v54 = vshll.u32 %v3343_v49, 16  ;;  %v3353_v58 = vsel %vm758_vm1, %v770_v21, %v772_v31  ;;  %v774_v2 = vrot.slane %v3222_v22, 1 }
  0x33   : > { %730 = vrot.lane.b32.xlu1 %v3195_v0, %s2986_s8  ;;  %2779 = vmatprep.subr.bf16.mxu0 %v3311_v20  ;;  %v3346_v51 = vsel %vm565_vm0, %v640_v38, %v644_v30  ;;  %v652_v60 = vor.u32 %v651_v44, %v647_v39  ;;  %v656_v62 = vrot.slane %v654_v12, 1  ;;  %v775_v3 = vrot.slane %v3251_v40, 1 }
  0x34   : > { %v858_v52 = vor.u32 %v856_v43, %v3340_v47  ;;  %v862_v6 = vrot.slane %v860_v54, 1  ;;  %v658_v8 = vshrl.u32 %v3321_v27, 16  ;;  %v662_v17 = vshll.u32 %v2903_v46, 16 }
  0x35   : > { %v3376_v21 = vsel %vm565_vm0, %v652_v60, %v656_v62  ;;  %v669_v24 = vshll.u32 %v3356_v63, 16  ;;  %v3382_v28 = vsel %vm758_vm1, %v774_v2, %v775_v3  ;;  %v777_v35 = vrot.slane %v3277_v59, 1 }
  0x36   : > { %839 = vrot.lane.b32.xlu0 %v3201_v4, %s2986_s8  ;;  %v3373_v19 = vsel %vm565_vm0, %v858_v52, %v862_v6  ;;  %v660_v30 = vor.u32 %v658_v8, %v656_v62  ;;  %v664_v31 = vrot.slane %v662_v17, 1  ;;  %v667_v38 = vshrl.u32 %v3356_v63, 16 }
  0x37   : > { %756 = vrot.lane.b32.xlu1 %v3211_v13, %s2986_s8  ;;  %4036 = vst [vmem:[#allocation3_spill] sm:$0xff] %v3373_v19  ;;  %v671_v39 = vrot.slane %v669_v24, 1  ;;  %v3396_v44 = vsel %vm758_vm1, %v775_v3, %v777_v35  ;;  %v779_v59 = vrot.slane %v3300_v14, 1  ;;  %v780_v52 = vrot.slane %v3321_v27, 1  ;;  %v3437_v35 = vld [vmem:[%s3364_s29] sm:$0xff]  }
  0x38   : > { %v3391_v43 = vsel %vm565_vm0, %v660_v30, %v664_v31  ;;  %v782_v62 = vrot.slane %v2903_v46, 1  ;;  %v785_v2 = vrot.slane %v3214_v18, 1  ;;  %v847_v6 = vshll.u32 %v3171_v53, 16  ;;  %4037 = vst [vmem:[#allocation4_spill] sm:$0xff] %v3437_v35 }
  0x39   : > { %v672_v12 = vor.u32 %v671_v39, %v667_v38  ;;  %v3411_v60 = vsel %vm758_vm1, %v779_v59, %v780_v52  ;;  %v787_v46 = vrot.slane %v3227_v26, 1  ;;  %v789_v17 = vrot.slane %v3111_v10, 1  ;;  %v3451_v59 = vld [vmem:[%s3364_s29 + $0x8] sm:$0xff]  }
  0x3a   : > { %815 = vrot.lane.b32.xlu0 %v3188_v61, %s2986_s8  ;;  %v3422_v3 = vsel %vm758_vm1, %v780_v52, %v782_v62  ;;  %v790_v24 = vrot.slane %v3114_v11, 1  ;;  %v845_v30 = vshrl.u32 %v3171_v53, 16  ;;  %v849_v31 = vrot.slane %v847_v6, 1 }
  0x3b   : > { %732 = vrot.lane.b32.xlu1 %v3238_v33, %s2986_s8  ;;  %v3406_v54 = vsel %vm565_vm0, %v672_v12, %v3241_v36  ;;  %v784_v36 = vrot.slane %v3356_v63, 1  ;;  %v3442_v26 = vsel %vm758_vm1, %v785_v2, %v787_v46  ;;  %v792_v38 = vrot.slane %v3130_v23, 1 }
  0x3c   : > { %v3448_v39 = vsel %vm758_vm1, %v789_v17, %v790_v24  ;;  %v850_v12 = vor.u32 %v849_v31, %v845_v30  ;;  %v917_v52 = vshll.u32 %v3437_v35, 16  ;;  %v795_v23 = vrot.slane %v3144_v34, 1  ;;  %v3470_v30 = vld [vmem:[%s3364_s29 + $0x10] ss:$0 sps:$4 sm:$0x11]  }
  0x3d   : > { %v3431_v8 = vsel %vm758_vm1, %v784_v36, %v785_v2  ;;  %v3457_v62 = vsel %vm758_vm1, %v790_v24, %v792_v38  ;;  %v794_v36 = vrot.slane %v3088_v7, 1  ;;  %v915_v6 = vshrl.u32 %v3437_v35, 16 }
  0x3e   : > { %734 = vrot.lane.b32.xlu0 %v3254_v42, %s2986_s8  ;;  %v3465_v2 = vsel %vm565_vm0, %v850_v12, %v3340_v47  ;;  %v919_v46 = vrot.slane %v917_v52, 1  ;;  %v922_v17 = vshll.u32 %v3451_v59, 16  ;;  %v797_v31 = vrot.slane %v3164_v48, 1 }
  0x3f   : > { %869 = vrot.lane.b32.xlu1 %v3267_v50, %s2986_s8  ;;  %v3475_v24 = vsel %vm758_vm1, %v794_v36, %v795_v23  ;;  %v926_v12 = vshrl.u32 %v3451_v59, 16  ;;  %v930_v52 = vshll.u32 %v3470_v30, 16  ;;  %v864_v36 = vrot.slane %v3171_v53, 1 }
  0x40   : > { %v920_v47 = vor.u32 %v919_v46, %v915_v6  ;;  %v924_v38 = vrot.slane %v922_v17, 1  ;;  %v3485_v35 = vsel %vm758_vm1, %v795_v23, %v797_v31  ;;  %v865_v13 = vrot.slane %v3201_v4, 1 }
  0x41   : > { %v932_v46 = vrot.slane %v930_v52, 1  ;;  %v867_v23 = vrot.slane %v3343_v49, 1 }
  0x42   : > { %817 = vrot.lane.b32.xlu0 %v3222_v22, %s2986_s8  ;;  %v925_v48 = vsel %vm565_vm0, %v920_v47, %v924_v38  ;;  %v928_v6 = vor.u32 %v926_v12, %v924_v38  ;;  %v3495_v17 = vsel %vm758_vm1, %v864_v36, %v865_v13  ;;  %v759_v47 = vrot.slane %v3120_v15, 1 }
  0x43   : > { %736 = vrot.lane.b32.xlu1 %v3288_v1, %s2986_s8  ;;  %v760_v38 = vrot.slane %v3123_v16, 1 }
  0x44   : > { %v933_v31 = vsel %vm565_vm0, %v928_v6, %v932_v46  ;;  %v2924_v46 = vld [vmem:[%s4028_s3 + $0xc8] sm:$0xff]  }
  0x45   : > { %v761_v49 = vsel %vm758_vm1, %v759_v47, %v760_v38  ;;  %v762_v47 = vrot.slane %v3138_v32, 1 }
  0x46   : > { %871 = vrot.lane.b32.xlu0 %v3297_v5, %s2986_s8 }
  0x47   : > { %819 = vrot.lane.b32.xlu1 %v3251_v40, %s2986_s8 }
  0x4a   : > { %738 = vrot.lane.b32.xlu0 %v3318_v25, %s2986_s8 }
  0x4b   : > { %873 = vrot.lane.b32.xlu1 %v3330_v37, %s2986_s8 }
  0x4e   : > { %821 = vrot.lane.b32.xlu0 %v3300_v14, %s2986_s8 }
  0x4f   : > { %740 = vrot.lane.b32.xlu1 %v3346_v51, %s2986_s8 }
  0x52   : > { %875 = vrot.lane.b32.xlu0 %v3353_v58, %s2986_s8 }
  0x53   : > { %823 = vrot.lane.b32.xlu1 %v3321_v27, %s2986_s8 }
  0x56   : > { %742 = vrot.lane.b32.xlu0 %v3376_v21, %s2986_s8 }
  0x57   : > { %877 = vrot.lane.b32.xlu1 %v3382_v28, %s2986_s8 }
  0x5a   : > { %825 = vrot.lane.b32.xlu0 %v3356_v63, %s2986_s8 }
  0x5b   : > { %744 = vrot.lane.b32.xlu1 %v3391_v43, %s2986_s8 }
  0x5e   : > { %879 = vrot.lane.b32.xlu0 %v3396_v44, %s2986_s8 }
  0x5f   : > { %827 = vrot.lane.b32.xlu1 %v3214_v18, %s2986_s8 }
  0x62   : > { %746 = vrot.lane.b32.xlu0 %v3406_v54, %s2986_s8 }
  0x63   : > { %881 = vrot.lane.b32.xlu1 %v3411_v60, %s2986_s8 }
  0x66   : > { %829 = vrot.lane.b32.xlu0 %v3111_v10, %s2986_s8 }
  0x67   : > { %748 = vrot.lane.b32.xlu1 %v3271_v56, %s2986_s8 }
  0x6a   : > { %883 = vrot.lane.b32.xlu0 %v3422_v3, %s2986_s8 }
  0x6b   : > { %831 = vrot.lane.b32.xlu1 %v3114_v11, %s2986_s8 }
  0x6e   : > { %885 = vrot.lane.b32.xlu0 %v3431_v8, %s2986_s8 }
  0x6f   : > { %887 = vrot.lane.b32.xlu1 %v3442_v26, %s2986_s8 }
  0x72   : > { %889 = vrot.lane.b32.xlu0 %v3448_v39, %s2986_s8 }
  0x73   : > { %891 = vrot.lane.b32.xlu1 %v3457_v62, %s2986_s8 }
  0x76   : > { %934 = vrot.lane.b32.xlu0 %v3465_v2, %s2986_s8 }
  0x77   : > { %893 = vrot.lane.b32.xlu1 %v3475_v24, %s2986_s8 }
  0x7a   : > { %936 = vrot.lane.b32.xlu0 %v3373_v19, %s2986_s8  ;;  %v3503_v19 = vsel %vm758_vm1, %v865_v13, %v867_v23 }
  0x7b   : > { %895 = vrot.lane.b32.xlu1 %v3485_v35, %s2986_s8 }
  0x7e   : > { %938 = vrot.lane.b32.xlu0 %v925_v48, %s2986_s8  ;;  %v2923_v48 = vld [vmem:[%s4028_s3 + $0x80] sm:$0xff]  }
  0x7f   : > { %897 = vrot.lane.b32.xlu1 %v3495_v17, %s2986_s8 }
  0x82   : > { %940 = vrot.lane.b32.xlu0 %v933_v31, %s2986_s8 }
  0x83   : > { %899 = vrot.lane.b32.xlu1 %v3503_v19, %s2986_s8 }
  0x8c   : > { %v834_v12 = vpop.permute.xlu0 %833 }
  0x8d   : > { %v810_v52 = vpop.permute.xlu1 %809  ;;  %v1046_v36 = vsel %vm947_vm2, %v3448_v39, %v834_v12 }
  0x8e   : > { %1522 = vmatprep.mubr.bf16.mxu1 %v1046_v36  ;;  %v998_v13 = vsel %vm947_vm2, %v761_v49, %v810_v52  ;;  %v2941_v49 = vld [vmem:[%s4028_s3 + $0x108] sm:$0xff]   ;;  %v2927_v36 = vld [vmem:[%s4028_s3 + $0xd0] sm:$0xff]  }
  0x8f   : > { %1426 = vmatprep.mubr.bf16.mxu0 %v998_v13  ;;  %v2926_v52 = vld [vmem:[%s4028_s3 + $0x88] sm:$0xff]  }
  0x94   : > { %v751_v6 = vpop.permute.xlu0 %750 }
  0x95   : > { %v3522_v23 = vsel %vm947_vm2, %v3111_v10, %v751_v6  ;;  %v727_v31 = vpop.permute.xlu1 %726  ;;  %v2928_v6 = vld [vmem:[%s4028_s3 + $0x90] sm:$0xff]  }
  0x96   : > { %1523 = vmatmul.mubr.bf16.vlgmr.msra.gmra.mrb[0].mxu1 %v3522_v23  ;;  %v949_v12 = vsel %vm947_vm2, %v3120_v15, %v727_v31  ;;  %v763_v15 = vsel %vm758_vm1, %v760_v38, %v762_v47  ;;  %v2929_v38 = vld [vmem:[%s4028_s3 + $0xd8] sm:$0xff]  }
  0x97   : > { %2648 = vmatpush3.bf16.msra.mxu1 %v2923_v48  ;;  %1427 = vmatmul.mubr.bf16.vlgmr.msra.gmra.mrb[0].mxu0 %v949_v12 }
  0x98   : > { %v836_v10 = vpop.permute.xlu0 %835  ;;  %2649 = vmatprep.subr.bf16.mxu1 %v2924_v46  ;;  %2780 = vmatpush3.bf16.msra.mxu0 %v3311_v20  ;;  %v2944_v20 = vld [vmem:[%s4028_s3 + $0x110] sm:$0xff]  }
  0x99   : > { %v1050_v32 = vsel %vm947_vm2, %v3457_v62, %v836_v10  ;;  %v753_v13 = vpop.permute.xlu1 %752  ;;  %2781 = vmatprep.subr.bf16.mxu0 %v2941_v49 }
  0x9a   : > { %1530 = vmatprep.mubr.bf16.mxu1 %v1050_v32  ;;  %v3543_v48 = vsel %vm947_vm2, %v3114_v11, %v753_v13  ;;  %v2945_v11 = vld [vmem:[%s4028_s3 + $0x118] sm:$0xff]   ;;  %v2932_v13 = vld [vmem:[%s4028_s3 + $0xa0] sm:$0xff]  }
  0x9b   : > { %2650 = vmatpush3.bf16.msra.mxu1 %v2926_v52  ;;  %v2930_v52 = vld [vmem:[%s4028_s3 + $0x98] sm:$0xff]  }
  0x9c   : > { %v812_v46 = vpop.permute.xlu0 %811  ;;  %2651 = vmatprep.subr.bf16.mxu1 %v2927_v36  ;;  %2782 = vmatpush3.bf16.msra.mxu0 %v2941_v49  ;;  %v2931_v49 = vld [vmem:[%s4028_s3 + $0xe0] sm:$0xff]  }
  0x9d   : > { %v1002_v31 = vsel %vm947_vm2, %v763_v15, %v812_v46  ;;  %v729_v47 = vpop.permute.xlu1 %728  ;;  %2783 = vmatprep.subr.bf16.mxu0 %v2944_v20 }
  0x9e   : > { %1434 = vmatprep.mubr.bf16.mxu0 %v1002_v31  ;;  %1531 = vmatmul.mubr.bf16.gmra.mrb[4].mxu1 %v3543_v48  ;;  %v952_v12 = vsel %vm947_vm2, %v3123_v16, %v729_v47 }
  0x9f   : > { %2652 = vmatpush3.bf16.msra.mxu1 %v2928_v6  ;;  %1435 = vmatmul.mubr.bf16.gmra.mrb[4].mxu0 %v952_v12  ;;  %v2933_v6 = vld [vmem:[%s4028_s3 + $0xe8] sm:$0xff]   ;;  %v2937_v12 = vld [vmem:[%s4028_s3 + $0xb0] sm:$0xff]  }
  0xa0   : > { %v838_v10 = vpop.permute.xlu0 %837  ;;  %2653 = vmatprep.subr.bf16.mxu1 %v2929_v38  ;;  %2784 = vmatpush3.bf16.msra.mxu0 %v2944_v20  ;;  %v2935_v38 = vld [vmem:[%s4028_s3 + $0xa8] sm:$0xff]  }
  0xa1   : > { %v1054_v36 = vsel %vm947_vm2, %v3475_v24, %v838_v10  ;;  %v755_v32 = vpop.permute.xlu1 %754  ;;  %2785 = vmatprep.subr.bf16.mxu0 %v2945_v11  ;;  %v2938_v10 = vld [vmem:[%s4028_s3 + $0xf8] sm:$0xff]  }
  0xa2   : > { %1538 = vmatprep.mubr.bf16.mxu1 %v1054_v36  ;;  %v3571_v16 = vsel %vm947_vm2, %v3088_v7, %v755_v32  ;;  %v2942_v32 = vld [vmem:[%s4028_s3 + $0xb8] sm:$0xff]  }
  0xa3   : > { %2654 = vmatpush3.bf16.msra.mxu1 %v2930_v52 }
  0xa4   : > { %v814_v15 = vpop.permute.xlu0 %813  ;;  %2655 = vmatprep.subr.bf16.mxu1 %v2931_v49  ;;  %2786 = vmatpush3.bf16.msra.mxu0 %v2945_v11 }
  0xa5   : > { %v1006_v20 = vsel %vm947_vm2, %v3267_v50, %v814_v15  ;;  %v731_v46 = vpop.permute.xlu1 %730  ;;  %v2936_v50 = vld [vmem:[%s4028_s3 + $0xf0] sm:$0xff]  }
  0xa6   : > { %1442 = vmatprep.mubr.bf16.mxu0 %v1006_v20  ;;  %1539 = vmatmul.mubr.bf16.gmra.mrb[8].mxu1 %v3571_v16  ;;  %v955_v7 = vsel %vm947_vm2, %v3096_v9, %v731_v46 }
  0xa7   : > { %2656 = vmatpush3.bf16.msra.mxu1 %v2932_v13  ;;  %1443 = vmatmul.mubr.bf16.gmra.mrb[8].mxu0 %v955_v7 }
  0xa8   : > { %v840_v31 = vpop.permute.xlu0 %839  ;;  %2657 = vmatprep.subr.bf16.mxu1 %v2933_v6 }
  0xa9   : > { %v1058_v47 = vsel %vm947_vm2, %v3485_v35, %v840_v31  ;;  %v757_v11 = vpop.permute.xlu1 %756 }
  0xaa   : > { %1546 = vmatprep.mubr.bf16.mxu1 %v1058_v47  ;;  %v3594_v9 = vsel %vm947_vm2, %v3144_v34, %v757_v11 }
  0xab   : > { %2658 = vmatpush3.bf16.msra.mxu1 %v2935_v38 }
  0xac   : > { %v816_v52 = vpop.permute.xlu0 %815  ;;  %2659 = vmatprep.subr.bf16.mxu1 %v2936_v50 }
  0xad   : > { %v1010_v49 = vsel %vm947_vm2, %v3297_v5, %v816_v52  ;;  %v733_v36 = vpop.permute.xlu1 %732 }
  0xae   : > { %1450 = vmatprep.mubr.bf16.mxu0 %v1010_v49  ;;  %1547 = vmatmul.mubr.bf16.gmra.mrb[12].mxu1 %v3594_v9  ;;  %v958_v34 = vsel %vm947_vm2, %v3158_v45, %v733_v36 }
  0xaf   : > { %2660 = vmatpush3.bf16.msra.mxu1 %v2937_v12  ;;  %1451 = vmatmul.mubr.bf16.gmra.mrb[12].mxu0 %v958_v34 }
  0xb0   : > { %v735_v13 = vpop.permute.xlu0 %734  ;;  %2661 = vmatprep.subr.bf16.mxu1 %v2938_v10 }
  0xb1   : > { %v961_v15 = vsel %vm947_vm2, %v3178_v55, %v735_v13  ;;  %v870_v6 = vpop.permute.xlu1 %869 }
  0xb2   : > { %1587 = vmatprep.mubr.bf16.mxu1 %v961_v15  ;;  %v1062_v5 = vsel %vm947_vm2, %v3195_v0, %v870_v6 }
  0xb3   : > { %2662 = vmatpush3.bf16.msra.mxu1 %v2942_v32 }
  0xb4   : > { %v818_v20 = vpop.permute.xlu0 %817 }
  0xb5   : > { %v1014_v45 = vsel %vm947_vm2, %v3330_v37, %v818_v20  ;;  %v737_v46 = vpop.permute.xlu1 %736 }
  0xb6   : > { %1458 = vmatprep.mubr.bf16.mxu0 %v1014_v45  ;;  %1588 = vmatmul.mubr.bf16.vlgmr.msra.gmra.mrb[16].mxu1 %v1062_v5  ;;  %v964_v7 = vsel %vm947_vm2, %v3188_v61, %v737_v46 }
  0xb7   : > { %1459 = vmatmul.mubr.bf16.gmra.mrb[16].mxu0 %v961_v15  ;;  %1595 = vmatprep.mubr.bf16.mxu1 %v964_v7 }
  0xb8   : > { %v872_v38 = vpop.permute.xlu0 %871 }
  0xb9   : > { %v820_v55 = vpop.permute.xlu1 %819  ;;  %v1066_v0 = vsel %vm947_vm2, %v3238_v33, %v872_v38 }
  0xba   : > { %v1018_v31 = vsel %vm947_vm2, %v3353_v58, %v820_v55 }
  0xbb   : > { %1466 = vmatprep.mubr.bf16.mxu0 %v1018_v31 }
  0xbc   : > { %v739_v50 = vpop.permute.xlu0 %738 }
  0xbd   : > { %v967_v47 = vsel %vm947_vm2, %v3222_v22, %v739_v50  ;;  %v874_v11 = vpop.permute.xlu1 %873 }
  0xbe   : > { %1596 = vmatmul.mubr.bf16.gmra.mrb[20].mxu1 %v1066_v0  ;;  %v1070_v10 = vsel %vm947_vm2, %v3254_v42, %v874_v11 }
  0xbf   : > { %1603 = vmatprep.mubr.bf16.mxu1 %v967_v47  ;;  %1467 = vmatmul.mubr.bf16.gmra.mrb[20].mxu0 %v964_v7 }
  0xc0   : > { %v822_v61 = vpop.permute.xlu0 %821 }
  0xc1   : > { %v1022_v12 = vsel %vm947_vm2, %v3382_v28, %v822_v61  ;;  %v741_v52 = vpop.permute.xlu1 %740 }
  0xc2   : > { %1474 = vmatprep.mubr.bf16.mxu0 %v1022_v12  ;;  %v970_v33 = vsel %vm947_vm2, %v3251_v40, %v741_v52  ;;  %v4040_v52 = vld [vmem:[#allocation3_spill] sm:$0xff] }
  0xc4   : > { %v876_v49 = vpop.permute.xlu0 %875 }
  0xc5   : > { %v824_v36 = vpop.permute.xlu1 %823  ;;  %v1074_v13 = vsel %vm947_vm2, %v3288_v1, %v876_v49 }
  0xc6   : > { %1604 = vmatmul.mubr.bf16.gmra.mrb[24].mxu1 %v1070_v10  ;;  %v1026_v22 = vsel %vm947_vm2, %v3396_v44, %v824_v36 }
  0xc7   : > { %1611 = vmatprep.mubr.bf16.mxu1 %v970_v33  ;;  %1475 = vmatmul.mubr.bf16.gmra.mrb[24].mxu0 %v967_v47 }
  0xc8   : > { %v743_v34 = vpop.permute.xlu0 %742  ;;  %1482 = vmatprep.mubr.bf16.mxu0 %v1026_v22 }
  0xc9   : > { %v878_v32 = vpop.permute.xlu1 %877  ;;  %v973_v42 = vsel %vm947_vm2, %v3300_v14, %v743_v34 }
  0xca   : > { %v1078_v20 = vsel %vm947_vm2, %v3318_v25, %v878_v32 }
  0xcc   : > { %v826_v15 = vpop.permute.xlu0 %825 }
  0xcd   : > { %v1030_v40 = vsel %vm947_vm2, %v3411_v60, %v826_v15  ;;  %v745_v6 = vpop.permute.xlu1 %744 }
  0xce   : > { %1612 = vmatmul.mubr.bf16.gmra.mrb[28].mxu1 %v1074_v13  ;;  %v976_v1 = vsel %vm947_vm2, %v3321_v27, %v745_v6 }
  0xcf   : > { %1619 = vmatprep.mubr.bf16.mxu1 %v973_v42  ;;  %1483 = vmatmul.mubr.bf16.gmra.mrb[28].mxu0 %v970_v33 }
  0xd0   : > { %v880_v5 = vpop.permute.xlu0 %879  ;;  %1490 = vmatprep.mubr.bf16.mxu0 %v1030_v40 }
  0xd1   : > { %v828_v45 = vpop.permute.xlu1 %827  ;;  %v1082_v38 = vsel %vm947_vm2, %v3346_v51, %v880_v5 }
  0xd2   : > { %v1034_v14 = vsel %vm947_vm2, %v3422_v3, %v828_v45 }
  0xd4   : > { %v747_v46 = vpop.permute.xlu0 %746 }
  0xd5   : > { %v882_v7 = vpop.permute.xlu1 %881  ;;  %v979_v25 = vsel %vm947_vm2, %v3356_v63, %v747_v46 }
  0xd6   : > { %1620 = vmatmul.mubr.bf16.gmra.mrb[32].mxu1 %v1078_v20  ;;  %v1086_v0 = vsel %vm947_vm2, %v3376_v21, %v882_v7 }
  0xd7   : > { %1627 = vmatprep.mubr.bf16.mxu1 %v976_v1  ;;  %1491 = vmatmul.mubr.bf16.gmra.mrb[32].mxu0 %v973_v42 }
  0xd8   : > { %1498 = vmatprep.mubr.bf16.mxu0 %v1034_v14  ;;  %v830_v55 = vpop.permute.xlu0 %829 }
  0xd9   : > { %v749_v31 = vpop.permute.xlu1 %748  ;;  %v1038_v27 = vsel %vm947_vm2, %v3431_v8, %v830_v55 }
  0xda   : > { %v982_v47 = vsel %vm947_vm2, %v3214_v18, %v749_v31 }
  0xdc   : > { %v884_v63 = vpop.permute.xlu0 %883 }
  0xdd   : > { %v832_v50 = vpop.permute.xlu1 %831  ;;  %v1090_v11 = vsel %vm947_vm2, %v3391_v43, %v884_v63 }
  0xde   : > { %1628 = vmatmul.mubr.bf16.gmra.mrb[36].mxu1 %v1082_v38  ;;  %v1042_v51 = vsel %vm947_vm2, %v3442_v26, %v832_v50 }
  0xdf   : > { %1635 = vmatprep.mubr.bf16.mxu1 %v979_v25  ;;  %1499 = vmatmul.mubr.bf16.gmra.mrb[36].mxu0 %v976_v1 }
  0xe0   : > { %1506 = vmatprep.mubr.bf16.mxu0 %v1038_v27  ;;  %v886_v21 = vpop.permute.xlu0 %885 }
  0xe1   : > { %v1094_v18 = vsel %vm947_vm2, %v3406_v54, %v886_v21  ;;  %v888_v61 = vpop.permute.xlu1 %887 }
  0xe2   : > { %v1098_v43 = vsel %vm947_vm2, %v3271_v56, %v888_v61 }
  0xe5   : > { %v892_v56 = vpop.permute.xlu1 %891 }
  0xe6   : > { %1636 = vmatmul.mubr.bf16.gmra.mrb[40].mxu1 %v1086_v0 }
  0xe7   : > { %1643 = vmatprep.mubr.bf16.mxu1 %v982_v47  ;;  %1507 = vmatmul.mubr.bf16.gmra.mrb[40].mxu0 %v979_v25 }
  0xe8   : > { %1514 = vmatprep.mubr.bf16.mxu0 %v1042_v51 }
  0xee   : > { %1644 = vmatmul.mubr.bf16.gmra.mrb[44].mxu1 %v1090_v11 }
  0xef   : > { %1651 = vmatprep.mubr.bf16.mxu1 %v3522_v23  ;;  %1515 = vmatmul.mubr.bf16.gmra.mrb[44].mxu0 %v982_v47  ;;  %v4039_v23 = vld [vmem:[#allocation4_spill] sm:$0xff] }
  0xf0   : > { %2787 = vmatprep.mubr.msk.bf16.mxu0 %vm947_vm2, %v3330_v37  ;;  %v890_v37 = vpop.permute.xlu0 %889 }
  0xf6   : > { %1652 = vmatmul.mubr.bf16.gmra.mrb[48].mxu1 %v1094_v18 }
  0xf7   : > { %1659 = vmatprep.mubr.bf16.mxu1 %v3543_v48  ;;  %2788 = vmatmul.mubr.msk.bf16.vlgmr.msra.gmra.mrb[48].mxu0 %vm947_vm2, %v3353_v58  ;;  %v1102_v58 = vsel %vm947_vm2, %v3135_v29, %v890_v37  ;;  %v894_v29 = vpop.permute.xlu1 %893 }
  0xf8   : > { %2791 = vmatprep.mubr.msk.bf16.mxu0 %vm947_vm2, %v3382_v28  ;;  %v935_v28 = vpop.permute.xlu0 %934 }
  0xf9   : > { %v1125_v54 = vsel %vm947_vm2, %v3171_v53, %v935_v28 }
  0xfe   : > { %1660 = vmatmul.mubr.bf16.gmra.mrb[52].mxu1 %v1098_v43 }
  0xff   : > { %1667 = vmatprep.mubr.bf16.mxu1 %v3571_v16  ;;  %2792 = vmatmul.mubr.msk.bf16.gmra.mrb[52].mxu0 %vm947_vm2, %v3396_v44  ;;  %v1106_v44 = vsel %vm947_vm2, %v3152_v41, %v892_v56  ;;  %v896_v41 = vpop.permute.xlu1 %895 }
 0x100   : > { %2795 = vmatprep.mubr.msk.bf16.mxu0 %vm947_vm2, %v3411_v60  ;;  %v937_v60 = vpop.permute.xlu0 %936 }
 0x104   : > { %v939_v53 = vpop.permute.xlu0 %938 }
 0x105   : > { %v1131_v48 = vsel %vm947_vm2, %v4039_v23, %v939_v53 }
 0x106   : > { %1668 = vmatmul.mubr.bf16.gmra.mrb[56].mxu1 %v1102_v58 }
 0x107   : > { %1675 = vmatprep.mubr.bf16.mxu1 %v3594_v9  ;;  %2796 = vmatmul.mubr.msk.bf16.gmra.mrb[56].mxu0 %vm947_vm2, %v3422_v3  ;;  %v1110_v3 = vsel %vm947_vm2, %v3182_v57, %v894_v29  ;;  %v898_v57 = vpop.permute.xlu1 %897 }
 0x108   : > { %2799 = vmatprep.mubr.msk.bf16.mxu0 %vm947_vm2, %v3431_v8  ;;  %v1128_v8 = vsel %vm947_vm2, %v3201_v4, %v937_v60  ;;  %v941_v4 = vpop.permute.xlu0 %940  ;;  %v1118_v16 = vsel %vm947_vm2, %v3465_v2, %v898_v57 }
 0x109   : > { %v1134_v9 = vsel %vm947_vm2, %v3451_v59, %v941_v4 }
 0x10e   : > { %1676 = vmatmul.mubr.bf16.gmra.mrb[60].mxu1 %v1106_v44 }
 0x10f   : > { %1683 = vmatprep.mubr.bf16.mxu1 %v1125_v54  ;;  %2800 = vmatmul.mubr.msk.bf16.gmra.mrb[60].mxu0 %vm947_vm2, %v3442_v26  ;;  %v4038_v26 = vld [vmem:[#allocation2_spill] sm:$0xff] }
 0x110   : > { %2803 = vmatprep.mubr.msk.bf16.mxu0 %vm947_vm2, %v3448_v39  ;;  %v1114_v39 = vsel %vm947_vm2, %v4038_v26, %v896_v41 }
 0x116   : > { %1684 = vmatmul.mubr.bf16.gmra.mrb[64].mxu1 %v1110_v3 }
 0x117   : > { %1691 = vmatprep.mubr.bf16.mxu1 %v1128_v8  ;;  %2804 = vmatmul.mubr.msk.bf16.gmra.mrb[64].mxu0 %vm947_vm2, %v3457_v62  ;;  %v942_v62 = vrot.slane %v4039_v23, 1 }
 0x118   : > { %2807 = vmatprep.mubr.msk.bf16.mxu0 %vm947_vm2, %v3475_v24  ;;  %v943_v24 = vrot.slane %v3451_v59, 1 }
 0x11a   : > { %v944_v12 = vsel %vm758_vm1, %v942_v62, %v943_v24 }
 0x11e   : > { %1692 = vmatmul.mubr.bf16.gmra.mrb[68].mxu1 %v1114_v39  ;;  %v3740_v39 = vld [vmem:[%s4029_s4] ss:$0 sm:$0xff] }
 0x11f   : > { %1699 = vmatprep.mubr.bf16.mxu1 %v1131_v48  ;;  %2808 = vmatmul.mubr.msk.bf16.gmra.mrb[68].mxu0 %vm947_vm2, %v3485_v35  ;;  %v900_v35 = vpop.permute.xlu1 %899 }
 0x120   : > { %2811 = vmatprep.mubr.msk.bf16.mxu0 %vm947_vm2, %v3495_v17  ;;  %v945_v17 = vrot.slane %v3470_v30, 1  ;;  %v1122_v10 = vsel %vm947_vm2, %v4040_v52, %v900_v35 }
 0x122   : > { %v946_v2 = vsel %vm758_vm1, %v943_v24, %v945_v17 }
 0x126   : > { %1700 = vmatmul.mubr.bf16.gmra.mrb[72].mxu1 %v1118_v16 }
 0x127   : > { %1707 = vmatprep.mubr.bf16.mxu1 %v1134_v9  ;;  %2812 = vmatmul.mubr.msk.bf16.gmra.mrb[72].mxu0 %vm947_vm2, %v3503_v19 }
 0x128   : > { %2815 = vmatprep.mubr.msk.bf16.mxu0 %vm947_vm2, %v944_v12 }
 0x12e   : > { %1708 = vmatmul.mubr.bf16.gmra.mrb[76].mxu1 %v1122_v10 }
 0x12f   : > { %2816 = vmatmul.mubr.msk.bf16.gmra.mrb[76].mxu0 %vm947_vm2, %v946_v2 }
 0x169   : > { %v2623_v59 = vpop.f32.mrb[0].mxu1 }
 0x16a   : > { %v2624_v49 = vpop.f32.mrb[1].mxu1  ;;  %v2551_v33 = vpop.f32.mrb[0].mxu0 }
 0x16b   : > { %v3721_v36 = vadd.f32 %v2624_v49, %v2623_v59  ;;  %v2626_v22 = vpop.f32.mrb[2].mxu1  ;;  %v2552_v19 = vpop.f32.mrb[1].mxu0 }
 0x16c   : > { %v2627_v34 = vpop.f32.mrb[3].mxu1  ;;  %v2553_v32 = vadd.f32 %v2552_v19, %v2551_v33  ;;  %v2554_v13 = vpop.f32.mrb[2].mxu0 }
 0x16d   : > { %v3723_v15 = vadd.f32 %v2627_v34, %v2626_v22  ;;  %v2555_v30 = vpop.f32.mrb[3].mxu0 }
 0x16e   : > { %v2556_v42 = vadd.f32 %v2555_v30, %v2554_v13  ;;  %v1429_v48 = vadd.f32 %v2553_v32, %v3740_v39 }
 0x170   : > { %v1432_v9 = vadd.f32 %v2556_v42, %v3740_v39 }
 0x171   : > { %v2629_v40 = vpop.f32.mrb[4].mxu1 }
 0x172   : > { %v2630_v6 = vpop.f32.mrb[5].mxu1  ;;  %v2557_v5 = vpop.f32.mrb[4].mxu0 }
 0x173   : > { %v3725_v20 = vadd.f32 %v2630_v6, %v2629_v40  ;;  %v2632_v45 = vpop.f32.mrb[6].mxu1  ;;  %v2558_v1 = vpop.f32.mrb[5].mxu0 }
 0x174   : > { %v2633_v46 = vpop.f32.mrb[7].mxu1  ;;  %v2559_v14 = vadd.f32 %v2558_v1, %v2557_v5  ;;  %v2560_v7 = vpop.f32.mrb[6].mxu0 }
 0x175   : > { %v3727_v38 = vadd.f32 %v2633_v46, %v2632_v45  ;;  %v2561_v55 = vpop.f32.mrb[7].mxu0 }
 0x176   : > { %v2562_v25 = vadd.f32 %v2561_v55, %v2560_v7  ;;  %v1437_v22 = vadd.f32 %v2559_v14, %v3740_v39 }
 0x178   : > { %v1440_v42 = vadd.f32 %v2562_v25, %v3740_v39 }
 0x179   : > { %v2635_v31 = vpop.f32.mrb[8].mxu1 }
 0x17a   : > { %v2636_v27 = vpop.f32.mrb[9].mxu1  ;;  %v2563_v0 = vpop.f32.mrb[8].mxu0 }
 0x17b   : > { %v3729_v50 = vadd.f32 %v2636_v27, %v2635_v31  ;;  %v2638_v47 = vpop.f32.mrb[10].mxu1  ;;  %v2564_v51 = vpop.f32.mrb[9].mxu0 }
 0x17c   : > { %v2639_v63 = vpop.f32.mrb[11].mxu1  ;;  %v2565_v11 = vadd.f32 %v2564_v51, %v2563_v0  ;;  %v2566_v21 = vpop.f32.mrb[10].mxu0 }
 0x17d   : > { %v3731_v18 = vadd.f32 %v2639_v63, %v2638_v47  ;;  %v2567_v61 = vpop.f32.mrb[11].mxu0 }
 0x17e   : > { %v2568_v43 = vadd.f32 %v2567_v61, %v2566_v21  ;;  %v1445_v14 = vadd.f32 %v2565_v11, %v3740_v39 }
 0x180   : > { %v1448_v25 = vadd.f32 %v2568_v43, %v3740_v39 }
 0x181   : > { %v2641_v37 = vpop.f32.mrb[12].mxu1 }
 0x182   : > { %v2642_v58 = vpop.f32.mrb[13].mxu1  ;;  %v2569_v56 = vpop.f32.mrb[12].mxu0 }
 0x183   : > { %v3733_v28 = vadd.f32 %v2642_v58, %v2641_v37  ;;  %v2644_v44 = vpop.f32.mrb[14].mxu1  ;;  %v2570_v54 = vpop.f32.mrb[13].mxu0 }
 0x184   : > { %v2645_v29 = vpop.f32.mrb[15].mxu1  ;;  %v2571_v60 = vadd.f32 %v2570_v54, %v2569_v56  ;;  %v2572_v3 = vpop.f32.mrb[14].mxu0 }
 0x185   : > { %v3735_v8 = vadd.f32 %v2645_v29, %v2644_v44  ;;  %v2573_v41 = vpop.f32.mrb[15].mxu0 }
 0x186   : > { %v2574_v53 = vadd.f32 %v2573_v41, %v2572_v3  ;;  %v1453_v11 = vadd.f32 %v2571_v60, %v3740_v39 }
 0x188   : > { %v1456_v43 = vadd.f32 %v2574_v53, %v3740_v39 }
 0x189   : > { %v2663_v26 = vpop.f32.mrb[16].mxu1 }
 0x18a   : > { %v2664_v23 = vpop.f32.mrb[17].mxu1  ;;  %v2575_v57 = vpop.f32.mrb[16].mxu0 }
 0x18b   : > { %v2665_v4 = vadd.f32 %v2664_v23, %v2663_v26  ;;  %v2666_v62 = vpop.f32.mrb[18].mxu1  ;;  %v2576_v24 = vpop.f32.mrb[17].mxu0 }
 0x18c   : > { %v2667_v16 = vpop.f32.mrb[19].mxu1  ;;  %v2577_v12 = vadd.f32 %v2576_v24, %v2575_v57  ;;  %v2578_v35 = vpop.f32.mrb[18].mxu0 }
 0x18d   : > { %v2668_v17 = vadd.f32 %v2667_v16, %v2666_v62  ;;  %v3744_v52 = vadd.f32 %v2665_v4, %v1429_v48  ;;  %v2579_v10 = vpop.f32.mrb[19].mxu0 }
 0x18e   : > { %v2580_v2 = vadd.f32 %v2579_v10, %v2578_v35  ;;  %v1461_v60 = vadd.f32 %v2577_v12, %v3740_v39 }
 0x18f   : > { %v3746_v59 = vadd.f32 %v2668_v17, %v1432_v9 }
 0x190   : > { %v1464_v53 = vadd.f32 %v2580_v2, %v3740_v39 }
 0x191   : > { %v2669_v49 = vpop.f32.mrb[20].mxu1 }
 0x192   : > { %v2670_v33 = vpop.f32.mrb[21].mxu1  ;;  %v2581_v19 = vpop.f32.mrb[20].mxu0 }
 0x193   : > { %v2671_v34 = vadd.f32 %v2670_v33, %v2669_v49  ;;  %v2672_v32 = vpop.f32.mrb[22].mxu1  ;;  %v2582_v13 = vpop.f32.mrb[21].mxu0 }
 0x194   : > { %v2673_v30 = vpop.f32.mrb[23].mxu1  ;;  %v2583_v40 = vadd.f32 %v2582_v13, %v2581_v19  ;;  %v2584_v6 = vpop.f32.mrb[22].mxu0 }
 0x195   : > { %v2674_v5 = vadd.f32 %v2673_v30, %v2672_v32  ;;  %v3750_v45 = vadd.f32 %v2671_v34, %v1437_v22  ;;  %v2585_v1 = vpop.f32.mrb[23].mxu0 }
 0x196   : > { %v2586_v46 = vadd.f32 %v2585_v1, %v2584_v6  ;;  %v1469_v12 = vadd.f32 %v2583_v40, %v3740_v39 }
 0x197   : > { %v3752_v7 = vadd.f32 %v2674_v5, %v1440_v42 }
 0x198   : > { %v1472_v2 = vadd.f32 %v2586_v46, %v3740_v39 }
 0x199   : > { %v2675_v55 = vpop.f32.mrb[24].mxu1 }
 0x19a   : > { %v2676_v31 = vpop.f32.mrb[25].mxu1  ;;  %v2587_v27 = vpop.f32.mrb[24].mxu0 }
 0x19b   : > { %v2677_v0 = vadd.f32 %v2676_v31, %v2675_v55  ;;  %v2678_v47 = vpop.f32.mrb[26].mxu1  ;;  %v2588_v51 = vpop.f32.mrb[25].mxu0 }
 0x19c   : > { %v2679_v63 = vpop.f32.mrb[27].mxu1  ;;  %v2589_v21 = vadd.f32 %v2588_v51, %v2587_v27  ;;  %v2590_v61 = vpop.f32.mrb[26].mxu0 }
 0x19d   : > { %v2680_v37 = vadd.f32 %v2679_v63, %v2678_v47  ;;  %v3756_v58 = vadd.f32 %v2677_v0, %v1445_v14  ;;  %v2591_v56 = vpop.f32.mrb[27].mxu0 }
 0x19e   : > { %v2592_v44 = vadd.f32 %v2591_v56, %v2590_v61 }
 0x19f   : > { %v3758_v54 = vadd.f32 %v2680_v37, %v1448_v25 }
 0x1a1   : > { %v2681_v29 = vpop.f32.mrb[28].mxu1 }
 0x1a2   : > { %v2682_v3 = vpop.f32.mrb[29].mxu1  ;;  %v2593_v41 = vpop.f32.mrb[28].mxu0 }
 0x1a3   : > { %v2683_v26 = vadd.f32 %v2682_v3, %v2681_v29  ;;  %v2684_v23 = vpop.f32.mrb[30].mxu1  ;;  %v2594_v48 = vpop.f32.mrb[29].mxu0 }
 0x1a4   : > { %v2685_v57 = vpop.f32.mrb[31].mxu1  ;;  %v2595_v4 = vadd.f32 %v2594_v48, %v2593_v41  ;;  %v2596_v62 = vpop.f32.mrb[30].mxu0 }
 0x1a5   : > { %v2686_v24 = vadd.f32 %v2685_v57, %v2684_v23  ;;  %v3762_v16 = vadd.f32 %v2683_v26, %v1453_v11  ;;  %v2597_v9 = vpop.f32.mrb[31].mxu0  ;;  %v1477_v26 = vadd.f32 %v2589_v21, %v3740_v39 }
 0x1a6   : > { %v2598_v35 = vadd.f32 %v2597_v9, %v2596_v62  ;;  %v1480_v62 = vadd.f32 %v2592_v44, %v3740_v39 }
 0x1a7   : > { %v3764_v17 = vadd.f32 %v2686_v24, %v1456_v43 }
 0x1a9   : > { %v2687_v10 = vpop.f32.mrb[32].mxu1 }
 0x1aa   : > { %v2688_v49 = vpop.f32.mrb[33].mxu1  ;;  %v2599_v33 = vpop.f32.mrb[32].mxu0 }
 0x1ab   : > { %v2689_v22 = vadd.f32 %v2688_v49, %v2687_v10  ;;  %v2690_v19 = vpop.f32.mrb[34].mxu1  ;;  %v2600_v34 = vpop.f32.mrb[33].mxu0 }
 0x1ac   : > { %v2691_v32 = vpop.f32.mrb[35].mxu1  ;;  %v2601_v13 = vadd.f32 %v2600_v34, %v2599_v33  ;;  %v2602_v30 = vpop.f32.mrb[34].mxu0  ;;  %v1485_v34 = vadd.f32 %v2595_v4, %v3740_v39 }
 0x1ad   : > { %v2692_v42 = vadd.f32 %v2691_v32, %v2690_v19  ;;  %v3768_v6 = vadd.f32 %v2689_v22, %v1461_v60  ;;  %v2603_v5 = vpop.f32.mrb[35].mxu0 }
 0x1ae   : > { %v2604_v1 = vadd.f32 %v2603_v5, %v2602_v30  ;;  %v1488_v5 = vadd.f32 %v2598_v35, %v3740_v39 }
 0x1af   : > { %v3770_v55 = vadd.f32 %v2692_v42, %v1464_v53 }
 0x1b1   : > { %v2693_v31 = vpop.f32.mrb[36].mxu1 }
 0x1b2   : > { %v2694_v14 = vpop.f32.mrb[37].mxu1  ;;  %v2605_v27 = vpop.f32.mrb[36].mxu0 }
 0x1b3   : > { %v2695_v0 = vadd.f32 %v2694_v14, %v2693_v31  ;;  %v2696_v47 = vpop.f32.mrb[38].mxu1  ;;  %v2606_v51 = vpop.f32.mrb[37].mxu0 }
 0x1b4   : > { %v2697_v63 = vpop.f32.mrb[39].mxu1  ;;  %v3774_v25 = vadd.f32 %v2606_v51, %v2605_v27  ;;  %v2608_v61 = vpop.f32.mrb[38].mxu0 }
 0x1b5   : > { %v2698_v37 = vadd.f32 %v2697_v63, %v2696_v47  ;;  %v3776_v56 = vadd.f32 %v2695_v0, %v1469_v12  ;;  %v2609_v29 = vpop.f32.mrb[39].mxu0 }
 0x1b6   : > { %v3778_v3 = vadd.f32 %v2609_v29, %v2608_v61 }
 0x1b7   : > { %v3780_v11 = vadd.f32 %v2698_v37, %v1472_v2  ;;  %v1493_v2 = vadd.f32 %v2601_v13, %v3740_v39 }
 0x1b9   : > { %v2699_v41 = vpop.f32.mrb[40].mxu1 }
 0x1ba   : > { %v2700_v40 = vpop.f32.mrb[41].mxu1  ;;  %v2611_v23 = vpop.f32.mrb[40].mxu0 }
 0x1bb   : > { %v2701_v48 = vadd.f32 %v2700_v40, %v2699_v41  ;;  %v2702_v57 = vpop.f32.mrb[42].mxu1  ;;  %v2612_v43 = vpop.f32.mrb[41].mxu0 }
 0x1bc   : > { %v2703_v46 = vpop.f32.mrb[43].mxu1  ;;  %v3784_v24 = vadd.f32 %v2612_v43, %v2611_v23  ;;  %v2614_v9 = vpop.f32.mrb[42].mxu0 }
 0x1bd   : > { %v2704_v10 = vadd.f32 %v2703_v46, %v2702_v57  ;;  %v3786_v49 = vadd.f32 %v2701_v48, %v1477_v26  ;;  %v2615_v60 = vpop.f32.mrb[43].mxu0  ;;  %v1496_v26 = vadd.f32 %v2604_v1, %v3740_v39 }
 0x1be   : > { %v3788_v33 = vadd.f32 %v2615_v60, %v2614_v9 }
 0x1bf   : > { %v3790_v22 = vadd.f32 %v2704_v10, %v1480_v62 }
 0x1c1   : > { %v2705_v19 = vpop.f32.mrb[44].mxu1 }
 0x1c2   : > { %v2706_v21 = vpop.f32.mrb[45].mxu1  ;;  %v2617_v32 = vpop.f32.mrb[44].mxu0 }
 0x1c3   : > { %v2707_v53 = vadd.f32 %v2706_v21, %v2705_v19  ;;  %v2708_v30 = vpop.f32.mrb[46].mxu1  ;;  %v2618_v42 = vpop.f32.mrb[45].mxu0 }
 0x1c4   : > { %v2709_v44 = vpop.f32.mrb[47].mxu1  ;;  %v3794_v31 = vadd.f32 %v2618_v42, %v2617_v32  ;;  %v2620_v14 = vpop.f32.mrb[46].mxu0 }
 0x1c5   : > { %v2710_v12 = vadd.f32 %v2709_v44, %v2708_v30  ;;  %v3796_v27 = vadd.f32 %v2707_v53, %v1485_v34  ;;  %v2621_v0 = vpop.f32.mrb[47].mxu0 }
 0x1c6   : > { %v3798_v47 = vadd.f32 %v2621_v0, %v2620_v14  ;;  %v1504_v14 = vadd.f32 %v3778_v3, %v3740_v39 }
 0x1c7   : > { %v3800_v51 = vadd.f32 %v2710_v12, %v1488_v5 }
 0x1c9   : > { %v2711_v63 = vpop.f32.mrb[48].mxu1 }
 0x1ca   : > { %v2712_v4 = vpop.f32.mrb[49].mxu1  ;;  %v2789_v37 = vpop.f32.mrb[48].mxu0 }
 0x1cb   : > { %v2713_v61 = vadd.f32 %v2712_v4, %v2711_v63  ;;  %v2714_v29 = vpop.f32.mrb[50].mxu1  ;;  %v1759_v35 = vadd.f32 %v2789_v37, %v3750_v45  ;;  %v1750_v41 = vpop.f32.mrb[49].mxu0 }
 0x1cc   : > { %v2715_v40 = vpop.f32.mrb[51].mxu1  ;;  %v1751_v23 = vadd.f32 %v1750_v41, %v3744_v52  ;;  %v2790_v57 = vpop.f32.mrb[50].mxu0 }
 0x1cd   : > { %v2716_v48 = vadd.f32 %v2715_v40, %v2714_v29  ;;  %v3806_v43 = vadd.f32 %v2713_v61, %v1493_v2  ;;  %v1762_v46 = vadd.f32 %v2790_v57, %v3752_v7  ;;  %v1753_v62 = vpop.f32.mrb[51].mxu0  ;;  %v1879_v10 = vmax.f32 %v1759_v35, 0.0 }
 0x1ce   : > { %v1754_v13 = vadd.f32 %v1753_v62, %v3746_v59  ;;  %v1877_v45 = vmax.f32 %v1751_v23, 0.0  ;;  %v1501_v7 = vadd.f32 %v3774_v25, %v3740_v39 }
 0x1cf   : > { %v3810_v9 = vadd.f32 %v2716_v48, %v1496_v26  ;;  %v1880_v60 = vmax.f32 %v1762_v46, 0.0 }
 0x1d0   : > { %v1878_v19 = vmax.f32 %v1754_v13, 0.0  ;;  %v1509_v13 = vadd.f32 %v3784_v24, %v3740_v39 }
 0x1d1   : > { %v2717_v21 = vpop.f32.mrb[52].mxu1  ;;  %v1910_v34 = vpack.c.bf16 %v1880_v60, %v1879_v10  ;;  %v1512_v10 = vadd.f32 %v3788_v33, %v3740_v39 }
 0x1d2   : > { %v2718_v52 = vpop.f32.mrb[53].mxu1  ;;  %v1909_v1 = vpack.c.bf16 %v1878_v19, %v1877_v45  ;;  %v2793_v53 = vpop.f32.mrb[52].mxu0 }
 0x1d3   : > { %v2719_v32 = vadd.f32 %v2718_v52, %v2717_v21  ;;  %v2720_v30 = vpop.f32.mrb[54].mxu1  ;;  %v1934_v59 = vshrl.u32 %v1910_v34, 16  ;;  %v1775_v42 = vadd.f32 %v2793_v53, %v3762_v16  ;;  %v1766_v44 = vpop.f32.mrb[53].mxu0  ;;  %v1937_v61 = vshll.u32 %v1910_v34, 16 }
 0x1d4   : > { %v2721_v5 = vpop.f32.mrb[55].mxu1  ;;  %v1927_v0 = vshrl.u32 %v1909_v1, 16  ;;  %v1767_v63 = vadd.f32 %v1766_v44, %v3756_v58  ;;  %v2794_v25 = vpop.f32.mrb[54].mxu0  ;;  %v1930_v41 = vshll.u32 %v1909_v1, 16 }
 0x1d5   : > { %v2722_v4 = vadd.f32 %v2721_v5, %v2720_v30  ;;  %v1936_v2 = vrot.slane %v1934_v59, 7  ;;  %v1778_v16 = vadd.f32 %v2794_v25, %v3764_v17  ;;  %v1769_v37 = vpop.f32.mrb[55].mxu0  ;;  %v3824_v29 = vadd.f32 %v2719_v32, %v1501_v7 }
 0x1d6   : > { %v1929_v35 = vrot.slane %v1927_v0, 7  ;;  %v1770_v3 = vadd.f32 %v1769_v37, %v3758_v54  ;;  %v1883_v26 = vmax.f32 %v1775_v42, 0.0  ;;  %v1881_v46 = vmax.f32 %v1767_v63, 0.0 }
 0x1d7   : > { %v3827_v40 = vadd.f32 %v2722_v4, %v1504_v14  ;;  %v1939_v58 = vor.u32 %v1937_v61, %v1936_v2  ;;  %v2072_v17 = vsel %vm3818_vm7, %v1936_v2, 0  ;;  %v1884_v23 = vmax.f32 %v1778_v16, 0.0 }
 0x1d8   : > { %v2497_v48 = vcombine.low %v2072_v17, %v2072_v17  ;;  %v1932_v57 = vor.u32 %v1930_v41, %v1929_v35  ;;  %v1882_v62 = vmax.f32 %v1770_v3, 0.0 }
 0x1d9   : > { %v2723_v54 = vpop.f32.mrb[56].mxu1  ;;  %v1940_v60 = vsel %vm1925_vm3, %v1929_v35, %v1939_v58  ;;  %v1912_v45 = vpack.c.bf16 %v1884_v23, %v1883_v26 }
 0x1da   : > { %v2724_v19 = vpop.f32.mrb[57].mxu1  ;;  %2222 = vst.msk [vmem:[%s3834_s19 + $0x10] sm:$0x1] %vm2221_vm5, %v2497_v48  ;;  %v2064_v21 = vsel %vm3818_vm7, 0, %v1932_v57  ;;  %v2495_v34 = vcombine.low %v1940_v60, %v1940_v60  ;;  %v2496_v52 = vcombine.high %v1940_v60, %v1940_v60  ;;  %v1911_v1 = vpack.c.bf16 %v1882_v62, %v1881_v46  ;;  %v2797_v32 = vpop.f32.mrb[56].mxu0 }
 0x1db   : > { %v2726_v24 = vpop.f32.mrb[58].mxu1  ;;  %v2493_v53 = vcombine.low %v2064_v21, %v2064_v21  ;;  %v2494_v33 = vcombine.high %v2064_v21, %v2064_v21  ;;  %v1949_v30 = vshrl.u32 %v1912_v45, 16  ;;  %v1952_v7 = vshll.u32 %v1912_v45, 16  ;;  %v1782_v59 = vpop.f32.mrb[57].mxu0 }
 0x1dc   : > { %v2727_v42 = vpop.f32.mrb[59].mxu1  ;;  %2219 = vst.msk [vmem:[%s3834_s19 + $0x8] sm:$0xf] %vm2216_vm6, %v2495_v34  ;;  %2220 = vst.msk [vmem:[%s3834_s19 + $0xc] sm:$0xf] %vm2216_vm6, %v2496_v52  ;;  %v1942_v44 = vshrl.u32 %v1911_v1, 16  ;;  %v2725_v14 = vadd.f32 %v2724_v19, %v2723_v54  ;;  %v1791_v0 = vadd.f32 %v2797_v32, %v3776_v56  ;;  %v1783_v25 = vadd.f32 %v1782_v59, %v3768_v6 }
 0x1dd   : > { %v1945_v5 = vshll.u32 %v1911_v1, 16  ;;  %v2798_v63 = vpop.f32.mrb[58].mxu0  ;;  %2217 = vst.msk [vmem:[%s3834_s19] sm:$0xf] %vm2216_vm6, %v2493_v53  ;;  %2218 = vst.msk [vmem:[%s3834_s19 + $0x4] sm:$0xf] %vm2216_vm6, %v2494_v33  ;;  %v2728_v2 = vadd.f32 %v2727_v42, %v2726_v24 }
 0x1de   : > { %v1951_v4 = vrot.slane %v1949_v30, 7  ;;  %v1794_v61 = vadd.f32 %v2798_v63, %v3780_v11  ;;  %v1785_v16 = vpop.f32.mrb[59].mxu0  ;;  %v1944_v37 = vrot.slane %v1942_v44, 7  ;;  %v1887_v35 = vmax.f32 %v1791_v0, 0.0 }
 0x1df   : > { %v1786_v41 = vadd.f32 %v1785_v16, %v3770_v55  ;;  %v3859_v3 = vadd.f32 %v2725_v14, %v1509_v13  ;;  %v1885_v17 = vmax.f32 %v1783_v25, 0.0  ;;  %v3863_v46 = vadd.f32 %v2728_v2, %v1512_v10 }
 0x1e0   : > { %v1954_v56 = vor.u32 %v1952_v7, %v1951_v4  ;;  %v2073_v58 = vsel %vm3818_vm7, %v1951_v4, 0  ;;  %v1888_v26 = vmax.f32 %v1794_v61, 0.0  ;;  %v1947_v48 = vor.u32 %v1945_v5, %v1944_v37 }
 0x1e1   : > { %v2502_v23 = vcombine.low %v2073_v58, %v2073_v58  ;;  %v1886_v6 = vmax.f32 %v1786_v41, 0.0  ;;  %v2729_v57 = vpop.f32.mrb[60].mxu1  ;;  %v1517_v11 = vadd.f32 %v3794_v31, %v3740_v39  ;;  %v1520_v55 = vadd.f32 %v3798_v47, %v3740_v39 }
 0x1e2   : > { %v1955_v62 = vsel %vm1925_vm3, %v1944_v37, %v1954_v56  ;;  %v1914_v54 = vpack.c.bf16 %v1888_v26, %v1887_v35  ;;  %v2730_v13 = vpop.f32.mrb[61].mxu1  ;;  %v2065_v60 = vsel %vm3818_vm7, 0, %v1947_v48  ;;  %v2801_v21 = vpop.f32.mrb[60].mxu0 }
 0x1e3   : > { %2227 = vst.msk [vmem:[%s3834_s19 + $0x24] sm:$0x1] %vm2221_vm5, %v2502_v23  ;;  %v2500_v45 = vcombine.low %v1955_v62, %v1955_v62  ;;  %v2501_v10 = vcombine.high %v1955_v62, %v1955_v62  ;;  %v1913_v19 = vpack.c.bf16 %v1886_v6, %v1885_v17  ;;  %v2732_v31 = vpop.f32.mrb[62].mxu1  ;;  %v2498_v34 = vcombine.low %v2065_v60, %v2065_v60  ;;  %v1798_v32 = vpop.f32.mrb[61].mxu0 }
 0x1e4   : > { %v2499_v47 = vcombine.high %v2065_v60, %v2065_v60  ;;  %v1964_v52 = vshrl.u32 %v1914_v54, 16  ;;  %v1967_v1 = vshll.u32 %v1914_v54, 16  ;;  %v2733_v24 = vpop.f32.mrb[63].mxu1  ;;  %v2731_v30 = vadd.f32 %v2730_v13, %v2729_v57  ;;  %v2802_v59 = vpop.f32.mrb[62].mxu0 }
 0x1e5   : > { %2225 = vst.msk [vmem:[%s3834_s19 + $0x1c] sm:$0xf] %vm2216_vm6, %v2500_v45  ;;  %2226 = vst.msk [vmem:[%s3834_s19 + $0x20] sm:$0xf] %vm2216_vm6, %v2501_v10  ;;  %v1957_v53 = vshrl.u32 %v1913_v19, 16  ;;  %v1960_v33 = vshll.u32 %v1913_v19, 16  ;;  %v1807_v7 = vadd.f32 %v2801_v21, %v3796_v27  ;;  %v1799_v44 = vadd.f32 %v1798_v32, %v3786_v49 }
 0x1e6   : > { %2223 = vst.msk [vmem:[%s3834_s19 + $0x14] sm:$0xf] %vm2216_vm6, %v2498_v34  ;;  %2224 = vst.msk [vmem:[%s3834_s19 + $0x18] sm:$0xf] %vm2216_vm6, %v2499_v47  ;;  %v1966_v42 = vrot.slane %v1964_v52, 7  ;;  %v2734_v5 = vadd.f32 %v2733_v24, %v2732_v31  ;;  %v1810_v14 = vadd.f32 %v2802_v59, %v3800_v51  ;;  %v1801_v0 = vpop.f32.mrb[63].mxu0  ;;  %v3886_v2 = vadd.f32 %v2731_v30, %v1517_v11 }
 0x1e7   : > { %v1959_v63 = vrot.slane %v1957_v53, 7  ;;  %v1891_v4 = vmax.f32 %v1807_v7, 0.0  ;;  %v1802_v25 = vadd.f32 %v1801_v0, %v3790_v22  ;;  %v1889_v16 = vmax.f32 %v1799_v44, 0.0 }
 0x1e8   : > { %v1969_v27 = vor.u32 %v1967_v1, %v1966_v42  ;;  %v2074_v61 = vsel %vm3818_vm7, %v1966_v42, 0  ;;  %v1892_v37 = vmax.f32 %v1810_v14, 0.0  ;;  %v3890_v58 = vadd.f32 %v2734_v5, %v1520_v55 }
 0x1e9   : > { %v2507_v35 = vcombine.low %v2074_v61, %v2074_v61  ;;  %v1962_v41 = vor.u32 %v1960_v33, %v1959_v63  ;;  %v1890_v49 = vmax.f32 %v1802_v25, 0.0  ;;  %v2735_v56 = vpop.f32.mrb[64].mxu1  ;;  %v1525_v51 = vadd.f32 %v3721_v36, %v3740_v39 }
 0x1ea   : > { %v1528_v22 = vadd.f32 %v3723_v15, %v3740_v39  ;;  %v1970_v17 = vsel %vm1925_vm3, %v1959_v63, %v1969_v27  ;;  %v1916_v26 = vpack.c.bf16 %v1892_v37, %v1891_v4  ;;  %v2736_v23 = vpop.f32.mrb[65].mxu1  ;;  %v2805_v55 = vpop.f32.mrb[64].mxu0 }
 0x1eb   : > { %2232 = vst.msk [vmem:[%s3834_s19 + $0x38] sm:$0x1] %vm2221_vm5, %v2507_v35  ;;  %v2066_v48 = vsel %vm3818_vm7, 0, %v1962_v41  ;;  %v2505_v6 = vcombine.low %v1970_v17, %v1970_v17  ;;  %v2506_v57 = vcombine.high %v1970_v17, %v1970_v17  ;;  %v1915_v11 = vpack.c.bf16 %v1890_v49, %v1889_v16  ;;  %v2738_v36 = vpop.f32.mrb[66].mxu1  ;;  %v1814_v60 = vpop.f32.mrb[65].mxu0 }
 0x1ec   : > { %v2503_v62 = vcombine.low %v2066_v48, %v2066_v48  ;;  %v2504_v15 = vcombine.high %v2066_v48, %v2066_v48  ;;  %v1979_v54 = vshrl.u32 %v1916_v26, 16  ;;  %v1982_v13 = vshll.u32 %v1916_v26, 16  ;;  %v2739_v45 = vpop.f32.mrb[67].mxu1  ;;  %v2806_v34 = vpop.f32.mrb[66].mxu0 }
 0x1ed   : > { %2230 = vst.msk [vmem:[%s3834_s19 + $0x30] sm:$0xf] %vm2216_vm6, %v2505_v6  ;;  %2231 = vst.msk [vmem:[%s3834_s19 + $0x34] sm:$0xf] %vm2216_vm6, %v2506_v57  ;;  %v1972_v10 = vshrl.u32 %v1915_v11, 16  ;;  %v1975_v19 = vshll.u32 %v1915_v11, 16  ;;  %v2737_v21 = vadd.f32 %v2736_v23, %v2735_v56  ;;  %v1823_v31 = vadd.f32 %v2805_v55, %v3824_v29 }
 0x1ee   : > { %2228 = vst.msk [vmem:[%s3834_s19 + $0x28] sm:$0xf] %vm2216_vm6, %v2503_v62  ;;  %2229 = vst.msk [vmem:[%s3834_s19 + $0x2c] sm:$0xf] %vm2216_vm6, %v2504_v15  ;;  %v1981_v47 = vrot.slane %v1979_v54, 7  ;;  %v1815_v52 = vadd.f32 %v1814_v60, %v3806_v43  ;;  %v2740_v1 = vadd.f32 %v2739_v45, %v2738_v36  ;;  %v1826_v32 = vadd.f32 %v2806_v34, %v3827_v40  ;;  %v1817_v24 = vpop.f32.mrb[67].mxu0 }
 0x1ef   : > { %v1974_v53 = vrot.slane %v1972_v10, 7  ;;  %v1895_v33 = vmax.f32 %v1823_v31, 0.0  ;;  %v1818_v30 = vadd.f32 %v1817_v24, %v3810_v9  ;;  %v3913_v7 = vadd.f32 %v2737_v21, %v1525_v51 }
 0x1f0   : > { %v1984_v29 = vor.u32 %v1982_v13, %v1981_v47  ;;  %v2075_v59 = vsel %vm3818_vm7, %v1981_v47, 0  ;;  %v1893_v42 = vmax.f32 %v1815_v52, 0.0  ;;  %v1896_v44 = vmax.f32 %v1826_v32, 0.0 }
 0x1f1   : > { %v2512_v5 = vcombine.low %v2075_v59, %v2075_v59  ;;  %v1977_v14 = vor.u32 %v1975_v19, %v1974_v53  ;;  %v1894_v43 = vmax.f32 %v1818_v30, 0.0  ;;  %v2741_v0 = vpop.f32.mrb[68].mxu1  ;;  %v3917_v63 = vadd.f32 %v2740_v1, %v1528_v22 }
 0x1f2   : > { %v1533_v40 = vadd.f32 %v3725_v20, %v3740_v39  ;;  %v1536_v9 = vadd.f32 %v3727_v38, %v3740_v39  ;;  %v1985_v4 = vsel %vm1925_vm3, %v1974_v53, %v1984_v29  ;;  %v1918_v25 = vpack.c.bf16 %v1896_v44, %v1895_v33  ;;  %v2742_v27 = vpop.f32.mrb[69].mxu1  ;;  %v2809_v41 = vpop.f32.mrb[68].mxu0 }
 0x1f3   : > { %2237 = vst.msk [vmem:[%s3834_s19 + $0x4c] sm:$0x1] %vm2221_vm5, %v2512_v5  ;;  %v2067_v61 = vsel %vm3818_vm7, 0, %v1977_v14  ;;  %v2510_v16 = vcombine.low %v1985_v4, %v1985_v4  ;;  %v2511_v37 = vcombine.high %v1985_v4, %v1985_v4  ;;  %v1917_v35 = vpack.c.bf16 %v1894_v43, %v1893_v42  ;;  %v2744_v20 = vpop.f32.mrb[70].mxu1  ;;  %v1830_v22 = vpop.f32.mrb[69].mxu0 }
 0x1f4   : > { %v2508_v49 = vcombine.low %v2067_v61, %v2067_v61  ;;  %v2509_v38 = vcombine.high %v2067_v61, %v2067_v61  ;;  %v1994_v56 = vshrl.u32 %v1918_v25, 16  ;;  %v1997_v51 = vshll.u32 %v1918_v25, 16  ;;  %v2745_v17 = vpop.f32.mrb[71].mxu1  ;;  %v2810_v57 = vpop.f32.mrb[70].mxu0 }
 0x1f5   : > { %2235 = vst.msk [vmem:[%s3834_s19 + $0x44] sm:$0xf] %vm2216_vm6, %v2510_v16  ;;  %2236 = vst.msk [vmem:[%s3834_s19 + $0x48] sm:$0xf] %vm2216_vm6, %v2511_v37  ;;  %v1987_v26 = vshrl.u32 %v1917_v35, 16  ;;  %v1990_v23 = vshll.u32 %v1917_v35, 16  ;;  %v2743_v48 = vadd.f32 %v2742_v27, %v2741_v0  ;;  %v1839_v6 = vadd.f32 %v2809_v41, %v3886_v2 }
 0x1f6   : > { %2233 = vst.msk [vmem:[%s3834_s19 + $0x3c] sm:$0xf] %vm2216_vm6, %v2508_v49  ;;  %2234 = vst.msk [vmem:[%s3834_s19 + $0x40] sm:$0xf] %vm2216_vm6, %v2509_v38  ;;  %v1996_v11 = vrot.slane %v1994_v56, 7  ;;  %v1831_v55 = vadd.f32 %v1830_v22, %v3859_v3  ;;  %v2746_v36 = vadd.f32 %v2745_v17, %v2744_v20  ;;  %v1842_v62 = vadd.f32 %v2810_v57, %v3890_v58  ;;  %v1833_v15 = vpop.f32.mrb[71].mxu0 }
 0x1f7   : > { %v1989_v54 = vrot.slane %v1987_v26, 7  ;;  %v1899_v13 = vmax.f32 %v1839_v6, 0.0  ;;  %v1834_v60 = vadd.f32 %v1833_v15, %v3863_v46  ;;  %v1694_v45 = vadd.f32 %v2743_v48, %v1533_v40 }
 0x1f8   : > { %v1999_v10 = vor.u32 %v1997_v51, %v1996_v11  ;;  %v2076_v2 = vsel %vm3818_vm7, %v1996_v11, 0  ;;  %v1897_v19 = vmax.f32 %v1831_v55, 0.0  ;;  %v1900_v21 = vmax.f32 %v1842_v62, 0.0 }
 0x1f9   : > { %v2517_v31 = vcombine.low %v2076_v2, %v2076_v2  ;;  %v1992_v34 = vor.u32 %v1990_v23, %v1989_v54  ;;  %v1898_v47 = vmax.f32 %v1834_v60, 0.0  ;;  %v2747_v3 = vpop.f32.mrb[72].mxu1  ;;  %v1697_v52 = vadd.f32 %v2746_v36, %v1536_v9 }
 0x1fa   : > { %v1541_v58 = vadd.f32 %v3729_v50, %v3740_v39  ;;  %v1544_v1 = vadd.f32 %v3731_v18, %v3740_v39  ;;  %v2000_v46 = vsel %vm1925_vm3, %v1989_v54, %v1999_v10  ;;  %v1920_v32 = vpack.c.bf16 %v1900_v21, %v1899_v13  ;;  %v2748_v24 = vpop.f32.mrb[73].mxu1  ;;  %v2813_v59 = vpop.f32.mrb[72].mxu0 }
 0x1fb   : > { %2242 = vst.msk [vmem:[%s3834_s19 + $0x60] sm:$0x1] %vm2221_vm5, %v2517_v31  ;;  %v2068_v53 = vsel %vm3818_vm7, 0, %v1992_v34  ;;  %v2515_v33 = vcombine.low %v2000_v46, %v2000_v46  ;;  %v2516_v30 = vcombine.high %v2000_v46, %v2000_v46  ;;  %v1919_v29 = vpack.c.bf16 %v1898_v47, %v1897_v19  ;;  %v2750_v50 = vpop.f32.mrb[74].mxu1  ;;  %v1846_v14 = vpop.f32.mrb[73].mxu0 }
 0x1fc   : > { %v2513_v42 = vcombine.low %v2068_v53, %v2068_v53  ;;  %v2514_v18 = vcombine.high %v2068_v53, %v2068_v53  ;;  %v2009_v44 = vshrl.u32 %v1920_v32, 16  ;;  %v2012_v5 = vshll.u32 %v1920_v32, 16  ;;  %v2751_v43 = vpop.f32.mrb[75].mxu1  ;;  %v2814_v25 = vpop.f32.mrb[74].mxu0 }
 0x1fd   : > { %2240 = vst.msk [vmem:[%s3834_s19 + $0x58] sm:$0xf] %vm2216_vm6, %v2515_v33  ;;  %2241 = vst.msk [vmem:[%s3834_s19 + $0x5c] sm:$0xf] %vm2216_vm6, %v2516_v30  ;;  %v2002_v0 = vshrl.u32 %v1919_v29, 16  ;;  %v2005_v40 = vshll.u32 %v1919_v29, 16  ;;  %v2749_v9 = vadd.f32 %v2748_v24, %v2747_v3  ;;  %v1855_v4 = vadd.f32 %v2813_v59, %v1694_v45 }
 0x1fe   : > { %2238 = vst.msk [vmem:[%s3834_s19 + $0x50] sm:$0xf] %vm2216_vm6, %v2513_v42  ;;  %2239 = vst.msk [vmem:[%s3834_s19 + $0x54] sm:$0xf] %vm2216_vm6, %v2514_v18  ;;  %v2011_v27 = vrot.slane %v2009_v44, 7  ;;  %v1847_v61 = vadd.f32 %v1846_v14, %v3913_v7  ;;  %v2752_v16 = vadd.f32 %v2751_v43, %v2750_v50  ;;  %v1858_v37 = vadd.f32 %v2814_v25, %v1697_v52  ;;  %v1849_v35 = vpop.f32.mrb[75].mxu0 }
 0x1ff   : > { %v2004_v41 = vrot.slane %v2002_v0, 7  ;;  %v1903_v20 = vmax.f32 %v1855_v4, 0.0  ;;  %v1850_v49 = vadd.f32 %v1849_v35, %v3917_v63  ;;  %v1702_v38 = vadd.f32 %v2749_v9, %v1541_v58 }
 0x200   : > { %v2014_v56 = vor.u32 %v2012_v5, %v2011_v27  ;;  %v2077_v51 = vsel %vm3818_vm7, %v2011_v27, 0  ;;  %v1901_v22 = vmax.f32 %v1847_v61, 0.0  ;;  %v1904_v17 = vmax.f32 %v1858_v37, 0.0 }
 0x201   : > { %v2522_v26 = vcombine.low %v2077_v51, %v2077_v51  ;;  %v2007_v23 = vor.u32 %v2005_v40, %v2004_v41  ;;  %v1902_v48 = vmax.f32 %v1850_v49, 0.0  ;;  %v2753_v6 = vpop.f32.mrb[76].mxu1  ;;  %v1705_v7 = vadd.f32 %v2752_v16, %v1544_v1 }
 0x202   : > { %v2015_v57 = vsel %vm1925_vm3, %v2004_v41, %v2014_v56  ;;  %v1922_v11 = vpack.c.bf16 %v1904_v17, %v1903_v20  ;;  %v2754_v55 = vpop.f32.mrb[77].mxu1  ;;  %v2817_v54 = vpop.f32.mrb[76].mxu0  ;;  %v1549_v21 = vadd.f32 %v3733_v28, %v3740_v39  ;;  %v1552_v52 = vadd.f32 %v3735_v8, %v3740_v39 }
 0x203   : > { %2247 = vst.msk [vmem:[%s3834_s19 + $0x74] sm:$0x1] %vm2221_vm5, %v2522_v26  ;;  %v2069_v63 = vsel %vm3818_vm7, 0, %v2007_v23  ;;  %v2520_v36 = vcombine.low %v2015_v57, %v2015_v57  ;;  %v2521_v62 = vcombine.high %v2015_v57, %v2015_v57  ;;  %v1921_v15 = vpack.c.bf16 %v1902_v48, %v1901_v22  ;;  %v2756_v13 = vpop.f32.mrb[78].mxu1  ;;  %v1862_v2 = vpop.f32.mrb[77].mxu0 }
 0x204   : > { %v2518_v60 = vcombine.low %v2069_v63, %v2069_v63  ;;  %v2519_v45 = vcombine.high %v2069_v63, %v2069_v63  ;;  %v2024_v10 = vshrl.u32 %v1922_v11, 16  ;;  %v2757_v19 = vpop.f32.mrb[79].mxu1  ;;  %v2755_v34 = vadd.f32 %v2754_v55, %v2753_v6  ;;  %v2818_v3 = vpop.f32.mrb[78].mxu0 }
 0x205   : > { %2245 = vst.msk [vmem:[%s3834_s19 + $0x6c] sm:$0xf] %vm2216_vm6, %v2520_v36  ;;  %2246 = vst.msk [vmem:[%s3834_s19 + $0x70] sm:$0xf] %vm2216_vm6, %v2521_v62  ;;  %v2017_v31 = vshrl.u32 %v1921_v15, 16  ;;  %v1863_v47 = vadd.f32 %v1862_v2, %v1702_v38  ;;  %v2027_v1 = vshll.u32 %v1922_v11, 16  ;;  %v2758_v46 = vadd.f32 %v2757_v19, %v2756_v13 }
 0x206   : > { %2243 = vst.msk [vmem:[%s3834_s19 + $0x64] sm:$0xf] %vm2216_vm6, %v2518_v60  ;;  %2244 = vst.msk [vmem:[%s3834_s19 + $0x68] sm:$0xf] %vm2216_vm6, %v2519_v45  ;;  %v2026_v58 = vrot.slane %v2024_v10, 7  ;;  %v1865_v28 = vpop.f32.mrb[79].mxu0  ;;  %v1710_v53 = vadd.f32 %v2755_v34, %v1549_v21 }
 0x207   : > { %v2019_v32 = vrot.slane %v2017_v31, 7  ;;  %v2020_v24 = vshll.u32 %v1921_v15, 16  ;;  %v1866_v33 = vadd.f32 %v1865_v28, %v1705_v7  ;;  %v1713_v59 = vadd.f32 %v2758_v46, %v1552_v52 }
 0x208   : > { %v2029_v30 = vor.u32 %v2027_v1, %v2026_v58  ;;  %v2078_v29 = vsel %vm3818_vm7, %v2026_v58, 0  ;;  %v1871_v39 = vadd.f32 %v2817_v54, %v1710_v53  ;;  %v1905_v44 = vmax.f32 %v1863_v47, 0.0 }
 0x209   : > { %v2527_v50 = vcombine.low %v2078_v29, %v2078_v29  ;;  %v2022_v8 = vor.u32 %v2020_v24, %v2019_v32  ;;  %v1906_v42 = vmax.f32 %v1866_v33, 0.0  ;;  %v1874_v5 = vadd.f32 %v2818_v3, %v1713_v59 }
 0x20a   : > { %v2030_v18 = vsel %vm1925_vm3, %v2019_v32, %v2029_v30  ;;  %v1907_v40 = vmax.f32 %v1871_v39, 0.0 }
 0x20b   : > { %2252 = vst.msk [vmem:[%s3834_s19 + $0x88] sm:$0x1] %vm2221_vm5, %v2527_v50  ;;  %v2070_v14 = vsel %vm3818_vm7, 0, %v2022_v8  ;;  %v2525_v43 = vcombine.low %v2030_v18, %v2030_v18  ;;  %v2526_v0 = vcombine.high %v2030_v18, %v2030_v18  ;;  %v1908_v25 = vmax.f32 %v1874_v5, 0.0 }
 0x20c   : > { %v2523_v9 = vcombine.low %v2070_v14, %v2070_v14  ;;  %v2524_v4 = vcombine.high %v2070_v14, %v2070_v14  ;;  %v1923_v27 = vpack.c.bf16 %v1906_v42, %v1905_v44 }
 0x20d   : > { %2250 = vst.msk [vmem:[%s3834_s19 + $0x80] sm:$0xf] %vm2216_vm6, %v2525_v43  ;;  %2251 = vst.msk [vmem:[%s3834_s19 + $0x84] sm:$0xf] %vm2216_vm6, %v2526_v0  ;;  %v1924_v61 = vpack.c.bf16 %v1908_v25, %v1907_v40 }
 0x20e   : > { %2248 = vst.msk [vmem:[%s3834_s19 + $0x78] sm:$0xf] %vm2216_vm6, %v2523_v9  ;;  %2249 = vst.msk [vmem:[%s3834_s19 + $0x7c] sm:$0xf] %vm2216_vm6, %v2524_v4  ;;  %v2032_v16 = vshrl.u32 %v1923_v27, 16  ;;  %v2035_v41 = vshll.u32 %v1923_v27, 16 }
 0x20f   : > { %v2039_v37 = vshrl.u32 %v1924_v61, 16  ;;  %v2042_v49 = vshll.u32 %v1924_v61, 16 }
 0x210   : > { %v2034_v35 = vrot.slane %v2032_v16, 7 }
 0x211   : > { %v2041_v20 = vrot.slane %v2039_v37, 7 }
 0x212   : > { %v2037_v38 = vor.u32 %v2035_v41, %v2034_v35 }
 0x213   : > { %v2044_v56 = vor.u32 %v2042_v49, %v2041_v20  ;;  %v2079_v51 = vsel %vm3818_vm7, %v2041_v20, 0 }
 0x214   : > { %v2071_v22 = vsel %vm3818_vm7, 0, %v2037_v38  ;;  %v2532_v17 = vcombine.low %v2079_v51, %v2079_v51 }
 0x215   : > { %v2528_v26 = vcombine.low %v2071_v22, %v2071_v22  ;;  %v2529_v23 = vcombine.high %v2071_v22, %v2071_v22  ;;  %v2045_v48 = vsel %vm1925_vm3, %v2034_v35, %v2044_v56 }
 0x216   : > { %2257 = vst.msk [vmem:[%s3834_s19 + $0x9c] sm:$0x1] %vm2221_vm5, %v2532_v17  ;;  %v2530_v6 = vcombine.low %v2045_v48, %v2045_v48  ;;  %v2531_v7 = vcombine.high %v2045_v48, %v2045_v48 }
 0x217   : > { %2253 = vst.msk [vmem:[%s3834_s19 + $0x8c] sm:$0xf] %vm2216_vm6, %v2528_v26  ;;  %2254 = vst.msk [vmem:[%s3834_s19 + $0x90] sm:$0xf] %vm2216_vm6, %v2529_v23 }
 0x218   : > { %2255 = vst.msk [vmem:[%s3834_s19 + $0x94] sm:$0xf] %vm2216_vm6, %v2530_v6  ;;  %2256 = vst.msk [vmem:[%s3834_s19 + $0x98] sm:$0xf] %vm2216_vm6, %v2531_v7 }
 0x219 PF: > { %s15_s22 = sadd.s32 1, %s2984_s22   ;;  %s4043_s18 = smov %s2976_s20 }
 0x21a   : > { %p12_p8 = scmp.ge.s32.totalorder %s15_s22, 10   ;;  %s4044_s19 = smov %s2980_s21 }
 0x21b   : > { %s4045_s20 = smov %s4048_s23  ;;  %s4046_s21 = smov %s4052_s24 }
 0x21c   :  { %14 = sbr.rel (!%p12_p8) target bundleno = 3 (0x3), region = 76 }

// kernel: polarization_forward.7
= control target key start
LH: loop header
LB: loop body
LE: loop exit
PB: predicated region body
PF: predicated region fallthrough
CT: control target
= control target key end

     0   :  { %s5147_s21 = smov 0   ;;  %s5149_s22 = smov 0   ;;  %s7276_s0 = inlined_call_operand.vmem [shape: bf16[2,32,34,64], index: 0, kind: input, shape index: {}]   ;;  %s7277_s1 = inlined_call_operand.vmem [shape: bf16[2,4,34,64], index: 1, kind: input, shape index: {}]   ;;  %s7278_s2 = inlined_call_operand.vmem [shape: bf16[2,4,34,64], index: 2, kind: input, shape index: {}]   ;;  %s7279_s3 = inlined_call_operand.vmem [shape: bf16[576,64], index: 3, kind: input, shape index: {}]   ;;  %s7280_s4 = inlined_call_operand.vmem [shape: f32[1,64], index: 4, kind: input, shape index: {}]   ;;  %s7281_s5 = inlined_call_operand.vmem [shape: bf16[1024,128], index: 5, kind: output, shape index: {0}]   ;;  %s7282_s6 = inlined_call_operand.vmem [shape: f32[2,1,64], index: 6, kind: output, shape index: {1}]  }
   0x1   :  { %s5151_s23 = smov 0  }
   0x2 LB: > { %s4121_s24 = sadd.s32 4294967295, %s5108_s23   ;;  %s5164_s25 = sadd.s32 1, %s5108_s23   ;;  %s5108_s23 = sphi %s5151_s23, %s7477_s23   ;;  %s5104_s22 = sphi %s5149_s22, %s7476_s22   ;;  %s5100_s21 = sphi %s5147_s21, %s7475_s21  }
   0x3   : > { %s21_s26 = ssub.s32 %s5108_s23, %s5164_s25  ;;  %s24_s27 = sadd.s32 1, %s5104_s22 }
   0x4   : > { %p22_p0 = scmp.eq.s32.totalorder %s21_s26, 0  ;;  %p31_p1 = scmp.ne.s32.totalorder %s5104_s22, %s5100_s21 }
   0x5   : > { %p32_p2 = scmp.eq.s32.totalorder %s5108_s23, 0  ;;  %p4124_p4 = scmp.ge.s32.totalorder %s5108_s23, 4 }
   0x6   : > { %s5173_s28 = scalar_select %p22_p0, %s5104_s22, %s24_s27  }
   0x7   : > { %p5175_p3 = por %p32_p2, %p31_p1  ;;  %204 = sbr.rel (%p4124_p4) target bundleno = 55 (0x37), region = 24 }
   0xe   : > { %207 = sbr.rel (!%p5175_p3) target bundleno = 39 (0x27), region = 28  ;;  %s209_s30 = sand.u32 (%p5175_p3), 1, %s5104_s22  }
   0xf   : > { %s4916_s7 = smul.u32 (%p5175_p3), 160, %s5108_s23 }
  0x10   : > { %s4915_s8 = smul.u32 (%p5175_p3), 320, %s209_s30 }
  0x11   : > { %s5187_s11 = scalar_lea.vmem (%p5175_p3), %s7276_s0, %s4916_s7 }
  0x12   : > { %v231_v0 = vld [vmem:[%s5187_s11] sm:$0xff] (%p5175_p3)   ;;  %v235_v1 = vld [vmem:[%s5187_s11 + $0x8] sm:$0xff] (%p5175_p3)   ;;  %v239_v2 = vld [vmem:[%s5187_s11 + $0x10] sm:$0xff] (%p5175_p3)   ;;  %s5192_s12 = scalar_lea.vmem (%p5175_p3), [#allocation2], %s4915_s8 }
  0x13   : > { %232 = vst [vmem:[%s5192_s12] sm:$0xff] (%p5175_p3), %v231_v0   ;;  %236 = vst [vmem:[%s5192_s12 + $0x8] sm:$0xff] (%p5175_p3), %v235_v1   ;;  %v243_v3 = vld [vmem:[%s5187_s11 + $0x18] sm:$0xff] (%p5175_p3)   ;;  %v247_v4 = vld [vmem:[%s5187_s11 + $0x20] sm:$0xff] (%p5175_p3)  }
  0x14   : > { %240 = vst [vmem:[%s5192_s12 + $0x10] sm:$0xff] (%p5175_p3), %v239_v2   ;;  %v251_v5 = vld [vmem:[%s5187_s11 + $0x28] sm:$0xff] (%p5175_p3)   ;;  %244 = vst [vmem:[%s5192_s12 + $0x18] sm:$0xff] (%p5175_p3), %v243_v3   ;;  %v255_v6 = vld [vmem:[%s5187_s11 + $0x30] sm:$0xff] (%p5175_p3)  }
  0x15   : > { %248 = vst [vmem:[%s5192_s12 + $0x20] sm:$0xff] %v247_v4   ;;  %252 = vst [vmem:[%s5192_s12 + $0x28] sm:$0xff] %v251_v5   ;;  %v259_v7 = vld [vmem:[%s5187_s11 + $0x38] sm:$0xff]   ;;  %v263_v8 = vld [vmem:[%s5187_s11 + $0x40] sm:$0xff]  }
  0x16   : > { %256 = vst [vmem:[%s5192_s12 + $0x30] sm:$0xff] %v255_v6   ;;  %260 = vst [vmem:[%s5192_s12 + $0x38] sm:$0xff] %v259_v7   ;;  %v267_v9 = vld [vmem:[%s5187_s11 + $0x48] sm:$0xff]   ;;  %v271_v10 = vld [vmem:[%s5187_s11 + $0x50] sm:$0xff]  }
  0x17   : > { %264 = vst [vmem:[%s5192_s12 + $0x40] sm:$0xff] %v263_v8   ;;  %v275_v11 = vld [vmem:[%s5187_s11 + $0x58] sm:$0xff]   ;;  %268 = vst [vmem:[%s5192_s12 + $0x48] sm:$0xff] %v267_v9   ;;  %v279_v12 = vld [vmem:[%s5187_s11 + $0x60] sm:$0xff]  }
  0x18   : > { %272 = vst [vmem:[%s5192_s12 + $0x50] sm:$0xff] %v271_v10   ;;  %276 = vst [vmem:[%s5192_s12 + $0x58] sm:$0xff] %v275_v11   ;;  %v283_v13 = vld [vmem:[%s5187_s11 + $0x68] sm:$0xff]   ;;  %v287_v14 = vld [vmem:[%s5187_s11 + $0x70] sm:$0xff]  }
  0x19   : > { %280 = vst [vmem:[%s5192_s12 + $0x60] sm:$0xff] %v279_v12   ;;  %284 = vst [vmem:[%s5192_s12 + $0x68] sm:$0xff] %v283_v13   ;;  %v291_v15 = vld [vmem:[%s5187_s11 + $0x78] sm:$0xff]   ;;  %v295_v16 = vld [vmem:[%s5187_s11 + $0x80] sm:$0xff]  }
  0x1a   : > { %288 = vst [vmem:[%s5192_s12 + $0x70] sm:$0xff] %v287_v14   ;;  %v299_v17 = vld [vmem:[%s5187_s11 + $0x88] sm:$0xff]   ;;  %292 = vst [vmem:[%s5192_s12 + $0x78] sm:$0xff] %v291_v15   ;;  %v303_v18 = vld [vmem:[%s5187_s11 + $0x90] sm:$0xff]  }
  0x1b   : > { %296 = vst [vmem:[%s5192_s12 + $0x80] sm:$0xff] %v295_v16   ;;  %300 = vst [vmem:[%s5192_s12 + $0x88] sm:$0xff] %v299_v17   ;;  %v307_v19 = vld [vmem:[%s5187_s11 + $0x98] sm:$0xff]   ;;  %v311_v20 = vld [vmem:[%s5187_s11 + $0x280] sm:$0xff]  }
  0x1c   : > { %304 = vst [vmem:[%s5192_s12 + $0x90] sm:$0xff] %v303_v18   ;;  %308 = vst [vmem:[%s5192_s12 + $0x98] sm:$0xff] %v307_v19   ;;  %v315_v21 = vld [vmem:[%s5187_s11 + $0x288] sm:$0xff]   ;;  %v319_v22 = vld [vmem:[%s5187_s11 + $0x290] sm:$0xff]  }
  0x1d   : > { %312 = vst [vmem:[%s5192_s12 + $0xa0] sm:$0xff] %v311_v20   ;;  %v323_v23 = vld [vmem:[%s5187_s11 + $0x298] sm:$0xff]   ;;  %316 = vst [vmem:[%s5192_s12 + $0xa8] sm:$0xff] %v315_v21   ;;  %v327_v24 = vld [vmem:[%s5187_s11 + $0x2a0] sm:$0xff]  }
  0x1e   : > { %320 = vst [vmem:[%s5192_s12 + $0xb0] sm:$0xff] %v319_v22   ;;  %324 = vst [vmem:[%s5192_s12 + $0xb8] sm:$0xff] %v323_v23   ;;  %v331_v25 = vld [vmem:[%s5187_s11 + $0x2a8] sm:$0xff]   ;;  %v335_v26 = vld [vmem:[%s5187_s11 + $0x2b0] sm:$0xff]  }
  0x1f   : > { %328 = vst [vmem:[%s5192_s12 + $0xc0] sm:$0xff] %v327_v24   ;;  %332 = vst [vmem:[%s5192_s12 + $0xc8] sm:$0xff] %v331_v25   ;;  %v339_v27 = vld [vmem:[%s5187_s11 + $0x2b8] sm:$0xff]   ;;  %v343_v28 = vld [vmem:[%s5187_s11 + $0x2c0] sm:$0xff]  }
  0x20   : > { %336 = vst [vmem:[%s5192_s12 + $0xd0] sm:$0xff] %v335_v26   ;;  %v347_v29 = vld [vmem:[%s5187_s11 + $0x2c8] sm:$0xff]   ;;  %340 = vst [vmem:[%s5192_s12 + $0xd8] sm:$0xff] %v339_v27   ;;  %v351_v30 = vld [vmem:[%s5187_s11 + $0x2d0] sm:$0xff]  }
  0x21   : > { %344 = vst [vmem:[%s5192_s12 + $0xe0] sm:$0xff] %v343_v28   ;;  %348 = vst [vmem:[%s5192_s12 + $0xe8] sm:$0xff] %v347_v29   ;;  %v355_v31 = vld [vmem:[%s5187_s11 + $0x2d8] sm:$0xff]   ;;  %v359_v32 = vld [vmem:[%s5187_s11 + $0x2e0] sm:$0xff]  }
  0x22   : > { %352 = vst [vmem:[%s5192_s12 + $0xf0] sm:$0xff] %v351_v30   ;;  %356 = vst [vmem:[%s5192_s12 + $0xf8] sm:$0xff] %v355_v31   ;;  %v363_v33 = vld [vmem:[%s5187_s11 + $0x2e8] sm:$0xff]   ;;  %v367_v34 = vld [vmem:[%s5187_s11 + $0x2f0] sm:$0xff]  }
  0x23   : > { %360 = vst [vmem:[%s5192_s12 + $0x100] sm:$0xff] %v359_v32   ;;  %v371_v35 = vld [vmem:[%s5187_s11 + $0x2f8] sm:$0xff]   ;;  %364 = vst [vmem:[%s5192_s12 + $0x108] sm:$0xff] %v363_v33   ;;  %v375_v36 = vld [vmem:[%s5187_s11 + $0x300] sm:$0xff]  }
  0x24   : > { %368 = vst [vmem:[%s5192_s12 + $0x110] sm:$0xff] %v367_v34   ;;  %372 = vst [vmem:[%s5192_s12 + $0x118] sm:$0xff] %v371_v35   ;;  %v379_v37 = vld [vmem:[%s5187_s11 + $0x308] sm:$0xff]   ;;  %v383_v38 = vld [vmem:[%s5187_s11 + $0x310] sm:$0xff]  }
  0x25   : > { %376 = vst [vmem:[%s5192_s12 + $0x120] sm:$0xff] %v375_v36   ;;  %380 = vst [vmem:[%s5192_s12 + $0x128] sm:$0xff] %v379_v37   ;;  %v387_v39 = vld [vmem:[%s5187_s11 + $0x318] sm:$0xff]  }
  0x26   : > { %384 = vst [vmem:[%s5192_s12 + $0x130] sm:$0xff] %v383_v38   ;;  %388 = vst [vmem:[%s5192_s12 + $0x138] sm:$0xff] %v387_v39  }
  0x27 PF: > { %573 = sbr.rel (!%p5175_p3) target bundleno = 47 (0x2f), region = 69  ;;  %s575_s13 = sand.u32 (%p5175_p3), 1, %s5104_s22  }
  0x28   : > { %s4918_s14 = smul.u32 (%p5175_p3), 20, %s5108_s23 }
  0x29   : > { %s4917_s15 = smul.u32 (%p5175_p3), 40, %s575_s13 }
  0x2a   : > { %s580_s18 = scalar_lea.vmem (%p5175_p3), %s7277_s1, %s4918_s14 }
  0x2b   : > { %v596_v40 = vld [vmem:[%s580_s18] sm:$0xff] (%p5175_p3)   ;;  %v600_v41 = vld [vmem:[%s580_s18 + $0x8] sm:$0xff] (%p5175_p3)   ;;  %v604_v42 = vld [vmem:[%s580_s18 + $0x10] sm:$0xf] (%p5175_p3)  ;;  %s577_s19 = scalar_lea.vmem (%p5175_p3), [#allocation3], %s4917_s15 }
  0x2c   : > { %597 = vst [vmem:[%s577_s19] sm:$0xff] (%p5175_p3), %v596_v40   ;;  %601 = vst [vmem:[%s577_s19 + $0x8] sm:$0xff] (%p5175_p3), %v600_v41   ;;  %v606_v43 = vld [vmem:[%s580_s18 + $0x50] sm:$0xff] (%p5175_p3)   ;;  %v610_v44 = vld [vmem:[%s580_s18 + $0x58] sm:$0xff] (%p5175_p3)  }
  0x2d   : > { %605 = vst [vmem:[%s577_s19 + $0x10] sm:$0xf] (%p5175_p3), %v604_v42  ;;  %v614_v45 = vld [vmem:[%s580_s18 + $0x60] sm:$0xf] (%p5175_p3)  ;;  %607 = vst [vmem:[%s577_s19 + $0x14] sm:$0xff] (%p5175_p3), %v606_v43  }
  0x2e   : > { %611 = vst [vmem:[%s577_s19 + $0x1c] sm:$0xff] %v610_v44   ;;  %615 = vst [vmem:[%s577_s19 + $0x24] sm:$0xf] %v614_v45 }
  0x2f PF: > { %658 = sbr.rel (!%p5175_p3) target bundleno = 55 (0x37), region = 110  ;;  %s660_s20 = sand.u32 (%p5175_p3), 1, %s5104_s22  }
  0x30   : > { %s4920_s26 = smul.u32 (%p5175_p3), 20, %s5108_s23 }
  0x31   : > { %s4919_s27 = smul.u32 (%p5175_p3), 40, %s660_s20 }
  0x32   : > { %s665_s8 = scalar_lea.vmem (%p5175_p3), %s7278_s2, %s4920_s26 }
  0x33   : > { %v681_v46 = vld [vmem:[%s665_s8] sm:$0xff] (%p5175_p3)   ;;  %v685_v47 = vld [vmem:[%s665_s8 + $0x8] sm:$0xff] (%p5175_p3)   ;;  %v689_v48 = vld [vmem:[%s665_s8 + $0x10] sm:$0xf] (%p5175_p3)  ;;  %s662_s9 = scalar_lea.vmem (%p5175_p3), [#allocation4], %s4919_s27 }
  0x34   : > { %682 = vst [vmem:[%s662_s9] sm:$0xff] (%p5175_p3), %v681_v46   ;;  %686 = vst [vmem:[%s662_s9 + $0x8] sm:$0xff] (%p5175_p3), %v685_v47   ;;  %v691_v49 = vld [vmem:[%s665_s8 + $0x50] sm:$0xff] (%p5175_p3)   ;;  %v695_v50 = vld [vmem:[%s665_s8 + $0x58] sm:$0xff] (%p5175_p3)  }
  0x35   : > { %690 = vst [vmem:[%s662_s9 + $0x10] sm:$0xf] (%p5175_p3), %v689_v48  ;;  %v699_v51 = vld [vmem:[%s665_s8 + $0x60] sm:$0xf] (%p5175_p3)  ;;  %692 = vst [vmem:[%s662_s9 + $0x14] sm:$0xff] (%p5175_p3), %v691_v49  }
  0x36   : > { %696 = vst [vmem:[%s662_s9 + $0x1c] sm:$0xff] %v695_v50   ;;  %700 = vst [vmem:[%s662_s9 + $0x24] sm:$0xf] %v699_v51 }
  0x37 PF: > { %p4130_p5 = scmp.ge.s32.totalorder %s5108_s23, 1  ;;  %p742_p6 = scmp.lt.s32.totalorder %s5108_s23, 5 }
  0x39   : > { %p743_p7 = pnand %p4130_p5, %p742_p6 }
  0x3b   : > { %746 = sbr.rel (%p743_p7) target bundleno = 859 (0x35b), region = 151 }
  0x42   : > { %s749_s29 = sand.u32 1, %s5100_s21   ;;  %s4131_s10 = sshll.u32 %s4121_s24, 5 }
  0x43   : > { %s4921_s11 = smul.u32 320, %s749_s29  ;;  %p802_p8 = scmp.lt.s32.totalorder %s4131_s10, 127 }
  0x44   : > { %s4922_s12 = smul.u32 40, %s749_s29  ;;  %p4133_p9 = scmp.ne.s32.totalorder %s4121_s24, 0 }
  0x45   : > { %s7479_s10 = smov (!%p802_p8, %s4131_s10), 127  ;;  %s5295_s17 = scalar_lea.vmem [#allocation2], %s4921_s11  ;;  %vm812_vm0 = vcmask (!%p4133_p9), 516096   ;;  %v5110_v52 = vmov (!%p4133_p9), 0.0  }
  0x46   : > { %s4132_s13 = sshll.u32 %s7479_s10, 2  ;;  %s5297_s18 = scalar_lea.vmem [#allocation3], %s4922_s12  ;;  %813 = vst.msk [vmem:[%s7282_s6] sm:$0x1] (!%p4133_p9), %vm812_vm0, %v5110_v52  ;;  %814 = vst.msk [vmem:[%s7282_s6 + $0x1] sm:$0x1] (!%p4133_p9), %vm812_vm0, %v5110_v52 }
  0x47   : > { %s5293_s16 = scalar_lea.vmem %s7281_s5, %s4132_s13  ;;  %s5299_s19 = scalar_lea.vmem [#allocation4], %s4922_s12 }
  0x48   : > { %811 = sbr.rel (%p4133_p9) target bundleno = 79 (0x4f), region = 167 }
  0x4f PF: > { %v4949_v53 = vld [vmem:[%s5295_s17] sm:$0xff]   ;;  %s5111_s23 = smov 64   ;;  %v5312_v54 = vld [vmem:[%s5295_s17 + $0x14] sm:$0xff]   ;;  %vm1042_vm1 = vsmask.f32 7424  ;;  %v5329_v1 = vld [vmem:[%s5295_s17 + $0x8] sm:$0xff]  }
  0x50   : > { %1286 = vrot.lane.b32.xlu0 %v4949_v53, %s5111_s23  ;;  %v5315_v55 = vld [vmem:[%s5295_s17 + $0x1c] sm:$0xff]   ;;  %v1084_v56 = vshrl.u32 %v5312_v54, 16  ;;  %v1086_v57 = vshll.u32 %v5312_v54, 16  ;;  %v5324_v60 = vld [vmem:[%s5297_s18 + $0x8] sm:$0xff]   ;;  %vm1235_vm2 = vcmask 1046528   ;;  %v1241_v3 = vrot.slane %v4949_v53, 1 }
  0x51   : > { %v1091_v58 = vshll.u32 %v5315_v55, 16  ;;  %v5321_v59 = vld [vmem:[%s5297_s18] sm:$0xff]   ;;  %v1051_v2 = vshll.u32 %v5324_v60, 16  ;;  %v1242_v6 = vrot.slane %v5329_v1, 1  ;;  %v1055_v8 = vshrl.u32 %v5324_v60, 16  ;;  %v5358_v23 = vld [vmem:[%s5295_s17 + $0x30] sm:$0xff]  }
  0x52   : > { %v1088_v61 = vrot.slane %v1086_v57, 1  ;;  %v1044_v63 = vshrl.u32 %v5321_v59, 16  ;;  %v1046_v0 = vshll.u32 %v5321_v59, 16  ;;  %v5334_v7 = vld [vmem:[%s5297_s18 + $0x10] ss:$0 sps:$4 sm:$0x11]  }
  0x53   : > { %v1093_v62 = vrot.slane %v1091_v58, 1  ;;  %v1053_v9 = vrot.slane %v1051_v2, 1  ;;  %v5338_v10 = vld [vmem:[%s5295_s17 + $0x24] ss:$0 sps:$4 sm:$0x11]   ;;  %v1059_v13 = vshll.u32 %v5334_v7, 16  ;;  %v5351_v16 = vsel %vm1235_vm2, %v1241_v3, %v1242_v6 }
  0x54   : > { %v1089_v4 = vor.u32 %v1088_v61, %v1084_v56  ;;  %v1048_v5 = vrot.slane %v1046_v0, 1  ;;  %v1095_v14 = vshrl.u32 %v5315_v55, 16  ;;  %v5346_v15 = vld [vmem:[%s5295_s17 + $0x28] sm:$0xff]   ;;  %v1099_v17 = vshll.u32 %v5338_v10, 16  ;;  %v5390_v47 = vld [vmem:[%s5295_s17 + $0x3c] sm:$0xff]  }
  0x55   : > { %v4957_v18 = vld [vmem:[%s5295_s17 + $0x10] ss:$0 sps:$4 sm:$0x11]   ;;  %v1057_v20 = vor.u32 %v1055_v8, %v1053_v9  ;;  %v1061_v21 = vrot.slane %v1059_v13, 1  ;;  %v1066_v22 = vshll.u32 %v4949_v53, 16  ;;  %v1106_v26 = vshll.u32 %v5346_v15, 16 }
  0x56   : > { %v5341_v11 = vsel %vm1042_vm1, %v1089_v4, %v1093_v62  ;;  %v1049_v12 = vor.u32 %v1048_v5, %v1044_v63  ;;  %v1097_v24 = vor.u32 %v1095_v14, %v1093_v62  ;;  %v1101_v25 = vrot.slane %v1099_v17, 1  ;;  %v5379_v41 = vld [vmem:[%s5295_s17 + $0x38] ss:$0 sps:$4 sm:$0x11]   ;;  %v5397_v48 = vld [vmem:[%s7279_s3 + $0x40] sm:$0xff]   ;;  %v5439_v8 = vld [vmem:[%s5295_s17 + $0x50] sm:$0xff]  }
  0x57   : > { %1211 = vrot.lane.b32.xlu1 %v5341_v11, %s5111_s23  ;;  %v1064_v27 = vshrl.u32 %v4949_v53, 16  ;;  %v1062_v28 = vsel %vm1042_vm1, %v1057_v20, %v1061_v21  ;;  %v1244_v29 = vrot.slane %v4957_v18, 1  ;;  %v1068_v30 = vrot.slane %v1066_v22, 1  ;;  %4347 = vmatprep.subr.bf16.mxu0 %v5397_v48  ;;  %v5411_v56 = vld [vmem:[%s5295_s17 + $0x44] sm:$0xff]   ;;  %v5481_v22 = vld [vmem:[%s7279_s3 + $0x50] sm:$0xff]  }
  0x58   : > { %v1054_v19 = vsel %vm1042_vm1, %v1049_v12, %v1053_v9  ;;  %v1071_v31 = vshll.u32 %v5329_v1, 16  ;;  %v5368_v32 = vsel %vm1042_vm1, %v1097_v24, %v1101_v25  ;;  %v1104_v33 = vshrl.u32 %v5346_v15, 16  ;;  %v5427_v3 = vld [vmem:[%s5295_s17 + $0x4c] ss:$0 sps:$4 sm:$0x11]   ;;  %v5432_v4 = vld [vmem:[%s7279_s3] sm:$0xff]  }
  0x59   : > { %1203 = vrot.lane.b32.xlu0 %v1054_v19, %s5111_s23  ;;  %v1108_v34 = vrot.slane %v1106_v26, 1  ;;  %v1111_v35 = vshll.u32 %v5358_v23, 16  ;;  %v5374_v36 = vsel %vm1235_vm2, %v1242_v6, %v1244_v29  ;;  %v1069_v37 = vor.u32 %v1068_v30, %v1064_v27  ;;  %4348 = vmatpush3.bf16.msra.mxu0 %v5432_v4  ;;  %v5448_v9 = vld [vmem:[%s7279_s3 + $0x48] sm:$0xff]   ;;  %v5456_v14 = vld [vmem:[%s7279_s3 + $0xc0] sm:$0xff]   ;;  %v5498_v29 = vld [vmem:[%s7279_s3 + $0x10] sm:$0xff]  }
  0x5a   : > { %v1073_v38 = vrot.slane %v1071_v31, 1  ;;  %v1246_v42 = vrot.slane %v5312_v54, 1  ;;  %v1247_v44 = vrot.slane %v5315_v55, 1  ;;  %v1075_v45 = vshrl.u32 %v5329_v1, 16  ;;  %4349 = vmatprep.subr.bf16.mxu0 %v5448_v9  ;;  %v5468_v19 = vld [vmem:[%s7279_s3 + $0x8] sm:$0xff]   ;;  %4459 = vmatprep.subr.bf16.mxu1 %v5456_v14  ;;  %v4977_v21 = vld [vmem:[%s7279_s3 + $0x80] sm:$0xff]  }
  0x5b   : > { %1346 = vrot.lane.b32.xlu1 %v5351_v16, %s5111_s23  ;;  %v1109_v39 = vor.u32 %v1108_v34, %v1104_v33  ;;  %v1113_v40 = vrot.slane %v1111_v35, 1  ;;  %v1079_v46 = vshll.u32 %v4957_v18, 16  ;;  %v1115_v50 = vshrl.u32 %v5358_v23, 16  ;;  %v5462_v18 = vld [vmem:[%s5295_s17 + $0x58] sm:$0xff]   ;;  %4460 = vmatpush3.bf16.msra.mxu1 %v4977_v21  ;;  %v4979_v27 = vld [vmem:[%s7279_s3 + $0xc8] sm:$0xff]  }
  0x5c   : > { %v5385_v43 = vsel %vm1042_vm1, %v1069_v37, %v1073_v38  ;;  %v1119_v51 = vshll.u32 %v5379_v41, 16  ;;  %v5408_v52 = vsel %vm1235_vm2, %v1246_v42, %v1247_v44  ;;  %v1077_v53 = vor.u32 %v1075_v45, %v1073_v38  ;;  %4461 = vmatprep.subr.bf16.mxu1 %v4979_v27  ;;  %v5513_v35 = vld [vmem:[%s7279_s3 + $0x58] sm:$0xff]   ;;  %v5516_v38 = vld [vmem:[%s5295_s17 + $0x60] ss:$0 sps:$4 sm:$0x11]   ;;  %v5533_v42 = vld [vmem:[%s5295_s17 + $0x64] sm:$0xff]  }
  0x5d   : > { %1288 = vrot.lane.b32.xlu0 %v5329_v1, %s5111_s23  ;;  %v5400_v49 = vsel %vm1042_vm1, %v1109_v39, %v1113_v40  ;;  %v1126_v57 = vshll.u32 %v5390_v47, 16  ;;  %v1117_v58 = vor.u32 %v1115_v50, %v1113_v40  ;;  %v1249_v62 = vrot.slane %v5338_v10, 1  ;;  %4350 = vmatpush3.bf16.msra.mxu0 %v5468_v19  ;;  %v4984_v39 = vld [vmem:[%s7279_s3 + $0xd0] sm:$0xff]   ;;  %v5527_v40 = vld [vmem:[%s7279_s3 + $0x18] sm:$0xff]   ;;  %v5544_v45 = vld [vmem:[%s7279_s3 + $0x60] sm:$0xff]  }
  0x5e   : > { %v1121_v61 = vrot.slane %v1119_v51, 1  ;;  %v1124_v63 = vshrl.u32 %v5390_v47, 16  ;;  %v1131_v2 = vshll.u32 %v5411_v56, 16  ;;  %v1251_v6 = vrot.slane %v5346_v15, 1  ;;  %4351 = vmatprep.subr.bf16.mxu0 %v5481_v22  ;;  %v5607_v27 = vld [vmem:[%s5295_s17 + $0x78] sm:$0xff]  }
  0x5f   : > { %1205 = vrot.lane.b32.xlu1 %v1062_v28, %s5111_s23  ;;  %v1128_v1 = vrot.slane %v1126_v57, 1  ;;  %v5451_v10 = vsel %vm1235_vm2, %v1247_v44, %v1249_v62  ;;  %v1135_v17 = vshrl.u32 %v5411_v56, 16  ;;  %v1139_v20 = vshll.u32 %v5427_v3, 16  ;;  %v4986_v44 = vld [vmem:[%s7279_s3 + $0x90] sm:$0xff]   ;;  %v5567_v62 = vld [vmem:[%s7279_s3 + $0x20] sm:$0xff]  }
  0x60   : > { %v5435_v5 = vsel %vm1042_vm1, %v1117_v58, %v1121_v61  ;;  %v1133_v13 = vrot.slane %v1131_v2, 1  ;;  %v1254_v25 = vrot.slane %v5379_v41, 1  ;;  %v1146_v26 = vshll.u32 %v5439_v8, 16  ;;  %v5596_v21 = vld [vmem:[%s5295_s17 + $0x74] ss:$0 sps:$4 sm:$0x11]  }
  0x61   : > { %1213 = vrot.lane.b32.xlu0 %v5368_v32, %s5111_s23  ;;  %v1129_v12 = vor.u32 %v1128_v1, %v1124_v63  ;;  %v1144_v28 = vshrl.u32 %v5439_v8, 16  ;;  %v1141_v33 = vrot.slane %v1139_v20, 1  ;;  %v1151_v34 = vshll.u32 %v5462_v18, 16  ;;  %4352 = vmatpush3.bf16.msra.mxu0 %v5498_v29  ;;  %v5588_v20 = vld [vmem:[%s7279_s3 + $0x68] sm:$0xff]  }
  0x62   : > { %v1137_v31 = vor.u32 %v1135_v17, %v1133_v13  ;;  %v1148_v37 = vrot.slane %v1146_v26, 1  ;;  %4353 = vmatprep.subr.bf16.mxu0 %v5513_v35  ;;  %v1257_v57 = vrot.slane %v5411_v56, 1  ;;  %v1155_v58 = vshrl.u32 %v5462_v18, 16  ;;  %v5602_v26 = vld [vmem:[%s7279_s3 + $0x28] sm:$0xff]  }
  0x63   : > { %1348 = vrot.lane.b32.xlu1 %v5374_v36, %s5111_s23  ;;  %v5484_v24 = vsel %vm1042_vm1, %v1129_v12, %v1133_v13  ;;  %v1153_v51 = vrot.slane %v1151_v34, 1  ;;  %v1159_v61 = vshll.u32 %v5516_v38, 16  ;;  %v1259_v1 = vrot.slane %v5427_v3, 1 }
  0x64   : > { %v5530_v41 = vsel %vm1042_vm1, %v1137_v31, %v1141_v33  ;;  %v1149_v50 = vor.u32 %v1148_v37, %v1144_v28  ;;  %v1164_v2 = vshrl.u32 %v5533_v42, 16  ;;  %v4996_v28 = vld [vmem:[%s7279_s3 + $0xa0] sm:$0xff]   ;;  %v5619_v33 = vld [vmem:[%s7279_s3 + $0x70] sm:$0xff]   ;;  %v1261_v34 = vrot.slane %v5439_v8, 1 }
  0x65   : > { %1290 = vrot.lane.b32.xlu0 %v5312_v54, %s5111_s23  ;;  %v1081_v54 = vrot.slane %v1079_v46, 1  ;;  %4354 = vmatpush3.bf16.msra.mxu0 %v5527_v40  ;;  %v1157_v13 = vor.u32 %v1155_v58, %v1153_v51  ;;  %v1161_v17 = vrot.slane %v1159_v61, 1  ;;  %v1262_v37 = vrot.slane %v5462_v18, 1  ;;  %v5652_v61 = vld [vmem:[%s7279_s3 + $0x78] sm:$0xff]  }
  0x66   : > { %4355 = vmatprep.subr.bf16.mxu0 %v5544_v45  ;;  %v5570_v63 = vsel %vm1042_vm1, %v1149_v50, %v1153_v51  ;;  %v1264_v58 = vrot.slane %v5516_v38, 1  ;;  %v1184_v38 = vshrl.u32 %v5607_v27, 16  ;;  %vm1424_vm3 = vcmask 523264  }
  0x67   : > { %1207 = vrot.lane.b32.xlu1 %v5385_v43, %s5111_s23  ;;  %v5421_v0 = vsel %vm1042_vm1, %v1077_v53, %v1081_v54  ;;  %v5550_v53 = vld [vmem:[%s5295_s17 + $0x6c] sm:$0xff]   ;;  %v4988_v54 = vld [vmem:[%s7279_s3 + $0xd8] sm:$0xff]   ;;  %v5613_v31 = vsel %vm1042_vm1, %v1157_v13, %v1161_v17  ;;  %vm4014_vm4 = vcmask 516096  }
  0x68   : > { %v1171_v3 = vshll.u32 %v5550_v53, 16  ;;  %7347 = vst [vmem:[#allocation5_spill] sm:$0xff] %v5613_v31  ;;  %v1175_v51 = vshrl.u32 %v5550_v53, 16  ;;  %v5005_v17 = vld [vmem:[%s7279_s3 + $0xb0] sm:$0xff]  }
  0x69   : > { %1215 = vrot.lane.b32.xlu0 %v5400_v49, %s5111_s23  ;;  %4356 = vmatpush3.bf16.msra.mxu0 %v5567_v62 }
  0x6a   : > { %4357 = vmatprep.subr.bf16.mxu0 %v5588_v20 }
  0x6b   : > { %1350 = vrot.lane.b32.xlu1 %v5408_v52, %s5111_s23 }
  0x6d   : > { %1292 = vrot.lane.b32.xlu0 %v5315_v55, %s5111_s23  ;;  %v1252_v55 = vrot.slane %v5358_v23, 1  ;;  %4358 = vmatpush3.bf16.msra.mxu0 %v5602_v26 }
  0x6e   : > { %4359 = vmatprep.subr.bf16.mxu0 %v5619_v33 }
  0x6f   : > { %1209 = vrot.lane.b32.xlu1 %v5421_v0, %s5111_s23  ;;  %v5501_v30 = vsel %vm1235_vm2, %v1251_v6, %v1252_v55  ;;  %v5547_v46 = vsel %vm1235_vm2, %v1252_v55, %v1254_v25  ;;  %v1166_v6 = vshll.u32 %v5533_v42, 16  ;;  %v4992_v55 = vld [vmem:[%s7279_s3 + $0x98] sm:$0xff]  }
  0x71   : > { %1217 = vrot.lane.b32.xlu0 %v5435_v5, %s5111_s23  ;;  %v1168_v25 = vrot.slane %v1166_v6, 1 }
  0x73   : > { %1352 = vrot.lane.b32.xlu1 %v5451_v10, %s5111_s23  ;;  %v1169_v50 = vor.u32 %v1168_v25, %v1164_v2  ;;  %v5003_v2 = vld [vmem:[%s7279_s3 + $0xf0] sm:$0xff]  }
  0x75   : > { %1294 = vrot.lane.b32.xlu0 %v5346_v15, %s5111_s23  ;;  %v4982_v15 = vld [vmem:[%s7279_s3 + $0x88] sm:$0xff]  }
  0x76   : > { %4462 = vmatpush3.bf16.msra.mxu1 %v4982_v15  ;;  %v1173_v15 = vrot.slane %v1171_v3, 1  ;;  %v5676_v3 = vsel %vm1235_vm2, %v1261_v34, %v1262_v37  ;;  %v5688_v34 = vld [vmem:[%s7279_s3 + $0x100] sm:$0xff]  }
  0x77   : > { %1219 = vrot.lane.b32.xlu1 %v5484_v24, %s5111_s23  ;;  %4463 = vmatprep.subr.bf16.mxu1 %v4984_v39  ;;  %v4998_v39 = vld [vmem:[%s7279_s3 + $0xe8] sm:$0xff]  }
  0x78   : > { %v5661_v6 = vsel %vm1042_vm1, %v1169_v50, %v1173_v15  ;;  %v5010_v50 = vld [vmem:[%s7279_s3 + $0xb8] sm:$0xff]  }
  0x79   : > { %1354 = vrot.lane.b32.xlu0 %v5501_v30, %s5111_s23  ;;  %7348 = vst [vmem:[#allocation6_spill] sm:$0xff] %v5661_v6 }
  0x7a   : > { %4464 = vmatpush3.bf16.msra.mxu1 %v4986_v44  ;;  %v5629_v44 = vsel %vm1235_vm2, %v1257_v57, %v1259_v1  ;;  %v1186_v1 = vshll.u32 %v5607_v27, 16 }
  0x7b   : > { %1296 = vrot.lane.b32.xlu1 %v5358_v23, %s5111_s23  ;;  %v1256_v23 = vrot.slane %v5390_v47, 1  ;;  %4465 = vmatprep.subr.bf16.mxu1 %v4988_v54  ;;  %v5633_v54 = vld [vmem:[%s5295_s17 + $0x80] sm:$0xff]  }
  0x7c   : > { %v1191_v25 = vshll.u32 %v5633_v54, 16 }
  0x7d   : > { %1221 = vrot.lane.b32.xlu0 %v5530_v41, %s5111_s23  ;;  %v5582_v12 = vsel %vm1235_vm2, %v1256_v23, %v1257_v57  ;;  %v1179_v23 = vshll.u32 %v5596_v21, 16  ;;  %v5001_v57 = vld [vmem:[%s7279_s3 + $0xa8] sm:$0xff]  }
  0x7e   : > { %4466 = vmatpush3.bf16.msra.mxu1 %v4992_v55  ;;  %v5668_v55 = vld [vmem:[%s7279_s3 + $0x38] sm:$0xff]  }
  0x7f   : > { %1356 = vrot.lane.b32.xlu1 %v5547_v46, %s5111_s23  ;;  %v1181_v13 = vrot.slane %v1179_v23, 1 }
  0x81   : > { %1298 = vrot.lane.b32.xlu0 %v5390_v47, %s5111_s23  ;;  %v4994_v47 = vld [vmem:[%s7279_s3 + $0xe0] sm:$0xff]  }
  0x82   : > { %4467 = vmatprep.subr.bf16.mxu1 %v4994_v47  ;;  %v1177_v47 = vor.u32 %v1175_v51, %v1173_v15  ;;  %v4980_v15 = vld [vmem:[%s5295_s17 + $0x88] ss:$0 sps:$4 sm:$0x11]   ;;  %v5703_v51 = vsel %vm1235_vm2, %v1262_v37, %v1264_v58  ;;  %v5720_v58 = vld [vmem:[%s5295_s17 + $0x94] sm:$0xff]  }
  0x83   : > { %1223 = vrot.lane.b32.xlu1 %v5570_v63, %s5111_s23  ;;  %4468 = vmatpush3.bf16.msra.mxu1 %v4996_v28  ;;  %v5006_v28 = vld [vmem:[%s7279_s3 + $0xf8] sm:$0xff]   ;;  %7350 = vst [vmem:[#allocation8_spill] sm:$0xff] %v5703_v51 }
  0x84   : > { %4469 = vmatprep.subr.bf16.mxu1 %v4998_v39  ;;  %v5695_v39 = vsel %vm1042_vm1, %v1177_v47, %v1181_v13  ;;  %v1267_v13 = vrot.slane %v5550_v53, 1 }
  0x85   : > { %1358 = vrot.lane.b32.xlu0 %v5582_v12, %s5111_s23  ;;  %7349 = vst [vmem:[#allocation7_spill] sm:$0xff] %v5695_v39 }
  0x87   : > { %1300 = vrot.lane.b32.xlu1 %v5411_v56, %s5111_s23  ;;  %v5639_v56 = vld [vmem:[%s7279_s3 + $0x30] sm:$0xff]   ;;  %4470 = vmatpush3.bf16.msra.mxu1 %v5001_v57  ;;  %v1193_v57 = vrot.slane %v1191_v25, 1 }
  0x88   : > { %4360 = vmatpush3.bf16.msra.mxu0 %v5639_v56  ;;  %4471 = vmatprep.subr.bf16.mxu1 %v5003_v2  ;;  %v1266_v2 = vrot.slane %v5533_v42, 1 }
  0x89   : > { %1225 = vrot.lane.b32.xlu0 %v5613_v31, %s5111_s23  ;;  %4361 = vmatprep.subr.bf16.mxu0 %v5652_v61  ;;  %v5903_v31 = vld [vmem:[%s5295_s17 + $0xd8] ss:$0 sps:$4 sm:$0x11]  }
  0x8b   : > { %1360 = vrot.lane.b32.xlu1 %v5629_v44, %s5111_s23  ;;  %4472 = vmatpush3.bf16.msra.mxu1 %v5005_v17  ;;  %v1195_v17 = vshrl.u32 %v5633_v54, 16 }
  0x8c   : > { %4362 = vmatpush3.bf16.msra.mxu0 %v5668_v55  ;;  %4473 = vmatprep.subr.bf16.mxu1 %v5006_v28  ;;  %v1269_v28 = vrot.slane %v5596_v21, 1 }
  0x8d   : > { %1302 = vrot.lane.b32.xlu0 %v5439_v8, %s5111_s23  ;;  %v1188_v8 = vrot.slane %v1186_v1, 1  ;;  %4835 = vmatprep.subr.bf16.mxu0 %v5688_v34  ;;  %v5706_v1 = vld [vmem:[%s5295_s17 + $0x8c] sm:$0xff]   ;;  %v1197_v47 = vor.u32 %v1195_v17, %v1193_v57 }
  0x8f   : > { %1227 = vrot.lane.b32.xlu1 %v5661_v6, %s5111_s23  ;;  %v1189_v23 = vor.u32 %v1188_v8, %v1184_v38  ;;  %4474 = vmatpush3.bf16.msra.mxu1 %v5010_v50  ;;  %v1324_v38 = vshll.u32 %v5706_v1, 16  ;;  %v1322_v8 = vshrl.u32 %v5706_v1, 16 }
  0x90   : > { %4591 = vmatprep.subr.bf16.mxu1 %v5397_v48  ;;  %v5726_v48 = vsel %vm1235_vm2, %v1266_v2, %v1267_v13  ;;  %v4999_v2 = vld [vmem:[%s5295_s17 + $0x9c] ss:$0 sps:$4 sm:$0x11]  }
  0x91   : > { %1362 = vrot.lane.b32.xlu0 %v5676_v3, %s5111_s23  ;;  %v5717_v37 = vsel %vm1042_vm1, %v1189_v23, %v1193_v57  ;;  %7352 = vst [vmem:[#allocation10_spill] sm:$0xff] %v5726_v48  ;;  %v1326_v50 = vrot.slane %v1324_v38, 1  ;;  %v1329_v23 = vshll.u32 %v5720_v58, 16  ;;  %v5742_v57 = vsel %vm1235_vm2, %v1267_v13, %v1269_v28  ;;  %v5758_v13 = vld [vmem:[%s5299_s19 + $0x8] sm:$0xff]  }
  0x92   : > { %7351 = vst [vmem:[#allocation9_spill] sm:$0xff] %v5717_v37  ;;  %7354 = vst [vmem:[#allocation12_spill] sm:$0xff] %v5742_v57  ;;  %v1271_v38 = vrot.slane %v5607_v27, 1 }
  0x93   : > { %1304 = vrot.lane.b32.xlu1 %v5462_v18, %s5111_s23  ;;  %v1199_v18 = vshll.u32 %v4980_v15, 16  ;;  %v1327_v21 = vor.u32 %v1326_v50, %v1322_v8  ;;  %v1331_v17 = vrot.slane %v1329_v23, 1  ;;  %7357 = vst [vmem:[#allocation15_spill] sm:$0xff] %v5758_v13 }
  0x95   : > { %1229 = vrot.lane.b32.xlu0 %v5695_v39, %s5111_s23  ;;  %v1201_v25 = vrot.slane %v1199_v18, 1  ;;  %v5745_v18 = vld [vmem:[%s5299_s19] sm:$0xff]   ;;  %v1399_v39 = vshll.u32 %v5758_v13, 16 }
  0x96   : > { %7355 = vst [vmem:[#allocation13_spill] sm:$0xff] %v5745_v18  ;;  %v1394_v28 = vshll.u32 %v5745_v18, 16 }
  0x97   : > { %1364 = vrot.lane.b32.xlu1 %v5703_v51, %s5111_s23 }
  0x99   : > { %1306 = vrot.lane.b32.xlu0 %v5533_v42, %s5111_s23  ;;  %v5736_v42 = vsel %vm1042_vm1, %v1197_v47, %v1201_v25  ;;  %v1333_v47 = vshrl.u32 %v5720_v58, 16  ;;  %v1337_v25 = vshll.u32 %v4999_v2, 16 }
  0x9a   : > { %7353 = vst [vmem:[#allocation11_spill] sm:$0xff] %v5736_v42 }
  0x9b   : > { %1231 = vrot.lane.b32.xlu1 %v5717_v37, %s5111_s23  ;;  %v1272_v37 = vrot.slane %v5633_v54, 1  ;;  %v1335_v50 = vor.u32 %v1333_v47, %v1331_v17  ;;  %v1339_v23 = vrot.slane %v1337_v25, 1  ;;  %v1401_v25 = vrot.slane %v1399_v39, 1 }
  0x9d   : > { %1366 = vrot.lane.b32.xlu0 %v5726_v48, %s5111_s23  ;;  %v5764_v8 = vsel %vm1235_vm2, %v1271_v38, %v1272_v37  ;;  %v5011_v38 = vld [vmem:[%s5299_s19 + $0x10] ss:$0 sps:$4 sm:$0x11]  }
  0x9e   : > { %7358 = vst [vmem:[#allocation16_spill] sm:$0xff] %v5764_v8 }
  0x9f   : > { %1308 = vrot.lane.b32.xlu1 %v5550_v53, %s5111_s23  ;;  %v5755_v53 = vsel %vm1042_vm1, %v1327_v21, %v1331_v17  ;;  %v1392_v21 = vshrl.u32 %v5745_v18, 16  ;;  %v1341_v17 = vrot.slane %v5706_v1, 1  ;;  %v5790_v18 = vld [vmem:[%s5297_s18 + $0x1c] sm:$0xff]  }
  0xa0   : > { %7356 = vst [vmem:[#allocation14_spill] sm:$0xff] %v5755_v53  ;;  %7362 = vst [vmem:[#allocation20_spill] sm:$0xff] %v5790_v18 }
  0xa1   : > { %1233 = vrot.lane.b32.xlu0 %v5736_v42, %s5111_s23  ;;  %v1274_v42 = vrot.slane %v4980_v15, 1 }
  0xa3   : > { %1368 = vrot.lane.b32.xlu1 %v5742_v57, %s5111_s23  ;;  %v1396_v57 = vrot.slane %v1394_v28, 1  ;;  %v5780_v15 = vsel %vm1235_vm2, %v1272_v37, %v1274_v42  ;;  %v5783_v28 = vld [vmem:[%s5297_s18 + $0x14] sm:$0xff]   ;;  %v1344_v37 = vrot.slane %v4999_v2, 1 }
  0xa4   : > { %7360 = vst [vmem:[#allocation18_spill] sm:$0xff] %v5780_v15  ;;  %7361 = vst [vmem:[#allocation19_spill] sm:$0xff] %v5783_v28  ;;  %v2600_v39 = vshll.u32 %v5783_v28, 16  ;;  %v5811_v2 = vld [vmem:[%s5295_s17 + $0xa0] sm:$0xff]  }
  0xa5   : > { %1310 = vrot.lane.b32.xlu0 %v5607_v27, %s5111_s23  ;;  %v5773_v27 = vsel %vm1042_vm1, %v1335_v50, %v1339_v23  ;;  %v1397_v47 = vor.u32 %v1396_v57, %v1392_v21  ;;  %v1342_v50 = vrot.slane %v5720_v58, 1  ;;  %v1403_v23 = vshrl.u32 %v5758_v13, 16 }
  0xa6   : > { %7359 = vst [vmem:[#allocation17_spill] sm:$0xff] %v5773_v27  ;;  %v2602_v13 = vrot.slane %v2600_v39, 1  ;;  %v2620_v39 = vshll.u32 %v5811_v2, 16 }
  0xa7   : > { %1411 = vrot.lane.b32.xlu1 %v5755_v53, %s5111_s23  ;;  %v1407_v53 = vshll.u32 %v5011_v38, 16  ;;  %v5799_v42 = vsel %vm1235_vm2, %v1341_v17, %v1342_v50  ;;  %v1405_v57 = vor.u32 %v1403_v23, %v1401_v25  ;;  %v2605_v38 = vshll.u32 %v5790_v18, 16 }
  0xa8   : > { %7363 = vst [vmem:[#allocation21_spill] sm:$0xff] %v5799_v42  ;;  %v2609_v17 = vshrl.u32 %v5790_v18, 16 }
  0xa9   : > { %1370 = vrot.lane.b32.xlu0 %v5764_v8, %s5111_s23  ;;  %v1409_v21 = vrot.slane %v1407_v53, 1  ;;  %v2607_v53 = vrot.slane %v2605_v38, 1 }
  0xab   : > { %1312 = vrot.lane.b32.xlu1 %v5633_v54, %s5111_s23  ;;  %v1402_v54 = vsel %vm1042_vm1, %v1397_v47, %v1401_v25  ;;  %v2598_v47 = vshrl.u32 %v5783_v28, 16  ;;  %v5817_v25 = vsel %vm1235_vm2, %v1342_v50, %v1344_v37  ;;  %v2618_v50 = vshrl.u32 %v5811_v2, 16  ;;  %v5045_v28 = vld [vmem:[%s5295_s17 + $0x14] sm:$0xff]  }
  0xac   : > { %7365 = vst [vmem:[#allocation23_spill] sm:$0xff] %v5817_v25  ;;  %v2611_v38 = vor.u32 %v2609_v17, %v2607_v53 }
  0xad   : > { %1413 = vrot.lane.b32.xlu0 %v5773_v27, %s5111_s23  ;;  %v5803_v27 = vld [vmem:[%s5297_s18 + $0x24] ss:$0 sps:$4 sm:$0x11]   ;;  %v2603_v23 = vor.u32 %v2602_v13, %v2598_v47 }
  0xae   : > { %7364 = vst [vmem:[#allocation22_spill] sm:$0xff] %v5803_v27 }
  0xaf   : > { %1372 = vrot.lane.b32.xlu1 %v5780_v15, %s5111_s23  ;;  %v2608_v37 = vsel %vm1042_vm1, %v2603_v23, %v2607_v53 }
  0xb1   : > { %1314 = vrot.lane.b32.xlu0 %v5706_v1, %s5111_s23  ;;  %v1410_v1 = vsel %vm1042_vm1, %v1405_v57, %v1409_v21  ;;  %v5823_v57 = vld [vmem:[%s5295_s17 + $0xa8] sm:$0xff]   ;;  %v1236_v21 = vrot.slane %v5321_v59, 1 }
  0xb2   : > { %v2625_v13 = vshll.u32 %v5823_v57, 16  ;;  %v2629_v17 = vshrl.u32 %v5823_v57, 16 }
  0xb3   : > { %1415 = vrot.lane.b32.xlu1 %v1402_v54, %s5111_s23  ;;  %v2613_v54 = vshll.u32 %v5803_v27, 16 }
  0xb5   : > { %1374 = vrot.lane.b32.xlu0 %v5799_v42, %s5111_s23  ;;  %v2615_v47 = vrot.slane %v2613_v54, 1  ;;  %v2622_v42 = vrot.slane %v2620_v39, 1 }
  0xb7   : > { %1316 = vrot.lane.b32.xlu1 %v5720_v58, %s5111_s23  ;;  %v1237_v58 = vrot.slane %v5324_v60, 1  ;;  %v5840_v60 = vld [vmem:[%s5295_s17 + $0xb4] sm:$0xff]   ;;  %v2616_v23 = vsel %vm1042_vm1, %v2611_v38, %v2615_v47  ;;  %v2623_v53 = vor.u32 %v2622_v42, %v2618_v50 }
  0xb9   : > { %1417 = vrot.lane.b32.xlu0 %v1410_v1, %s5111_s23  ;;  %v5833_v1 = vld [vmem:[%s5295_s17 + $0xb0] ss:$0 sps:$4 sm:$0x11]   ;;  %v1238_v59 = vsel %vm1235_vm2, %v1236_v21, %v1237_v58  ;;  %v2640_v21 = vshll.u32 %v5840_v60, 16 }
  0xba   : > { %v2633_v54 = vshll.u32 %v5833_v1, 16 }
  0xbb   : > { %1376 = vrot.lane.b32.xlu1 %v5817_v25, %s5111_s23  ;;  %v2627_v25 = vrot.slane %v2625_v13, 1  ;;  %v5851_v13 = vld [vmem:[%s5295_s17 + $0xbc] sm:$0xff]   ;;  %v2642_v38 = vrot.slane %v2640_v21, 1 }
  0xbc   : > { %v2645_v47 = vshll.u32 %v5851_v13, 16 }
  0xbd   : > { %2839 = vrot.lane.b32.xlu0 %v5811_v2, %s5111_s23  ;;  %v5854_v42 = vsel %vm1042_vm1, %v2623_v53, %v2627_v25  ;;  %v2631_v50 = vor.u32 %v2629_v17, %v2627_v25  ;;  %v1239_v25 = vrot.slane %v5334_v7, 1  ;;  %v2649_v17 = vshrl.u32 %v5851_v13, 16 }
  0xbe   : > { %7366 = vst [vmem:[#allocation24_spill] sm:$0xff] %v5854_v42  ;;  %v2647_v21 = vrot.slane %v2645_v47, 1 }
  0xbf   : > { %2757 = vrot.lane.b32.xlu1 %v2608_v37, %s5111_s23  ;;  %v2635_v37 = vrot.slane %v2633_v54, 1 }
  0xc0   : > { %v2651_v47 = vor.u32 %v2649_v17, %v2647_v21 }
  0xc1   : > { %2841 = vrot.lane.b32.xlu0 %v5823_v57, %s5111_s23  ;;  %v5870_v53 = vsel %vm1042_vm1, %v2631_v50, %v2635_v37  ;;  %v5885_v50 = vld [vmem:[%s7279_s3 + $0x108] sm:$0xff]   ;;  %v5890_v37 = vld [vmem:[%s5295_s17 + $0xd0] sm:$0xff]  }
  0xc2   : > { %v1287_v27 = vpop.permute.xlu0 %1286  ;;  %7367 = vst [vmem:[#allocation25_spill] sm:$0xff] %v5870_v53  ;;  %v2665_v51 = vshll.u32 %v5890_v37, 16  ;;  %v2669_v17 = vshrl.u32 %v5890_v37, 16 }
  0xc3   : > { %v1475_v39 = vsel %vm1424_vm3, %v1238_v59, %v1287_v27  ;;  %2759 = vrot.lane.b32.xlu1 %v2616_v23, %s5111_s23  ;;  %v2638_v27 = vshrl.u32 %v5840_v60, 16  ;;  %v5861_v59 = vld [vmem:[%s5295_s17 + $0xc4] ss:$0 sps:$4 sm:$0x11]   ;;  %v5866_v23 = vld [vmem:[%s5295_s17 + $0xc8] sm:$0xff]  }
  0xc4   : > { %1903 = vmatprep.mubr.bf16.mxu0 %v1475_v39  ;;  %v2653_v18 = vshll.u32 %v5861_v59, 16 }
  0xc5   : > { %2843 = vrot.lane.b32.xlu0 %v5840_v60, %s5111_s23  ;;  %v2643_v39 = vor.u32 %v2642_v38, %v2638_v27  ;;  %v5046_v27 = vld [vmem:[%s5297_s18] sm:$0xff]  }
  0xc6   : > { %v2655_v6 = vrot.slane %v2653_v18, 1  ;;  %v5912_v18 = vld [vmem:[%s7279_s3 + $0x110] sm:$0xff]  }
  0xc7   : > { %2761 = vrot.lane.b32.xlu1 %v5854_v42, %s5111_s23  ;;  %v2660_v42 = vshll.u32 %v5866_v23, 16  ;;  %v5899_v48 = vsel %vm1042_vm1, %v2643_v39, %v2647_v21  ;;  %v5924_v39 = vld [vmem:[%s5295_s17 + $0xdc] sm:$0xff]  }
  0xc9   : > { %v1212_v54 = vpop.permute.xlu1 %1211  ;;  %2845 = vrot.lane.b32.xlu0 %v5851_v13, %s5111_s23 }
  0xca   : > { %v5879_v15 = vsel %vm1424_vm3, %v5045_v28, %v1212_v54  ;;  %v1240_v28 = vsel %vm1235_vm2, %v1237_v58, %v1239_v25  ;;  %v2658_v54 = vshrl.u32 %v5866_v23, 16 }
  0xcb   : > { %v1204_v7 = vpop.permute.xlu0 %1203  ;;  %2064 = vmatprep.mubr.bf16.mxu1 %v5879_v15  ;;  %2763 = vrot.lane.b32.xlu1 %v5870_v53, %s5111_s23  ;;  %v2662_v53 = vrot.slane %v2660_v42, 1 }
  0xcc   : > { %v1426_v38 = vsel %vm1424_vm3, %v5046_v27, %v1204_v7  ;;  %v2667_v7 = vrot.slane %v2665_v51, 1  ;;  %v5047_v27 = vld [vmem:[%s5297_s18 + $0x8] sm:$0xff]  }
  0xcd   : > { %1904 = vmatmul.mubr.bf16.vlgmr.msra.gmra.mrb[0].mxu0 %v1426_v38  ;;  %v1347_v8 = vpop.permute.xlu1 %1346  ;;  %2847 = vrot.lane.b32.xlu0 %v5866_v23, %s5111_s23  ;;  %v2663_v21 = vor.u32 %v2662_v53, %v2658_v54  ;;  %v5946_v54 = vld [vmem:[%s5295_s17 + $0xe4] sm:$0xff]  }
  0xce   : > { %4836 = vmatpush3.bf16.msra.mxu0 %v5688_v34  ;;  %v1539_v58 = vsel %vm1424_vm3, %v5385_v43, %v1347_v8  ;;  %v5921_v8 = vsel %vm1042_vm1, %v2651_v47, %v2655_v6  ;;  %v5048_v6 = vld [vmem:[%s5295_s17 + $0x1c] sm:$0xff]  }
  0xcf   : > { %2065 = vmatmul.mubr.bf16.vlgmr.msra.gmra.mrb[0].mxu1 %v1539_v58  ;;  %v1289_v25 = vpop.permute.xlu0 %1288  ;;  %4837 = vmatprep.subr.bf16.mxu0 %v5885_v50  ;;  %v5943_v47 = vsel %vm1042_vm1, %v2663_v21, %v2667_v7  ;;  %v2671_v58 = vor.u32 %v2669_v17, %v2667_v7  ;;  %v2685_v7 = vshll.u32 %v5946_v54, 16 }
  0xd0   : > { %4592 = vmatpush3.bf16.msra.mxu1 %v5432_v4  ;;  %v1479_v42 = vsel %vm1424_vm3, %v1240_v28, %v1289_v25  ;;  %2765 = vrot.lane.b32.xlu1 %v5899_v48, %s5111_s23  ;;  %v2673_v4 = vshll.u32 %v5903_v31, 16  ;;  %7368 = vst [vmem:[#allocation26_spill] sm:$0xff] %v5943_v47 }
  0xd1   : > { %v1206_v43 = vpop.permute.xlu1 %1205  ;;  %1911 = vmatprep.mubr.bf16.mxu0 %v1479_v42  ;;  %4593 = vmatprep.subr.bf16.mxu1 %v5448_v9  ;;  %v2680_v9 = vshll.u32 %v5924_v39, 16 }
  0xd2   : > { %v1429_v38 = vsel %vm1424_vm3, %v5047_v27, %v1206_v43  ;;  %4838 = vmatpush3.bf16.msra.mxu0 %v5885_v50  ;;  %2849 = vrot.lane.b32.xlu0 %v5890_v37, %s5111_s23  ;;  %v2675_v25 = vrot.slane %v2673_v4, 1  ;;  %v5957_v43 = vld [vmem:[%s7279_s3 + $0x118] sm:$0xff]  }
  0xd3   : > { %v1214_v28 = vpop.permute.xlu0 %1213  ;;  %4839 = vmatprep.subr.bf16.mxu0 %v5912_v18  ;;  %v2682_v21 = vrot.slane %v2680_v9, 1  ;;  %v5049_v9 = vld [vmem:[%s5295_s17] sm:$0xff]  }
  0xd4   : > { %v5936_v53 = vsel %vm1424_vm3, %v5048_v6, %v1214_v28  ;;  %4594 = vmatpush3.bf16.msra.mxu1 %v5468_v19  ;;  %2767 = vrot.lane.b32.xlu1 %v5921_v8, %s5111_s23  ;;  %v2794_v19 = vrot.slane %v5811_v2, 1  ;;  %v5973_v28 = vld [vmem:[%s5295_s17 + $0xec] ss:$0 sps:$4 sm:$0x11]  }
  0xd5   : > { %1912 = vmatmul.mubr.bf16.gmra.mrb[4].mxu0 %v1429_v38  ;;  %v1349_v51 = vpop.permute.xlu1 %1348  ;;  %2072 = vmatprep.mubr.bf16.mxu1 %v5936_v53  ;;  %v5970_v38 = vsel %vm1042_vm1, %v2671_v58, %v2675_v25  ;;  %v5050_v58 = vld [vmem:[%s5295_s17 + $0x28] sm:$0xff]  }
  0xd6   : > { %v1543_v42 = vsel %vm1424_vm3, %v5421_v0, %v1349_v51  ;;  %4595 = vmatprep.subr.bf16.mxu1 %v5481_v22  ;;  %2851 = vrot.lane.b32.xlu0 %v5924_v39, %s5111_s23  ;;  %v2795_v0 = vrot.slane %v5823_v57, 1  ;;  %v2678_v22 = vshrl.u32 %v5924_v39, 16  ;;  %7369 = vst [vmem:[#allocation27_spill] sm:$0xff] %v5970_v38 }
  0xd7   : > { %2073 = vmatmul.mubr.bf16.gmra.mrb[4].mxu1 %v1543_v42  ;;  %v1291_v17 = vpop.permute.xlu0 %1290  ;;  %4840 = vmatpush3.bf16.msra.mxu0 %v5912_v18  ;;  %v5992_v42 = vld [vmem:[%s5295_s17 + $0xf0] sm:$0xff]  }
  0xd8   : > { %v1483_v4 = vsel %vm1424_vm3, %v5351_v16, %v1291_v17  ;;  %4596 = vmatpush3.bf16.msra.mxu1 %v5498_v29  ;;  %2769 = vrot.lane.b32.xlu1 %v5943_v47, %s5111_s23  ;;  %v5981_v29 = vsel %vm1235_vm2, %v2794_v19, %v2795_v0  ;;  %v2683_v51 = vor.u32 %v2682_v21, %v2678_v22  ;;  %v2797_v19 = vrot.slane %v5833_v1, 1 }
  0xd9   : > { %v1208_v27 = vpop.permute.xlu1 %1207  ;;  %1919 = vmatprep.mubr.bf16.mxu0 %v1483_v4  ;;  %4597 = vmatprep.subr.bf16.mxu1 %v5513_v35  ;;  %v2687_v35 = vrot.slane %v2685_v7, 1  ;;  %v2689_v22 = vshrl.u32 %v5946_v54, 16  ;;  %v2693_v21 = vshll.u32 %v5973_v28, 16  ;;  %v2700_v1 = vshll.u32 %v5992_v42, 16 }
  0xda   : > { %v1432_v6 = vsel %vm1424_vm3, %v5049_v9, %v1208_v27  ;;  %2853 = vrot.lane.b32.xlu0 %v5946_v54, %s5111_s23  ;;  %4841 = vmatprep.subr.bf16.mxu0 %v5957_v43  ;;  %v6018_v9 = vld [vmem:[%s5295_s17 + $0xf8] sm:$0xff]  }
  0xdb   : > { %v1216_v16 = vpop.permute.xlu0 %1215  ;;  %4842 = vmatpush3.bf16.msra.mxu0 %v5957_v43  ;;  %v6004_v4 = vsel %vm1042_vm1, %v2683_v51, %v2687_v35  ;;  %7371 = vst [vmem:[#allocation29_spill] sm:$0xff] %v6018_v9 }
  0xdc   : > { %v5986_v25 = vsel %vm1424_vm3, %v5050_v58, %v1216_v16  ;;  %4598 = vmatpush3.bf16.msra.mxu1 %v5527_v40  ;;  %2771 = vrot.lane.b32.xlu1 %v5970_v38, %s5111_s23  ;;  %7370 = vst [vmem:[#allocation28_spill] sm:$0xff] %v6004_v4  ;;  %v5051_v16 = vld [vmem:[%s5295_s17 + $0x8] sm:$0xff]   ;;  %v2800_v58 = vrot.slane %v5851_v13, 1 }
  0xdd   : > { %1920 = vmatmul.mubr.bf16.gmra.mrb[8].mxu0 %v1432_v6  ;;  %v1351_v17 = vpop.permute.xlu1 %1350  ;;  %2080 = vmatprep.mubr.bf16.mxu1 %v5986_v25  ;;  %v2691_v6 = vor.u32 %v2689_v22, %v2687_v35 }
  0xde   : > { %v1547_v7 = vsel %vm1424_vm3, %v5341_v11, %v1351_v17  ;;  %4599 = vmatprep.subr.bf16.mxu1 %v5544_v45  ;;  %2899 = vrot.lane.b32.xlu0 %v5981_v29, %s5111_s23  ;;  %v6015_v45 = vsel %vm1235_vm2, %v2795_v0, %v2797_v19  ;;  %v2702_v0 = vrot.slane %v2700_v1, 1  ;;  %v2705_v17 = vshll.u32 %v6018_v9, 16  ;;  %v5052_v19 = vld [vmem:[%s5295_s17 + $0x30] sm:$0xff]  }
  0xdf   : > { %2081 = vmatmul.mubr.bf16.gmra.mrb[8].mxu1 %v1547_v7  ;;  %v1293_v40 = vpop.permute.xlu0 %1292  ;;  %4703 = vmatprep.subr.bf16.mxu0 %v5456_v14  ;;  %v2695_v14 = vrot.slane %v2693_v21, 1  ;;  %v6040_v7 = vld [vmem:[%s5295_s17 + $0x100] ss:$0 sps:$4 sm:$0x11]  }
  0xe0   : > { %v1487_v27 = vsel %vm1424_vm3, %v5374_v36, %v1293_v40  ;;  %4600 = vmatpush3.bf16.msra.mxu1 %v5567_v62  ;;  %2855 = vrot.lane.b32.xlu1 %v5992_v42, %s5111_s23  ;;  %v2799_v62 = vrot.slane %v5840_v60, 1 }
  0xe1   : > { %v1210_v11 = vpop.permute.xlu1 %1209  ;;  %1927 = vmatprep.mubr.bf16.mxu0 %v1487_v27  ;;  %4601 = vmatprep.subr.bf16.mxu1 %v5588_v20  ;;  %v2698_v20 = vshrl.u32 %v5992_v42, 16  ;;  %v6037_v21 = vsel %vm1042_vm1, %v2691_v6, %v2695_v14  ;;  %v2802_v14 = vrot.slane %v5861_v59, 1 }
  0xe2   : > { %v1435_v36 = vsel %vm1424_vm3, %v5051_v16, %v1210_v11  ;;  %2773 = vrot.lane.b32.xlu0 %v6004_v4, %s5111_s23  ;;  %7372 = vst [vmem:[#allocation30_spill] sm:$0xff] %v6037_v21  ;;  %v6048_v1 = vsel %vm1235_vm2, %v2799_v62, %v2800_v58  ;;  %v2707_v11 = vrot.slane %v2705_v17, 1  ;;  %v2709_v16 = vshrl.u32 %v6018_v9, 16  ;;  %v5053_v62 = vld [vmem:[%s5295_s17 + $0x3c] sm:$0xff]  }
  0xe3   : > { %v1218_v51 = vpop.permute.xlu0 %1217  ;;  %v2703_v27 = vor.u32 %v2702_v0, %v2698_v20  ;;  %v6080_v17 = vsel %vm1235_vm2, %v2800_v58, %v2802_v14  ;;  %v2805_v58 = vrot.slane %v5890_v37, 1 }
  0xe4   : > { %v6030_v35 = vsel %vm1424_vm3, %v5052_v19, %v1218_v51  ;;  %4602 = vmatpush3.bf16.msra.mxu1 %v5602_v26  ;;  %2901 = vrot.lane.b32.xlu1 %v6015_v45, %s5111_s23  ;;  %v6083_v19 = vld [vmem:[%s5295_s17 + $0x10c] sm:$0xff]  }
  0xe5   : > { %1928 = vmatmul.mubr.bf16.gmra.mrb[12].mxu0 %v1435_v36  ;;  %v1353_v22 = vpop.permute.xlu1 %1352  ;;  %2088 = vmatprep.mubr.bf16.mxu1 %v6030_v35  ;;  %v2713_v36 = vshll.u32 %v6040_v7, 16  ;;  %7375 = vst [vmem:[#allocation33_spill] sm:$0xff] %v6083_v19 }
  0xe6   : > { %v1551_v40 = vsel %vm1424_vm3, %v5368_v32, %v1353_v22  ;;  %2857 = vrot.lane.b32.xlu0 %v6018_v9, %s5111_s23  ;;  %4603 = vmatprep.subr.bf16.mxu1 %v5619_v33  ;;  %v6055_v32 = vld [vmem:[%s5295_s17 + $0x104] sm:$0xff]   ;;  %v2711_v22 = vor.u32 %v2709_v16, %v2707_v11  ;;  %v6105_v16 = vld [vmem:[%s5295_s17 + $0x114] ss:$0 sps:$4 sm:$0x11]  }
  0xe7   : > { %2089 = vmatmul.mubr.bf16.gmra.mrb[12].mxu1 %v1551_v40  ;;  %v1295_v26 = vpop.permute.xlu0 %1294  ;;  %7373 = vst [vmem:[#allocation31_spill] sm:$0xff] %v6055_v32  ;;  %v2720_v59 = vshll.u32 %v6055_v32, 16  ;;  %v2715_v40 = vrot.slane %v2713_v36, 1 }
  0xe8   : > { %v1491_v6 = vsel %vm1424_vm3, %v5408_v52, %v1295_v26  ;;  %2775 = vrot.lane.b32.xlu1 %v6037_v21, %s5111_s23  ;;  %4604 = vmatpush3.bf16.msra.mxu1 %v5639_v56  ;;  %v6070_v56 = vsel %vm1042_vm1, %v2703_v27, %v2707_v11  ;;  %v2718_v26 = vshrl.u32 %v6055_v32, 16  ;;  %v2725_v11 = vshll.u32 %v6083_v19, 16  ;;  %v6230_v21 = vld [vmem:[%s5299_s19 + $0x14] sm:$0xff]  }
  0xe9   : > { %1935 = vmatprep.mubr.bf16.mxu0 %v1491_v6  ;;  %v1220_v33 = vpop.permute.xlu1 %1219  ;;  %4605 = vmatprep.subr.bf16.mxu1 %v5652_v61  ;;  %7374 = vst [vmem:[#allocation32_spill] sm:$0xff] %v6070_v56  ;;  %v2722_v27 = vrot.slane %v2720_v59, 1  ;;  %v6102_v14 = vsel %vm1042_vm1, %v2711_v22, %v2715_v40  ;;  %v6119_v22 = vld [vmem:[%s5295_s17 + $0x118] sm:$0xff]  }
  0xea   : > { %v6064_v51 = vsel %vm1424_vm3, %v5053_v62, %v1220_v33  ;;  %2903 = vrot.lane.b32.xlu0 %v6048_v1, %s5111_s23  ;;  %7376 = vst [vmem:[#allocation34_spill] sm:$0xff] %v6102_v14  ;;  %v2727_v59 = vrot.slane %v2725_v11, 1  ;;  %7377 = vst [vmem:[#allocation35_spill] sm:$0xff] %v6119_v22  ;;  %v2740_v11 = vshll.u32 %v6119_v22, 16 }
  0xeb   : > { %v1355_v20 = vpop.permute.xlu0 %1354  ;;  %2096 = vmatprep.mubr.bf16.mxu1 %v6064_v51 }
  0xec   : > { %v1555_v0 = vsel %vm1424_vm3, %v5400_v49, %v1355_v20  ;;  %2859 = vrot.lane.b32.xlu1 %v6055_v32, %s5111_s23  ;;  %4606 = vmatpush3.bf16.msra.mxu1 %v5668_v55  ;;  %v2804_v55 = vrot.slane %v5866_v23, 1  ;;  %v2723_v20 = vor.u32 %v2722_v27, %v2718_v26 }
  0xed   : > { %1936 = vmatmul.mubr.bf16.gmra.mrb[16].mxu0 %v5879_v15  ;;  %v1297_v61 = vpop.permute.xlu1 %1296  ;;  %4875 = vmatprep.subr.bf16.mxu1 %v5688_v34  ;;  %v5054_v34 = vld [vmem:[%s5295_s17 + $0x44] sm:$0xff]  }
  0xee   : > { %v1495_v49 = vsel %vm1424_vm3, %v5451_v10, %v1297_v61  ;;  %2777 = vrot.lane.b32.xlu0 %v6070_v56, %s5111_s23  ;;  %v6110_v62 = vsel %vm1235_vm2, %v2804_v55, %v2805_v58  ;;  %v2729_v55 = vshrl.u32 %v6083_v19, 16 }
  0xef   : > { %2097 = vmatmul.mubr.bf16.gmra.mrb[16].mxu1 %v1555_v0  ;;  %1943 = vmatprep.mubr.bf16.mxu0 %v1495_v49  ;;  %v1222_v15 = vpop.permute.xlu0 %1221  ;;  %v2807_v49 = vrot.slane %v5903_v31, 1 }
  0xf0   : > { %v6096_v6 = vsel %vm1424_vm3, %v5054_v34, %v1222_v15  ;;  %2905 = vrot.lane.b32.xlu1 %v6080_v17, %s5111_s23  ;;  %v2733_v15 = vshll.u32 %v6105_v16, 16 }
  0xf1   : > { %v1357_v33 = vpop.permute.xlu1 %1356  ;;  %2104 = vmatprep.mubr.bf16.mxu1 %v6096_v6  ;;  %v6139_v34 = vsel %vm1235_vm2, %v2805_v58, %v2807_v49  ;;  %v2742_v58 = vrot.slane %v2740_v11, 1 }
  0xf2   : > { %2861 = vrot.lane.b32.xlu0 %v6083_v19, %s5111_s23  ;;  %v1559_v0 = vsel %vm1424_vm3, %v5435_v5, %v1357_v33  ;;  %v5055_v5 = vld [vmem:[%s5295_s17 + $0x50] sm:$0xff]   ;;  %v6142_v33 = vld [vmem:[%s5295_s17 + $0x120] sm:$0xff]  }
  0xf3   : > { %v1299_v36 = vpop.permute.xlu0 %1298  ;;  %7379 = vst [vmem:[#allocation37_spill] sm:$0xff] %v6142_v33  ;;  %v2745_v49 = vshll.u32 %v6142_v33, 16 }
  0xf4   : > { %v1499_v61 = vsel %vm1424_vm3, %v5501_v30, %v1299_v36  ;;  %2779 = vrot.lane.b32.xlu1 %v6102_v14, %s5111_s23  ;;  %v2731_v36 = vor.u32 %v2729_v55, %v2727_v59  ;;  %v2738_v14 = vshrl.u32 %v6119_v22, 16  ;;  %v5056_v55 = vld [vmem:[%s5295_s17 + $0x58] sm:$0xff]  }
  0xf5   : > { %1944 = vmatmul.mubr.bf16.gmra.mrb[20].mxu0 %v5936_v53  ;;  %v1224_v40 = vpop.permute.xlu1 %1223  ;;  %v6132_v53 = vsel %vm1042_vm1, %v2723_v20, %v2727_v59  ;;  %v2809_v20 = vrot.slane %v5924_v39, 1 }
  0xf6   : > { %1951 = vmatprep.mubr.bf16.mxu0 %v1499_v61  ;;  %v6127_v26 = vsel %vm1424_vm3, %v5055_v5, %v1224_v40  ;;  %2907 = vrot.lane.b32.xlu0 %v6110_v62, %s5111_s23  ;;  %7378 = vst [vmem:[#allocation36_spill] sm:$0xff] %v6132_v53  ;;  %v2810_v61 = vrot.slane %v5946_v54, 1 }
  0xf7   : > { %2105 = vmatmul.mubr.bf16.gmra.mrb[20].mxu1 %v1559_v0  ;;  %v1359_v27 = vpop.permute.xlu0 %1358  ;;  %v2735_v0 = vrot.slane %v2733_v15, 1 }
  0xf8   : > { %2112 = vmatprep.mubr.bf16.mxu1 %v6127_v26  ;;  %2863 = vrot.lane.b32.xlu1 %v6119_v22, %s5111_s23  ;;  %v1563_v59 = vsel %vm1424_vm3, %v5484_v24, %v1359_v27  ;;  %v6170_v24 = vsel %vm1235_vm2, %v2809_v20, %v2810_v61  ;;  %v2743_v27 = vor.u32 %v2742_v58, %v2738_v14 }
  0xf9   : > { %v1301_v31 = vpop.permute.xlu1 %1300 }
  0xfa   : > { %2781 = vrot.lane.b32.xlu0 %v6132_v53, %s5111_s23  ;;  %v1503_v40 = vsel %vm1424_vm3, %v5547_v46, %v1301_v31  ;;  %v6162_v31 = vsel %vm1042_vm1, %v2731_v36, %v2735_v0  ;;  %v6165_v53 = vld [vmem:[%s5295_s17 + $0x128] ss:$0 sps:$4 sm:$0x11]   ;;  %v6176_v36 = vld [vmem:[%s5295_s17 + $0x12c] sm:$0xff]   ;;  %v2812_v0 = vrot.slane %v5973_v28, 1 }
  0xfb   : > { %v1226_v5 = vpop.permute.xlu0 %1225  ;;  %7380 = vst [vmem:[#allocation38_spill] sm:$0xff] %v6162_v31  ;;  %v5057_v28 = vld [vmem:[%s5295_s17 + $0x64] sm:$0xff]  }
  0xfc   : > { %2909 = vrot.lane.b32.xlu1 %v6139_v34, %s5111_s23  ;;  %v6159_v15 = vsel %vm1424_vm3, %v5056_v55, %v1226_v5 }
  0xfd   : > { %1952 = vmatmul.mubr.bf16.gmra.mrb[24].mxu0 %v5986_v25  ;;  %v1361_v11 = vpop.permute.xlu1 %1360  ;;  %v2747_v25 = vrot.slane %v2745_v49, 1 }
  0xfe   : > { %1959 = vmatprep.mubr.bf16.mxu0 %v1503_v40  ;;  %2865 = vrot.lane.b32.xlu0 %v6142_v33, %s5111_s23  ;;  %v2749_v40 = vshrl.u32 %v6142_v33, 16  ;;  %v1567_v49 = vsel %vm1424_vm3, %v5530_v41, %v1361_v11  ;;  %v6203_v41 = vld [vmem:[%s5295_s17 + $0x134] sm:$0xff]   ;;  %v2877_v11 = vshll.u32 %v6176_v36, 16 }
  0xff   : > { %2113 = vmatmul.mubr.bf16.gmra.mrb[24].mxu1 %v1563_v59  ;;  %v1303_v5 = vpop.permute.xlu0 %1302  ;;  %v2753_v59 = vshll.u32 %v6165_v53, 16  ;;  %v6186_v58 = vsel %vm1042_vm1, %v2743_v27, %v2747_v25 }
 0x100   : > { %2120 = vmatprep.mubr.bf16.mxu1 %v6159_v15  ;;  %2783 = vrot.lane.b32.xlu1 %v6162_v31, %s5111_s23  ;;  %v1507_v14 = vsel %vm1424_vm3, %v5582_v12, %v1303_v5  ;;  %7381 = vst [vmem:[#allocation39_spill] sm:$0xff] %v6186_v58  ;;  %v6198_v31 = vsel %vm1235_vm2, %v2810_v61, %v2812_v0  ;;  %v2817_v0 = vrot.slane %v6040_v7, 1  ;;  %v2820_v7 = vrot.slane %v6083_v19, 1 }
 0x101   : > { %v1228_v20 = vpop.permute.xlu1 %1227  ;;  %v2751_v56 = vor.u32 %v2749_v40, %v2747_v25  ;;  %v2755_v5 = vrot.slane %v2753_v59, 1  ;;  %v2875_v59 = vshrl.u32 %v6176_v36, 16  ;;  %v2822_v19 = vrot.slane %v6105_v16, 1 }
 0x102   : > { %2911 = vrot.lane.b32.xlu0 %v6170_v24, %s5111_s23  ;;  %v6195_v55 = vsel %vm1424_vm3, %v5057_v28, %v1228_v20  ;;  %v2815_v20 = vrot.slane %v6018_v9, 1  ;;  %v6220_v28 = vld [vmem:[%s5295_s17 + $0x13c] ss:$0 sps:$4 sm:$0x11]   ;;  %v7384_v9 = vld [vmem:[#allocation5_spill] sm:$0xff] }
 0x103   : > { %v1363_v27 = vpop.permute.xlu0 %1362  ;;  %v6212_v25 = vsel %vm1042_vm1, %v2751_v56, %v2755_v5  ;;  %v2819_v5 = vrot.slane %v6055_v32, 1 }
 0x104   : > { %2867 = vrot.lane.b32.xlu1 %v6176_v36, %s5111_s23  ;;  %7382 = vst [vmem:[#allocation40_spill] sm:$0xff] %v6212_v25  ;;  %v1571_v4 = vsel %vm1424_vm3, %v5570_v63, %v1363_v27 }
 0x105   : > { %1960 = vmatmul.mubr.bf16.gmra.mrb[28].mxu0 %v6030_v35  ;;  %v2814_v35 = vrot.slane %v5992_v42, 1  ;;  %v1305_v61 = vpop.permute.xlu1 %1304 }
 0x106   : > { %1967 = vmatprep.mubr.bf16.mxu0 %v1507_v14  ;;  %2785 = vrot.lane.b32.xlu0 %v6186_v58, %s5111_s23  ;;  %v2879_v14 = vrot.slane %v2877_v11, 1  ;;  %v1511_v58 = vsel %vm1424_vm3, %v5629_v44, %v1305_v61  ;;  %v5058_v11 = vld [vmem:[%s5295_s17 + $0x6c] sm:$0xff]  }
 0x107   : > { %2121 = vmatmul.mubr.bf16.gmra.mrb[28].mxu1 %v1567_v49  ;;  %v1230_v40 = vpop.permute.xlu0 %1229  ;;  %v2882_v49 = vshll.u32 %v6203_v41, 16  ;;  %v6225_v56 = vsel %vm1235_vm2, %v2814_v35, %v2815_v20  ;;  %v6242_v35 = vsel %vm1235_vm2, %v2815_v20, %v2817_v0  ;;  %v2947_v20 = vshll.u32 %v6230_v21, 16 }
 0x108   : > { %2128 = vmatprep.mubr.bf16.mxu1 %v6195_v55  ;;  %2913 = vrot.lane.b32.xlu1 %v6198_v31, %s5111_s23  ;;  %v6239_v61 = vsel %vm1424_vm3, %v5058_v11, %v1230_v40  ;;  %v2880_v63 = vor.u32 %v2879_v14, %v2875_v59  ;;  %v6250_v40 = vsel %vm1235_vm2, %v2819_v5, %v2820_v7  ;;  %v6253_v11 = vld [vmem:[%s5299_s19 + $0x1c] sm:$0xff]   ;;  %v2825_v0 = vrot.slane %v6142_v33, 1 }
 0x109   : > { %v1365_v38 = vpop.permute.xlu1 %1364  ;;  %v2884_v27 = vrot.slane %v2882_v49, 1  ;;  %v2952_v47 = vshll.u32 %v6253_v11, 16 }
 0x10a   : > { %2869 = vrot.lane.b32.xlu0 %v6203_v41, %s5111_s23  ;;  %v1575_v33 = vsel %vm1424_vm3, %v7384_v9, %v1365_v38 }
 0x10b   : > { %v1307_v16 = vpop.permute.xlu0 %1306  ;;  %v6267_v14 = vsel %vm1042_vm1, %v2880_v63, %v2884_v27  ;;  %v5059_v63 = vld [vmem:[%s5295_s17 + $0x78] sm:$0xff]  }
 0x10c   : > { %2787 = vrot.lane.b32.xlu1 %v6212_v25, %s5111_s23  ;;  %v2886_v25 = vshrl.u32 %v6203_v41, 16  ;;  %7383 = vst [vmem:[#allocation41_spill] sm:$0xff] %v6267_v14  ;;  %v1515_v32 = vsel %vm1424_vm3, %v5676_v3, %v1307_v16  ;;  %v2956_v16 = vshrl.u32 %v6253_v11, 16 }
 0x10d   : > { %1968 = vmatmul.mubr.bf16.gmra.mrb[32].mxu0 %v6064_v51  ;;  %v2890_v51 = vshll.u32 %v6220_v28, 16  ;;  %v1232_v59 = vpop.permute.xlu1 %1231 }
 0x10e   : > { %1975 = vmatprep.mubr.bf16.mxu0 %v1511_v58  ;;  %2915 = vrot.lane.b32.xlu0 %v6225_v56, %s5111_s23  ;;  %v6260_v58 = vsel %vm1235_vm2, %v2820_v7, %v2822_v19  ;;  %v2888_v49 = vor.u32 %v2886_v25, %v2884_v27  ;;  %v2945_v19 = vshrl.u32 %v6230_v21, 16  ;;  %v2949_v7 = vrot.slane %v2947_v20, 1 }
 0x10f   : > { %2129 = vmatmul.mubr.bf16.gmra.mrb[32].mxu1 %v1571_v4  ;;  %v2824_v4 = vrot.slane %v6119_v22, 1  ;;  %v2892_v5 = vrot.slane %v2890_v51, 1  ;;  %v5044_v22 = vld [vmem:[%s5299_s19 + $0x24] ss:$0 sps:$4 sm:$0x11]   ;;  %v6281_v25 = vsel %vm1424_vm3, %v5059_v63, %v1232_v59  ;;  %v2827_v51 = vrot.slane %v6165_v53, 1  ;;  %v1367_v20 = vpop.permute.xlu0 %1366 }
 0x110   : > { %2136 = vmatprep.mubr.bf16.mxu1 %v6239_v61  ;;  %2917 = vrot.lane.b32.xlu1 %v6242_v35, %s5111_s23  ;;  %v2950_v9 = vor.u32 %v2949_v7, %v2945_v19  ;;  %v2960_v59 = vshll.u32 %v5044_v22, 16  ;;  %v2894_v53 = vrot.slane %v6176_v36, 1  ;;  %v7387_v63 = vld [vmem:[#allocation6_spill] sm:$0xff] }
 0x111   : > { %v6284_v27 = vsel %vm1235_vm2, %v2824_v4, %v2825_v0  ;;  %v6290_v38 = vsel %vm1042_vm1, %v2888_v49, %v2892_v5  ;;  %v1309_v4 = vpop.permute.xlu1 %1308  ;;  %v2895_v49 = vrot.slane %v6203_v41, 1 }
 0x112   : > { %2919 = vrot.lane.b32.xlu0 %v6250_v40, %s5111_s23  ;;  %7385 = vst [vmem:[#allocation5_spill] sm:$0xff] %v6290_v38  ;;  %v2962_v7 = vrot.slane %v2960_v59, 1 }
 0x114   : > { %2921 = vrot.lane.b32.xlu1 %v6260_v58, %s5111_s23 }
 0x115   : > { %1976 = vmatmul.mubr.bf16.gmra.mrb[36].mxu0 %v6096_v6  ;;  %v2954_v6 = vrot.slane %v2952_v47, 1  ;;  %v7386_v47 = vld [vmem:[#allocation8_spill] sm:$0xff] }
 0x116   : > { %1983 = vmatprep.mubr.bf16.mxu0 %v1515_v32  ;;  %2964 = vrot.lane.b32.xlu0 %v6267_v14, %s5111_s23  ;;  %v6297_v32 = vsel %vm1235_vm2, %v2825_v0, %v2827_v51  ;;  %v1519_v22 = vsel %vm1424_vm3, %v7386_v47, %v1309_v4  ;;  %v1579_v14 = vsel %vm1424_vm3, %v7387_v63, %v1367_v20  ;;  %v5060_v0 = vld [vmem:[%s5295_s17 + $0x80] sm:$0xff]   ;;  %v2897_v4 = vrot.slane %v6220_v28, 1  ;;  %v7388_v28 = vld [vmem:[#allocation10_spill] sm:$0xff] }
 0x117   : > { %2137 = vmatmul.mubr.bf16.gmra.mrb[36].mxu1 %v1575_v33  ;;  %v1234_v33 = vpop.permute.xlu0 %1233  ;;  %v2955_v5 = vsel %vm1042_vm1, %v2950_v9, %v2954_v6  ;;  %v2958_v19 = vor.u32 %v2956_v16, %v2954_v6  ;;  %v1369_v9 = vpop.permute.xlu1 %1368 }
 0x118   : > { %2144 = vmatprep.mubr.bf16.mxu1 %v6281_v25  ;;  %2923 = vrot.lane.b32.xlu1 %v6284_v27, %s5111_s23  ;;  %v1471_v51 = vsel %vm1424_vm3, %v5060_v0, %v1234_v33  ;;  %v5061_v33 = vld [vmem:[%s5295_s17 + $0x8c] sm:$0xff]   ;;  %v7391_v0 = vld [vmem:[#allocation9_spill] sm:$0xff] }
 0x119   : > { %v2963_v20 = vsel %vm1042_vm1, %v2958_v19, %v2962_v7  ;;  %v7390_v7 = vld [vmem:[#allocation12_spill] sm:$0xff] }
 0x11a   : > { %2966 = vrot.lane.b32.xlu0 %v6290_v38, %s5111_s23  ;;  %v6314_v38 = vsel %vm1235_vm2, %v2894_v53, %v2895_v49  ;;  %v7389_v53 = vld [vmem:[#allocation7_spill] sm:$0xff] }
 0x11b   : > { %v1311_v6 = vpop.permute.xlu0 %1310  ;;  %v1412_v16 = vpop.permute.xlu1 %1411 }
 0x11c   : > { %2925 = vrot.lane.b32.xlu1 %v6297_v32, %s5111_s23  ;;  %v1523_v59 = vsel %vm1424_vm3, %v7388_v28, %v1311_v6 }
 0x11d   : > { %1984 = vmatmul.mubr.bf16.gmra.mrb[40].mxu0 %v6127_v26  ;;  %v6322_v26 = vsel %vm1235_vm2, %v2895_v49, %v2897_v4 }
 0x11e   : > { %1991 = vmatprep.mubr.bf16.mxu0 %v1519_v22  ;;  %2968 = vrot.lane.b32.xlu0 %v2955_v5, %s5111_s23  ;;  %v1602_v22 = vsel %vm1424_vm3, %v5061_v33, %v1412_v16 }
 0x11f   : > { %2145 = vmatmul.mubr.bf16.gmra.mrb[40].mxu1 %v1579_v14  ;;  %v1583_v14 = vsel %vm1424_vm3, %v7389_v53, %v1369_v9  ;;  %v1371_v49 = vpop.permute.xlu0 %1370  ;;  %v1313_v5 = vpop.permute.xlu1 %1312  ;;  %v5062_v9 = vld [vmem:[%s5295_s17 + $0x94] sm:$0xff]  }
 0x120   : > { %2152 = vmatprep.mubr.bf16.mxu1 %v1471_v51  ;;  %2927 = vrot.lane.b32.xlu1 %v6314_v38, %s5111_s23  ;;  %v1527_v63 = vsel %vm1424_vm3, %v7390_v7, %v1313_v5  ;;  %v1587_v4 = vsel %vm1424_vm3, %v7391_v0, %v1371_v49 }
 0x122   : > { %2970 = vrot.lane.b32.xlu0 %v2963_v20, %s5111_s23 }
 0x123   : > { %v1414_v19 = vpop.permute.xlu0 %1413  ;;  %v1373_v20 = vpop.permute.xlu1 %1372 }
 0x124   : > { %2929 = vrot.lane.b32.xlu1 %v6322_v26, %s5111_s23 }
 0x125   : > { %1992 = vmatmul.mubr.bf16.gmra.mrb[44].mxu0 %v6159_v15  ;;  %v1605_v15 = vsel %vm1424_vm3, %v5062_v9, %v1414_v19 }
 0x126   : > { %1999 = vmatprep.mubr.bf16.mxu0 %v1523_v59  ;;  %v7392_v59 = vld [vmem:[#allocation16_spill] sm:$0xff] }
 0x127   : > { %2153 = vmatmul.mubr.bf16.gmra.mrb[44].mxu1 %v1583_v14  ;;  %v1315_v6 = vpop.permute.xlu0 %1314  ;;  %v1416_v16 = vpop.permute.xlu1 %1415  ;;  %v7393_v14 = vld [vmem:[#allocation11_spill] sm:$0xff] }
 0x128   : > { %2160 = vmatprep.mubr.bf16.mxu1 %v1602_v22  ;;  %v1531_v53 = vsel %vm1424_vm3, %v7392_v59, %v1315_v6  ;;  %v1591_v33 = vsel %vm1424_vm3, %v7393_v14, %v1373_v20  ;;  %v7394_v22 = vld [vmem:[#allocation13_spill] sm:$0xff]  ;;  %v7398_v20 = vld [vmem:[#allocation19_spill] sm:$0xff] }
 0x129   : > { %v2789_v6 = vrot.slane %v7398_v20, 1 }
 0x12b   : > { %v1375_v49 = vpop.permute.xlu0 %1374  ;;  %v1317_v5 = vpop.permute.xlu1 %1316 }
 0x12d   : > { %2000 = vmatmul.mubr.bf16.gmra.mrb[48].mxu0 %v6195_v55  ;;  %v1608_v55 = vsel %vm1424_vm3, %v7394_v22, %v1416_v16  ;;  %v7399_v16 = vld [vmem:[#allocation20_spill] sm:$0xff] }
 0x12e   : > { %2007 = vmatprep.mubr.bf16.mxu0 %v1527_v63  ;;  %v7395_v63 = vld [vmem:[#allocation18_spill] sm:$0xff] }
 0x12f   : > { %2161 = vmatmul.mubr.bf16.gmra.mrb[48].mxu1 %v1587_v4  ;;  %v1418_v19 = vpop.permute.xlu0 %1417  ;;  %v1535_v0 = vsel %vm1424_vm3, %v7395_v63, %v1317_v5  ;;  %v7396_v4 = vld [vmem:[#allocation14_spill] sm:$0xff]  ;;  %v1377_v14 = vpop.permute.xlu1 %1376 }
 0x130   : > { %2168 = vmatprep.mubr.bf16.mxu1 %v1605_v15  ;;  %v1595_v9 = vsel %vm1424_vm3, %v7396_v4, %v1375_v49  ;;  %v7397_v15 = vld [vmem:[#allocation15_spill] sm:$0xff]  ;;  %v7401_v49 = vld [vmem:[#allocation22_spill] sm:$0xff] }
 0x135   : > { %2008 = vmatmul.mubr.bf16.gmra.mrb[52].mxu0 %v6239_v61  ;;  %v1611_v61 = vsel %vm1424_vm3, %v7397_v15, %v1418_v19  ;;  %v2792_v19 = vrot.slane %v7401_v49, 1 }
 0x136   : > { %2015 = vmatprep.mubr.bf16.mxu0 %v1531_v53  ;;  %v2790_v53 = vrot.slane %v7399_v16, 1 }
 0x137   : > { %2169 = vmatmul.mubr.bf16.gmra.mrb[52].mxu1 %v1591_v33  ;;  %v2840_v33 = vpop.permute.xlu0 %2839 }
 0x138   : > { %2176 = vmatprep.mubr.bf16.mxu1 %v1608_v55  ;;  %v2791_v22 = vsel %vm1235_vm2, %v2789_v6, %v2790_v53  ;;  %v7400_v55 = vld [vmem:[#allocation17_spill] sm:$0xff]  ;;  %v5066_v6 = vld [vmem:[%s7279_s3 + $0x88] sm:$0xff]  }
 0x139   : > { %v1599_v5 = vsel %vm1424_vm3, %v7400_v55, %v1377_v14 }
 0x13b   : > { %v2842_v4 = vpop.permute.xlu0 %2841 }
 0x13d   : > { %2016 = vmatmul.mubr.bf16.gmra.mrb[56].mxu0 %v6281_v25  ;;  %v3027_v25 = vsel %vm1424_vm3, %v2791_v22, %v2840_v33  ;;  %v5068_v22 = vld [vmem:[%s7279_s3 + $0x90] sm:$0xff]  }
 0x13e   : > { %2023 = vmatprep.mubr.bf16.mxu0 %v1535_v0  ;;  %v2758_v0 = vpop.permute.xlu1 %2757 }
 0x13f   : > { %2177 = vmatmul.mubr.bf16.gmra.mrb[56].mxu1 %v1595_v9  ;;  %v2793_v9 = vsel %vm1235_vm2, %v2790_v53, %v2792_v19  ;;  %v2978_v15 = vsel %vm1424_vm3, %v7398_v20, %v2758_v0  ;;  %v5067_v53 = vld [vmem:[%s7279_s3 + $0xd0] sm:$0xff]   ;;  %v5077_v0 = vld [vmem:[%s7279_s3 + $0xf8] sm:$0xff]  }
 0x140   : > { %2184 = vmatprep.mubr.bf16.mxu1 %v1611_v61  ;;  %v5064_v61 = vld [vmem:[%s7279_s3 + $0xc8] sm:$0xff]   ;;  %v5076_v19 = vld [vmem:[%s7279_s3 + $0xb0] sm:$0xff]  }
 0x142   : > { %v2760_v20 = vpop.permute.xlu1 %2759 }
 0x143   : > { %v2981_v14 = vsel %vm1424_vm3, %v7399_v16, %v2760_v20  ;;  %v5071_v16 = vld [vmem:[%s7279_s3 + $0xe0] sm:$0xff]  }
 0x145   : > { %2024 = vmatmul.mubr.bf16.gmra.mrb[60].mxu0 %v1471_v51  ;;  %v3031_v51 = vsel %vm1424_vm3, %v2793_v9, %v2842_v4  ;;  %v5078_v4 = vld [vmem:[%s7279_s3 + $0xb8] sm:$0xff]  }
 0x146   : > { %4843 = vmatprep.mubr.msk.bf16.mxu0 %vm1424_vm3, %v5408_v52  ;;  %v5063_v52 = vld [vmem:[%s7279_s3 + $0x80] sm:$0xff]  }
 0x147   : > { %2185 = vmatmul.mubr.bf16.gmra.mrb[60].mxu1 %v1599_v5  ;;  %v5072_v5 = vld [vmem:[%s7279_s3 + $0xa0] sm:$0xff]  }
 0x148   : > { %3233 = vmatprep.mubr.bf16.mxu1 %v3027_v25 }
 0x14d   : > { %4844 = vmatmul.mubr.msk.bf16.vlgmr.msra.gmra.mrb[64].mxu0 %vm1424_vm3, %v5451_v10  ;;  %v5065_v10 = vld [vmem:[%s7279_s3 + $0x100] sm:$0xff]  }
 0x14e   : > { %4704 = vmatpush3.bf16.msra.mxu0 %v5063_v52  ;;  %4847 = vmatprep.mubr.msk.bf16.mxu0 %vm1424_vm3, %v5501_v30  ;;  %v2844_v30 = vpop.permute.xlu0 %2843 }
 0x14f   : > { %3234 = vmatmul.mubr.bf16.vlgmr.msra.gmra.mrb[64].mxu1 %v2978_v15  ;;  %4705 = vmatprep.subr.bf16.mxu0 %v5064_v61  ;;  %v3035_v33 = vsel %vm1424_vm3, %v5981_v29, %v2844_v30  ;;  %v5079_v61 = vld [vmem:[%s5299_s19] sm:$0xff]  }
 0x150   : > { %4876 = vmatpush3.bf16.msra.mxu1 %v5065_v10  ;;  %3241 = vmatprep.mubr.bf16.mxu1 %v3031_v51  ;;  %v5080_v10 = vld [vmem:[%s5299_s19 + $0x8] sm:$0xff]  }
 0x151   : > { %4877 = vmatprep.subr.bf16.mxu1 %v5885_v50  ;;  %v1420_v20 = vrot.slane %v5080_v10, 1 }
 0x152   : > { %4706 = vmatpush3.bf16.msra.mxu0 %v5066_v6  ;;  %v2846_v29 = vpop.permute.xlu0 %2845 }
 0x153   : > { %4707 = vmatprep.subr.bf16.mxu0 %v5067_v53  ;;  %v7403_v53 = vld [vmem:[#allocation23_spill] sm:$0xff] }
 0x154   : > { %4878 = vmatpush3.bf16.msra.mxu1 %v5885_v50  ;;  %v5069_v50 = vld [vmem:[%s7279_s3 + $0xd8] sm:$0xff]  }
 0x155   : > { %4848 = vmatmul.mubr.msk.bf16.gmra.mrb[68].mxu0 %vm1424_vm3, %v5547_v46  ;;  %4879 = vmatprep.subr.bf16.mxu1 %v5912_v18  ;;  %v2762_v46 = vpop.permute.xlu1 %2761 }
 0x156   : > { %4851 = vmatprep.mubr.msk.bf16.mxu0 %vm1424_vm3, %v5582_v12  ;;  %4708 = vmatpush3.bf16.msra.mxu0 %v5068_v22  ;;  %v5070_v12 = vld [vmem:[%s7279_s3 + $0x98] sm:$0xff]   ;;  %v2984_v55 = vsel %vm1424_vm3, %v5811_v2, %v2762_v46  ;;  %v5073_v2 = vld [vmem:[%s7279_s3 + $0xe8] sm:$0xff]  }
 0x157   : > { %3242 = vmatmul.mubr.bf16.gmra.mrb[68].mxu1 %v2981_v14  ;;  %4709 = vmatprep.subr.bf16.mxu0 %v5069_v50  ;;  %v5081_v22 = vld [vmem:[%s5299_s19 + $0x10] ss:$0 sps:$4 sm:$0x11]  }
 0x158   : > { %3249 = vmatprep.mubr.bf16.mxu1 %v3035_v33  ;;  %4880 = vmatpush3.bf16.msra.mxu1 %v5912_v18  ;;  %v3039_v18 = vsel %vm1424_vm3, %v6015_v45, %v2846_v29  ;;  %v5074_v45 = vld [vmem:[%s7279_s3 + $0xa8] sm:$0xff]   ;;  %v1422_v50 = vrot.slane %v5081_v22, 1 }
 0x159   : > { %4881 = vmatprep.subr.bf16.mxu1 %v5957_v43 }
 0x15a   : > { %4710 = vmatpush3.bf16.msra.mxu0 %v5070_v12  ;;  %v1423_v29 = vsel %vm1235_vm2, %v1420_v20, %v1422_v50 }
 0x15b   : > { %4711 = vmatprep.subr.bf16.mxu0 %v5071_v16 }
 0x15c   : > { %4882 = vmatpush3.bf16.msra.mxu1 %v5957_v43  ;;  %v2764_v43 = vpop.permute.xlu1 %2763 }
 0x15d   : > { %4852 = vmatmul.mubr.msk.bf16.gmra.mrb[72].mxu0 %vm1424_vm3, %v5629_v44  ;;  %v2848_v44 = vpop.permute.xlu0 %2847  ;;  %v2987_v25 = vsel %vm1424_vm3, %v5823_v57, %v2764_v43 }
 0x15e   : > { %4855 = vmatprep.mubr.msk.bf16.mxu0 %vm1424_vm3, %v5676_v3  ;;  %4712 = vmatpush3.bf16.msra.mxu0 %v5072_v5  ;;  %v5075_v3 = vld [vmem:[%s7279_s3 + $0xf0] sm:$0xff]   ;;  %v3043_v49 = vsel %vm1424_vm3, %v6048_v1, %v2848_v44 }
 0x15f   : > { %3250 = vmatmul.mubr.bf16.gmra.mrb[72].mxu1 %v2984_v55  ;;  %4713 = vmatprep.subr.bf16.mxu0 %v5073_v2  ;;  %v7404_v2 = vld [vmem:[#allocation24_spill] sm:$0xff] }
 0x160   : > { %3257 = vmatprep.mubr.bf16.mxu1 %v3039_v18  ;;  %v2766_v57 = vpop.permute.xlu1 %2765 }
 0x162   : > { %4714 = vmatpush3.bf16.msra.mxu0 %v5074_v45 }
 0x163   : > { %4715 = vmatprep.subr.bf16.mxu0 %v5075_v3 }
 0x164   : > { %v2768_v15 = vpop.permute.xlu1 %2767 }
 0x165   : > { %4856 = vmatmul.mubr.msk.bf16.gmra.mrb[76].mxu0 %vm1424_vm3, %v7386_v47  ;;  %v2850_v47 = vpop.permute.xlu0 %2849  ;;  %v2993_v52 = vsel %vm1424_vm3, %v5851_v13, %v2768_v15 }
 0x166   : > { %4859 = vmatprep.mubr.msk.bf16.mxu0 %vm1424_vm3, %v7388_v28  ;;  %4716 = vmatpush3.bf16.msra.mxu0 %v5076_v19  ;;  %v2990_v28 = vsel %vm1424_vm3, %v5840_v60, %v2766_v57  ;;  %v3047_v9 = vsel %vm1424_vm3, %v6080_v17, %v2850_v47 }
 0x167   : > { %3258 = vmatmul.mubr.bf16.gmra.mrb[76].mxu1 %v2987_v25  ;;  %4717 = vmatprep.subr.bf16.mxu0 %v5077_v0 }
 0x168   : > { %3265 = vmatprep.mubr.bf16.mxu1 %v3043_v49  ;;  %v2770_v6 = vpop.permute.xlu1 %2769  ;;  %v7405_v49 = vld [vmem:[#allocation25_spill] sm:$0xff] }
 0x169   : > { %v2852_v51 = vpop.permute.xlu0 %2851 }
 0x16a   : > { %4718 = vmatpush3.bf16.msra.mxu0 %v5078_v4  ;;  %v3051_v60 = vsel %vm1424_vm3, %v6110_v62, %v2852_v51 }
 0x16c   : > { %v2772_v14 = vpop.permute.xlu1 %2771 }
 0x16d   : > { %4860 = vmatmul.mubr.msk.bf16.gmra.mrb[80].mxu0 %vm1424_vm3, %v7390_v7  ;;  %v7402_v7 = vld [vmem:[#allocation21_spill] sm:$0xff]  ;;  %v2854_v30 = vpop.permute.xlu0 %2853 }
 0x16e   : > { %4863 = vmatprep.mubr.msk.bf16.mxu0 %vm1424_vm3, %v7392_v59  ;;  %v1419_v59 = vrot.slane %v5079_v61, 1  ;;  %v3055_v33 = vsel %vm1424_vm3, %v6139_v34, %v2854_v30 }
 0x16f   : > { %3266 = vmatmul.mubr.bf16.gmra.mrb[80].mxu1 %v2990_v28 }
 0x170   : > { %3273 = vmatprep.mubr.bf16.mxu1 %v3047_v9  ;;  %v1421_v13 = vsel %vm1235_vm2, %v1419_v59, %v1420_v20  ;;  %v2856_v12 = vpop.permute.xlu1 %2855 }
 0x171   : > { %v2900_v46 = vpop.permute.xlu0 %2899  ;;  %v3059_v55 = vsel %vm1424_vm3, %v6170_v24, %v2856_v12 }
 0x172   : > { %v3091_v43 = vsel %vm1424_vm3, %v7404_v2, %v2900_v46 }
 0x174   : > { %v2902_v18 = vpop.permute.xlu1 %2901 }
 0x175   : > { %4864 = vmatmul.mubr.msk.bf16.gmra.mrb[84].mxu0 %vm1424_vm3, %v7395_v63  ;;  %v2996_v63 = vsel %vm1424_vm3, %v5866_v23, %v2770_v6  ;;  %v2999_v23 = vsel %vm1424_vm3, %v5890_v37, %v2772_v14  ;;  %v2774_v16 = vpop.permute.xlu0 %2773  ;;  %v3095_v19 = vsel %vm1424_vm3, %v7405_v49, %v2902_v18  ;;  %v7406_v14 = vld [vmem:[#allocation29_spill] sm:$0xff] }
 0x176   : > { %4867 = vmatprep.mubr.msk.bf16.mxu0 %vm1424_vm3, %v7402_v7  ;;  %v3002_v44 = vsel %vm1424_vm3, %v5924_v39, %v2774_v16 }
 0x177   : > { %3274 = vmatmul.mubr.bf16.gmra.mrb[84].mxu1 %v2993_v52 }
 0x178   : > { %3281 = vmatprep.mubr.bf16.mxu1 %v3051_v60  ;;  %v2776_v45 = vpop.permute.xlu1 %2775  ;;  %v6510_v60 = vld [vmem:[%s7280_s4] ss:$0 sm:$0xff] }
 0x179   : > { %v2858_v5 = vpop.permute.xlu0 %2857  ;;  %v6493_v0 = vsel %vm1424_vm3, %v5946_v54, %v2776_v45 }
 0x17a   : > { %v3063_v37 = vsel %vm1424_vm3, %v6198_v31, %v2858_v5 }
 0x17c   : > { %v2860_v25 = vpop.permute.xlu1 %2859 }
 0x17d   : > { %4868 = vmatmul.mubr.msk.bf16.gmra.mrb[88].mxu0 %vm1424_vm3, %v7403_v53  ;;  %v2904_v3 = vpop.permute.xlu0 %2903  ;;  %v3067_v39 = vsel %vm1424_vm3, %v6225_v56, %v2860_v25 }
 0x17e   : > { %4871 = vmatprep.mubr.msk.bf16.mxu0 %vm1424_vm3, %v1421_v13 }
 0x17f   : > { %3282 = vmatmul.mubr.bf16.gmra.mrb[88].mxu1 %v2996_v63 }
 0x180   : > { %3289 = vmatprep.mubr.bf16.mxu1 %v3055_v33  ;;  %v2906_v47 = vpop.permute.xlu1 %2905 }
 0x181   : > { %v2778_v57 = vpop.permute.xlu0 %2777  ;;  %v3103_v10 = vsel %vm1424_vm3, %v5921_v8, %v2906_v47  ;;  %v7408_v47 = vld [vmem:[#allocation31_spill] sm:$0xff] }
 0x182   : > { %v6502_v9 = vsel %vm1424_vm3, %v5992_v42, %v2778_v57 }
 0x184   : > { %v2780_v54 = vpop.permute.xlu1 %2779 }
 0x185   : > { %4872 = vmatmul.mubr.msk.bf16.gmra.mrb[92].mxu0 %vm1424_vm3, %v1423_v29  ;;  %v2862_v4 = vpop.permute.xlu0 %2861  ;;  %v6517_v33 = vsel %vm1424_vm3, %v7406_v14, %v2780_v54 }
 0x186   : > { %3394 = vmatprep.mubr.bf16.mxu0 %v2990_v28  ;;  %v3099_v28 = vsel %vm1424_vm3, %v5899_v48, %v2904_v3  ;;  %v3071_v15 = vsel %vm1424_vm3, %v6242_v35, %v2862_v4 }
 0x187   : > { %3290 = vmatmul.mubr.bf16.gmra.mrb[92].mxu1 %v2999_v23 }
 0x188   : > { %3297 = vmatprep.mubr.bf16.mxu1 %v3059_v55  ;;  %v2864_v7 = vpop.permute.xlu1 %2863 }
 0x189   : > { %v2908_v51 = vpop.permute.xlu0 %2907  ;;  %v3075_v46 = vsel %vm1424_vm3, %v6250_v40, %v2864_v7 }
 0x18d   : > { %3395 = vmatmul.mubr.bf16.vlgmr.msra.gmra.mrb[96].mxu0 %v3091_v43  ;;  %v2782_v50 = vpop.permute.xlu0 %2781 }
 0x18e   : > { %3402 = vmatprep.mubr.bf16.mxu0 %v2993_v52  ;;  %v6532_v4 = vsel %vm1424_vm3, %v7408_v47, %v2782_v50 }
 0x18f   : > { %3298 = vmatmul.mubr.bf16.gmra.mrb[96].mxu1 %v3002_v44 }
 0x190   : > { %3305 = vmatprep.mubr.bf16.mxu1 %v3063_v37  ;;  %v7407_v37 = vld [vmem:[#allocation26_spill] sm:$0xff] }
 0x191   : > { %v2866_v5 = vpop.permute.xlu0 %2865  ;;  %v3107_v3 = vsel %vm1424_vm3, %v7407_v37, %v2908_v51 }
 0x195   : > { %3403 = vmatmul.mubr.bf16.gmra.mrb[100].mxu0 %v3095_v19  ;;  %v2912_v7 = vpop.permute.xlu0 %2911 }
 0x196   : > { %3410 = vmatprep.mubr.bf16.mxu0 %v2996_v63 }
 0x197   : > { %3306 = vmatmul.mubr.bf16.gmra.mrb[100].mxu1 %v6493_v0 }
 0x198   : > { %3313 = vmatprep.mubr.bf16.mxu1 %v3067_v39 }
 0x19d   : > { %3411 = vmatmul.mubr.bf16.gmra.mrb[104].mxu0 %v3099_v28 }
 0x19e   : > { %3418 = vmatprep.mubr.bf16.mxu0 %v2999_v23  ;;  %v2910_v23 = vpop.permute.xlu1 %2909 }
 0x19f   : > { %3314 = vmatmul.mubr.bf16.gmra.mrb[104].mxu1 %v6502_v9 }
 0x1a0   : > { %v4363_v52 = vpop.f32.mrb[0].mxu0  ;;  %3321 = vmatprep.mubr.bf16.mxu1 %v3071_v15  ;;  %v3079_v15 = vsel %vm1424_vm3, %v6260_v58, %v2866_v5 }
 0x1a1   : > { %v4364_v48 = vpop.f32.mrb[1].mxu0 }
 0x1a2   : > { %v4365_v42 = vadd.f32 %v4364_v48, %v4363_v52  ;;  %v4366_v61 = vpop.f32.mrb[2].mxu0  ;;  %v4475_v59 = vpop.f32.mrb[0].mxu1 }
 0x1a3   : > { %v4367_v20 = vpop.f32.mrb[3].mxu0  ;;  %v4476_v6 = vpop.f32.mrb[1].mxu1 }
 0x1a4   : > { %v1906_v30 = vadd.f32 %v4365_v42, %v6510_v60  ;;  %v4368_v13 = vadd.f32 %v4367_v20, %v4366_v61  ;;  %v4477_v63 = vadd.f32 %v4476_v6, %v4475_v59  ;;  %v4478_v53 = vpop.f32.mrb[2].mxu1  ;;  %v2784_v54 = vpop.permute.xlu1 %2783 }
 0x1a5   : > { %3419 = vmatmul.mubr.bf16.gmra.mrb[108].mxu0 %v3103_v10  ;;  %v4479_v22 = vpop.f32.mrb[3].mxu1 }
 0x1a6   : > { %v1909_v12 = vadd.f32 %v4368_v13, %v6510_v60  ;;  %3426 = vmatprep.mubr.bf16.mxu0 %v3002_v44  ;;  %v4480_v8 = vadd.f32 %v4479_v22, %v4478_v53  ;;  %v6522_v29 = vadd.f32 %v4477_v63, %v1906_v30  ;;  %v7409_v13 = vld [vmem:[#allocation27_spill] sm:$0xff] }
 0x1a7   : > { %3322 = vmatmul.mubr.bf16.gmra.mrb[108].mxu1 %v6517_v33  ;;  %v3111_v63 = vsel %vm1424_vm3, %v7409_v13, %v2910_v23 }
 0x1a8   : > { %v4369_v16 = vpop.f32.mrb[4].mxu0  ;;  %3329 = vmatprep.mubr.bf16.mxu1 %v3075_v46  ;;  %v6525_v55 = vadd.f32 %v4480_v8, %v1909_v12  ;;  %v2868_v10 = vpop.permute.xlu1 %2867  ;;  %v7410_v12 = vld [vmem:[#allocation33_spill] sm:$0xff] }
 0x1a9   : > { %v4370_v18 = vpop.f32.mrb[5].mxu0  ;;  %v6548_v8 = vsel %vm1424_vm3, %v7410_v12, %v2784_v54  ;;  %v3083_v5 = vsel %vm1424_vm3, %v6284_v27, %v2868_v10 }
 0x1aa   : > { %v4371_v2 = vadd.f32 %v4370_v18, %v4369_v16  ;;  %v4372_v43 = vpop.f32.mrb[6].mxu0  ;;  %v4481_v45 = vpop.f32.mrb[4].mxu1 }
 0x1ab   : > { %v4373_v25 = vpop.f32.mrb[7].mxu0  ;;  %v4482_v44 = vpop.f32.mrb[5].mxu1 }
 0x1ac   : > { %v1914_v49 = vadd.f32 %v4371_v2, %v6510_v60  ;;  %v4374_v19 = vadd.f32 %v4373_v25, %v4372_v43  ;;  %v4483_v57 = vadd.f32 %v4482_v44, %v4481_v45  ;;  %v4484_v39 = vpop.f32.mrb[6].mxu1  ;;  %v2786_v18 = vpop.permute.xlu0 %2785 }
 0x1ad   : > { %3427 = vmatmul.mubr.bf16.gmra.mrb[112].mxu0 %v3107_v3  ;;  %v4485_v28 = vpop.f32.mrb[7].mxu1  ;;  %v2914_v37 = vpop.permute.xlu1 %2913 }
 0x1ae   : > { %v1917_v52 = vadd.f32 %v4374_v19, %v6510_v60  ;;  %3434 = vmatprep.mubr.bf16.mxu0 %v6493_v0  ;;  %v4486_v51 = vadd.f32 %v4485_v28, %v4484_v39  ;;  %v6538_v48 = vadd.f32 %v4483_v57, %v1914_v49  ;;  %v7411_v39 = vld [vmem:[#allocation28_spill] sm:$0xff] }
 0x1af   : > { %3330 = vmatmul.mubr.bf16.gmra.mrb[112].mxu1 %v6532_v4  ;;  %v3115_v47 = vsel %vm1424_vm3, %v7411_v39, %v2912_v7 }
 0x1b0   : > { %v4375_v42 = vpop.f32.mrb[8].mxu0  ;;  %3337 = vmatprep.mubr.bf16.mxu1 %v3079_v15  ;;  %v6541_v61 = vadd.f32 %v4486_v51, %v1917_v52  ;;  %v2870_v44 = vpop.permute.xlu0 %2869 }
 0x1b1   : > { %v4376_v59 = vpop.f32.mrb[9].mxu0 }
 0x1b2   : > { %v4377_v20 = vadd.f32 %v4376_v59, %v4375_v42  ;;  %v4378_v6 = vpop.f32.mrb[10].mxu0  ;;  %v4487_v30 = vpop.f32.mrb[8].mxu1  ;;  %v7412_v42 = vld [vmem:[#allocation35_spill] sm:$0xff] }
 0x1b3   : > { %v4379_v53 = vpop.f32.mrb[11].mxu0  ;;  %v4488_v0 = vpop.f32.mrb[9].mxu1  ;;  %v6564_v59 = vsel %vm1424_vm3, %v7412_v42, %v2786_v18 }
 0x1b4   : > { %v1922_v14 = vadd.f32 %v4377_v20, %v6510_v60  ;;  %v4380_v22 = vadd.f32 %v4379_v53, %v4378_v6  ;;  %v4489_v50 = vadd.f32 %v4488_v0, %v4487_v30  ;;  %v4490_v46 = vpop.f32.mrb[10].mxu1  ;;  %v3087_v20 = vsel %vm1424_vm3, %v6297_v32, %v2870_v44  ;;  %v2788_v0 = vpop.permute.xlu1 %2787 }
 0x1b5   : > { %3435 = vmatmul.mubr.bf16.gmra.mrb[116].mxu0 %v3111_v63  ;;  %v4491_v16 = vpop.f32.mrb[11].mxu1 }
 0x1b6   : > { %v1925_v2 = vadd.f32 %v4380_v22, %v6510_v60  ;;  %3442 = vmatprep.mubr.bf16.mxu0 %v6502_v9  ;;  %v4492_v23 = vadd.f32 %v4491_v16, %v4490_v46  ;;  %v6554_v43 = vadd.f32 %v4489_v50, %v1922_v14  ;;  %v7413_v46 = vld [vmem:[#allocation30_spill] sm:$0xff] }
 0x1b7   : > { %3338 = vmatmul.mubr.bf16.gmra.mrb[116].mxu1 %v6548_v8  ;;  %v3119_v12 = vsel %vm1424_vm3, %v7413_v46, %v2914_v37  ;;  %v2916_v37 = vpop.permute.xlu0 %2915 }
 0x1b8   : > { %v4381_v45 = vpop.f32.mrb[12].mxu0  ;;  %3345 = vmatprep.mubr.bf16.mxu1 %v3083_v5  ;;  %v6557_v3 = vadd.f32 %v4492_v23, %v1925_v2 }
 0x1b9   : > { %v4382_v25 = vpop.f32.mrb[13].mxu0 }
 0x1ba   : > { %v4383_v49 = vadd.f32 %v4382_v25, %v4381_v45  ;;  %v4384_v19 = vpop.f32.mrb[14].mxu0  ;;  %v4493_v57 = vpop.f32.mrb[12].mxu1  ;;  %v7414_v45 = vld [vmem:[#allocation37_spill] sm:$0xff] }
 0x1bb   : > { %v4385_v28 = vpop.f32.mrb[15].mxu0  ;;  %v4494_v9 = vpop.f32.mrb[13].mxu1  ;;  %v6580_v25 = vsel %vm1424_vm3, %v7414_v45, %v2788_v0 }
 0x1bc   : > { %v1930_v54 = vadd.f32 %v4383_v49, %v6510_v60  ;;  %v4386_v15 = vadd.f32 %v4385_v28, %v4384_v19  ;;  %v4495_v52 = vadd.f32 %v4494_v9, %v4493_v57  ;;  %v4496_v51 = vpop.f32.mrb[14].mxu1 }
 0x1bd   : > { %3443 = vmatmul.mubr.bf16.gmra.mrb[120].mxu0 %v3115_v47  ;;  %v4497_v10 = vpop.f32.mrb[15].mxu1 }
 0x1be   : > { %v1933_v6 = vadd.f32 %v4386_v15, %v6510_v60  ;;  %3450 = vmatprep.mubr.bf16.mxu0 %v6517_v33  ;;  %v4498_v7 = vadd.f32 %v4497_v10, %v4496_v51  ;;  %v6570_v30 = vadd.f32 %v4495_v52, %v1930_v54  ;;  %v7415_v52 = vld [vmem:[#allocation32_spill] sm:$0xff] }
 0x1bf   : > { %3346 = vmatmul.mubr.bf16.gmra.mrb[120].mxu1 %v6564_v59  ;;  %v3123_v51 = vsel %vm1424_vm3, %v7415_v52, %v2916_v37 }
 0x1c0   : > { %v4387_v13 = vpop.f32.mrb[16].mxu0  ;;  %3353 = vmatprep.mubr.bf16.mxu1 %v3087_v20  ;;  %v6573_v63 = vadd.f32 %v4498_v7, %v1933_v6 }
 0x1c1   : > { %v4388_v53 = vpop.f32.mrb[17].mxu0 }
 0x1c2   : > { %v4389_v14 = vadd.f32 %v4388_v53, %v4387_v13  ;;  %v4390_v22 = vpop.f32.mrb[18].mxu0  ;;  %v4499_v50 = vpop.f32.mrb[16].mxu1 }
 0x1c3   : > { %v4391_v16 = vpop.f32.mrb[19].mxu0  ;;  %v4500_v18 = vpop.f32.mrb[17].mxu1 }
 0x1c4   : > { %v1938_v33 = vadd.f32 %v4389_v14, %v6510_v60  ;;  %v4392_v5 = vadd.f32 %v4391_v16, %v4390_v22  ;;  %v4501_v2 = vadd.f32 %v4500_v18, %v4499_v50  ;;  %v4502_v23 = vpop.f32.mrb[18].mxu1  ;;  %v2918_v14 = vpop.permute.xlu1 %2917 }
 0x1c5   : > { %3451 = vmatmul.mubr.bf16.gmra.mrb[124].mxu0 %v3119_v12  ;;  %v4503_v44 = vpop.f32.mrb[19].mxu1 }
 0x1c6   : > { %v1941_v49 = vadd.f32 %v4392_v5, %v6510_v60  ;;  %3458 = vmatprep.mubr.bf16.mxu0 %v6532_v4  ;;  %v4504_v19 = vadd.f32 %v4503_v44, %v4502_v23  ;;  %v6584_v57 = vadd.f32 %v4501_v2, %v1938_v33  ;;  %v7416_v33 = vld [vmem:[#allocation34_spill] sm:$0xff] }
 0x1c7   : > { %3354 = vmatmul.mubr.bf16.gmra.mrb[124].mxu1 %v6580_v25 }
 0x1c8   : > { %v4393_v39 = vpop.f32.mrb[20].mxu0  ;;  %4883 = vmatprep.mubr.msk.bf16.mxu1 %vm1424_vm3, %v6048_v1  ;;  %v6589_v47 = vadd.f32 %v4504_v19, %v1941_v49 }
 0x1c9   : > { %v4394_v28 = vpop.f32.mrb[21].mxu0 }
 0x1ca   : > { %v4395_v9 = vadd.f32 %v4394_v28, %v4393_v39  ;;  %v4396_v54 = vpop.f32.mrb[22].mxu0  ;;  %v4505_v15 = vpop.f32.mrb[20].mxu1 }
 0x1cb   : > { %v4397_v4 = vpop.f32.mrb[23].mxu0  ;;  %v4506_v42 = vpop.f32.mrb[21].mxu1 }
 0x1cc   : > { %v1946_v10 = vadd.f32 %v4395_v9, %v6510_v60  ;;  %v4398_v20 = vadd.f32 %v4397_v4, %v4396_v54  ;;  %v4507_v6 = vadd.f32 %v4506_v42, %v4505_v15  ;;  %v4508_v7 = vpop.f32.mrb[22].mxu1  ;;  %v2920_v39 = vpop.permute.xlu0 %2919  ;;  %v7417_v4 = vld [vmem:[#allocation36_spill] sm:$0xff] }
 0x1cd   : > { %3459 = vmatmul.mubr.bf16.gmra.mrb[128].mxu0 %v3123_v51  ;;  %v4509_v13 = vpop.f32.mrb[23].mxu1 }
 0x1ce   : > { %v1949_v1 = vadd.f32 %v4398_v20, %v6510_v60  ;;  %3466 = vmatprep.mubr.bf16.mxu0 %v6548_v8  ;;  %v4510_v53 = vadd.f32 %v4509_v13, %v4508_v7  ;;  %v6596_v0 = vadd.f32 %v4507_v6, %v1946_v10  ;;  %v3127_v8 = vsel %vm1424_vm3, %v7416_v33, %v2918_v14  ;;  %v2922_v14 = vpop.permute.xlu1 %2921 }
 0x1cf   : > { %4884 = vmatmul.mubr.msk.bf16.vlgmr.msra.gmra.mrb[128].mxu1 %vm1424_vm3, %v6080_v17 }
 0x1d0   : > { %v4399_v22 = vpop.f32.mrb[24].mxu0  ;;  %4887 = vmatprep.mubr.msk.bf16.mxu1 %vm1424_vm3, %v6110_v62  ;;  %v6602_v50 = vadd.f32 %v4510_v53, %v1949_v1 }
 0x1d1   : > { %v4400_v46 = vpop.f32.mrb[25].mxu0 }
 0x1d2   : > { %v4401_v12 = vadd.f32 %v4400_v46, %v4399_v22  ;;  %v4402_v16 = vpop.f32.mrb[26].mxu0  ;;  %v4511_v18 = vpop.f32.mrb[24].mxu1 }
 0x1d3   : > { %v4403_v5 = vpop.f32.mrb[27].mxu0  ;;  %v4512_v2 = vpop.f32.mrb[25].mxu1 }
 0x1d4   : > { %v1954_v23 = vadd.f32 %v4401_v12, %v6510_v60  ;;  %v4404_v45 = vadd.f32 %v4403_v5, %v4402_v16  ;;  %v4513_v17 = vadd.f32 %v4512_v2, %v4511_v18  ;;  %v4514_v44 = vpop.f32.mrb[26].mxu1  ;;  %v2965_v46 = vpop.permute.xlu0 %2964  ;;  %v7418_v5 = vld [vmem:[#allocation38_spill] sm:$0xff] }
 0x1d5   : > { %3467 = vmatmul.mubr.bf16.gmra.mrb[132].mxu0 %v3127_v8  ;;  %v4515_v49 = vpop.f32.mrb[27].mxu1 }
 0x1d6   : > { %v1957_v62 = vadd.f32 %v4404_v45, %v6510_v60  ;;  %3474 = vmatprep.mubr.bf16.mxu0 %v6564_v59  ;;  %v4516_v19 = vadd.f32 %v4515_v49, %v4514_v44  ;;  %v6609_v37 = vadd.f32 %v4513_v17, %v1954_v23  ;;  %v3131_v59 = vsel %vm1424_vm3, %v7417_v4, %v2920_v39 }
 0x1d7   : > { %4888 = vmatmul.mubr.msk.bf16.gmra.mrb[132].mxu1 %vm1424_vm3, %v6139_v34 }
 0x1d8   : > { %v4405_v28 = vpop.f32.mrb[28].mxu0  ;;  %4891 = vmatprep.mubr.msk.bf16.mxu1 %vm1424_vm3, %v6170_v24  ;;  %v6615_v9 = vadd.f32 %v4516_v19, %v1957_v62 }
 0x1d9   : > { %v4406_v54 = vpop.f32.mrb[29].mxu0 }
 0x1da   : > { %v4407_v15 = vadd.f32 %v4406_v54, %v4405_v28  ;;  %v4408_v52 = vpop.f32.mrb[30].mxu0  ;;  %v4517_v51 = vpop.f32.mrb[28].mxu1 }
 0x1db   : > { %v4409_v42 = vpop.f32.mrb[31].mxu0  ;;  %v4518_v10 = vpop.f32.mrb[29].mxu1 }
 0x1dc   : > { %v1962_v20 = vadd.f32 %v4407_v15, %v6510_v60  ;;  %v4410_v6 = vadd.f32 %v4409_v42, %v4408_v52  ;;  %v4519_v34 = vadd.f32 %v4518_v10, %v4517_v51  ;;  %v4520_v7 = vpop.f32.mrb[30].mxu1  ;;  %v2924_v28 = vpop.permute.xlu1 %2923  ;;  %v7419_v42 = vld [vmem:[#allocation39_spill] sm:$0xff] }
 0x1dd   : > { %3475 = vmatmul.mubr.bf16.gmra.mrb[136].mxu0 %v3131_v59  ;;  %v4521_v13 = vpop.f32.mrb[31].mxu1  ;;  %v3139_v10 = vsel %vm1424_vm3, %v7419_v42, %v2924_v28  ;;  %v2973_v42 = vrot.slane %v6253_v11, 1 }
 0x1de   : > { %v1965_v24 = vadd.f32 %v4410_v6, %v6510_v60  ;;  %3482 = vmatprep.mubr.bf16.mxu0 %v6580_v25  ;;  %v4522_v1 = vadd.f32 %v4521_v13, %v4520_v7  ;;  %v6622_v53 = vadd.f32 %v4519_v34, %v1962_v20  ;;  %v3135_v25 = vsel %vm1424_vm3, %v7418_v5, %v2922_v14 }
 0x1df   : > { %4892 = vmatmul.mubr.msk.bf16.gmra.mrb[136].mxu1 %vm1424_vm3, %v6198_v31  ;;  %v3154_v31 = vsel %vm1424_vm3, %v6176_v36, %v2965_v46  ;;  %v2967_v36 = vpop.permute.xlu0 %2966 }
 0x1e0   : > { %v4411_v22 = vpop.f32.mrb[32].mxu0  ;;  %4895 = vmatprep.mubr.msk.bf16.mxu1 %vm1424_vm3, %v6225_v56  ;;  %v6628_v12 = vadd.f32 %v4522_v1, %v1965_v24  ;;  %v2926_v46 = vpop.permute.xlu1 %2925 }
 0x1e1   : > { %v4412_v16 = vpop.f32.mrb[33].mxu0 }
 0x1e2   : > { %v4413_v18 = vadd.f32 %v4412_v16, %v4411_v22  ;;  %v4414_v33 = vpop.f32.mrb[34].mxu0  ;;  %v4523_v8 = vpop.f32.mrb[32].mxu1 }
 0x1e3   : > { %v4415_v2 = vpop.f32.mrb[35].mxu0  ;;  %v4524_v23 = vpop.f32.mrb[33].mxu1 }
 0x1e4   : > { %v1970_v45 = vadd.f32 %v4413_v18, %v6510_v60  ;;  %v4416_v17 = vadd.f32 %v4415_v2, %v4414_v33  ;;  %v4525_v44 = vadd.f32 %v4524_v23, %v4523_v8  ;;  %v4526_v56 = vpop.f32.mrb[34].mxu1  ;;  %v7420_v2 = vld [vmem:[#allocation40_spill] sm:$0xff] }
 0x1e5   : > { %3483 = vmatmul.mubr.bf16.gmra.mrb[140].mxu0 %v3135_v25  ;;  %v4527_v49 = vpop.f32.mrb[35].mxu1  ;;  %v3143_v23 = vsel %vm1424_vm3, %v7420_v2, %v2926_v46 }
 0x1e6   : > { %v1973_v62 = vadd.f32 %v4416_v17, %v6510_v60  ;;  %v4528_v19 = vadd.f32 %v4527_v49, %v4526_v56  ;;  %3490 = vmatprep.mubr.bf16.mxu0 %v3154_v31  ;;  %v6636_v39 = vadd.f32 %v4525_v44, %v1970_v45 }
 0x1e7   : > { %4896 = vmatmul.mubr.msk.bf16.gmra.mrb[140].mxu1 %vm1424_vm3, %v6242_v35  ;;  %v3157_v35 = vsel %vm1424_vm3, %v6203_v41, %v2967_v36  ;;  %v2969_v41 = vpop.permute.xlu0 %2968 }
 0x1e8   : > { %v4417_v54 = vpop.f32.mrb[36].mxu0  ;;  %4899 = vmatprep.mubr.msk.bf16.mxu1 %vm1424_vm3, %v6250_v40  ;;  %v6642_v15 = vadd.f32 %v4528_v19, %v1973_v62 }
 0x1e9   : > { %v4418_v52 = vpop.f32.mrb[37].mxu0 }
 0x1ea   : > { %v4419_v51 = vadd.f32 %v4418_v52, %v4417_v54  ;;  %v4420_v4 = vpop.f32.mrb[38].mxu0  ;;  %v4529_v59 = vpop.f32.mrb[36].mxu1 }
 0x1eb   : > { %v4421_v20 = vpop.f32.mrb[39].mxu0  ;;  %v4530_v6 = vpop.f32.mrb[37].mxu1 }
 0x1ec   : > { %v1978_v34 = vadd.f32 %v4419_v51, %v6510_v60  ;;  %v4422_v7 = vadd.f32 %v4421_v20, %v4420_v4  ;;  %v4531_v13 = vadd.f32 %v4530_v6, %v4529_v59  ;;  %v4532_v40 = vpop.f32.mrb[38].mxu1  ;;  %v2928_v54 = vpop.permute.xlu1 %2927  ;;  %v5082_v4 = vld [vmem:[%s5299_s19 + $0x14] sm:$0xff]  }
 0x1ed   : > { %3491 = vmatmul.mubr.bf16.gmra.mrb[144].mxu0 %v3139_v10  ;;  %v4533_v24 = vpop.f32.mrb[39].mxu1  ;;  %v2971_v36 = vpop.permute.xlu0 %2970  ;;  %v2972_v59 = vrot.slane %v5082_v4, 1 }
 0x1ee   : > { %v1981_v1 = vadd.f32 %v4422_v7, %v6510_v60  ;;  %v4534_v14 = vadd.f32 %v4533_v24, %v4532_v40  ;;  %3498 = vmatprep.mubr.bf16.mxu0 %v3157_v35  ;;  %v6650_v22 = vadd.f32 %v4531_v13, %v1978_v34  ;;  %v7421_v35 = vld [vmem:[#allocation41_spill] sm:$0xff]  ;;  %v5083_v13 = vld [vmem:[%s5299_s19 + $0x1c] sm:$0xff]  }
 0x1ef   : > { %4900 = vmatmul.mubr.msk.bf16.gmra.mrb[144].mxu1 %vm1424_vm3, %v6260_v58  ;;  %v3160_v58 = vsel %vm1424_vm3, %v6230_v21, %v2969_v41  ;;  %v3163_v40 = vsel %vm1424_vm3, %v5083_v13, %v2971_v36  ;;  %v2974_v11 = vsel %vm1235_vm2, %v2972_v59, %v2973_v42 }
 0x1f0   : > { %v4423_v16 = vpop.f32.mrb[40].mxu0  ;;  %4903 = vmatprep.mubr.msk.bf16.mxu1 %vm1424_vm3, %v6284_v27  ;;  %v6656_v18 = vadd.f32 %v4534_v14, %v1981_v1 }
 0x1f1   : > { %v4424_v33 = vpop.f32.mrb[41].mxu0 }
 0x1f2   : > { %v4425_v8 = vadd.f32 %v4424_v33, %v4423_v16  ;;  %v4426_v5 = vpop.f32.mrb[42].mxu0  ;;  %v4535_v25 = vpop.f32.mrb[40].mxu1 }
 0x1f3   : > { %v4427_v31 = vpop.f32.mrb[43].mxu0  ;;  %v4536_v45 = vpop.f32.mrb[41].mxu1 }
 0x1f4   : > { %v1986_v17 = vadd.f32 %v4425_v8, %v6510_v60  ;;  %v4428_v44 = vadd.f32 %v4427_v31, %v4426_v5  ;;  %v4537_v27 = vadd.f32 %v4536_v45, %v4535_v25  ;;  %v4538_v56 = vpop.f32.mrb[42].mxu1  ;;  %v2930_v8 = vpop.permute.xlu1 %2929  ;;  %v5084_v25 = vld [vmem:[%s5299_s19 + $0x24] ss:$0 sps:$4 sm:$0x11]  }
 0x1f5   : > { %3499 = vmatmul.mubr.bf16.gmra.mrb[148].mxu0 %v3143_v23  ;;  %v4539_v49 = vpop.f32.mrb[43].mxu1  ;;  %v2975_v2 = vrot.slane %v5084_v25, 1 }
 0x1f6   : > { %v1989_v62 = vadd.f32 %v4428_v44, %v6510_v60  ;;  %v4540_v19 = vadd.f32 %v4539_v49, %v4538_v56  ;;  %3506 = vmatprep.mubr.bf16.mxu0 %v3160_v58  ;;  %v6664_v28 = vadd.f32 %v4537_v27, %v1986_v17  ;;  %v7422_v44 = vld [vmem:[#allocation5_spill] sm:$0xff] }
 0x1f7   : > { %4904 = vmatmul.mubr.msk.bf16.gmra.mrb[148].mxu1 %vm1424_vm3, %v6297_v32  ;;  %v3147_v32 = vsel %vm1424_vm3, %v7421_v35, %v2928_v54  ;;  %v3151_v27 = vsel %vm1424_vm3, %v7422_v44, %v2930_v8 }
 0x1f8   : > { %v4429_v21 = vpop.f32.mrb[44].mxu0  ;;  %4907 = vmatprep.mubr.msk.bf16.mxu1 %vm1424_vm3, %v6314_v38  ;;  %v6670_v52 = vadd.f32 %v4540_v19, %v1989_v62 }
 0x1f9   : > { %v4430_v51 = vpop.f32.mrb[45].mxu0 }
 0x1fa   : > { %v4431_v10 = vadd.f32 %v4430_v51, %v4429_v21  ;;  %v4432_v20 = vpop.f32.mrb[46].mxu0  ;;  %v4541_v6 = vpop.f32.mrb[44].mxu1  ;;  %v2976_v21 = vsel %vm1235_vm2, %v2973_v42, %v2975_v2 }
 0x1fb   : > { %v4433_v34 = vpop.f32.mrb[47].mxu0  ;;  %v4542_v7 = vpop.f32.mrb[45].mxu1 }
 0x1fc   : > { %v1994_v38 = vadd.f32 %v4431_v10, %v6510_v60  ;;  %v4434_v24 = vadd.f32 %v4433_v34, %v4432_v20  ;;  %v4543_v1 = vadd.f32 %v4542_v7, %v4541_v6  ;;  %v4544_v14 = vpop.f32.mrb[46].mxu1 }
 0x1fd   : > { %3507 = vmatmul.mubr.bf16.gmra.mrb[152].mxu0 %v3147_v32  ;;  %v4545_v46 = vpop.f32.mrb[47].mxu1 }
 0x1fe   : > { %v1997_v16 = vadd.f32 %v4434_v24, %v6510_v60  ;;  %v4546_v41 = vadd.f32 %v4545_v46, %v4544_v14  ;;  %3514 = vmatprep.mubr.bf16.mxu0 %v3163_v40  ;;  %v6681_v33 = vadd.f32 %v4543_v1, %v1994_v38 }
 0x1ff   : > { %4908 = vmatmul.mubr.msk.bf16.gmra.mrb[152].mxu1 %vm1424_vm3, %v6322_v26 }
 0x200   : > { %v4435_v5 = vpop.f32.mrb[48].mxu0  ;;  %4911 = vmatprep.mubr.msk.bf16.mxu1 %vm1424_vm3, %v2974_v11  ;;  %v6687_v23 = vadd.f32 %v4546_v41, %v1997_v16 }
 0x201   : > { %v4436_v31 = vpop.f32.mrb[49].mxu0 }
 0x202   : > { %v4437_v45 = vadd.f32 %v4436_v31, %v4435_v5  ;;  %v4438_v58 = vpop.f32.mrb[50].mxu0  ;;  %v4547_v17 = vpop.f32.mrb[48].mxu1 }
 0x203   : > { %v4439_v56 = vpop.f32.mrb[51].mxu0  ;;  %v4548_v49 = vpop.f32.mrb[49].mxu1 }
 0x204   : > { %v2002_v62 = vadd.f32 %v4437_v45, %v6510_v60  ;;  %v4440_v26 = vadd.f32 %v4439_v56, %v4438_v58  ;;  %v4549_v19 = vadd.f32 %v4548_v49, %v4547_v17  ;;  %v4550_v54 = vpop.f32.mrb[50].mxu1 }
 0x205   : > { %3515 = vmatmul.mubr.bf16.gmra.mrb[156].mxu0 %v3151_v27  ;;  %v4551_v36 = vpop.f32.mrb[51].mxu1 }
 0x206   : > { %v2005_v51 = vadd.f32 %v4440_v26, %v6510_v60  ;;  %v4552_v4 = vadd.f32 %v4551_v36, %v4550_v54  ;;  %v6694_v59 = vadd.f32 %v4549_v19, %v2002_v62 }
 0x207   : > { %4912 = vmatmul.mubr.msk.bf16.gmra.mrb[156].mxu1 %vm1424_vm3, %v2976_v21 }
 0x208   : > { %v4441_v10 = vpop.f32.mrb[52].mxu0  ;;  %v6697_v20 = vadd.f32 %v4552_v4, %v2005_v51 }
 0x209   : > { %v4442_v6 = vpop.f32.mrb[53].mxu0 }
 0x20a   : > { %v4443_v35 = vadd.f32 %v4442_v6, %v4441_v10  ;;  %v4444_v32 = vpop.f32.mrb[54].mxu0  ;;  %v4553_v34 = vpop.f32.mrb[52].mxu1 }
 0x20b   : > { %v4445_v7 = vpop.f32.mrb[55].mxu0  ;;  %v4554_v13 = vpop.f32.mrb[53].mxu1 }
 0x20c   : > { %v2010_v42 = vadd.f32 %v4443_v35, %v6510_v60  ;;  %v4446_v40 = vadd.f32 %v4445_v7, %v4444_v32  ;;  %v4555_v38 = vadd.f32 %v4554_v13, %v4553_v34  ;;  %v4556_v24 = vpop.f32.mrb[54].mxu1 }
 0x20d   : > { %v4557_v1 = vpop.f32.mrb[55].mxu1 }
 0x20e   : > { %v2013_v14 = vadd.f32 %v4446_v40, %v6510_v60  ;;  %v4558_v46 = vadd.f32 %v4557_v1, %v4556_v24  ;;  %v6701_v11 = vadd.f32 %v4555_v38, %v2010_v42 }
 0x210   : > { %v4447_v16 = vpop.f32.mrb[56].mxu0  ;;  %v6703_v41 = vadd.f32 %v4558_v46, %v2013_v14 }
 0x211   : > { %v4448_v8 = vpop.f32.mrb[57].mxu0 }
 0x212   : > { %v4449_v5 = vadd.f32 %v4448_v8, %v4447_v16  ;;  %v4450_v25 = vpop.f32.mrb[58].mxu0  ;;  %v4559_v2 = vpop.f32.mrb[56].mxu1 }
 0x213   : > { %v4451_v31 = vpop.f32.mrb[59].mxu0  ;;  %v4560_v45 = vpop.f32.mrb[57].mxu1 }
 0x214   : > { %v2018_v58 = vadd.f32 %v4449_v5, %v6510_v60  ;;  %v4452_v17 = vadd.f32 %v4451_v31, %v4450_v25  ;;  %v4561_v44 = vadd.f32 %v4560_v45, %v4559_v2  ;;  %v4562_v27 = vpop.f32.mrb[58].mxu1 }
 0x215   : > { %v4563_v56 = vpop.f32.mrb[59].mxu1 }
 0x216   : > { %v2021_v49 = vadd.f32 %v4452_v17, %v6510_v60  ;;  %v4564_v62 = vadd.f32 %v4563_v56, %v4562_v27  ;;  %v6707_v26 = vadd.f32 %v4561_v44, %v2018_v58 }
 0x218   : > { %v4453_v19 = vpop.f32.mrb[60].mxu0  ;;  %v6709_v54 = vadd.f32 %v4564_v62, %v2021_v49 }
 0x219   : > { %v4454_v21 = vpop.f32.mrb[61].mxu0 }
 0x21a   : > { %v4455_v36 = vadd.f32 %v4454_v21, %v4453_v19  ;;  %v4456_v51 = vpop.f32.mrb[62].mxu0  ;;  %v4565_v4 = vpop.f32.mrb[60].mxu1 }
 0x21b   : > { %v4457_v10 = vpop.f32.mrb[63].mxu0  ;;  %v4566_v6 = vpop.f32.mrb[61].mxu1 }
 0x21c   : > { %v2026_v35 = vadd.f32 %v4455_v36, %v6510_v60  ;;  %v4458_v32 = vadd.f32 %v4457_v10, %v4456_v51  ;;  %v4567_v34 = vadd.f32 %v4566_v6, %v4565_v4  ;;  %v4568_v7 = vpop.f32.mrb[62].mxu1 }
 0x21d   : > { %v4569_v13 = vpop.f32.mrb[63].mxu1 }
 0x21e   : > { %v2029_v42 = vadd.f32 %v4458_v32, %v6510_v60  ;;  %v4570_v40 = vadd.f32 %v4569_v13, %v4568_v7  ;;  %v6713_v38 = vadd.f32 %v4567_v34, %v2026_v35 }
 0x220   : > { %v4845_v24 = vpop.f32.mrb[64].mxu0  ;;  %v6715_v1 = vadd.f32 %v4570_v40, %v2029_v42 }
 0x221   : > { %v6718_v14 = vadd.f32 %v4845_v24, %v6538_v48  ;;  %v2227_v46 = vpop.f32.mrb[65].mxu0 }
 0x222   : > { %v6721_v16 = vadd.f32 %v2227_v46, %v6522_v29  ;;  %v4846_v8 = vpop.f32.mrb[66].mxu0  ;;  %v4607_v5 = vpop.f32.mrb[64].mxu1 }
 0x223   : > { %v6724_v25 = vadd.f32 %v4846_v8, %v6541_v61  ;;  %v2230_v2 = vpop.f32.mrb[67].mxu0  ;;  %v4608_v60 = vpop.f32.mrb[65].mxu1  ;;  %v2373_v56 = vsel %vm1424_vm3, %v6718_v14, 0.0 }
 0x224   : > { %v6727_v31 = vadd.f32 %v2230_v2, %v6525_v55  ;;  %v6729_v45 = vadd.f32 %v4608_v60, %v4607_v5  ;;  %v4610_v58 = vpop.f32.mrb[66].mxu1  ;;  %v2370_v29 = vsel %vm1424_vm3, %v6721_v16, 0.0 }
 0x225   : > { %v4611_v17 = vpop.f32.mrb[67].mxu1  ;;  %v2375_v36 = vsel %vm1424_vm3, %v6724_v25, 0.0 }
 0x226   : > { %v2371_v61 = vsel %vm1424_vm3, %v6727_v31, 0.0  ;;  %v6739_v27 = vadd.f32 %v4611_v17, %v4610_v58 }
 0x227   : > { %v2372_v55 = vadd.f32 %v2371_v61, %v2370_v29 }
 0x228   : > { %v4849_v49 = vpop.f32.mrb[68].mxu0 }
 0x229   : > { %v2374_v62 = vadd.f32 %v2373_v56, %v2372_v55  ;;  %v6744_v19 = vadd.f32 %v4849_v49, %v6570_v30  ;;  %v2243_v21 = vpop.f32.mrb[69].mxu0 }
 0x22a   : > { %v6749_v51 = vadd.f32 %v2243_v21, %v6554_v43  ;;  %v4850_v4 = vpop.f32.mrb[70].mxu0  ;;  %v4613_v10 = vpop.f32.mrb[68].mxu1 }
 0x22b   : > { %v2376_v6 = vadd.f32 %v2375_v36, %v2374_v62  ;;  %v6752_v35 = vadd.f32 %v4850_v4, %v6573_v63  ;;  %v2246_v32 = vpop.f32.mrb[71].mxu0  ;;  %v4614_v34 = vpop.f32.mrb[69].mxu1 }
 0x22c   : > { %v2377_v7 = vsel %vm1424_vm3, %v6749_v51, 0.0  ;;  %v6757_v30 = vadd.f32 %v2246_v32, %v6557_v3  ;;  %v6759_v13 = vadd.f32 %v4614_v34, %v4613_v10  ;;  %v4616_v42 = vpop.f32.mrb[70].mxu1  ;;  %v2381_v3 = vsel %vm1424_vm3, %v6744_v19, 0.0 }
 0x22d   : > { %v2378_v40 = vadd.f32 %v2377_v7, %v2376_v6  ;;  %v4617_v24 = vpop.f32.mrb[71].mxu1  ;;  %v2383_v29 = vsel %vm1424_vm3, %v6752_v35, 0.0 }
 0x22e   : > { %v2379_v46 = vsel %vm1424_vm3, %v6757_v30, 0.0  ;;  %v6767_v8 = vadd.f32 %v4617_v24, %v4616_v42 }
 0x22f   : > { %v2380_v5 = vadd.f32 %v2379_v46, %v2378_v40 }
 0x230   : > { %v4853_v2 = vpop.f32.mrb[72].mxu0 }
 0x231   : > { %v2382_v60 = vadd.f32 %v2381_v3, %v2380_v5  ;;  %v6772_v58 = vadd.f32 %v4853_v2, %v6596_v0  ;;  %v2259_v17 = vpop.f32.mrb[73].mxu0 }
 0x232   : > { %v6777_v61 = vadd.f32 %v2259_v17, %v6584_v57  ;;  %v4854_v55 = vpop.f32.mrb[74].mxu0  ;;  %v4619_v56 = vpop.f32.mrb[72].mxu1 }
 0x233   : > { %v2384_v49 = vadd.f32 %v2383_v29, %v2382_v60  ;;  %v6780_v62 = vadd.f32 %v4854_v55, %v6602_v50  ;;  %v2262_v21 = vpop.f32.mrb[75].mxu0  ;;  %v4620_v36 = vpop.f32.mrb[73].mxu1 }
 0x234   : > { %v2385_v4 = vsel %vm1424_vm3, %v6777_v61, 0.0  ;;  %v6785_v0 = vadd.f32 %v2262_v21, %v6589_v47  ;;  %v6787_v10 = vadd.f32 %v4620_v36, %v4619_v56  ;;  %v4622_v6 = vpop.f32.mrb[74].mxu1  ;;  %v2389_v47 = vsel %vm1424_vm3, %v6772_v58, 0.0 }
 0x235   : > { %v2386_v32 = vadd.f32 %v2385_v4, %v2384_v49  ;;  %v4623_v34 = vpop.f32.mrb[75].mxu1  ;;  %v2391_v2 = vsel %vm1424_vm3, %v6780_v62, 0.0 }
 0x236   : > { %v2387_v7 = vsel %vm1424_vm3, %v6785_v0, 0.0  ;;  %v6795_v42 = vadd.f32 %v4623_v34, %v4622_v6 }
 0x237   : > { %v2388_v40 = vadd.f32 %v2387_v7, %v2386_v32 }
 0x238   : > { %v4857_v24 = vpop.f32.mrb[76].mxu0 }
 0x239   : > { %v2390_v46 = vadd.f32 %v2389_v47, %v2388_v40  ;;  %v6800_v5 = vadd.f32 %v4857_v24, %v6622_v53  ;;  %v2275_v3 = vpop.f32.mrb[77].mxu0 }
 0x23a   : > { %v6805_v60 = vadd.f32 %v2275_v3, %v6609_v37  ;;  %v4858_v17 = vpop.f32.mrb[78].mxu0  ;;  %v4625_v29 = vpop.f32.mrb[76].mxu1 }
 0x23b   : > { %v2392_v55 = vadd.f32 %v2391_v2, %v2390_v46  ;;  %v6808_v56 = vadd.f32 %v4858_v17, %v6628_v12  ;;  %v2278_v49 = vpop.f32.mrb[79].mxu0  ;;  %v4626_v21 = vpop.f32.mrb[77].mxu1 }
 0x23c   : > { %7423 = vst [vmem:[#allocation8_spill] sm:$0xff] %v6805_v60  ;;  %v2393_v36 = vsel %vm1424_vm3, %v6805_v60, 0.0  ;;  %v6813_v53 = vadd.f32 %v2278_v49, %v6615_v9  ;;  %v6815_v4 = vadd.f32 %v4626_v21, %v4625_v29  ;;  %v4628_v6 = vpop.f32.mrb[78].mxu1  ;;  %v2397_v9 = vsel %vm1424_vm3, %v6800_v5, 0.0 }
 0x23d   : > { %v2394_v32 = vadd.f32 %v2393_v36, %v2392_v55  ;;  %v4629_v34 = vpop.f32.mrb[79].mxu1  ;;  %v2399_v17 = vsel %vm1424_vm3, %v6808_v56, 0.0 }
 0x23e   : > { %7424 = vst [vmem:[#allocation6_spill] sm:$0xff] %v6813_v53  ;;  %v2395_v7 = vsel %vm1424_vm3, %v6813_v53, 0.0  ;;  %v6823_v40 = vadd.f32 %v4629_v34, %v4628_v6 }
 0x23f   : > { %v2396_v47 = vadd.f32 %v2395_v7, %v2394_v32 }
 0x240   : > { %v4861_v24 = vpop.f32.mrb[80].mxu0 }
 0x241   : > { %v2398_v46 = vadd.f32 %v2397_v9, %v2396_v47  ;;  %v6828_v3 = vadd.f32 %v4861_v24, %v6650_v22  ;;  %v2291_v2 = vpop.f32.mrb[81].mxu0 }
 0x242   : > { %v6833_v29 = vadd.f32 %v2291_v2, %v6636_v39  ;;  %v4862_v55 = vpop.f32.mrb[82].mxu0  ;;  %v4631_v49 = vpop.f32.mrb[80].mxu1 }
 0x243   : > { %7425 = vst [vmem:[#allocation10_spill] sm:$0xff] %v6828_v3  ;;  %v2400_v21 = vadd.f32 %v2399_v17, %v2398_v46  ;;  %v6836_v36 = vadd.f32 %v4862_v55, %v6656_v18  ;;  %v2294_v6 = vpop.f32.mrb[83].mxu0  ;;  %v4632_v32 = vpop.f32.mrb[81].mxu1 }
 0x244   : > { %7426 = vst [vmem:[#allocation7_spill] sm:$0xff] %v6833_v29  ;;  %v2401_v34 = vsel %vm1424_vm3, %v6833_v29, 0.0  ;;  %v6841_v22 = vadd.f32 %v2294_v6, %v6642_v15  ;;  %v6843_v7 = vadd.f32 %v4632_v32, %v4631_v49  ;;  %v4634_v47 = vpop.f32.mrb[82].mxu1  ;;  %v2405_v15 = vsel %vm1424_vm3, %v6828_v3, 0.0 }
 0x245   : > { %7427 = vst [vmem:[#allocation12_spill] sm:$0xff] %v6836_v36  ;;  %v2402_v9 = vadd.f32 %v2401_v34, %v2400_v21  ;;  %v4635_v24 = vpop.f32.mrb[83].mxu1  ;;  %v2407_v32 = vsel %vm1424_vm3, %v6836_v36, 0.0 }
 0x246   : > { %7428 = vst [vmem:[#allocation9_spill] sm:$0xff] %v6841_v22  ;;  %v2403_v46 = vsel %vm1424_vm3, %v6841_v22, 0.0  ;;  %v6851_v2 = vadd.f32 %v4635_v24, %v4634_v47 }
 0x247   : > { %v2404_v17 = vadd.f32 %v2403_v46, %v2402_v9 }
 0x248   : > { %v4865_v55 = vpop.f32.mrb[84].mxu0 }
 0x249   : > { %v2406_v49 = vadd.f32 %v2405_v15, %v2404_v17  ;;  %v6856_v21 = vadd.f32 %v4865_v55, %v6681_v33  ;;  %v2307_v6 = vpop.f32.mrb[85].mxu0 }
 0x24a   : > { %v6861_v34 = vadd.f32 %v2307_v6, %v6664_v28  ;;  %v4866_v18 = vpop.f32.mrb[86].mxu0  ;;  %v4637_v39 = vpop.f32.mrb[84].mxu1 }
 0x24b   : > { %7429 = vst [vmem:[#allocation16_spill] sm:$0xff] %v6856_v21  ;;  %v2408_v47 = vadd.f32 %v2407_v32, %v2406_v49  ;;  %v6864_v9 = vadd.f32 %v4866_v18, %v6687_v23  ;;  %v2310_v24 = vpop.f32.mrb[87].mxu0  ;;  %v4638_v46 = vpop.f32.mrb[85].mxu1 }
 0x24c   : > { %7430 = vst [vmem:[#allocation11_spill] sm:$0xff] %v6861_v34  ;;  %v2409_v17 = vsel %vm1424_vm3, %v6861_v34, 0.0  ;;  %v6869_v33 = vadd.f32 %v2310_v24, %v6670_v52  ;;  %v6871_v15 = vadd.f32 %v4638_v46, %v4637_v39  ;;  %v4640_v55 = vpop.f32.mrb[86].mxu1  ;;  %v2413_v52 = vsel %vm1424_vm3, %v6856_v21, 0.0 }
 0x24d   : > { %7431 = vst [vmem:[#allocation13_spill] sm:$0xff] %v6864_v9  ;;  %v2410_v12 = vadd.f32 %v2409_v17, %v2408_v47  ;;  %v4641_v6 = vpop.f32.mrb[87].mxu1  ;;  %v2415_v17 = vsel %vm1424_vm3, %v6864_v9, 0.0 }
 0x24e   : > { %7432 = vst [vmem:[#allocation18_spill] sm:$0xff] %v6869_v33  ;;  %v2411_v18 = vsel %vm1424_vm3, %v6869_v33, 0.0  ;;  %v6879_v49 = vadd.f32 %v4641_v6, %v4640_v55 }
 0x24f   : > { %v2412_v32 = vadd.f32 %v2411_v18, %v2410_v12 }
 0x250   : > { %v4869_v39 = vpop.f32.mrb[88].mxu0 }
 0x251   : > { %v2414_v24 = vadd.f32 %v2413_v52, %v2412_v32  ;;  %v6884_v47 = vadd.f32 %v4869_v39, %v6701_v11  ;;  %v2323_v46 = vpop.f32.mrb[89].mxu0 }
 0x252   : > { %v6889_v23 = vadd.f32 %v2323_v46, %v6694_v59  ;;  %v4870_v28 = vpop.f32.mrb[90].mxu0  ;;  %v4643_v37 = vpop.f32.mrb[88].mxu1 }
 0x253   : > { %7433 = vst [vmem:[#allocation14_spill] sm:$0xff] %v6884_v47  ;;  %v2416_v55 = vadd.f32 %v2415_v17, %v2414_v24  ;;  %v6892_v12 = vadd.f32 %v4870_v28, %v6703_v41  ;;  %v2326_v6 = vpop.f32.mrb[91].mxu0  ;;  %v4644_v18 = vpop.f32.mrb[89].mxu1 }
 0x254   : > { %7434 = vst [vmem:[#allocation15_spill] sm:$0xff] %v6889_v23  ;;  %v2417_v32 = vsel %vm1424_vm3, %v6889_v23, 0.0  ;;  %v6897_v11 = vadd.f32 %v2326_v6, %v6697_v20  ;;  %v6899_v52 = vadd.f32 %v4644_v18, %v4643_v37  ;;  %v4646_v39 = vpop.f32.mrb[90].mxu1  ;;  %v2421_v20 = vsel %vm1424_vm3, %v6884_v47, 0.0 }
 0x255   : > { %7435 = vst [vmem:[#allocation19_spill] sm:$0xff] %v6892_v12  ;;  %v2418_v50 = vadd.f32 %v2417_v32, %v2416_v55  ;;  %v4647_v46 = vpop.f32.mrb[91].mxu1  ;;  %v2423_v32 = vsel %vm1424_vm3, %v6892_v12, 0.0 }
 0x256   : > { %7436 = vst [vmem:[#allocation20_spill] sm:$0xff] %v6897_v11  ;;  %v2419_v28 = vsel %vm1424_vm3, %v6897_v11, 0.0  ;;  %v6907_v24 = vadd.f32 %v4647_v46, %v4646_v39 }
 0x257   : > { %v2420_v17 = vadd.f32 %v2419_v28, %v2418_v50 }
 0x258   : > { %v4873_v37 = vpop.f32.mrb[92].mxu0 }
 0x259   : > { %v2422_v6 = vadd.f32 %v2421_v20, %v2420_v17  ;;  %v6912_v55 = vadd.f32 %v4873_v37, %v6713_v38  ;;  %v2339_v18 = vpop.f32.mrb[93].mxu0 }
 0x25a   : > { %v6917_v41 = vadd.f32 %v2339_v18, %v6707_v26  ;;  %v4874_v59 = vpop.f32.mrb[94].mxu0  ;;  %v4649_v57 = vpop.f32.mrb[92].mxu1 }
 0x25b   : > { %7437 = vst [vmem:[#allocation17_spill] sm:$0xff] %v6912_v55  ;;  %v2424_v39 = vadd.f32 %v2423_v32, %v2422_v6  ;;  %v6920_v50 = vadd.f32 %v4874_v59, %v6715_v1  ;;  %v2342_v46 = vpop.f32.mrb[95].mxu0  ;;  %v4650_v28 = vpop.f32.mrb[93].mxu1 }
 0x25c   : > { %7438 = vst [vmem:[#allocation22_spill] sm:$0xff] %v6917_v41  ;;  %v2425_v17 = vsel %vm1424_vm3, %v6917_v41, 0.0  ;;  %v6925_v38 = vadd.f32 %v2342_v46, %v6709_v54  ;;  %v6927_v20 = vadd.f32 %v4650_v28, %v4649_v57  ;;  %v4652_v37 = vpop.f32.mrb[94].mxu1  ;;  %v2429_v54 = vsel %vm1424_vm3, %v6912_v55, 0.0 }
 0x25d   : > { %7439 = vst [vmem:[#allocation21_spill] sm:$0xff] %v6920_v50  ;;  %v2426_v63 = vadd.f32 %v2425_v17, %v2424_v39  ;;  %v4653_v18 = vpop.f32.mrb[95].mxu1  ;;  %v6942_v39 = vld [vmem:[%s7280_s4] ss:$0 sm:$0xff]  ;;  %v2431_v26 = vsel %vm1424_vm3, %v6920_v50, 0.0 }
 0x25e   : > { %7440 = vst [vmem:[#allocation23_spill] sm:$0xff] %v6925_v38  ;;  %v2427_v59 = vsel %vm1424_vm3, %v6925_v38, 0.0  ;;  %v6935_v6 = vadd.f32 %v4653_v18, %v4652_v37  ;;  %v3236_v17 = vadd.f32 %v6942_v39, %v6729_v45  ;;  %v3244_v23 = vadd.f32 %v6942_v39, %v6759_v13 }
 0x25f   : > { %v2428_v32 = vadd.f32 %v2427_v59, %v2426_v63 }
 0x260   : > { %v4719_v57 = vpop.f32.mrb[96].mxu0 }
 0x261   : > { %v2430_v46 = vadd.f32 %v2429_v54, %v2428_v32  ;;  %v4720_v28 = vpop.f32.mrb[97].mxu0  ;;  %v3239_v32 = vadd.f32 %v6942_v39, %v6739_v27 }
 0x262   : > { %v4721_v37 = vadd.f32 %v4720_v28, %v4719_v57  ;;  %v4722_v18 = vpop.f32.mrb[98].mxu0  ;;  %v4655_v63 = vpop.f32.mrb[96].mxu1 }
 0x263   : > { %v2432_v59 = vadd.f32 %v2431_v26, %v2430_v46  ;;  %v4723_v1 = vpop.f32.mrb[99].mxu0  ;;  %v4656_v43 = vpop.f32.mrb[97].mxu1 }
 0x264   : > { %v4724_v54 = vadd.f32 %v4723_v1, %v4722_v18  ;;  %v6950_v44 = vadd.f32 %v4656_v43, %v4655_v63  ;;  %v4658_v48 = vpop.f32.mrb[98].mxu1  ;;  %v6952_v55 = vadd.f32 %v4721_v37, %v3236_v17  ;;  %v3247_v37 = vadd.f32 %v6942_v39, %v6767_v8 }
 0x265   : > { %v2433_v41 = vrot.slane %v2432_v59, 4  ;;  %v4659_v45 = vpop.f32.mrb[99].mxu1 }
 0x266   : > { %v6954_v38 = vadd.f32 %v4659_v45, %v4658_v48  ;;  %v6956_v50 = vadd.f32 %v4724_v54, %v3239_v32 }
 0x267   : > { %v2434_v57 = vadd.f32 %v2433_v41, %v2432_v59 }
 0x268   : > { %v4725_v28 = vpop.f32.mrb[100].mxu0 }
 0x269   : > { %v2435_v26 = vrot.slane %v2434_v57, 2  ;;  %v4726_v46 = vpop.f32.mrb[101].mxu0 }
 0x26a   : > { %v4727_v27 = vadd.f32 %v4726_v46, %v4725_v28  ;;  %v4728_v1 = vpop.f32.mrb[102].mxu0  ;;  %v4661_v43 = vpop.f32.mrb[100].mxu1 }
 0x26b   : > { %v2436_v18 = vadd.f32 %v2435_v26, %v2434_v57  ;;  %v4729_v63 = vpop.f32.mrb[103].mxu0  ;;  %v4662_v17 = vpop.f32.mrb[101].mxu1  ;;  %v4010_v57 = vld [vmem:[%s7282_s6] sm:$0x1] }
 0x26c   : > { %v4730_v48 = vadd.f32 %v4729_v63, %v4728_v1  ;;  %v6962_v45 = vadd.f32 %v4662_v17, %v4661_v43  ;;  %v4664_v32 = vpop.f32.mrb[102].mxu1  ;;  %v6964_v41 = vadd.f32 %v4727_v27, %v3244_v23  ;;  %v3252_v1 = vadd.f32 %v6942_v39, %v6787_v10 }
 0x26d   : > { %v2437_v59 = vrot.slane %v2436_v18, 1  ;;  %v4665_v54 = vpop.f32.mrb[103].mxu1 }
 0x26e   : > { %v6966_v11 = vadd.f32 %v4665_v54, %v4664_v32  ;;  %v6968_v13 = vadd.f32 %v4730_v48, %v3247_v37 }
 0x26f   : > { %v2438_v28 = vadd.f32 %v2437_v59, %v2436_v18  ;;  %v3255_v18 = vadd.f32 %v6942_v39, %v6795_v42  ;;  %v3260_v42 = vadd.f32 %v6942_v39, %v6815_v4 }
 0x270   : > { %v4731_v26 = vpop.f32.mrb[104].mxu0 }
 0x271   : > { %v2439_v46 = vmul.f32 0.0009765625, %v2438_v28  ;;  %v4732_v8 = vpop.f32.mrb[105].mxu0 }
 0x272   : > { %v4733_v23 = vadd.f32 %v4732_v8, %v4731_v26  ;;  %v4734_v27 = vpop.f32.mrb[106].mxu0  ;;  %v4667_v43 = vpop.f32.mrb[104].mxu1 }
 0x273   : > { %v4012_v63 = vadd.f32 %v4010_v57, %v2439_v46  ;;  %v4735_v17 = vpop.f32.mrb[107].mxu0  ;;  %v4668_v32 = vpop.f32.mrb[105].mxu1 }
 0x274   : > { %v4736_v37 = vadd.f32 %v4735_v17, %v4734_v27  ;;  %v6977_v48 = vadd.f32 %v4668_v32, %v4667_v43  ;;  %v4670_v59 = vpop.f32.mrb[106].mxu1  ;;  %v6979_v54 = vadd.f32 %v4733_v23, %v3252_v1  ;;  %v3263_v17 = vadd.f32 %v6942_v39, %v6823_v40 }
 0x275   : > { %4015 = vst.msk [vmem:[%s7282_s6] sm:$0x1] %vm4014_vm4, %v4012_v63  ;;  %v4671_v10 = vpop.f32.mrb[107].mxu1 }
 0x276   : > { %v6985_v28 = vadd.f32 %v4671_v10, %v4670_v59  ;;  %v6987_v57 = vadd.f32 %v4736_v37, %v3255_v18 }
 0x278   : > { %v4737_v26 = vpop.f32.mrb[108].mxu0 }
 0x279   : > { %v4738_v46 = vpop.f32.mrb[109].mxu0 }
 0x27a   : > { %v4739_v8 = vadd.f32 %v4738_v46, %v4737_v26  ;;  %v4740_v27 = vpop.f32.mrb[110].mxu0  ;;  %v4673_v43 = vpop.f32.mrb[108].mxu1  ;;  %v3268_v46 = vadd.f32 %v6942_v39, %v6843_v7 }
 0x27b   : > { %v4741_v1 = vpop.f32.mrb[111].mxu0  ;;  %v4674_v23 = vpop.f32.mrb[109].mxu1 }
 0x27c   : > { %v4742_v32 = vadd.f32 %v4741_v1, %v4740_v27  ;;  %v6993_v63 = vadd.f32 %v4674_v23, %v4673_v43  ;;  %v4676_v59 = vpop.f32.mrb[110].mxu1  ;;  %v6995_v10 = vadd.f32 %v4739_v8, %v3260_v42  ;;  %v3271_v43 = vadd.f32 %v6942_v39, %v6851_v2 }
 0x27d   : > { %v4677_v18 = vpop.f32.mrb[111].mxu1 }
 0x27e   : > { %v6997_v37 = vadd.f32 %v4677_v18, %v4676_v59  ;;  %v6999_v47 = vadd.f32 %v4742_v32, %v3263_v17 }
 0x280   : > { %v4743_v4 = vpop.f32.mrb[112].mxu0 }
 0x281   : > { %v4744_v26 = vpop.f32.mrb[113].mxu0 }
 0x282   : > { %v4745_v12 = vadd.f32 %v4744_v26, %v4743_v4  ;;  %v4746_v34 = vpop.f32.mrb[114].mxu0  ;;  %v4679_v33 = vpop.f32.mrb[112].mxu1  ;;  %v3276_v4 = vadd.f32 %v6942_v39, %v6871_v15 }
 0x283   : > { %v4747_v40 = vpop.f32.mrb[115].mxu0  ;;  %v4680_v27 = vpop.f32.mrb[113].mxu1 }
 0x284   : > { %v4748_v42 = vadd.f32 %v4747_v40, %v4746_v34  ;;  %v7005_v8 = vadd.f32 %v4680_v27, %v4679_v33  ;;  %v4682_v1 = vpop.f32.mrb[114].mxu1  ;;  %v7007_v23 = vadd.f32 %v4745_v12, %v3268_v46  ;;  %v3279_v33 = vadd.f32 %v6942_v39, %v6879_v49 }
 0x285   : > { %v4683_v17 = vpop.f32.mrb[115].mxu1 }
 0x286   : > { %v7009_v32 = vadd.f32 %v4683_v17, %v4682_v1  ;;  %v7011_v59 = vadd.f32 %v4748_v42, %v3271_v43 }
 0x288   : > { %v4749_v7 = vpop.f32.mrb[116].mxu0 }
 0x289   : > { %v4750_v18 = vpop.f32.mrb[117].mxu0 }
 0x28a   : > { %v4751_v26 = vadd.f32 %v4750_v18, %v4749_v7  ;;  %v4752_v21 = vpop.f32.mrb[118].mxu0  ;;  %v4685_v9 = vpop.f32.mrb[116].mxu1  ;;  %v3284_v7 = vadd.f32 %v6942_v39, %v6899_v52 }
 0x28b   : > { %v4753_v2 = vpop.f32.mrb[119].mxu0  ;;  %v4686_v34 = vpop.f32.mrb[117].mxu1 }
 0x28c   : > { %v4754_v12 = vadd.f32 %v4753_v2, %v4752_v21  ;;  %v7017_v46 = vadd.f32 %v4686_v34, %v4685_v9  ;;  %v4688_v40 = vpop.f32.mrb[118].mxu1  ;;  %v7019_v27 = vadd.f32 %v4751_v26, %v3276_v4  ;;  %v3287_v9 = vadd.f32 %v6942_v39, %v6907_v24 }
 0x28d   : > { %v4689_v43 = vpop.f32.mrb[119].mxu1 }
 0x28e   : > { %v7021_v42 = vadd.f32 %v4689_v43, %v4688_v40  ;;  %v7023_v1 = vadd.f32 %v4754_v12, %v3279_v33 }
 0x290   : > { %v4755_v15 = vpop.f32.mrb[120].mxu0 }
 0x291   : > { %v4756_v17 = vpop.f32.mrb[121].mxu0 }
 0x292   : > { %v4757_v18 = vadd.f32 %v4756_v17, %v4755_v15  ;;  %v4758_v29 = vpop.f32.mrb[122].mxu0  ;;  %v4691_v22 = vpop.f32.mrb[120].mxu1  ;;  %v3292_v15 = vadd.f32 %v6942_v39, %v6927_v20 }
 0x293   : > { %v4759_v49 = vpop.f32.mrb[123].mxu0  ;;  %v4692_v21 = vpop.f32.mrb[121].mxu1 }
 0x294   : > { %v4760_v4 = vadd.f32 %v4759_v49, %v4758_v29  ;;  %v7029_v26 = vadd.f32 %v4692_v21, %v4691_v22  ;;  %v4694_v2 = vpop.f32.mrb[122].mxu1  ;;  %v7031_v34 = vadd.f32 %v4757_v18, %v3284_v7  ;;  %v3295_v22 = vadd.f32 %v6942_v39, %v6935_v6 }
 0x295   : > { %v4695_v33 = vpop.f32.mrb[123].mxu1 }
 0x296   : > { %v7033_v12 = vadd.f32 %v4695_v33, %v4694_v2  ;;  %v7035_v40 = vadd.f32 %v4760_v4, %v3287_v9 }
 0x298   : > { %v4761_v52 = vpop.f32.mrb[124].mxu0 }
 0x299   : > { %v4762_v43 = vpop.f32.mrb[125].mxu0 }
 0x29a   : > { %v4763_v17 = vadd.f32 %v4762_v43, %v4761_v52  ;;  %v4764_v3 = vpop.f32.mrb[126].mxu0  ;;  %v4697_v36 = vpop.f32.mrb[124].mxu1  ;;  %v3300_v52 = vadd.f32 %v6942_v39, %v6950_v44 }
 0x29b   : > { %v4765_v24 = vpop.f32.mrb[127].mxu0  ;;  %v4698_v29 = vpop.f32.mrb[125].mxu1 }
 0x29c   : > { %v4766_v7 = vadd.f32 %v4765_v24, %v4764_v3  ;;  %v7041_v18 = vadd.f32 %v4698_v29, %v4697_v36  ;;  %v4700_v49 = vpop.f32.mrb[126].mxu1  ;;  %v7043_v21 = vadd.f32 %v4763_v17, %v3292_v15  ;;  %v3303_v15 = vadd.f32 %v6942_v39, %v6954_v38 }
 0x29d   : > { %v4701_v9 = vpop.f32.mrb[127].mxu1 }
 0x29e   : > { %v7045_v4 = vadd.f32 %v4701_v9, %v4700_v49  ;;  %v7047_v2 = vadd.f32 %v4766_v7, %v3295_v22 }
 0x2a0   : > { %v4767_v20 = vpop.f32.mrb[128].mxu0 }
 0x2a1   : > { %v4768_v33 = vpop.f32.mrb[129].mxu0 }
 0x2a2   : > { %v4769_v43 = vadd.f32 %v4768_v33, %v4767_v20  ;;  %v4770_v60 = vpop.f32.mrb[130].mxu0  ;;  %v4885_v53 = vpop.f32.mrb[128].mxu1 }
 0x2a3   : > { %v4771_v6 = vpop.f32.mrb[131].mxu0  ;;  %v3566_v3 = vadd.f32 %v4885_v53, %v6964_v41  ;;  %v3557_v36 = vpop.f32.mrb[129].mxu1 }
 0x2a4   : > { %v4772_v17 = vadd.f32 %v4771_v6, %v4770_v60  ;;  %v3558_v24 = vadd.f32 %v3557_v36, %v6952_v55  ;;  %v4886_v29 = vpop.f32.mrb[130].mxu1  ;;  %v7055_v22 = vadd.f32 %v4769_v43, %v3300_v52  ;;  %v3308_v55 = vadd.f32 %v6942_v39, %v6962_v45 }
 0x2a5   : > { %v3569_v7 = vadd.f32 %v4886_v29, %v6968_v13  ;;  %v3560_v49 = vpop.f32.mrb[131].mxu1  ;;  %v3703_v13 = vsel %vm1424_vm3, %v3566_v3, 0.0  ;;  %v3311_v36 = vadd.f32 %v6942_v39, %v6966_v11 }
 0x2a6   : > { %v3561_v44 = vadd.f32 %v3560_v49, %v6956_v50  ;;  %v7059_v9 = vadd.f32 %v4772_v17, %v3303_v15  ;;  %v3700_v53 = vsel %vm1424_vm3, %v3558_v24, 0.0 }
 0x2a7   : > { %v3685_v20 = vpack.c.bf16 %v3569_v7, %v3566_v3  ;;  %v3705_v49 = vsel %vm1424_vm3, %v3569_v7, 0.0 }
 0x2a8   : > { %v3684_v41 = vpack.c.bf16 %v3561_v44, %v3558_v24  ;;  %v3701_v33 = vsel %vm1424_vm3, %v3561_v44, 0.0  ;;  %v4773_v38 = vpop.f32.mrb[132].mxu0 }
 0x2a9   : > { %v3702_v60 = vadd.f32 %v3701_v33, %v3700_v53  ;;  %v4774_v6 = vpop.f32.mrb[133].mxu0  ;;  %3788 = vrot.lane.b32.xlu1 %v3685_v20, %s5111_s23 }
 0x2aa   : > { %v4775_v52 = vadd.f32 %v4774_v6, %v4773_v38  ;;  %v4776_v50 = vpop.f32.mrb[134].mxu0  ;;  %v4889_v43 = vpop.f32.mrb[132].mxu1  ;;  %3786 = vrot.lane.b32.xlu0 %v3684_v41, %s5111_s23 }
 0x2ab   : > { %v3704_v15 = vadd.f32 %v3703_v13, %v3702_v60  ;;  %v4777_v17 = vpop.f32.mrb[135].mxu0  ;;  %v3582_v24 = vadd.f32 %v4889_v43, %v6995_v10  ;;  %v3573_v29 = vpop.f32.mrb[133].mxu1 }
 0x2ac   : > { %v4778_v44 = vadd.f32 %v4777_v17, %v4776_v50  ;;  %v3574_v45 = vadd.f32 %v3573_v29, %v6979_v54  ;;  %v4890_v20 = vpop.f32.mrb[134].mxu1  ;;  %v7073_v3 = vadd.f32 %v4775_v52, %v3308_v55 }
 0x2ad   : > { %v3706_v53 = vadd.f32 %v3705_v49, %v3704_v15  ;;  %v3585_v33 = vadd.f32 %v4890_v20, %v6999_v47  ;;  %v3576_v41 = vpop.f32.mrb[135].mxu1  ;;  %v3316_v47 = vadd.f32 %v6942_v39, %v6977_v48  ;;  %v3711_v55 = vsel %vm1424_vm3, %v3582_v24, 0.0 }
 0x2ae   : > { %v3707_v38 = vsel %vm1424_vm3, %v3574_v45, 0.0  ;;  %v3577_v11 = vadd.f32 %v3576_v41, %v6987_v57  ;;  %v7078_v60 = vadd.f32 %v4778_v44, %v3311_v36  ;;  %v3319_v36 = vadd.f32 %v6942_v39, %v6985_v28 }
 0x2af   : > { %v3708_v10 = vadd.f32 %v3707_v38, %v3706_v53  ;;  %v3687_v6 = vpack.c.bf16 %v3585_v33, %v3582_v24 }
 0x2b0   : > { %v3686_v13 = vpack.c.bf16 %v3577_v11, %v3574_v45  ;;  %v3709_v7 = vsel %vm1424_vm3, %v3577_v11, 0.0  ;;  %v4779_v50 = vpop.f32.mrb[136].mxu0  ;;  %v3713_v45 = vsel %vm1424_vm3, %v3585_v33, 0.0 }
 0x2b1   : > { %v3710_v54 = vadd.f32 %v3709_v7, %v3708_v10  ;;  %v4780_v43 = vpop.f32.mrb[137].mxu0  ;;  %3792 = vrot.lane.b32.xlu1 %v3687_v6, %s5111_s23 }
 0x2b2   : > { %v4781_v52 = vadd.f32 %v4780_v43, %v4779_v50  ;;  %v4782_v15 = vpop.f32.mrb[138].mxu0  ;;  %v4893_v57 = vpop.f32.mrb[136].mxu1  ;;  %3790 = vrot.lane.b32.xlu0 %v3686_v13, %s5111_s23 }
 0x2b3   : > { %v3712_v17 = vadd.f32 %v3711_v55, %v3710_v54  ;;  %v4783_v29 = vpop.f32.mrb[139].mxu0  ;;  %v3598_v49 = vadd.f32 %v4893_v57, %v7019_v27  ;;  %v3589_v44 = vpop.f32.mrb[137].mxu1 }
 0x2b4   : > { %v4784_v20 = vadd.f32 %v4783_v29, %v4782_v15  ;;  %v3590_v48 = vadd.f32 %v3589_v44, %v7007_v23  ;;  %v4894_v53 = vpop.f32.mrb[138].mxu1  ;;  %v7091_v24 = vadd.f32 %v4781_v52, %v3316_v47  ;;  %v3327_v52 = vadd.f32 %v6942_v39, %v6997_v37 }
 0x2b5   : > { %v3714_v41 = vadd.f32 %v3713_v45, %v3712_v17  ;;  %v3601_v38 = vadd.f32 %v4894_v53, %v7023_v1  ;;  %v3592_v11 = vpop.f32.mrb[139].mxu1  ;;  %v3324_v1 = vadd.f32 %v6942_v39, %v6993_v63  ;;  %v3719_v43 = vsel %vm1424_vm3, %v3598_v49, 0.0 }
 0x2b6   : > { %v3715_v10 = vsel %vm1424_vm3, %v3590_v48, 0.0  ;;  %v3593_v28 = vadd.f32 %v3592_v11, %v7011_v59  ;;  %v7096_v6 = vadd.f32 %v4784_v20, %v3319_v36 }
 0x2b7   : > { %v3716_v27 = vadd.f32 %v3715_v10, %v3714_v41  ;;  %v3689_v13 = vpack.c.bf16 %v3601_v38, %v3598_v49  ;;  %v3721_v29 = vsel %vm1424_vm3, %v3601_v38, 0.0 }
 0x2b8   : > { %v3688_v7 = vpack.c.bf16 %v3593_v28, %v3590_v48  ;;  %v3717_v33 = vsel %vm1424_vm3, %v3593_v28, 0.0  ;;  %v4785_v50 = vpop.f32.mrb[140].mxu0 }
 0x2b9   : > { %v3718_v23 = vadd.f32 %v3717_v33, %v3716_v27  ;;  %v4786_v54 = vpop.f32.mrb[141].mxu0  ;;  %3796 = vrot.lane.b32.xlu1 %v3689_v13, %s5111_s23 }
 0x2ba   : > { %v4787_v47 = vadd.f32 %v4786_v54, %v4785_v50  ;;  %v4788_v55 = vpop.f32.mrb[142].mxu0  ;;  %v4897_v59 = vpop.f32.mrb[140].mxu1  ;;  %3794 = vrot.lane.b32.xlu0 %v3688_v7, %s5111_s23 }
 0x2bb   : > { %v3720_v15 = vadd.f32 %v3719_v43, %v3718_v23  ;;  %v4789_v57 = vpop.f32.mrb[143].mxu0  ;;  %v3614_v36 = vadd.f32 %v4897_v59, %v7043_v21  ;;  %v3605_v17 = vpop.f32.mrb[141].mxu1 }
 0x2bc   : > { %v4790_v44 = vadd.f32 %v4789_v57, %v4788_v55  ;;  %v3606_v63 = vadd.f32 %v3605_v17, %v7031_v34  ;;  %v4898_v45 = vpop.f32.mrb[142].mxu1  ;;  %v3485_v49 = vadd.f32 %v4787_v47, %v3324_v1  ;;  %v3332_v34 = vadd.f32 %v6942_v39, %v7005_v8 }
 0x2bd   : > { %v3722_v20 = vadd.f32 %v3721_v29, %v3720_v15  ;;  %v3617_v48 = vadd.f32 %v4898_v45, %v7047_v2  ;;  %v3608_v53 = vpop.f32.mrb[143].mxu1  ;;  %v3727_v2 = vsel %vm1424_vm3, %v3614_v36, 0.0 }
 0x2be   : > { %v3723_v41 = vsel %vm1424_vm3, %v3606_v63, 0.0  ;;  %v3609_v37 = vadd.f32 %v3608_v53, %v7035_v40  ;;  %v3488_v11 = vadd.f32 %v4790_v44, %v3327_v52  ;;  %v3335_v40 = vadd.f32 %v6942_v39, %v7009_v32 }
 0x2bf   : > { %v3724_v10 = vadd.f32 %v3723_v41, %v3722_v20  ;;  %v3691_v28 = vpack.c.bf16 %v3617_v48, %v3614_v36  ;;  %v3729_v55 = vsel %vm1424_vm3, %v3617_v48, 0.0 }
 0x2c0   : > { %v3690_v21 = vpack.c.bf16 %v3609_v37, %v3606_v63  ;;  %v3725_v27 = vsel %vm1424_vm3, %v3609_v37, 0.0  ;;  %v4791_v38 = vpop.f32.mrb[144].mxu0 }
 0x2c1   : > { %v3726_v13 = vadd.f32 %v3725_v27, %v3724_v10  ;;  %v4792_v7 = vpop.f32.mrb[145].mxu0  ;;  %3800 = vrot.lane.b32.xlu1 %v3691_v28, %s5111_s23 }
 0x2c2   : > { %v4793_v33 = vadd.f32 %v4792_v7, %v4791_v38  ;;  %v4794_v50 = vpop.f32.mrb[146].mxu0  ;;  %v4901_v23 = vpop.f32.mrb[144].mxu1  ;;  %3798 = vrot.lane.b32.xlu0 %v3690_v21, %s5111_s23 }
 0x2c3   : > { %v3728_v54 = vadd.f32 %v3727_v2, %v3726_v13  ;;  %v4795_v1 = vpop.f32.mrb[147].mxu0  ;;  %v3630_v43 = vadd.f32 %v4901_v23, %v7073_v3  ;;  %v3621_v47 = vpop.f32.mrb[145].mxu1 }
 0x2c4   : > { %v4796_v59 = vadd.f32 %v4795_v1, %v4794_v50  ;;  %v3622_v8 = vadd.f32 %v3621_v47, %v7055_v22  ;;  %v4902_v52 = vpop.f32.mrb[146].mxu1  ;;  %v3493_v15 = vadd.f32 %v4793_v33, %v3332_v34  ;;  %v3340_v22 = vadd.f32 %v6942_v39, %v7017_v46 }
 0x2c5   : > { %v3730_v57 = vadd.f32 %v3729_v55, %v3728_v54  ;;  %v3633_v36 = vadd.f32 %v4902_v52, %v7078_v60  ;;  %v3624_v17 = vpop.f32.mrb[147].mxu1  ;;  %v3735_v60 = vsel %vm1424_vm3, %v3630_v43, 0.0 }
 0x2c6   : > { %v3731_v29 = vsel %vm1424_vm3, %v3622_v8, 0.0  ;;  %v3625_v32 = vadd.f32 %v3624_v17, %v7059_v9  ;;  %v3496_v44 = vadd.f32 %v4796_v59, %v3335_v40  ;;  %v3343_v9 = vadd.f32 %v6942_v39, %v7021_v42 }
 0x2c7   : > { %v3732_v63 = vadd.f32 %v3731_v29, %v3730_v57  ;;  %v3693_v45 = vpack.c.bf16 %v3633_v36, %v3630_v43  ;;  %v3737_v7 = vsel %vm1424_vm3, %v3633_v36, 0.0 }
 0x2c8   : > { %v3692_v3 = vpack.c.bf16 %v3625_v32, %v3622_v8  ;;  %v3733_v20 = vsel %vm1424_vm3, %v3625_v32, 0.0  ;;  %v4797_v48 = vpop.f32.mrb[148].mxu0 }
 0x2c9   : > { %v3734_v53 = vadd.f32 %v3733_v20, %v3732_v63  ;;  %v4798_v41 = vpop.f32.mrb[149].mxu0  ;;  %3804 = vrot.lane.b32.xlu1 %v3693_v45, %s5111_s23 }
 0x2ca   : > { %v4799_v37 = vadd.f32 %v4798_v41, %v4797_v48  ;;  %v4800_v10 = vpop.f32.mrb[150].mxu0  ;;  %v4905_v28 = vpop.f32.mrb[148].mxu1  ;;  %3802 = vrot.lane.b32.xlu0 %v3692_v3, %s5111_s23 }
 0x2cb   : > { %v3736_v21 = vadd.f32 %v3735_v60, %v3734_v53  ;;  %v4801_v27 = vpop.f32.mrb[151].mxu0  ;;  %v3646_v38 = vadd.f32 %v4905_v28, %v3485_v49  ;;  %v3637_v13 = vpop.f32.mrb[149].mxu1 }
 0x2cc   : > { %v4802_v34 = vadd.f32 %v4801_v27, %v4800_v10  ;;  %v3638_v2 = vadd.f32 %v3637_v13, %v7091_v24  ;;  %v4906_v46 = vpop.f32.mrb[150].mxu1  ;;  %v3501_v33 = vadd.f32 %v4799_v37, %v3340_v22  ;;  %v3348_v24 = vadd.f32 %v6942_v39, %v7029_v26 }
 0x2cd   : > { %v3738_v50 = vadd.f32 %v3737_v7, %v3736_v21  ;;  %v3649_v23 = vadd.f32 %v4906_v46, %v3488_v11  ;;  %v3640_v40 = vpop.f32.mrb[151].mxu1  ;;  %v3743_v11 = vsel %vm1424_vm3, %v3646_v38, 0.0 }
 0x2ce   : > { %v3739_v54 = vsel %vm1424_vm3, %v3638_v2, 0.0  ;;  %v3641_v1 = vadd.f32 %v3640_v40, %v7096_v6  ;;  %v3504_v43 = vadd.f32 %v4802_v34, %v3343_v9  ;;  %v3351_v6 = vadd.f32 %v6942_v39, %v7033_v12 }
 0x2cf   : > { %v3740_v42 = vadd.f32 %v3739_v54, %v3738_v50  ;;  %v3695_v47 = vpack.c.bf16 %v3649_v23, %v3646_v38  ;;  %v3745_v3 = vsel %vm1424_vm3, %v3649_v23, 0.0 }
 0x2d0   : > { %v3694_v55 = vpack.c.bf16 %v3641_v1, %v3638_v2  ;;  %v3741_v49 = vsel %vm1424_vm3, %v3641_v1, 0.0  ;;  %v4803_v59 = vpop.f32.mrb[152].mxu0 }
 0x2d1   : > { %v3742_v8 = vadd.f32 %v3741_v49, %v3740_v42  ;;  %v4804_v52 = vpop.f32.mrb[153].mxu0  ;;  %3808 = vrot.lane.b32.xlu1 %v3695_v47, %s5111_s23 }
 0x2d2   : > { %v4805_v57 = vadd.f32 %v4804_v52, %v4803_v59  ;;  %v4806_v36 = vpop.f32.mrb[154].mxu0  ;;  %v4909_v17 = vpop.f32.mrb[152].mxu1  ;;  %3806 = vrot.lane.b32.xlu0 %v3694_v55, %s5111_s23 }
 0x2d3   : > { %v3744_v29 = vadd.f32 %v3743_v11, %v3742_v8  ;;  %v4807_v32 = vpop.f32.mrb[155].mxu0  ;;  %v3662_v63 = vadd.f32 %v4909_v17, %v3501_v33  ;;  %v3653_v45 = vpop.f32.mrb[153].mxu1 }
 0x2d4   : > { %v4808_v20 = vadd.f32 %v4807_v32, %v4806_v36  ;;  %v3654_v48 = vadd.f32 %v3653_v45, %v3493_v15  ;;  %v4910_v53 = vpop.f32.mrb[154].mxu1  ;;  %v3509_v26 = vadd.f32 %v4805_v57, %v3348_v24  ;;  %v3356_v15 = vadd.f32 %v6942_v39, %v7041_v18 }
 0x2d5   : > { %v3746_v41 = vadd.f32 %v3745_v3, %v3744_v29  ;;  %v3665_v22 = vadd.f32 %v4910_v53, %v3504_v43  ;;  %v3656_v60 = vpop.f32.mrb[155].mxu1  ;;  %v3751_v34 = vsel %vm1424_vm3, %v3662_v63, 0.0 }
 0x2d6   : > { %v3747_v37 = vsel %vm1424_vm3, %v3654_v48, 0.0  ;;  %v3657_v10 = vadd.f32 %v3656_v60, %v3496_v44  ;;  %v3512_v28 = vadd.f32 %v4808_v20, %v3351_v6  ;;  %v3359_v44 = vadd.f32 %v6942_v39, %v7045_v4 }
 0x2d7   : > { %v3748_v9 = vadd.f32 %v3747_v37, %v3746_v41  ;;  %v3697_v21 = vpack.c.bf16 %v3665_v22, %v3662_v63  ;;  %v3753_v54 = vsel %vm1424_vm3, %v3665_v22, 0.0  ;;  %v7441_v37 = vpack.c.bf16 %v6724_v25, %v6718_v14 }
 0x2d8   : > { %v3696_v12 = vpack.c.bf16 %v3657_v10, %v3654_v48  ;;  %v3749_v27 = vsel %vm1424_vm3, %v3657_v10, 0.0  ;;  %v4809_v38 = vpop.f32.mrb[156].mxu0  ;;  %v7443_v25 = vpack.c.bf16 %v6752_v35, %v6744_v19  ;;  %v7445_v35 = vpack.c.bf16 %v6780_v62, %v6772_v58 }
 0x2d9   : > { %v3750_v13 = vadd.f32 %v3749_v27, %v3748_v9  ;;  %v4810_v7 = vpop.f32.mrb[157].mxu0  ;;  %3812 = vrot.lane.b32.xlu1 %v3697_v21, %s5111_s23  ;;  %v7447_v62 = vpack.c.bf16 %v6808_v56, %v6800_v5  ;;  %v7451_v56 = vld [vmem:[#allocation12_spill] sm:$0xff] }
 0x2da   : > { %v4811_v2 = vadd.f32 %v4810_v7, %v4809_v38  ;;  %v4812_v46 = vpop.f32.mrb[158].mxu0  ;;  %v4913_v33 = vpop.f32.mrb[156].mxu1  ;;  %3810 = vrot.lane.b32.xlu0 %v3696_v12, %s5111_s23  ;;  %v7442_v12 = vpack.c.bf16 %v6727_v31, %v6721_v16 }
 0x2db   : > { %v3752_v50 = vadd.f32 %v3751_v34, %v3750_v13  ;;  %v4813_v23 = vpop.f32.mrb[159].mxu0  ;;  %v3669_v40 = vpop.f32.mrb[157].mxu1  ;;  %v7444_v34 = vpack.c.bf16 %v6757_v30, %v6749_v51 }
 0x2dc   : > { %v4814_v1 = vadd.f32 %v4813_v23, %v4812_v46  ;;  %v3517_v43 = vadd.f32 %v4811_v2, %v3356_v15  ;;  %v3670_v42 = vadd.f32 %v3669_v40, %v3509_v26  ;;  %v4914_v47 = vpop.f32.mrb[158].mxu1  ;;  %v4011_v26 = vld [vmem:[%s7282_s6 + $0x1] sm:$0x1]  ;;  %v7446_v23 = vpack.c.bf16 %v6785_v0, %v6777_v61 }
 0x2dd   : > { %v3754_v18 = vadd.f32 %v3753_v54, %v3752_v50  ;;  %v3672_v55 = vpop.f32.mrb[159].mxu1 }
 0x2de   : > { %v3678_v49 = vadd.f32 %v4913_v33, %v3517_v43  ;;  %v3755_v59 = vsel %vm1424_vm3, %v3670_v42, 0.0  ;;  %v3520_v8 = vadd.f32 %v4814_v1, %v3359_v44  ;;  %v3673_v52 = vadd.f32 %v3672_v55, %v3512_v28 }
 0x2df   : > { %v3756_v24 = vadd.f32 %v3755_v59, %v3754_v18  ;;  %v7449_v18 = vld [vmem:[#allocation8_spill] sm:$0xff] }
 0x2e0   : > { %v3681_v11 = vadd.f32 %v4914_v47, %v3520_v8  ;;  %v3698_v57 = vpack.c.bf16 %v3673_v52, %v3670_v42  ;;  %v3757_v39 = vsel %vm1424_vm3, %v3673_v52, 0.0  ;;  %v3759_v36 = vsel %vm1424_vm3, %v3678_v49, 0.0  ;;  %v7448_v47 = vld [vmem:[#allocation6_spill] sm:$0xff] }
 0x2e1   : > { %v3758_v4 = vadd.f32 %v3757_v39, %v3756_v24  ;;  %v7450_v55 = vpack.c.bf16 %v7448_v47, %v7449_v18  ;;  %v7452_v52 = vld [vmem:[#allocation10_spill] sm:$0xff] }
 0x2e2   : > { %v3699_v17 = vpack.c.bf16 %v3681_v11, %v3678_v49  ;;  %3814 = vrot.lane.b32.xlu0 %v3698_v57, %s5111_s23  ;;  %v3761_v29 = vsel %vm1424_vm3, %v3681_v11, 0.0  ;;  %v7453_v24 = vpack.c.bf16 %v7451_v56, %v7452_v52 }
 0x2e3   : > { %v3760_v6 = vadd.f32 %v3759_v36, %v3758_v4  ;;  %v7454_v36 = vld [vmem:[#allocation9_spill] sm:$0xff] }
 0x2e4   : > { %3816 = vrot.lane.b32.xlu1 %v3699_v17, %s5111_s23  ;;  %v7455_v17 = vld [vmem:[#allocation7_spill] sm:$0xff] }
 0x2e5   : > { %v3762_v32 = vadd.f32 %v3761_v29, %v3760_v6  ;;  %v7456_v6 = vpack.c.bf16 %v7454_v36, %v7455_v17 }
 0x2e7   : > { %v3763_v63 = vrot.slane %v3762_v32, 4 }
 0x2e9   : > { %v3764_v45 = vadd.f32 %v3763_v63, %v3762_v32 }
 0x2eb   : > { %v3765_v3 = vrot.slane %v3764_v45, 2 }
 0x2ed   : > { %v3766_v20 = vadd.f32 %v3765_v3, %v3764_v45  ;;  %v7457_v3 = vld [vmem:[#allocation13_spill] sm:$0xff] }
 0x2ef   : > { %v3767_v48 = vrot.slane %v3766_v20, 1 }
 0x2f1   : > { %v3768_v53 = vadd.f32 %v3767_v48, %v3766_v20  ;;  %v7458_v20 = vld [vmem:[#allocation16_spill] sm:$0xff] }
 0x2f2   : > { %v7459_v48 = vpack.c.bf16 %v7457_v3, %v7458_v20 }
 0x2f3   : > { %v3769_v41 = vmul.f32 0.0009765625, %v3768_v53 }
 0x2f5   : > { %v4013_v22 = vadd.f32 %v4011_v26, %v3769_v41 }
 0x2f7   : > { %4016 = vst.msk [vmem:[%s7282_s6 + $0x1] sm:$0x1] %vm4014_vm4, %v4013_v22 }
 0x31b   : > { %v3789_v60 = vpop.permute.xlu1 %3788 }
 0x31c   : > { %v3823_v10 = vsel %vm1424_vm3, %v7441_v37, %v3789_v60  ;;  %v3787_v28 = vpop.permute.xlu0 %3786  ;;  %v7460_v60 = vld [vmem:[#allocation18_spill] sm:$0xff]  ;;  %v7461_v37 = vld [vmem:[#allocation11_spill] sm:$0xff] }
 0x31d   : > { %v4315_v9 = vcombine.low %v3823_v10, %v3823_v10  ;;  %v4316_v21 = vcombine.high %v3823_v10, %v3823_v10  ;;  %v3820_v27 = vsel %vm1424_vm3, %v7442_v12, %v3787_v28  ;;  %v7462_v10 = vpack.c.bf16 %v7460_v60, %v7461_v37 }
 0x31e   : > { %v4313_v38 = vcombine.low %v3820_v27, %v3820_v27  ;;  %v4314_v13 = vcombine.high %v3820_v27, %v3820_v27  ;;  %v7463_v27 = vld [vmem:[#allocation19_spill] sm:$0xff] }
 0x31f   : > { %3980 = vst [vmem:[%s5293_s16 + $0x8] sm:$0xf] %v4315_v9  ;;  %3981 = vst [vmem:[%s5293_s16 + $0xc] sm:$0xf] %v4316_v21 }
 0x320   : > { %3978 = vst [vmem:[%s5293_s16] sm:$0xf] %v4313_v38  ;;  %3979 = vst [vmem:[%s5293_s16 + $0x4] sm:$0xf] %v4314_v13  ;;  %v7464_v38 = vld [vmem:[#allocation14_spill] sm:$0xff] }
 0x321   : > { %v7465_v13 = vpack.c.bf16 %v7463_v27, %v7464_v38 }
 0x323   : > { %v3793_v14 = vpop.permute.xlu1 %3792 }
 0x324   : > { %v3829_v7 = vsel %vm1424_vm3, %v7443_v25, %v3793_v14  ;;  %v3791_v15 = vpop.permute.xlu0 %3790 }
 0x325   : > { %v4319_v16 = vcombine.low %v3829_v7, %v3829_v7  ;;  %v4320_v31 = vcombine.high %v3829_v7, %v3829_v7  ;;  %v3826_v2 = vsel %vm1424_vm3, %v7444_v34, %v3791_v15 }
 0x326   : > { %v4317_v46 = vcombine.low %v3826_v2, %v3826_v2  ;;  %v4318_v33 = vcombine.high %v3826_v2, %v3826_v2 }
 0x327   : > { %3984 = vst [vmem:[%s5293_s16 + $0x18] sm:$0xf] %v4319_v16  ;;  %3985 = vst [vmem:[%s5293_s16 + $0x1c] sm:$0xf] %v4320_v31  ;;  %v7466_v16 = vld [vmem:[#allocation20_spill] sm:$0xff]  ;;  %v7467_v31 = vld [vmem:[#allocation15_spill] sm:$0xff] }
 0x328   : > { %3982 = vst [vmem:[%s5293_s16 + $0x10] sm:$0xf] %v4317_v46  ;;  %3983 = vst [vmem:[%s5293_s16 + $0x14] sm:$0xf] %v4318_v33  ;;  %v7468_v34 = vpack.c.bf16 %v7466_v16, %v7467_v31 }
 0x32b   : > { %v3797_v19 = vpop.permute.xlu1 %3796 }
 0x32c   : > { %v3835_v44 = vsel %vm1424_vm3, %v7445_v35, %v3797_v19  ;;  %v3795_v50 = vpop.permute.xlu0 %3794  ;;  %v7469_v35 = vld [vmem:[#allocation23_spill] sm:$0xff] }
 0x32d   : > { %v4323_v51 = vcombine.low %v3835_v44, %v3835_v44  ;;  %v4324_v30 = vcombine.high %v3835_v44, %v3835_v44  ;;  %v3832_v40 = vsel %vm1424_vm3, %v7446_v23, %v3795_v50  ;;  %v7470_v44 = vld [vmem:[#allocation22_spill] sm:$0xff] }
 0x32e   : > { %v4321_v54 = vcombine.low %v3832_v40, %v3832_v40  ;;  %v4322_v1 = vcombine.high %v3832_v40, %v3832_v40  ;;  %v7471_v50 = vpack.c.bf16 %v7469_v35, %v7470_v44 }
 0x32f   : > { %3988 = vst [vmem:[%s5293_s16 + $0x28] sm:$0xf] %v4323_v51  ;;  %3989 = vst [vmem:[%s5293_s16 + $0x2c] sm:$0xf] %v4324_v30 }
 0x330   : > { %3986 = vst [vmem:[%s5293_s16 + $0x20] sm:$0xf] %v4321_v54  ;;  %3987 = vst [vmem:[%s5293_s16 + $0x24] sm:$0xf] %v4322_v1  ;;  %v7472_v54 = vld [vmem:[#allocation21_spill] sm:$0xff] }
 0x331   : > { %v7473_v1 = vld [vmem:[#allocation17_spill] sm:$0xff] }
 0x333   : > { %v3801_v58 = vpop.permute.xlu1 %3800 }
 0x334   : > { %v3841_v43 = vsel %vm1424_vm3, %v7447_v62, %v3801_v58  ;;  %v3799_v42 = vpop.permute.xlu0 %3798  ;;  %v7474_v58 = vpack.c.bf16 %v7472_v54, %v7473_v1 }
 0x335   : > { %v4327_v61 = vcombine.low %v3841_v43, %v3841_v43  ;;  %v4328_v0 = vcombine.high %v3841_v43, %v3841_v43  ;;  %v3838_v49 = vsel %vm1424_vm3, %v7450_v55, %v3799_v42 }
 0x336   : > { %v4325_v59 = vcombine.low %v3838_v49, %v3838_v49  ;;  %v4326_v8 = vcombine.high %v3838_v49, %v3838_v49 }
 0x337   : > { %3992 = vst [vmem:[%s5293_s16 + $0x38] sm:$0xf] %v4327_v61  ;;  %3993 = vst [vmem:[%s5293_s16 + $0x3c] sm:$0xf] %v4328_v0 }
 0x338   : > { %3990 = vst [vmem:[%s5293_s16 + $0x30] sm:$0xf] %v4325_v59  ;;  %3991 = vst [vmem:[%s5293_s16 + $0x34] sm:$0xf] %v4326_v8 }
 0x33b   : > { %v3805_v5 = vpop.permute.xlu1 %3804 }
 0x33c   : > { %v3847_v11 = vsel %vm1424_vm3, %v7453_v24, %v3805_v5  ;;  %v3803_v57 = vpop.permute.xlu0 %3802 }
 0x33d   : > { %v4331_v39 = vcombine.low %v3847_v11, %v3847_v11  ;;  %v4332_v4 = vcombine.high %v3847_v11, %v3847_v11  ;;  %v3844_v29 = vsel %vm1424_vm3, %v7456_v6, %v3803_v57 }
 0x33e   : > { %v4329_v32 = vcombine.low %v3844_v29, %v3844_v29  ;;  %v4330_v63 = vcombine.high %v3844_v29, %v3844_v29 }
 0x33f   : > { %3996 = vst [vmem:[%s5293_s16 + $0x48] sm:$0xf] %v4331_v39  ;;  %3997 = vst [vmem:[%s5293_s16 + $0x4c] sm:$0xf] %v4332_v4 }
 0x340   : > { %3994 = vst [vmem:[%s5293_s16 + $0x40] sm:$0xf] %v4329_v32  ;;  %3995 = vst [vmem:[%s5293_s16 + $0x44] sm:$0xf] %v4330_v63 }
 0x343   : > { %v3809_v45 = vpop.permute.xlu1 %3808 }
 0x344   : > { %v3853_v53 = vsel %vm1424_vm3, %v7459_v48, %v3809_v45  ;;  %v3807_v26 = vpop.permute.xlu0 %3806 }
 0x345   : > { %v4335_v41 = vcombine.low %v3853_v53, %v3853_v53  ;;  %v4336_v22 = vcombine.high %v3853_v53, %v3853_v53  ;;  %v3850_v28 = vsel %vm1424_vm3, %v7462_v10, %v3807_v26 }
 0x346   : > { %v4333_v9 = vcombine.low %v3850_v28, %v3850_v28  ;;  %v4334_v21 = vcombine.high %v3850_v28, %v3850_v28 }
 0x347   : > { %4000 = vst [vmem:[%s5293_s16 + $0x58] sm:$0xf] %v4335_v41  ;;  %4001 = vst [vmem:[%s5293_s16 + $0x5c] sm:$0xf] %v4336_v22 }
 0x348   : > { %3998 = vst [vmem:[%s5293_s16 + $0x50] sm:$0xf] %v4333_v9  ;;  %3999 = vst [vmem:[%s5293_s16 + $0x54] sm:$0xf] %v4334_v21 }
 0x34b   : > { %v3813_v12 = vpop.permute.xlu1 %3812 }
 0x34c   : > { %v3859_v14 = vsel %vm1424_vm3, %v7465_v13, %v3813_v12  ;;  %v3811_v25 = vpop.permute.xlu0 %3810 }
 0x34d   : > { %v4339_v7 = vcombine.low %v3859_v14, %v3859_v14  ;;  %v4340_v15 = vcombine.high %v3859_v14, %v3859_v14  ;;  %v3856_v2 = vsel %vm1424_vm3, %v7468_v34, %v3811_v25 }
 0x34e   : > { %v4337_v46 = vcombine.low %v3856_v2, %v3856_v2  ;;  %v4338_v33 = vcombine.high %v3856_v2, %v3856_v2 }
 0x34f   : > { %4004 = vst [vmem:[%s5293_s16 + $0x68] sm:$0xf] %v4339_v7  ;;  %4005 = vst [vmem:[%s5293_s16 + $0x6c] sm:$0xf] %v4340_v15 }
 0x350   : > { %4002 = vst [vmem:[%s5293_s16 + $0x60] sm:$0xf] %v4337_v46  ;;  %4003 = vst [vmem:[%s5293_s16 + $0x64] sm:$0xf] %v4338_v33 }
 0x354   : > { %v3815_v19 = vpop.permute.xlu0 %3814 }
 0x355   : > { %v3862_v51 = vsel %vm1424_vm3, %v7471_v50, %v3815_v19 }
 0x356   : > { %v3817_v30 = vpop.permute.xlu1 %3816  ;;  %v4341_v23 = vcombine.low %v3862_v51, %v3862_v51  ;;  %v4342_v40 = vcombine.high %v3862_v51, %v3862_v51 }
 0x357   : > { %v3865_v62 = vsel %vm1424_vm3, %v7474_v58, %v3817_v30 }
 0x358   : > { %v4343_v43 = vcombine.low %v3865_v62, %v3865_v62  ;;  %v4344_v42 = vcombine.high %v3865_v62, %v3865_v62  ;;  %4006 = vst [vmem:[%s5293_s16 + $0x70] sm:$0xf] %v4341_v23  ;;  %4007 = vst [vmem:[%s5293_s16 + $0x74] sm:$0xf] %v4342_v40 }
 0x35a   : > { %4008 = vst [vmem:[%s5293_s16 + $0x78] sm:$0xf] %v4343_v43  ;;  %4009 = vst [vmem:[%s5293_s16 + $0x7c] sm:$0xf] %v4344_v42 }
 0x35b PF: > { %p14_p10 = scmp.ge.s32.totalorder %s5164_s25, 6   ;;  %s7475_s21 = smov %s5104_s22 }
 0x35c   : > { %s7476_s22 = smov %s5173_s28  ;;  %s7477_s23 = smov %s5164_s25 }
 0x35d   :  { %16 = sbr.rel (!%p14_p10) target bundleno = 2 (0x2), region = 229 }

// kernel: polarization_forward.8
= control target key start
LH: loop header
LB: loop body
LE: loop exit
PB: predicated region body
PF: predicated region fallthrough
CT: control target
= control target key end

     0   :  { %v1425_v0 = vmov 0.0|0.0   ;;  %vm1426_vm0 = vmmov 0   ;;  %v1427_v4 = vmov 0.0   ;;  %v1428_v5 = vmov 1966171168   ;;  %s2413_s1 = inlined_call_operand.vmem [shape: f32[64,8], index: 1, kind: input, shape index: {}]   ;;  %s2414_s0 = inlined_call_operand.vmem [shape: f32[2,1,64], index: 0, kind: input, shape index: {}]   ;;  %s2415_s3 = inlined_call_operand.vmem [shape: f32[8,64], index: 3, kind: input, shape index: {}]   ;;  %s2416_s2 = inlined_call_operand.vmem [shape: f32[1,8], index: 2, kind: input, shape index: {}]   ;;  %s2417_s5 = inlined_call_operand.vmem [shape: f32[64,480], index: 5, kind: input, shape index: {}]   ;;  %s2418_s7 = inlined_call_operand.vmem [shape: f32[480,480], index: 7, kind: input, shape index: {}]   ;;  %s2419_s4 = inlined_call_operand.vmem [shape: f32[1,64], index: 4, kind: input, shape index: {}]   ;;  %s2420_s9 = inlined_call_operand.vmem [shape: f32[2,1,64], index: 9, kind: output, shape index: {0}]   ;;  %s2421_s6 = inlined_call_operand.vmem [shape: f32[1,480], index: 6, kind: input, shape index: {}]   ;;  %s2422_s8 = inlined_call_operand.vmem [shape: f32[1,480], index: 8, kind: input, shape index: {}]   ;;  %s2423_s10 = inlined_call_operand.vmem [shape: f32[2,1,480], index: 10, kind: output, shape index: {1}]  }
   0x1   :  { %1125 = vmatprep.subr.bf16.mxu0 %v1425_v0  ;;  %v36_v1 = vld [vmem:[%s2413_s1] sm:$0xff]  ;;  %v37_v2 = vld [vmem:[%s2413_s1 + $0x8] sm:$0xff]  ;;  %v38_v3 = vld [vmem:[%s2413_s1 + $0x10] sm:$0xff]  ;;  %1117 = vmatprep.mubr.msk.f32.mxu0 %vm1426_vm0, %v1427_v4  ;;  %v55_v6 = vunpack.c.l.s4 %v1428_v5  ;;  %v57_v7 = vlaneseq  ;;  %vm68_vm1 = vcmask 523264   ;;  %vm150_vm2 = vcmask 64512  }
   0x2   :  { %v1126_v8 = vpack.c.bf16 %v37_v2, %v36_v1  ;;  %v39_v9 = vld [vmem:[%s2413_s1 + $0x18] sm:$0xff]  ;;  %1120 = vmatprep.subr.mxu1 %v1427_v4  ;;  %1122 = vmatprep.mubr.msk.f32.mxu1 %vm1426_vm0, %v1427_v4  ;;  %v1502_v13 = vld [vmem:[%s2414_s0] sm:$0x1]  ;;  %v1507_v14 = vld [vmem:[%s2414_s0 + $0x1] sm:$0x1]  ;;  %vm1026_vm3 = vcmask 516096  }
   0x3   :  { %v56_v10 = vunpack.c.0.s8 %v55_v6  ;;  %v1497_v11 = vshrl.u32 %v57_v7, 7  ;;  %v1129_v12 = vpack.c.bf16 %v39_v9, %v38_v3  ;;  %v40_v15 = vld [vmem:[%s2413_s1 + $0x20] sm:$0xff]  ;;  %v41_v16 = vld [vmem:[%s2413_s1 + $0x28] sm:$0xff]  ;;  %v53_v17 = vcombine.low %v1502_v13, %v1507_v14  ;;  %v42_v20 = vld [vmem:[%s2413_s1 + $0x30] sm:$0xff] }
   0x4   :  { %1127 = vmatpush3.bf16.msra.mxu0 %v1126_v8  ;;  %v1132_v19 = vpack.c.bf16 %v41_v16, %v40_v15  ;;  %v43_v21 = vld [vmem:[%s2413_s1 + $0x38] sm:$0xff]  ;;  %v142_v25 = vld [vmem:[%s2415_s3] sm:$0xff]  ;;  %v258_v31 = vld [vmem:[%s2417_s5 + $0x8] sm:$0xff]  ;;  %vm738_vm4 = vcmask 785408   ;;  %vm1069_vm5 = vcmp.lt.s32.totalorder %v57_v7, 480 }
   0x5   :  { %1128 = vmatprep.subr.bf16.mxu0 %v1425_v0  ;;  %v1518_v18 = vsub.s32 %v56_v10, %v1497_v11  ;;  %v1135_v23 = vpack.c.bf16 %v43_v21, %v42_v20  ;;  %1121 = vmatpush3.msra.mxu1 %v142_v25  ;;  %v1081_v26 = vld [vmem:[%s2416_s2] ss:$0 sm:$0xff]  ;;  %v262_v32 = vld [vmem:[%s2417_s5 + $0x28] sm:$0xff]  ;;  %v260_v33 = vld [vmem:[%s2417_s5 + $0x18] sm:$0xff] }
   0x6   :  { %v1137_v34 = vpack.c.bf16 %v262_v32, %v258_v31  ;;  %v264_v35 = vld [vmem:[%s2417_s5 + $0x38] sm:$0xff]  ;;  %v257_v36 = vld [vmem:[%s2417_s5] sm:$0xff]  ;;  %v259_v40 = vld [vmem:[%s2417_s5 + $0x10] sm:$0xff] }
   0x7   :  { %v60_v22 = vrot.slane %v53_v17, %v1518_v18  ;;  %v261_v37 = vld [vmem:[%s2417_s5 + $0x20] sm:$0xff]  ;;  %v1153_v38 = vpack.c.bf16 %v264_v35, %v260_v33  ;;  %v263_v41 = vld [vmem:[%s2417_s5 + $0x30] sm:$0xff]  ;;  %v266_v43 = vld [vmem:[%s2417_s5 + $0x48] sm:$0xff] }
   0x8   :  { %1130 = vmatpush3.bf16.msra.mxu0 %v1129_v12  ;;  %v1139_v39 = vpack.c.bf16 %v261_v37, %v257_v36  ;;  %1138 = vmatprep.subr.bf16.mxu1 %v1137_v34  ;;  %v1155_v42 = vpack.c.bf16 %v263_v41, %v259_v40  ;;  %v270_v44 = vld [vmem:[%s2417_s5 + $0x68] sm:$0xff]  ;;  %v268_v45 = vld [vmem:[%s2417_s5 + $0x58] sm:$0xff]  ;;  %v265_v48 = vld [vmem:[%s2417_s5 + $0x40] sm:$0xff] }
   0x9   :  { %1131 = vmatprep.subr.bf16.mxu0 %v1425_v0  ;;  %v67_v24 = vrot.slane %v60_v22, %v1518_v18  ;;  %v1141_v46 = vpack.c.bf16 %v270_v44, %v266_v43  ;;  %v272_v47 = vld [vmem:[%s2417_s5 + $0x78] sm:$0xff]  ;;  %v269_v49 = vld [vmem:[%s2417_s5 + $0x60] sm:$0xff]  ;;  %v267_v52 = vld [vmem:[%s2417_s5 + $0x50] sm:$0xff] }
   0xa   :  { %v1157_v50 = vpack.c.bf16 %v272_v47, %v268_v45  ;;  %v1143_v51 = vpack.c.bf16 %v269_v49, %v265_v48  ;;  %v271_v53 = vld [vmem:[%s2417_s5 + $0x70] sm:$0xff]  ;;  %v274_v55 = vld [vmem:[%s2417_s5 + $0x88] sm:$0xff]  ;;  %v276_v57 = vld [vmem:[%s2417_s5 + $0x98] sm:$0xff] }
   0xb   :  { %v1159_v54 = vpack.c.bf16 %v271_v53, %v267_v52  ;;  %v278_v56 = vld [vmem:[%s2417_s5 + $0xa8] sm:$0xff]  ;;  %v280_v59 = vld [vmem:[%s2417_s5 + $0xb8] sm:$0xff]  ;;  %v273_v60 = vld [vmem:[%s2417_s5 + $0x80] sm:$0xff] }
   0xc   :  { %1133 = vmatpush3.bf16.msra.mxu0 %v1132_v19  ;;  %v1145_v58 = vpack.c.bf16 %v278_v56, %v274_v55  ;;  %v277_v61 = vld [vmem:[%s2417_s5 + $0xa0] sm:$0xff]  ;;  %v1161_v62 = vpack.c.bf16 %v280_v59, %v276_v57  ;;  %v279_v1 = vld [vmem:[%s2417_s5 + $0xb0] sm:$0xff]  ;;  %v282_v3 = vld [vmem:[%s2417_s5 + $0xc8] sm:$0xff] }
   0xd   :  { %1134 = vmatprep.subr.bf16.mxu0 %v1425_v0  ;;  %v1147_v63 = vpack.c.bf16 %v277_v61, %v273_v60  ;;  %v275_v0 = vld [vmem:[%s2417_s5 + $0x90] sm:$0xff]  ;;  %v284_v5 = vld [vmem:[%s2417_s5 + $0xd8] sm:$0xff]  ;;  %v281_v9 = vld [vmem:[%s2417_s5 + $0xc0] sm:$0xff] }
   0xe   :  { %v1163_v2 = vpack.c.bf16 %v279_v1, %v275_v0  ;;  %v288_v8 = vld [vmem:[%s2417_s5 + $0xf8] sm:$0xff]  ;;  %v285_v10 = vld [vmem:[%s2417_s5 + $0xe0] sm:$0xff]  ;;  %v283_v16 = vld [vmem:[%s2417_s5 + $0xd0] sm:$0xff] }
   0xf   :  { %v1165_v12 = vpack.c.bf16 %v288_v8, %v284_v5  ;;  %v1151_v15 = vpack.c.bf16 %v285_v10, %v281_v9  ;;  %v287_v17 = vld [vmem:[%s2417_s5 + $0xf0] sm:$0xff]  ;;  %v477_v20 = vld [vmem:[%s2418_s7 + $0x8] sm:$0xff]  ;;  %v479_v22 = vld [vmem:[%s2418_s7 + $0x18] sm:$0xff] }
  0x10   :  { %1136 = vmatpush3.bf16.msra.mxu0 %v1135_v23  ;;  %v1167_v19 = vpack.c.bf16 %v287_v17, %v283_v16  ;;  %v481_v21 = vld [vmem:[%s2418_s7 + $0x28] sm:$0xff]  ;;  %v476_v40 = vld [vmem:[%s2418_s7] sm:$0xff]  ;;  %v478_v43 = vld [vmem:[%s2418_s7 + $0x10] sm:$0xff] }
  0x11   :  { %1154 = vmatprep.subr.bf16.mxu0 %v1153_v38  ;;  %v1169_v23 = vpack.c.bf16 %v481_v21, %v477_v20  ;;  %v480_v41 = vld [vmem:[%s2418_s7 + $0x20] sm:$0xff]  ;;  %v482_v44 = vld [vmem:[%s2418_s7 + $0x30] sm:$0xff]  ;;  %v487_v45 = vld [vmem:[%s2418_s7 + $0x58] sm:$0xff] }
  0x12   :  { %v1171_v48 = vpack.c.bf16 %v480_v41, %v476_v40  ;;  %v1291_v49 = vpack.c.bf16 %v482_v44, %v478_v43  ;;  %v486_v55 = vld [vmem:[%s2418_s7 + $0x50] sm:$0xff]  ;;  %v493_v57 = vld [vmem:[%s2418_s7 + $0x88] sm:$0xff]  ;;  %v495_v59 = vld [vmem:[%s2418_s7 + $0x98] sm:$0xff] }
  0x13   :  { %1118 = vmatmul.mubr.msk.f32.vlgmr.msra.gmra.mrb[0].mxu0 %vm68_vm1, %v67_v24  ;;  %v483_v24 = vld [vmem:[%s2418_s7 + $0x38] sm:$0xff]  ;;  %v490_v56 = vld [vmem:[%s2418_s7 + $0x70] sm:$0xff]  ;;  %v496_v0 = vld [vmem:[%s2418_s7 + $0xa0] sm:$0xff] }
  0x14   :  { %465 = vmatprep.mubr.f32.mxu0 %v1427_v4  ;;  %1156 = vmatpush1.bf16.msra.mxu0 %v1155_v42  ;;  %v1289_v25 = vpack.c.bf16 %v483_v24, %v479_v22  ;;  %v499_v60 = vld [vmem:[%s2418_s7 + $0xb8] sm:$0xff]  ;;  %v501_v5 = vld [vmem:[%s2418_s7 + $0xc8] sm:$0xff]  ;;  %v504_v16 = vld [vmem:[%s2418_s7 + $0xe0] sm:$0xff] }
  0x15   :  { %1158 = vmatprep.subr.bf16.mxu0 %v1157_v50  ;;  %v484_v50 = vld [vmem:[%s2418_s7 + $0x40] sm:$0xff]  ;;  %v503_v8 = vld [vmem:[%s2418_s7 + $0xd8] sm:$0xff]  ;;  %v502_v20 = vld [vmem:[%s2418_s7 + $0xd0] sm:$0xff] }
  0x16   :  { %v507_v9 = vld [vmem:[%s2418_s7 + $0xf8] sm:$0xff]  ;;  %v506_v21 = vld [vmem:[%s2418_s7 + $0xf0] sm:$0xff]  ;;  %v509_v22 = vld [vmem:[%s2418_s7 + $0x108] sm:$0xff] }
  0x17   :  { %v511_v24 = vld [vmem:[%s2418_s7 + $0x118] sm:$0xff]  ;;  %v516_v40 = vld [vmem:[%s2418_s7 + $0x140] sm:$0xff]  ;;  %v518_v44 = vld [vmem:[%s2418_s7 + $0x150] sm:$0xff] }
  0x18   :  { %1160 = vmatpush1.bf16.msra.mxu0 %v1159_v54  ;;  %v520_v41 = vld [vmem:[%s2418_s7 + $0x160] sm:$0xff] }
  0x19   :  { %1162 = vmatprep.subr.bf16.mxu0 %v1161_v62  ;;  %v1295_v62 = vpack.c.bf16 %v490_v56, %v486_v55  ;;  %v530_v55 = vld [vmem:[%s2418_s7 + $0x1b0] sm:$0xff]  ;;  %v533_v56 = vld [vmem:[%s2418_s7 + $0x1c8] sm:$0xff] }
  0x1c   :  { %1164 = vmatpush1.bf16.msra.mxu0 %v1163_v2  ;;  %v1297_v2 = vpack.c.bf16 %v499_v60, %v495_v59  ;;  %v539_v59 = vld [vmem:[%s2418_s7 + $0x1f8] sm:$0xff] }
  0x1d   :  { %1166 = vmatprep.subr.bf16.mxu0 %v1165_v12 }
  0x20   :  { %1168 = vmatpush1.bf16.msra.mxu0 %v1167_v19  ;;  %v1301_v19 = vpack.c.bf16 %v507_v9, %v503_v8  ;;  %v547_v8 = vld [vmem:[%s2418_s7 + $0x238] sm:$0xff] }
  0x21   :  { %1290 = vmatprep.subr.bf16.mxu0 %v1289_v25  ;;  %v515_v25 = vld [vmem:[%s2418_s7 + $0x138] sm:$0xff] }
  0xe6   :  { %v137_v27 = vpop.f32.mrb[0].mxu0 }
  0xe7   :  { %v138_v28 = vadd.f32 %v1081_v26, %v137_v27  ;;  %v1119_v29 = vpop.f32.mrb[1].mxu0  ;;  %v1083_v26 = vld [vmem:[%s2419_s4] ss:$0 sm:$0xff] }
  0xe9   :  { %v141_v30 = vmax.f32 %v138_v28, 0.0 }
  0xeb   :  { %1123 = vmatmul.mubr.msk.f32.vlgmr.msra.gmra.mrb[0].mxu1 %vm150_vm2, %v141_v30 }
  0xec   :  { %394 = vmatprep.mubr.f32.mxu1 %v1427_v4  ;;  %1140 = vmatpush1.bf16.msra.mxu1 %v1139_v39  ;;  %v286_v4 = vld [vmem:[%s2417_s5 + $0xe8] sm:$0xff] }
  0xed   :  { %1142 = vmatprep.subr.bf16.mxu1 %v1141_v46  ;;  %v1149_v6 = vpack.c.bf16 %v286_v4, %v282_v3  ;;  %v491_v46 = vld [vmem:[%s2418_s7 + $0x78] sm:$0xff]  ;;  %v494_v3 = vld [vmem:[%s2418_s7 + $0x90] sm:$0xff] }
  0xee   :  { %v1293_v54 = vpack.c.bf16 %v491_v46, %v487_v45  ;;  %v498_v4 = vld [vmem:[%s2418_s7 + $0xb0] sm:$0xff]  ;;  %v529_v45 = vld [vmem:[%s2418_s7 + $0x1a8] sm:$0xff]  ;;  %v527_v46 = vld [vmem:[%s2418_s7 + $0x198] sm:$0xff] }
  0xef   :  { %v1299_v12 = vpack.c.bf16 %v498_v4, %v494_v3  ;;  %v538_v3 = vld [vmem:[%s2418_s7 + $0x1f0] sm:$0xff]  ;;  %v541_v4 = vld [vmem:[%s2418_s7 + $0x208] sm:$0xff] }
  0xf0   :  { %1144 = vmatpush1.bf16.msra.mxu1 %v1143_v51  ;;  %v488_v51 = vld [vmem:[%s2418_s7 + $0x60] sm:$0xff] }
  0xf1   :  { %1146 = vmatprep.subr.bf16.mxu1 %v1145_v58  ;;  %v497_v58 = vld [vmem:[%s2418_s7 + $0xa8] sm:$0xff]  ;;  %v1175_v61 = vpack.c.bf16 %v488_v51, %v484_v50  ;;  %v524_v50 = vld [vmem:[%s2418_s7 + $0x180] sm:$0xff] }
  0xf2   :  { %v1177_v1 = vpack.c.bf16 %v497_v58, %v493_v57  ;;  %v528_v51 = vld [vmem:[%s2418_s7 + $0x1a0] sm:$0xff]  ;;  %v537_v57 = vld [vmem:[%s2418_s7 + $0x1e8] sm:$0xff]  ;;  %v535_v58 = vld [vmem:[%s2418_s7 + $0x1d8] sm:$0xff] }
  0xf3   :  { %v1195_v60 = vpack.c.bf16 %v528_v51, %v524_v50  ;;  %v568_v50 = vld [vmem:[%s2418_s7 + $0x2e0] sm:$0xff] }
  0xf4   :  { %1148 = vmatpush1.bf16.msra.mxu1 %v1147_v63  ;;  %v492_v63 = vld [vmem:[%s2418_s7 + $0x80] sm:$0xff] }
  0xf5   :  { %1150 = vmatprep.subr.bf16.mxu1 %v1149_v6  ;;  %v505_v6 = vld [vmem:[%s2418_s7 + $0xe8] sm:$0xff]  ;;  %v1179_v10 = vpack.c.bf16 %v496_v0, %v492_v63  ;;  %v536_v63 = vld [vmem:[%s2418_s7 + $0x1e0] sm:$0xff]  ;;  %v1197_v0 = vpack.c.bf16 %v537_v57, %v533_v56  ;;  %v575_v57 = vld [vmem:[%s2418_s7 + $0x318] sm:$0xff] }
  0xf6   :  { %v1181_v17 = vpack.c.bf16 %v505_v6, %v501_v5  ;;  %v545_v5 = vld [vmem:[%s2418_s7 + $0x228] sm:$0xff]  ;;  %v543_v6 = vld [vmem:[%s2418_s7 + $0x218] sm:$0xff] }
  0xf7   :  { %v577_v56 = vld [vmem:[%s2418_s7 + $0x328] sm:$0xff] }
  0xf8   :  { %1152 = vmatpush1.bf16.msra.mxu1 %v1151_v15  ;;  %v500_v15 = vld [vmem:[%s2418_s7 + $0xc0] sm:$0xff] }
  0xf9   :  { %1170 = vmatprep.subr.bf16.mxu1 %v1169_v23  ;;  %v513_v23 = vld [vmem:[%s2418_s7 + $0x128] sm:$0xff] }
 0x1be   :  { %v220_v27 = vpop.f32.mrb[0].mxu1 }
 0x1bf   :  { %v221_v28 = vadd.f32 %v1083_v26, %v220_v27  ;;  %v1124_v29 = vpop.f32.mrb[1].mxu1  ;;  %v1183_v26 = vpack.c.bf16 %v504_v16, %v500_v15  ;;  %v1303_v27 = vpack.c.bf16 %v506_v21, %v502_v20  ;;  %v544_v15 = vld [vmem:[%s2418_s7 + $0x220] sm:$0xff]  ;;  %v1201_v16 = vpack.c.bf16 %v545_v5, %v541_v4  ;;  %v546_v20 = vld [vmem:[%s2418_s7 + $0x230] sm:$0xff]  ;;  %v549_v21 = vld [vmem:[%s2418_s7 + $0x248] sm:$0xff] }
 0x1c0   :  { %v512_v29 = vld [vmem:[%s2418_s7 + $0x120] sm:$0xff]  ;;  %v585_v4 = vld [vmem:[%s2418_s7 + $0x368] sm:$0xff]  ;;  %v583_v5 = vld [vmem:[%s2418_s7 + $0x358] sm:$0xff] }
 0x1c1   :  { %v1085_v30 = vmul.f32 -1.442695, %v221_v28  ;;  %v508_v28 = vld [vmem:[%s2418_s7 + $0x100] sm:$0xff] }
 0x1c3   :  { %1421 = vpow2.f32 %v1085_v30  ;;  %v1185_v30 = vpack.c.bf16 %v513_v23, %v509_v22  ;;  %v553_v22 = vld [vmem:[%s2418_s7 + $0x268] sm:$0xff]  ;;  %v551_v23 = vld [vmem:[%s2418_s7 + $0x258] sm:$0xff] }
 0x1cd   :  { %v1422_v31 = vpop.eup %1421 }
 0x1ce   :  { %v227_v32 = vadd.f32 1.0, %v1422_v31  ;;  %v1305_v31 = vpack.c.bf16 %v515_v25, %v511_v24  ;;  %v555_v24 = vld [vmem:[%s2418_s7 + $0x278] sm:$0xff] }
 0x1d0   :  { %1423 = vrcp.f32 %v227_v32  ;;  %v510_v32 = vld [vmem:[%s2418_s7 + $0x110] sm:$0xff] }
 0x1da   :  { %v1424_v33 = vpop.eup %1423 }
 0x1db   :  { %v237_v34 = vrot.slane %v1424_v33, %v1518_v18  ;;  %v514_v33 = vld [vmem:[%s2418_s7 + $0x130] sm:$0xff] }
 0x1dd   :  { %v238_v35 = vcombine.high %v237_v34, %v237_v34  ;;  %v245_v36 = vrot.slane %v237_v34, %v1518_v18  ;;  %v517_v34 = vld [vmem:[%s2418_s7 + $0x148] sm:$0xff] }
 0x1df   :  { %v252_v37 = vrot.slane %v238_v35, %v1518_v18  ;;  %1027 = vst.msk [vmem:[%s2420_s9] sm:$0x1] %vm1026_vm3, %v245_v36  ;;  %v255_v38 = vmul.f32 %v245_v36, %v1502_v13  ;;  %v485_v13 = vld [vmem:[%s2418_s7 + $0x48] sm:$0xff]  ;;  %v519_v36 = vld [vmem:[%s2418_s7 + $0x158] sm:$0xff] }
 0x1e0   :  { %v521_v35 = vld [vmem:[%s2418_s7 + $0x168] sm:$0xff] }
 0x1e1   :  { %1028 = vst.msk [vmem:[%s2420_s9 + $0x1] sm:$0x1] %vm1026_vm3, %v252_v37  ;;  %v256_v39 = vmul.f32 %v252_v37, %v1507_v14  ;;  %v489_v14 = vld [vmem:[%s2418_s7 + $0x68] sm:$0xff]  ;;  %v523_v37 = vld [vmem:[%s2418_s7 + $0x178] sm:$0xff] }
 0x1e2   :  { %v1173_v53 = vpack.c.bf16 %v489_v14, %v485_v13  ;;  %v1309_v43 = vpack.c.bf16 %v523_v37, %v519_v36  ;;  %v522_v13 = vld [vmem:[%s2418_s7 + $0x170] sm:$0xff]  ;;  %v525_v14 = vld [vmem:[%s2418_s7 + $0x188] sm:$0xff]  ;;  %v563_v36 = vld [vmem:[%s2418_s7 + $0x2b8] sm:$0xff] }
 0x1e3   :  { %v313_v42 = vcombine.low %v255_v38, %v256_v39  ;;  %v1187_v38 = vpack.c.bf16 %v512_v29, %v508_v28  ;;  %v1307_v39 = vpack.c.bf16 %v514_v33, %v510_v32  ;;  %v552_v28 = vld [vmem:[%s2418_s7 + $0x260] sm:$0xff]  ;;  %v1205_v29 = vpack.c.bf16 %v553_v22, %v549_v21  ;;  %v554_v32 = vld [vmem:[%s2418_s7 + $0x270] sm:$0xff]  ;;  %v557_v33 = vld [vmem:[%s2418_s7 + $0x288] sm:$0xff] }
 0x1e4   :  { %v593_v21 = vld [vmem:[%s2418_s7 + $0x3a8] sm:$0xff]  ;;  %v591_v22 = vld [vmem:[%s2418_s7 + $0x398] sm:$0xff] }
 0x1e5   :  { %v320_v47 = vrot.slane %v313_v42, %v1518_v18  ;;  %v1189_v42 = vpack.c.bf16 %v521_v35, %v517_v34  ;;  %v561_v34 = vld [vmem:[%s2418_s7 + $0x2a8] sm:$0xff]  ;;  %v559_v35 = vld [vmem:[%s2418_s7 + $0x298] sm:$0xff] }
 0x1e7   :  { %v327_v52 = vrot.slane %v320_v47, %v1518_v18  ;;  %v531_v47 = vld [vmem:[%s2418_s7 + $0x1b8] sm:$0xff] }
 0x1e9   :  { %1086 = vmatmul.mubr.msk.f32.vlgmr.msra.gmra.mrb[2].mxu1 %vm68_vm1, %v327_v52  ;;  %1087 = vmatmul.mubr.msk.f32.vlgmr.msra.gmra.mrb[2].mxu0 %vm68_vm1, %v327_v52  ;;  %v1193_v52 = vpack.c.bf16 %v529_v45, %v525_v14  ;;  %v569_v14 = vld [vmem:[%s2418_s7 + $0x2e8] sm:$0xff]  ;;  %v567_v45 = vld [vmem:[%s2418_s7 + $0x2d8] sm:$0xff] }
 0x1ea   :  { %1172 = vmatpush1.bf16.msra.mxu1 %v1171_v48  ;;  %1292 = vmatpush1.bf16.msra.mxu0 %v1291_v49  ;;  %v1191_v48 = vpack.c.bf16 %v520_v41, %v516_v40  ;;  %v1311_v49 = vpack.c.bf16 %v522_v13, %v518_v44  ;;  %v560_v40 = vld [vmem:[%s2418_s7 + $0x2a0] sm:$0xff]  ;;  %v1209_v41 = vpack.c.bf16 %v561_v34, %v557_v33  ;;  %v562_v44 = vld [vmem:[%s2418_s7 + $0x2b0] sm:$0xff]  ;;  %v565_v13 = vld [vmem:[%s2418_s7 + $0x2c8] sm:$0xff] }
 0x1eb   :  { %1174 = vmatprep.subr.bf16.mxu1 %v1173_v53  ;;  %1294 = vmatprep.subr.bf16.mxu0 %v1293_v54  ;;  %v1313_v53 = vpack.c.bf16 %v531_v47, %v527_v46  ;;  %v526_v54 = vld [vmem:[%s2418_s7 + $0x190] sm:$0xff]  ;;  %v571_v46 = vld [vmem:[%s2418_s7 + $0x2f8] sm:$0xff]  ;;  %v1213_v51 = vpack.c.bf16 %v569_v14, %v565_v13  ;;  %v597_v34 = vld [vmem:[%s2418_s7 + $0x3c8] sm:$0xff] }
 0x1ec   :  { %v605_v14 = vld [vmem:[%s2418_s7 + $0x408] sm:$0xff] }
 0x1ee   :  { %1176 = vmatpush1.bf16.msra.mxu1 %v1175_v61  ;;  %1296 = vmatpush1.bf16.msra.mxu0 %v1295_v62  ;;  %v1315_v61 = vpack.c.bf16 %v530_v55, %v526_v54  ;;  %v532_v62 = vld [vmem:[%s2418_s7 + $0x1c0] sm:$0xff]  ;;  %v570_v54 = vld [vmem:[%s2418_s7 + $0x2f0] sm:$0xff]  ;;  %v573_v55 = vld [vmem:[%s2418_s7 + $0x308] sm:$0xff] }
 0x1ef   :  { %1178 = vmatprep.subr.bf16.mxu1 %v1177_v1  ;;  %1298 = vmatprep.subr.bf16.mxu0 %v1297_v2  ;;  %v1317_v1 = vpack.c.bf16 %v539_v59, %v535_v58  ;;  %v534_v2 = vld [vmem:[%s2418_s7 + $0x1d0] sm:$0xff]  ;;  %v1199_v9 = vpack.c.bf16 %v536_v63, %v532_v62  ;;  %v579_v58 = vld [vmem:[%s2418_s7 + $0x338] sm:$0xff]  ;;  %v576_v62 = vld [vmem:[%s2418_s7 + $0x320] sm:$0xff]  ;;  %v1217_v63 = vpack.c.bf16 %v577_v56, %v573_v55 }
 0x1f2   :  { %1180 = vmatpush1.bf16.msra.mxu1 %v1179_v10  ;;  %1300 = vmatpush1.bf16.msra.mxu0 %v1299_v12  ;;  %v1319_v10 = vpack.c.bf16 %v538_v3, %v534_v2  ;;  %v540_v12 = vld [vmem:[%s2418_s7 + $0x200] sm:$0xff]  ;;  %v578_v2 = vld [vmem:[%s2418_s7 + $0x330] sm:$0xff]  ;;  %v581_v3 = vld [vmem:[%s2418_s7 + $0x348] sm:$0xff] }
 0x1f3   :  { %1182 = vmatprep.subr.bf16.mxu1 %v1181_v17  ;;  %1302 = vmatprep.subr.bf16.mxu0 %v1301_v19  ;;  %v1321_v17 = vpack.c.bf16 %v547_v8, %v543_v6  ;;  %v542_v19 = vld [vmem:[%s2418_s7 + $0x210] sm:$0xff]  ;;  %v1203_v25 = vpack.c.bf16 %v544_v15, %v540_v12  ;;  %v587_v6 = vld [vmem:[%s2418_s7 + $0x378] sm:$0xff]  ;;  %v584_v12 = vld [vmem:[%s2418_s7 + $0x360] sm:$0xff]  ;;  %v1221_v15 = vpack.c.bf16 %v585_v4, %v581_v3 }
 0x1f4   :  { %v613_v3 = vld [vmem:[%s2418_s7 + $0x448] sm:$0xff] }
 0x1f6   :  { %1184 = vmatpush1.bf16.msra.mxu1 %v1183_v26  ;;  %1304 = vmatpush1.bf16.msra.mxu0 %v1303_v27  ;;  %v1323_v26 = vpack.c.bf16 %v546_v20, %v542_v19  ;;  %v548_v27 = vld [vmem:[%s2418_s7 + $0x240] sm:$0xff]  ;;  %v586_v19 = vld [vmem:[%s2418_s7 + $0x370] sm:$0xff]  ;;  %v589_v20 = vld [vmem:[%s2418_s7 + $0x388] sm:$0xff] }
 0x1f7   :  { %1186 = vmatprep.subr.bf16.mxu1 %v1185_v30  ;;  %1306 = vmatprep.subr.bf16.mxu0 %v1305_v31  ;;  %v1325_v30 = vpack.c.bf16 %v555_v24, %v551_v23  ;;  %v550_v31 = vld [vmem:[%s2418_s7 + $0x250] sm:$0xff]  ;;  %v1207_v37 = vpack.c.bf16 %v552_v28, %v548_v27  ;;  %v595_v23 = vld [vmem:[%s2418_s7 + $0x3b8] sm:$0xff]  ;;  %v1225_v27 = vpack.c.bf16 %v593_v21, %v589_v20  ;;  %v621_v21 = vld [vmem:[%s2418_s7 + $0x488] sm:$0xff] }
 0x1f8   :  { %v1345_v28 = vpack.c.bf16 %v595_v23, %v591_v22  ;;  %v618_v20 = vld [vmem:[%s2418_s7 + $0x470] sm:$0xff] }
 0x1fa   :  { %1188 = vmatpush1.bf16.msra.mxu1 %v1187_v38  ;;  %1308 = vmatpush1.bf16.msra.mxu0 %v1307_v39  ;;  %v1327_v38 = vpack.c.bf16 %v554_v32, %v550_v31  ;;  %v556_v39 = vld [vmem:[%s2418_s7 + $0x280] sm:$0xff]  ;;  %v594_v31 = vld [vmem:[%s2418_s7 + $0x3b0] sm:$0xff] }
 0x1fb   :  { %1190 = vmatprep.subr.bf16.mxu1 %v1189_v42  ;;  %1310 = vmatprep.subr.bf16.mxu0 %v1309_v43  ;;  %v1329_v42 = vpack.c.bf16 %v563_v36, %v559_v35  ;;  %v558_v43 = vld [vmem:[%s2418_s7 + $0x290] sm:$0xff]  ;;  %v1211_v47 = vpack.c.bf16 %v560_v40, %v556_v39  ;;  %v601_v35 = vld [vmem:[%s2418_s7 + $0x3e8] sm:$0xff]  ;;  %v599_v36 = vld [vmem:[%s2418_s7 + $0x3d8] sm:$0xff] }
 0x1fc   :  { %v596_v39 = vld [vmem:[%s2418_s7 + $0x3c0] sm:$0xff] }
 0x1fd   :  { %v600_v40 = vld [vmem:[%s2418_s7 + $0x3e0] sm:$0xff] }
 0x1fe   :  { %1192 = vmatpush1.bf16.msra.mxu1 %v1191_v48  ;;  %1312 = vmatpush1.bf16.msra.mxu0 %v1311_v49  ;;  %v1331_v48 = vpack.c.bf16 %v562_v44, %v558_v43  ;;  %v564_v49 = vld [vmem:[%s2418_s7 + $0x2c0] sm:$0xff]  ;;  %v598_v43 = vld [vmem:[%s2418_s7 + $0x3d0] sm:$0xff] }
 0x1ff   :  { %1194 = vmatprep.subr.bf16.mxu1 %v1193_v52  ;;  %1314 = vmatprep.subr.bf16.mxu0 %v1313_v53  ;;  %v1333_v52 = vpack.c.bf16 %v571_v46, %v567_v45  ;;  %v566_v53 = vld [vmem:[%s2418_s7 + $0x2d0] sm:$0xff]  ;;  %v1215_v59 = vpack.c.bf16 %v568_v50, %v564_v49  ;;  %v609_v45 = vld [vmem:[%s2418_s7 + $0x428] sm:$0xff]  ;;  %v607_v46 = vld [vmem:[%s2418_s7 + $0x418] sm:$0xff]  ;;  %v293_v50 = vsub.s32 0, %v1497_v11 }
 0x200   :  { %v602_v44 = vld [vmem:[%s2418_s7 + $0x3f0] sm:$0xff] }
 0x201   :  { %v1351_v13 = vpack.c.bf16 %v602_v44, %v598_v43  ;;  %v632_v43 = vld [vmem:[%s2418_s7 + $0x4e0] sm:$0xff] }
 0x202   :  { %1196 = vmatpush1.bf16.msra.mxu1 %v1195_v60  ;;  %1316 = vmatpush1.bf16.msra.mxu0 %v1315_v61  ;;  %v1335_v60 = vpack.c.bf16 %v570_v54, %v566_v53  ;;  %v572_v61 = vld [vmem:[%s2418_s7 + $0x300] sm:$0xff]  ;;  %v305_v53 = vsub.s32 3, %v1497_v11 }
 0x203   :  { %1198 = vmatprep.subr.bf16.mxu1 %v1197_v0  ;;  %1318 = vmatprep.subr.bf16.mxu0 %v1317_v1  ;;  %v1337_v0 = vpack.c.bf16 %v579_v58, %v575_v57  ;;  %v574_v1 = vld [vmem:[%s2418_s7 + $0x310] sm:$0xff]  ;;  %v1219_v8 = vpack.c.bf16 %v576_v62, %v572_v61 }
 0x206   :  { %1200 = vmatpush1.bf16.msra.mxu1 %v1199_v9  ;;  %1320 = vmatpush1.bf16.msra.mxu0 %v1319_v10  ;;  %v1339_v9 = vpack.c.bf16 %v578_v2, %v574_v1  ;;  %v580_v10 = vld [vmem:[%s2418_s7 + $0x340] sm:$0xff]  ;;  %v610_v1 = vld [vmem:[%s2418_s7 + $0x430] sm:$0xff] }
 0x207   :  { %1202 = vmatprep.subr.bf16.mxu1 %v1201_v16  ;;  %1322 = vmatprep.subr.bf16.mxu0 %v1321_v17  ;;  %v1341_v16 = vpack.c.bf16 %v587_v6, %v583_v5  ;;  %v582_v17 = vld [vmem:[%s2418_s7 + $0x350] sm:$0xff]  ;;  %v1223_v24 = vpack.c.bf16 %v584_v12, %v580_v10  ;;  %v617_v5 = vld [vmem:[%s2418_s7 + $0x468] sm:$0xff]  ;;  %v615_v6 = vld [vmem:[%s2418_s7 + $0x458] sm:$0xff] }
 0x208   :  { %v1237_v22 = vpack.c.bf16 %v617_v5, %v613_v3  ;;  %v644_v5 = vld [vmem:[%s2418_s7 + $0x540] sm:$0xff] }
 0x20a   :  { %1204 = vmatpush1.bf16.msra.mxu1 %v1203_v25  ;;  %1324 = vmatpush1.bf16.msra.mxu0 %v1323_v26  ;;  %v1343_v25 = vpack.c.bf16 %v586_v19, %v582_v17  ;;  %v588_v26 = vld [vmem:[%s2418_s7 + $0x380] sm:$0xff]  ;;  %v614_v19 = vld [vmem:[%s2418_s7 + $0x450] sm:$0xff] }
 0x20b   :  { %1206 = vmatprep.subr.bf16.mxu1 %v1205_v29  ;;  %1326 = vmatprep.subr.bf16.mxu0 %v1325_v30  ;;  %v592_v29 = vld [vmem:[%s2418_s7 + $0x3a0] sm:$0xff]  ;;  %v590_v30 = vld [vmem:[%s2418_s7 + $0x390] sm:$0xff] }
 0x20c   :  { %v1227_v32 = vpack.c.bf16 %v592_v29, %v588_v26  ;;  %v1347_v33 = vpack.c.bf16 %v594_v31, %v590_v30  ;;  %v627_v26 = vld [vmem:[%s2418_s7 + $0x4b8] sm:$0xff]  ;;  %v1359_v29 = vpack.c.bf16 %v618_v20, %v614_v19  ;;  %v620_v30 = vld [vmem:[%s2418_s7 + $0x480] sm:$0xff] }
 0x20d   :  { %v624_v31 = vld [vmem:[%s2418_s7 + $0x4a0] sm:$0xff]  ;;  %v659_v19 = vld [vmem:[%s2418_s7 + $0x5b8] sm:$0xff] }
 0x20e   :  { %1208 = vmatpush1.bf16.msra.mxu1 %v1207_v37  ;;  %1328 = vmatpush1.bf16.msra.mxu0 %v1327_v38  ;;  %v1229_v37 = vpack.c.bf16 %v601_v35, %v597_v34  ;;  %v603_v38 = vld [vmem:[%s2418_s7 + $0x3f8] sm:$0xff]  ;;  %v622_v34 = vld [vmem:[%s2418_s7 + $0x490] sm:$0xff] }
 0x20f   :  { %1210 = vmatprep.subr.bf16.mxu1 %v1209_v41  ;;  %1330 = vmatprep.subr.bf16.mxu0 %v1329_v42  ;;  %v1349_v41 = vpack.c.bf16 %v603_v38, %v599_v36  ;;  %v1231_v42 = vpack.c.bf16 %v600_v40, %v596_v39  ;;  %v626_v35 = vld [vmem:[%s2418_s7 + $0x4b0] sm:$0xff]  ;;  %v629_v36 = vld [vmem:[%s2418_s7 + $0x4c8] sm:$0xff]  ;;  %v631_v38 = vld [vmem:[%s2418_s7 + $0x4d8] sm:$0xff]  ;;  %v1243_v40 = vpack.c.bf16 %v624_v31, %v620_v30 }
 0x210   :  { %v635_v39 = vld [vmem:[%s2418_s7 + $0x4f8] sm:$0xff] }
 0x211   :  { %v663_v30 = vld [vmem:[%s2418_s7 + $0x5d8] sm:$0xff] }
 0x212   :  { %1212 = vmatpush1.bf16.msra.mxu1 %v1211_v47  ;;  %1332 = vmatpush1.bf16.msra.mxu0 %v1331_v48  ;;  %v1233_v47 = vpack.c.bf16 %v609_v45, %v605_v14  ;;  %v611_v48 = vld [vmem:[%s2418_s7 + $0x438] sm:$0xff]  ;;  %v630_v14 = vld [vmem:[%s2418_s7 + $0x4d0] sm:$0xff] }
 0x213   :  { %1214 = vmatprep.subr.bf16.mxu1 %v1213_v51  ;;  %1334 = vmatprep.subr.bf16.mxu0 %v1333_v52  ;;  %v1353_v49 = vpack.c.bf16 %v611_v48, %v607_v46  ;;  %v2049_v51 = vld [vmem:[%s2421_s6] sm:$0xf]  ;;  %v297_v52 = vsub.s32 1, %v1497_v11  ;;  %v634_v45 = vld [vmem:[%s2418_s7 + $0x4f0] sm:$0xff]  ;;  %v637_v46 = vld [vmem:[%s2418_s7 + $0x508] sm:$0xff] }
 0x214   :  { %v294_v54 = vrot.slane %v2049_v51, %v293_v50  ;;  %v306_v56 = vrot.slane %v2049_v51, %v305_v53  ;;  %v639_v48 = vld [vmem:[%s2418_s7 + $0x518] sm:$0xff] }
 0x215   :  { %v298_v55 = vrot.slane %v2049_v51, %v297_v52  ;;  %v667_v31 = vld [vmem:[%s2418_s7 + $0x5f8] sm:$0xff] }
 0x216   :  { %1216 = vmatpush1.bf16.msra.mxu1 %v1215_v59  ;;  %1336 = vmatpush1.bf16.msra.mxu0 %v1335_v60  ;;  %v604_v59 = vld [vmem:[%s2418_s7 + $0x400] sm:$0xff] }
 0x217   :  { %1218 = vmatprep.subr.bf16.mxu1 %v1217_v63  ;;  %1338 = vmatprep.subr.bf16.mxu0 %v1337_v0  ;;  %v608_v63 = vld [vmem:[%s2418_s7 + $0x420] sm:$0xff]  ;;  %v606_v0 = vld [vmem:[%s2418_s7 + $0x410] sm:$0xff] }
 0x218   :  { %v1235_v10 = vpack.c.bf16 %v608_v63, %v604_v59  ;;  %v1355_v12 = vpack.c.bf16 %v610_v1, %v606_v0  ;;  %v645_v63 = vld [vmem:[%s2418_s7 + $0x548] sm:$0xff]  ;;  %v647_v1 = vld [vmem:[%s2418_s7 + $0x558] sm:$0xff] }
 0x219   :  { %v649_v0 = vld [vmem:[%s2418_s7 + $0x568] sm:$0xff] }
 0x21a   :  { %1220 = vmatpush1.bf16.msra.mxu1 %v1219_v8  ;;  %1340 = vmatpush1.bf16.msra.mxu0 %v1339_v9  ;;  %v619_v8 = vld [vmem:[%s2418_s7 + $0x478] sm:$0xff] }
 0x21b   :  { %1222 = vmatprep.subr.bf16.mxu1 %v1221_v15  ;;  %1342 = vmatprep.subr.bf16.mxu0 %v1341_v16  ;;  %v612_v15 = vld [vmem:[%s2418_s7 + $0x440] sm:$0xff]  ;;  %v1357_v23 = vpack.c.bf16 %v619_v8, %v615_v6  ;;  %v1253_v8 = vpack.c.bf16 %v649_v0, %v645_v63 }
 0x21c   :  { %v616_v16 = vld [vmem:[%s2418_s7 + $0x460] sm:$0xff] }
 0x21d   :  { %v648_v6 = vld [vmem:[%s2418_s7 + $0x560] sm:$0xff] }
 0x21e   :  { %1224 = vmatpush1.bf16.msra.mxu1 %v1223_v24  ;;  %1344 = vmatpush1.bf16.msra.mxu0 %v1343_v25  ;;  %v625_v24 = vld [vmem:[%s2418_s7 + $0x4a8] sm:$0xff]  ;;  %v623_v25 = vld [vmem:[%s2418_s7 + $0x498] sm:$0xff]  ;;  %v1255_v20 = vpack.c.bf16 %v648_v6, %v644_v5 }
 0x21f   :  { %1226 = vmatprep.subr.bf16.mxu1 %v1225_v27  ;;  %1346 = vmatprep.subr.bf16.mxu0 %v1345_v28  ;;  %v1239_v28 = vpack.c.bf16 %v616_v16, %v612_v15  ;;  %v653_v15 = vld [vmem:[%s2418_s7 + $0x588] sm:$0xff]  ;;  %v687_v5 = vld [vmem:[%s2418_s7 + $0x698] sm:$0xff] }
 0x220   :  { %v657_v16 = vld [vmem:[%s2418_s7 + $0x5a8] sm:$0xff]  ;;  %v691_v6 = vld [vmem:[%s2418_s7 + $0x6b8] sm:$0xff] }
 0x222   :  { %1228 = vmatpush1.bf16.msra.mxu1 %v1227_v32  ;;  %1348 = vmatpush1.bf16.msra.mxu0 %v1347_v33  ;;  %v1241_v32 = vpack.c.bf16 %v625_v24, %v621_v21  ;;  %v1361_v33 = vpack.c.bf16 %v627_v26, %v623_v25  ;;  %v1257_v24 = vpack.c.bf16 %v657_v16, %v653_v15  ;;  %v654_v26 = vld [vmem:[%s2418_s7 + $0x590] sm:$0xff] }
 0x223   :  { %1230 = vmatprep.subr.bf16.mxu1 %v1229_v37  ;;  %1350 = vmatprep.subr.bf16.mxu0 %v1349_v41  ;;  %v633_v37 = vld [vmem:[%s2418_s7 + $0x4e8] sm:$0xff]  ;;  %v1363_v41 = vpack.c.bf16 %v626_v35, %v622_v34  ;;  %v660_v34 = vld [vmem:[%s2418_s7 + $0x5c0] sm:$0xff]  ;;  %v1393_v16 = vpack.c.bf16 %v691_v6, %v687_v5 }
 0x224   :  { %v1245_v44 = vpack.c.bf16 %v633_v37, %v629_v36  ;;  %v664_v35 = vld [vmem:[%s2418_s7 + $0x5e0] sm:$0xff]  ;;  %v1381_v37 = vpack.c.bf16 %v667_v31, %v663_v30  ;;  %v694_v30 = vld [vmem:[%s2418_s7 + $0x6d0] sm:$0xff] }
 0x225   :  { %v698_v31 = vld [vmem:[%s2418_s7 + $0x6f0] sm:$0xff] }
 0x226   :  { %1232 = vmatpush1.bf16.msra.mxu1 %v1231_v42  ;;  %1352 = vmatpush1.bf16.msra.mxu0 %v1351_v13  ;;  %v628_v42 = vld [vmem:[%s2418_s7 + $0x4c0] sm:$0xff]  ;;  %v1365_v13 = vpack.c.bf16 %v635_v39, %v631_v38  ;;  %v662_v38 = vld [vmem:[%s2418_s7 + $0x5d0] sm:$0xff] }
 0x227   :  { %1234 = vmatprep.subr.bf16.mxu1 %v1233_v47  ;;  %1354 = vmatprep.subr.bf16.mxu0 %v1353_v49  ;;  %v641_v47 = vld [vmem:[%s2418_s7 + $0x528] sm:$0xff]  ;;  %v643_v49 = vld [vmem:[%s2418_s7 + $0x538] sm:$0xff]  ;;  %v666_v39 = vld [vmem:[%s2418_s7 + $0x5f0] sm:$0xff] }
 0x228   :  { %v1249_v59 = vpack.c.bf16 %v641_v47, %v637_v46 }
 0x2bc   :  { %v396_v57 = vpop.f32.mrb[2].mxu1  ;;  %v2062_v58 = vpop.f32.mrb[2].mxu0 }
 0x2bd   :  { %v397_v60 = vadd.f32 %v396_v57, %v294_v54  ;;  %v398_v61 = vpop.f32.mrb[3].mxu1  ;;  %v469_v62 = vpop.f32.mrb[3].mxu0  ;;  %v1247_v54 = vpack.c.bf16 %v632_v43, %v628_v42  ;;  %v640_v57 = vld [vmem:[%s2418_s7 + $0x520] sm:$0xff]  ;;  %v671_v42 = vld [vmem:[%s2418_s7 + $0x618] sm:$0xff] }
 0x2be   :  { %v399_v2 = vadd.f32 %v398_v61, %v298_v55  ;;  %v470_v4 = vadd.f32 %v469_v62, %v306_v56  ;;  %v1367_v55 = vpack.c.bf16 %v634_v45, %v630_v14  ;;  %v636_v56 = vld [vmem:[%s2418_s7 + $0x500] sm:$0xff]  ;;  %v638_v61 = vld [vmem:[%s2418_s7 + $0x510] sm:$0xff]  ;;  %v675_v43 = vld [vmem:[%s2418_s7 + $0x638] sm:$0xff] }
 0x2bf   :  { %v472_v17 = vmax.f32 %v397_v60, 0.0  ;;  %v1369_v60 = vpack.c.bf16 %v643_v49, %v639_v48  ;;  %v642_v62 = vld [vmem:[%s2418_s7 + $0x530] sm:$0xff]  ;;  %v1251_v3 = vpack.c.bf16 %v640_v57, %v636_v56  ;;  %v668_v14 = vld [vmem:[%s2418_s7 + $0x600] sm:$0xff]  ;;  %v1385_v47 = vpack.c.bf16 %v675_v43, %v671_v42  ;;  %v679_v56 = vld [vmem:[%s2418_s7 + $0x658] sm:$0xff] }
 0x2c0   :  { %v473_v9 = vmax.f32 %v399_v2, 0.0  ;;  %v475_v27 = vmax.f32 %v470_v4, 0.0  ;;  %v651_v2 = vld [vmem:[%s2418_s7 + $0x578] sm:$0xff]  ;;  %v1371_v4 = vpack.c.bf16 %v642_v62, %v638_v61  ;;  %v672_v45 = vld [vmem:[%s2418_s7 + $0x620] sm:$0xff]  ;;  %v670_v48 = vld [vmem:[%s2418_s7 + $0x610] sm:$0xff] }
 0x2c1   :  { %v674_v49 = vld [vmem:[%s2418_s7 + $0x630] sm:$0xff]  ;;  %v683_v57 = vld [vmem:[%s2418_s7 + $0x678] sm:$0xff]  ;;  %v676_v61 = vld [vmem:[%s2418_s7 + $0x640] sm:$0xff] }
 0x2c2   :  { %806 = vmatprep.mubr.f32.mxu1 %v473_v9  ;;  %948 = vmatprep.mubr.f32.mxu0 %v473_v9  ;;  %v1373_v9 = vpack.c.bf16 %v651_v2, %v647_v1  ;;  %v680_v62 = vld [vmem:[%s2418_s7 + $0x660] sm:$0xff]  ;;  %v1389_v0 = vpack.c.bf16 %v683_v57, %v679_v56  ;;  %v678_v1 = vld [vmem:[%s2418_s7 + $0x650] sm:$0xff] }
 0x2c3   :  { %807 = vmatmul.mubr.f32.vlgmr.msra.gmra.mrb[4].mxu1 %v472_v17  ;;  %949 = vmatmul.mubr.f32.vlgmr.msra.gmra.mrb[4].mxu0 %v472_v17  ;;  %v655_v17 = vld [vmem:[%s2418_s7 + $0x598] sm:$0xff]  ;;  %v682_v2 = vld [vmem:[%s2418_s7 + $0x670] sm:$0xff]  ;;  %v712_v57 = vld [vmem:[%s2418_s7 + $0x760] sm:$0xff] }
 0x2c4   :  { %1236 = vmatpush1.bf16.msra.mxu1 %v1235_v10  ;;  %1356 = vmatpush1.bf16.msra.mxu0 %v1355_v12  ;;  %v646_v10 = vld [vmem:[%s2418_s7 + $0x550] sm:$0xff]  ;;  %v1377_v25 = vpack.c.bf16 %v659_v19, %v655_v17 }
 0x2c5   :  { %1088 = vmatprep.mubr.msk.f32.mxu1 %vm738_vm4, %v475_v27  ;;  %1089 = vmatprep.mubr.msk.f32.mxu0 %vm738_vm4, %v475_v27  ;;  %v650_v12 = vld [vmem:[%s2418_s7 + $0x570] sm:$0xff] }
 0x2c6   :  { %1238 = vmatprep.subr.bf16.mxu1 %v1237_v22  ;;  %1358 = vmatprep.subr.bf16.mxu0 %v1357_v23  ;;  %v1375_v21 = vpack.c.bf16 %v650_v12, %v646_v10  ;;  %v652_v22 = vld [vmem:[%s2418_s7 + $0x580] sm:$0xff]  ;;  %v658_v27 = vld [vmem:[%s2418_s7 + $0x5b0] sm:$0xff] }
 0x2c7   :  { %v656_v23 = vld [vmem:[%s2418_s7 + $0x5a0] sm:$0xff]  ;;  %v686_v17 = vld [vmem:[%s2418_s7 + $0x690] sm:$0xff] }
 0x2c8   :  { %1240 = vmatpush1.bf16.msra.mxu1 %v1239_v28  ;;  %1360 = vmatpush1.bf16.msra.mxu0 %v1359_v29  ;;  %v661_v28 = vld [vmem:[%s2418_s7 + $0x5c8] sm:$0xff]  ;;  %v684_v10 = vld [vmem:[%s2418_s7 + $0x680] sm:$0xff]  ;;  %v690_v19 = vld [vmem:[%s2418_s7 + $0x6b0] sm:$0xff] }
 0x2c9   :  { %1242 = vmatprep.subr.bf16.mxu1 %v1241_v32  ;;  %1362 = vmatprep.subr.bf16.mxu0 %v1361_v33  ;;  %v665_v29 = vld [vmem:[%s2418_s7 + $0x5e8] sm:$0xff]  ;;  %v1259_v32 = vpack.c.bf16 %v656_v23, %v652_v22  ;;  %v1379_v33 = vpack.c.bf16 %v658_v27, %v654_v26  ;;  %v688_v12 = vld [vmem:[%s2418_s7 + $0x6a0] sm:$0xff]  ;;  %v695_v22 = vld [vmem:[%s2418_s7 + $0x6d8] sm:$0xff] }
 0x2ca   :  { %v1261_v36 = vpack.c.bf16 %v665_v29, %v661_v28  ;;  %v699_v23 = vld [vmem:[%s2418_s7 + $0x6f8] sm:$0xff]  ;;  %v692_v26 = vld [vmem:[%s2418_s7 + $0x6c0] sm:$0xff]  ;;  %v702_v43 = vld [vmem:[%s2418_s7 + $0x710] sm:$0xff] }
 0x2cb   :  { %v696_v27 = vld [vmem:[%s2418_s7 + $0x6e0] sm:$0xff]  ;;  %v1397_v29 = vpack.c.bf16 %v699_v23, %v695_v22 }
 0x2cc   :  { %1244 = vmatpush1.bf16.msra.mxu1 %v1243_v40  ;;  %1364 = vmatpush1.bf16.msra.mxu0 %v1363_v41  ;;  %v669_v40 = vld [vmem:[%s2418_s7 + $0x608] sm:$0xff] }
 0x2cd   :  { %1246 = vmatprep.subr.bf16.mxu1 %v1245_v44  ;;  %1366 = vmatprep.subr.bf16.mxu0 %v1365_v13  ;;  %v673_v41 = vld [vmem:[%s2418_s7 + $0x628] sm:$0xff]  ;;  %v1263_v44 = vpack.c.bf16 %v664_v35, %v660_v34  ;;  %v1383_v13 = vpack.c.bf16 %v666_v39, %v662_v38  ;;  %v703_v34 = vld [vmem:[%s2418_s7 + $0x718] sm:$0xff]  ;;  %v700_v38 = vld [vmem:[%s2418_s7 + $0x700] sm:$0xff] }
 0x2ce   :  { %v1265_v46 = vpack.c.bf16 %v673_v41, %v669_v40  ;;  %v707_v35 = vld [vmem:[%s2418_s7 + $0x738] sm:$0xff]  ;;  %v704_v39 = vld [vmem:[%s2418_s7 + $0x720] sm:$0xff]  ;;  %v301_v40 = vsub.s32 2, %v1497_v11 }
 0x2cf   :  { %v1401_v42 = vpack.c.bf16 %v707_v35, %v703_v34 }
 0x2d0   :  { %1248 = vmatpush1.bf16.msra.mxu1 %v1247_v54  ;;  %1368 = vmatpush1.bf16.msra.mxu0 %v1367_v55  ;;  %v677_v54 = vld [vmem:[%s2418_s7 + $0x648] sm:$0xff] }
 0x2d1   :  { %1250 = vmatprep.subr.bf16.mxu1 %v1249_v59  ;;  %1370 = vmatprep.subr.bf16.mxu0 %v1369_v60  ;;  %v681_v55 = vld [vmem:[%s2418_s7 + $0x668] sm:$0xff]  ;;  %v1267_v59 = vpack.c.bf16 %v672_v45, %v668_v14  ;;  %v1387_v60 = vpack.c.bf16 %v674_v49, %v670_v48  ;;  %v711_v45 = vld [vmem:[%s2418_s7 + $0x758] sm:$0xff]  ;;  %v708_v49 = vld [vmem:[%s2418_s7 + $0x740] sm:$0xff] }
 0x2d2   :  { %v1269_v63 = vpack.c.bf16 %v681_v55, %v677_v54  ;;  %v713_v14 = vld [vmem:[%s2418_s7 + $0x768] sm:$0xff]  ;;  %v302_v54 = vrot.slane %v2049_v51, %v301_v40 }
 0x2d4   :  { %1252 = vmatpush1.bf16.msra.mxu1 %v1251_v3  ;;  %1372 = vmatpush1.bf16.msra.mxu0 %v1371_v4  ;;  %v685_v3 = vld [vmem:[%s2418_s7 + $0x688] sm:$0xff] }
 0x2d5   :  { %1254 = vmatprep.subr.bf16.mxu1 %v1253_v8  ;;  %1374 = vmatprep.subr.bf16.mxu0 %v1373_v9  ;;  %v689_v4 = vld [vmem:[%s2418_s7 + $0x6a8] sm:$0xff]  ;;  %v1271_v8 = vpack.c.bf16 %v680_v62, %v676_v61  ;;  %v1391_v9 = vpack.c.bf16 %v682_v2, %v678_v1  ;;  %v1287_v61 = vpack.c.bf16 %v712_v57, %v708_v49 }
 0x2d6   :  { %v1273_v15 = vpack.c.bf16 %v689_v4, %v685_v3  ;;  %v468_v62 = vadd.f32 %v2062_v58, %v302_v54 }
 0x2d8   :  { %1256 = vmatpush1.bf16.msra.mxu1 %v1255_v20  ;;  %1376 = vmatpush1.bf16.msra.mxu0 %v1375_v21  ;;  %v693_v20 = vld [vmem:[%s2418_s7 + $0x6c8] sm:$0xff] }
 0x2d9   :  { %1258 = vmatprep.subr.bf16.mxu1 %v1257_v24  ;;  %1378 = vmatprep.subr.bf16.mxu0 %v1377_v25  ;;  %v697_v21 = vld [vmem:[%s2418_s7 + $0x6e8] sm:$0xff]  ;;  %v1275_v24 = vpack.c.bf16 %v688_v12, %v684_v10  ;;  %v1395_v25 = vpack.c.bf16 %v690_v19, %v686_v17 }
 0x2da   :  { %v1277_v28 = vpack.c.bf16 %v697_v21, %v693_v20 }
 0x2dc   :  { %1260 = vmatpush1.bf16.msra.mxu1 %v1259_v32  ;;  %1380 = vmatpush1.bf16.msra.mxu0 %v1379_v33  ;;  %v701_v32 = vld [vmem:[%s2418_s7 + $0x708] sm:$0xff] }
 0x2dd   :  { %1262 = vmatprep.subr.bf16.mxu1 %v1261_v36  ;;  %1382 = vmatprep.subr.bf16.mxu0 %v1381_v37  ;;  %v705_v33 = vld [vmem:[%s2418_s7 + $0x728] sm:$0xff]  ;;  %v1279_v36 = vpack.c.bf16 %v696_v27, %v692_v26  ;;  %v1399_v37 = vpack.c.bf16 %v698_v31, %v694_v30 }
 0x2de   :  { %v1281_v41 = vpack.c.bf16 %v705_v33, %v701_v32 }
 0x2e0   :  { %1264 = vmatpush1.bf16.msra.mxu1 %v1263_v44  ;;  %1384 = vmatpush1.bf16.msra.mxu0 %v1383_v13  ;;  %v706_v44 = vld [vmem:[%s2418_s7 + $0x730] sm:$0xff]  ;;  %v709_v13 = vld [vmem:[%s2418_s7 + $0x748] sm:$0xff] }
 0x2e1   :  { %1266 = vmatprep.subr.bf16.mxu1 %v1265_v46  ;;  %1386 = vmatprep.subr.bf16.mxu0 %v1385_v47  ;;  %v715_v46 = vld [vmem:[%s2418_s7 + $0x778] sm:$0xff]  ;;  %v1283_v47 = vpack.c.bf16 %v704_v39, %v700_v38  ;;  %v1403_v48 = vpack.c.bf16 %v706_v44, %v702_v43  ;;  %v1285_v55 = vpack.c.bf16 %v713_v14, %v709_v13 }
 0x2e2   :  { %v1405_v56 = vpack.c.bf16 %v715_v46, %v711_v45 }
 0x2e4   :  { %1268 = vmatpush1.bf16.msra.mxu1 %v1267_v59  ;;  %1388 = vmatpush1.bf16.msra.mxu0 %v1387_v60  ;;  %v710_v59 = vld [vmem:[%s2418_s7 + $0x750] sm:$0xff] }
 0x2e5   :  { %1270 = vmatprep.subr.bf16.mxu1 %v1269_v63  ;;  %1390 = vmatprep.subr.bf16.mxu0 %v1389_v0  ;;  %v714_v60 = vld [vmem:[%s2418_s7 + $0x770] sm:$0xff]  ;;  %v474_v63 = vmax.f32 %v468_v62, 0.0  ;;  %v716_v0 = vld [vmem:[%s2422_s8] sm:$0xf] }
 0x2e6   :  { %v1407_v51 = vpack.c.bf16 %v714_v60, %v710_v59  ;;  %v721_v1 = vrot.slane %v716_v0, %v293_v50  ;;  %v729_v2 = vrot.slane %v716_v0, %v301_v40  ;;  %v725_v3 = vrot.slane %v716_v0, %v297_v52 }
 0x2e7   :  { %v733_v58 = vrot.slane %v716_v0, %v305_v53 }
 0x2e8   :  { %1272 = vmatpush1.bf16.msra.mxu1 %v1271_v8  ;;  %1392 = vmatpush1.bf16.msra.mxu0 %v1391_v9 }
 0x2e9   :  { %1274 = vmatprep.subr.bf16.mxu1 %v1273_v15  ;;  %1394 = vmatprep.subr.bf16.mxu0 %v1393_v16 }
 0x2ec   :  { %1276 = vmatpush1.bf16.msra.mxu1 %v1275_v24  ;;  %1396 = vmatpush1.bf16.msra.mxu0 %v1395_v25 }
 0x2ed   :  { %1278 = vmatprep.subr.bf16.mxu1 %v1277_v28  ;;  %1398 = vmatprep.subr.bf16.mxu0 %v1397_v29 }
 0x2f0   :  { %1280 = vmatpush1.bf16.msra.mxu1 %v1279_v36  ;;  %1400 = vmatpush1.bf16.msra.mxu0 %v1399_v37 }
 0x2f1   :  { %1282 = vmatprep.subr.bf16.mxu1 %v1281_v41  ;;  %1402 = vmatprep.subr.bf16.mxu0 %v1401_v42 }
 0x2f4   :  { %1284 = vmatpush1.bf16.msra.mxu1 %v1283_v47  ;;  %1404 = vmatpush1.bf16.msra.mxu0 %v1403_v48 }
 0x2f5   :  { %1286 = vmatprep.subr.bf16.mxu1 %v1285_v55  ;;  %1406 = vmatprep.subr.bf16.mxu0 %v1405_v56 }
 0x2f8   :  { %1288 = vmatpush1.bf16.msra.mxu1 %v1287_v61  ;;  %1408 = vmatpush1.bf16.msra.mxu0 %v1407_v51 }
 0x2fb   :  { %878 = vmatmul.mubr.f32.vlgmr.msra.gmra.mrb[4].mxu1 %v474_v63  ;;  %1020 = vmatmul.mubr.f32.vlgmr.msra.gmra.mrb[4].mxu0 %v474_v63 }
 0x3ce   :  { %v879_v4 = vpop.f32.mrb[4].mxu1  ;;  %v1021_v5 = vpop.f32.mrb[4].mxu0 }
 0x3cf   :  { %v1409_v6 = vadd.f32 %v879_v4, %v721_v1  ;;  %v1411_v8 = vadd.f32 %v1021_v5, %v729_v2  ;;  %v881_v9 = vpop.f32.mrb[5].mxu1  ;;  %v1023_v10 = vpop.f32.mrb[5].mxu0 }
 0x3d0   :  { %v1410_v12 = vadd.f32 %v881_v9, %v725_v3  ;;  %v1412_v15 = vadd.f32 %v1023_v10, %v733_v58 }
 0x3d2   :  { %v1033_v16 = vcombine.low %v1409_v6, %v1410_v12  ;;  %v1034_v17 = vcombine.low %v1411_v8, %v1412_v15 }
 0x3d4   :  { %v1041_v19 = vrot.slane %v1033_v16, %v1518_v18  ;;  %v1048_v50 = vrot.slane %v1034_v17, %v1518_v18 }
 0x3d6   :  { %v1049_v20 = vcombine.low %v1041_v19, %v1048_v50  ;;  %v1050_v21 = vcombine.high %v1041_v19, %v1048_v50 }
 0x3d8   :  { %v1057_v11 = vrot.slane %v1049_v20, %v1518_v18  ;;  %v1064_v52 = vrot.slane %v1050_v21, %v1518_v18 }
 0x3da   :  { %1071 = vst.msk [vmem:[%s2423_s10] sm:$0xf] %vm1069_vm5, %v1057_v11  ;;  %1072 = vst.msk [vmem:[%s2423_s10 + $0x4] sm:$0xf] %vm1069_vm5, %v1064_v52 }

// kernel: polarization_forward.9
= control target key start
LH: loop header
LB: loop body
LE: loop exit
PB: predicated region body
PF: predicated region fallthrough
CT: control target
= control target key end

     0   :  { %s6185_s0 = inlined_call_operand.vmem [shape: bf16[1024,128], index: 0, kind: input, shape index: {}]   ;;  %s6186_s1 = inlined_call_operand.vmem [shape: bf16[1024,480], index: 1, kind: input, shape index: {}]   ;;  %s6187_s2 = inlined_call_operand.vmem [shape: f32[2,64,1], index: 2, kind: input, shape index: {}]   ;;  %s6188_s3 = inlined_call_operand.vmem [shape: f32[2,1,480], index: 3, kind: input, shape index: {}]   ;;  %s6189_s4 = inlined_call_operand.vmem [shape: f32[1,480], index: 4, kind: input, shape index: {}]   ;;  %s6190_s5 = inlined_call_operand.hbm [shape: f32[2,64,480], index: 5, kind: output, shape index: {}]  }
   0x1   :  { %v4383_v0 = vld [vmem:[%s6185_s0 + $0x40] sm:$0xff]   ;;  %v4385_v2 = vld [vmem:[%s6185_s0 + $0x48] sm:$0xff]   ;;  %v4387_v4 = vld [vmem:[%s6185_s0 + $0x50] sm:$0xff]  }
   0x2   :  { %v4384_v1 = vld [vmem:[%s6185_s0] sm:$0xff]   ;;  %938 = vxpose.xlu0.c.b16.start [1/8] %v4383_v0, 128  ;;  %v4386_v3 = vld [vmem:[%s6185_s0 + $0x8] sm:$0xff]   ;;  %v4388_v5 = vld [vmem:[%s6185_s0 + $0x10] sm:$0xff]  }
   0x3   :  { %922 = vxpose.xlu1.c.b16.start [1/8] %v4384_v1, 128  ;;  %v4389_v6 = vld [vmem:[%s6185_s0 + $0x58] sm:$0xff]   ;;  %v4391_v8 = vld [vmem:[%s6185_s0 + $0x60] sm:$0xff]   ;;  %v4393_v10 = vld [vmem:[%s6185_s0 + $0x68] sm:$0xff]  }
   0x4   :  { %v4390_v7 = vld [vmem:[%s6185_s0 + $0x18] sm:$0xff]   ;;  %v4392_v9 = vld [vmem:[%s6185_s0 + $0x20] sm:$0xff]   ;;  %v4394_v12 = vld [vmem:[%s6185_s0 + $0x28] sm:$0xff]  }
   0x5   :  { %v4399_v11 = vld [vmem:[%s6186_s1 + $0x4] ss:$16 sps:$4 sm:$0xff]   ;;  %v4401_v13 = vld [vmem:[%s6186_s1 + $0xc] ss:$16 sps:$4 sm:$0xff]   ;;  %v4403_v14 = vld [vmem:[%s6186_s1] ss:$16 sps:$4 sm:$0xff]  }
   0x6   :  { %939 = vxpose.xlu0.c.b16.cont [2/8] %v4385_v2, 128  ;;  %2330 = vmatprep.subr.bf16.mxu0 %v4399_v11  ;;  %v4404_v15 = vld [vmem:[%s6186_s1 + $0x8] ss:$16 sps:$4 sm:$0xff]   ;;  %v4405_v16 = vld [vmem:[%s6186_s1 + $0x24] ss:$16 sps:$4 sm:$0xff]   ;;  %v4407_v18 = vld [vmem:[%s6186_s1 + $0x2c] ss:$16 sps:$4 sm:$0xff]  }
   0x7   :  { %923 = vxpose.xlu1.c.b16.cont [2/8] %v4386_v3, 128  ;;  %2782 = vmatprep.subr.bf16.mxu1 %v4401_v13  ;;  %v4395_v17 = vld [vmem:[%s6185_s0 + $0x70] sm:$0xff]   ;;  %v4410_v21 = vld [vmem:[%s6186_s1 + $0x28] ss:$16 sps:$4 sm:$0xff]   ;;  %v4413_v23 = vld [vmem:[%s6186_s1 + $0x4c] ss:$16 sps:$4 sm:$0xff]  }
   0x8   :  { %2331 = vmatpush1.bf16.msra.mxu0 %v4403_v14  ;;  %2783 = vmatpush1.bf16.msra.mxu1 %v4404_v15  ;;  %v4409_v19 = vld [vmem:[%s6186_s1 + $0x20] ss:$16 sps:$4 sm:$0xff]   ;;  %v4411_v22 = vld [vmem:[%s6186_s1 + $0x44] ss:$16 sps:$4 sm:$0xff]   ;;  %v4416_v25 = vld [vmem:[%s6186_s1 + $0x48] ss:$16 sps:$4 sm:$0xff]  }
   0x9   :  { %v4396_v20 = vld [vmem:[%s6185_s0 + $0x30] sm:$0xff]   ;;  %2332 = vmatprep.subr.bf16.mxu0 %v4405_v16  ;;  %2784 = vmatprep.subr.bf16.mxu1 %v4407_v18  ;;  %v4419_v27 = vld [vmem:[%s6186_s1 + $0x6c] ss:$16 sps:$4 sm:$0xff]   ;;  %v4422_v31 = vld [vmem:[%s6186_s1 + $0x68] ss:$16 sps:$4 sm:$0xff]  }
   0xa   :  { %940 = vxpose.xlu0.c.b16.cont [3/8] %v4387_v4, 128  ;;  %v4415_v24 = vld [vmem:[%s6186_s1 + $0x40] ss:$16 sps:$4 sm:$0xff]   ;;  %v4417_v26 = vld [vmem:[%s6186_s1 + $0x64] ss:$16 sps:$4 sm:$0xff]   ;;  %v4397_v28 = vld [vmem:[%s6185_s0 + $0x78] sm:$0xff]  }
   0xb   :  { %924 = vxpose.xlu1.c.b16.cont [3/8] %v4388_v5, 128  ;;  %v4398_v29 = vld [vmem:[%s6185_s0 + $0x38] sm:$0xff]   ;;  %v4421_v30 = vld [vmem:[%s6186_s1 + $0x60] ss:$16 sps:$4 sm:$0xff]   ;;  %v4423_v32 = vld [vmem:[%s6186_s1 + $0x84] ss:$16 sps:$4 sm:$0xff]  }
   0xc   :  { %2333 = vmatpush1.bf16.msra.mxu0 %v4409_v19  ;;  %2785 = vmatpush1.bf16.msra.mxu1 %v4410_v21  ;;  %v4425_v33 = vld [vmem:[%s6186_s1 + $0x8c] ss:$16 sps:$4 sm:$0xff]   ;;  %v4427_v34 = vld [vmem:[%s6186_s1 + $0x80] ss:$16 sps:$4 sm:$0xff]   ;;  %v4428_v35 = vld [vmem:[%s6186_s1 + $0x88] ss:$16 sps:$4 sm:$0xff]  }
   0xd   :  { %2334 = vmatprep.subr.bf16.mxu0 %v4411_v22  ;;  %2786 = vmatprep.subr.bf16.mxu1 %v4413_v23  ;;  %v4429_v36 = vld [vmem:[%s6186_s1 + $0xa4] ss:$16 sps:$4 sm:$0xff]   ;;  %v4431_v37 = vld [vmem:[%s6186_s1 + $0xac] ss:$16 sps:$4 sm:$0xff]   ;;  %v4433_v38 = vld [vmem:[%s6186_s1 + $0xa0] ss:$16 sps:$4 sm:$0xff]  }
   0xe   :  { %941 = vxpose.xlu0.c.b16.cont [4/8] %v4389_v6, 128  ;;  %v4434_v39 = vld [vmem:[%s6186_s1 + $0xa8] ss:$16 sps:$4 sm:$0xff]   ;;  %v4435_v40 = vld [vmem:[%s6186_s1 + $0xc4] ss:$16 sps:$4 sm:$0xff]   ;;  %v4437_v43 = vld [vmem:[%s6186_s1 + $0xcc] ss:$16 sps:$4 sm:$0xff]  }
   0xf   :  { %925 = vxpose.xlu1.c.b16.cont [4/8] %v4390_v7, 128  ;;  %v4441_v41 = vld [vmem:[%s6185_s0 + $0xc0] sm:$0xff]   ;;  %v4440_v45 = vld [vmem:[%s6186_s1 + $0xc8] ss:$16 sps:$4 sm:$0xff]   ;;  %v4445_v47 = vld [vmem:[%s6186_s1 + $0xec] ss:$16 sps:$4 sm:$0xff]  }
  0x10   :  { %2335 = vmatpush1.bf16.msra.mxu0 %v4415_v24  ;;  %2787 = vmatpush1.bf16.msra.mxu1 %v4416_v25  ;;  %v4442_v42 = vld [vmem:[%s6185_s0 + $0x80] sm:$0xff]   ;;  %v4449_v48 = vld [vmem:[%s6185_s0 + $0xc8] sm:$0xff]   ;;  %v4457_v54 = vld [vmem:[%s6185_s0 + $0xd0] sm:$0xff]  }
  0x11   :  { %2336 = vmatprep.subr.bf16.mxu0 %v4417_v26  ;;  %2788 = vmatprep.subr.bf16.mxu1 %v4419_v27  ;;  %v4439_v44 = vld [vmem:[%s6186_s1 + $0xc0] ss:$16 sps:$4 sm:$0xff]   ;;  %v4443_v46 = vld [vmem:[%s6186_s1 + $0xe4] ss:$16 sps:$4 sm:$0xff]   ;;  %v4450_v49 = vld [vmem:[%s6185_s0 + $0x88] sm:$0xff]  }
  0x12   :  { %942 = vxpose.xlu0.c.b16.cont [5/8] %v4391_v8, 128  ;;  %v4447_v50 = vld [vmem:[%s6186_s1 + $0xe0] ss:$16 sps:$4 sm:$0xff]   ;;  %v4448_v51 = vld [vmem:[%s6186_s1 + $0xe8] ss:$16 sps:$4 sm:$0xff]   ;;  %v4451_v52 = vld [vmem:[%s6186_s1 + $0x104] ss:$16 sps:$4 sm:$0xff]  }
  0x13   :  { %926 = vxpose.xlu1.c.b16.cont [5/8] %v4392_v9, 128  ;;  %v4453_v53 = vld [vmem:[%s6186_s1 + $0x10c] ss:$16 sps:$4 sm:$0xff]   ;;  %v4458_v55 = vld [vmem:[%s6185_s0 + $0x90] sm:$0xff]   ;;  %v4456_v57 = vld [vmem:[%s6186_s1 + $0x108] ss:$16 sps:$4 sm:$0xff]  }
  0x14   :  { %2337 = vmatpush1.bf16.msra.mxu0 %v4421_v30  ;;  %2789 = vmatpush1.bf16.msra.mxu1 %v4422_v31  ;;  %v4455_v56 = vld [vmem:[%s6186_s1 + $0x100] ss:$16 sps:$4 sm:$0xff]   ;;  %v4459_v58 = vld [vmem:[%s6186_s1 + $0x124] ss:$16 sps:$4 sm:$0xff]   ;;  %v4461_v59 = vld [vmem:[%s6186_s1 + $0x12c] ss:$16 sps:$4 sm:$0xff]  }
  0x15   :  { %2338 = vmatprep.subr.bf16.mxu0 %v4423_v32  ;;  %2790 = vmatprep.subr.bf16.mxu1 %v4425_v33  ;;  %v4465_v60 = vld [vmem:[%s6185_s0 + $0xd8] sm:$0xff]   ;;  %v4463_v62 = vld [vmem:[%s6186_s1 + $0x120] ss:$16 sps:$4 sm:$0xff]   ;;  %v4467_v0 = vld [vmem:[%s6186_s1 + $0x144] ss:$16 sps:$4 sm:$0xff]  }
  0x16   :  { %943 = vxpose.xlu0.c.b16.cont [6/8] %v4393_v10, 128  ;;  %v4466_v61 = vld [vmem:[%s6185_s0 + $0x98] sm:$0xff]   ;;  %v4471_v2 = vld [vmem:[%s6186_s1 + $0x140] ss:$16 sps:$4 sm:$0xff]   ;;  %v4475_v6 = vld [vmem:[%s6186_s1 + $0x164] ss:$16 sps:$4 sm:$0xff]  }
  0x17   :  { %927 = vxpose.xlu1.c.b16.cont [6/8] %v4394_v12, 128  ;;  %v4464_v63 = vld [vmem:[%s6186_s1 + $0x128] ss:$16 sps:$4 sm:$0xff]   ;;  %v4469_v1 = vld [vmem:[%s6186_s1 + $0x14c] ss:$16 sps:$4 sm:$0xff]   ;;  %v4473_v3 = vld [vmem:[%s6185_s0 + $0xe0] sm:$0xff]  }
  0x18   :  { %2339 = vmatpush1.bf16.msra.mxu0 %v4427_v34  ;;  %2791 = vmatpush1.bf16.msra.mxu1 %v4428_v35  ;;  %v4474_v4 = vld [vmem:[%s6185_s0 + $0xa0] sm:$0xff]   ;;  %v4472_v5 = vld [vmem:[%s6186_s1 + $0x148] ss:$16 sps:$4 sm:$0xff]   ;;  %v4477_v7 = vld [vmem:[%s6186_s1 + $0x16c] ss:$16 sps:$4 sm:$0xff]  }
  0x19   :  { %2340 = vmatprep.subr.bf16.mxu0 %v4429_v36  ;;  %2792 = vmatprep.subr.bf16.mxu1 %v4431_v37  ;;  %v4479_v8 = vld [vmem:[%s6186_s1 + $0x160] ss:$16 sps:$4 sm:$0xff]   ;;  %v4480_v9 = vld [vmem:[%s6186_s1 + $0x168] ss:$16 sps:$4 sm:$0xff]   ;;  %v4483_v12 = vld [vmem:[%s6186_s1 + $0x184] ss:$16 sps:$4 sm:$0xff]  }
  0x1a   :  { %944 = vxpose.xlu0.c.b16.cont [7/8] %v4395_v17, 128  ;;  %v4481_v10 = vld [vmem:[%s6185_s0 + $0xe8] sm:$0xff]   ;;  %v4487_v14 = vld [vmem:[%s6186_s1 + $0x180] ss:$16 sps:$4 sm:$0xff]   ;;  %v4491_v18 = vld [vmem:[%s6186_s1 + $0x1a4] ss:$16 sps:$4 sm:$0xff]  }
  0x1b   :  { %928 = vxpose.xlu1.c.b16.cont [7/8] %v4396_v20, 128  ;;  %v4482_v11 = vld [vmem:[%s6185_s0 + $0xa8] sm:$0xff]   ;;  %v4489_v16 = vld [vmem:[%s6185_s0 + $0xf0] sm:$0xff]   ;;  %v4497_v22 = vld [vmem:[%s6185_s0 + $0xf8] sm:$0xff]  }
  0x1c   :  { %2341 = vmatpush1.bf16.msra.mxu0 %v4433_v38  ;;  %2793 = vmatpush1.bf16.msra.mxu1 %v4434_v39  ;;  %v4485_v13 = vld [vmem:[%s6186_s1 + $0x18c] ss:$16 sps:$4 sm:$0xff]   ;;  %v4488_v15 = vld [vmem:[%s6186_s1 + $0x188] ss:$16 sps:$4 sm:$0xff]   ;;  %v4490_v17 = vld [vmem:[%s6185_s0 + $0xb0] sm:$0xff]  }
  0x1d   :  { %2342 = vmatprep.subr.bf16.mxu0 %v4435_v40  ;;  %2794 = vmatprep.subr.bf16.mxu1 %v4437_v43  ;;  %v4493_v19 = vld [vmem:[%s6186_s1 + $0x1ac] ss:$16 sps:$4 sm:$0xff]   ;;  %v4495_v20 = vld [vmem:[%s6186_s1 + $0x1a0] ss:$16 sps:$4 sm:$0xff]   ;;  %v4496_v21 = vld [vmem:[%s6186_s1 + $0x1a8] ss:$16 sps:$4 sm:$0xff]  }
  0x1e   :  { %945 = vxpose.xlu0.c.b16.end [8/8] %v4397_v28, 128  ;;  %v4498_v23 = vld [vmem:[%s6185_s0 + $0xb8] sm:$0xff]   ;;  %v4499_v24 = vld [vmem:[%s6186_s1 + $0x1c4] ss:$16 sps:$4 sm:$0xff]   ;;  %v4503_v26 = vld [vmem:[%s6186_s1 + $0x1c0] ss:$16 sps:$4 sm:$0xff]  }
  0x1f   :  { %929 = vxpose.xlu1.c.b16.end [8/8] %v4398_v29, 128  ;;  %v4501_v25 = vld [vmem:[%s6186_s1 + $0x1cc] ss:$16 sps:$4 sm:$0xff]   ;;  %v4504_v27 = vld [vmem:[%s6186_s1 + $0x1c8] ss:$16 sps:$4 sm:$0xff]   ;;  %v4505_v28 = vld [vmem:[%s6186_s1 + $0x1e4] ss:$16 sps:$4 sm:$0xff]  }
  0x20   :  { %2343 = vmatpush1.bf16.msra.mxu0 %v4439_v44  ;;  %2795 = vmatpush1.bf16.msra.mxu1 %v4440_v45  ;;  %v4507_v29 = vld [vmem:[%s6186_s1 + $0x1ec] ss:$16 sps:$4 sm:$0xff]   ;;  %v4509_v30 = vld [vmem:[%s6186_s1 + $0x1e0] ss:$16 sps:$4 sm:$0xff]   ;;  %v4510_v31 = vld [vmem:[%s6186_s1 + $0x1e8] ss:$16 sps:$4 sm:$0xff]  }
  0x21   :  { %2344 = vmatprep.subr.bf16.mxu0 %v4443_v46  ;;  %2796 = vmatprep.subr.bf16.mxu1 %v4445_v47  ;;  %v4513_v32 = vld [vmem:[%s6186_s1 + $0x204] ss:$16 sps:$4 sm:$0xff]   ;;  %v4516_v33 = vld [vmem:[%s6186_s1 + $0x20c] ss:$16 sps:$4 sm:$0xff]   ;;  %v4511_v38 = vld [vmem:[%s6186_s1 + $0x200] ss:$16 sps:$4 sm:$0xff]  }
  0x22   :  { %970 = vxpose.xlu0.c.b16.start [1/8] %v4441_v41, 128  ;;  %v4553_v34 = vld [vmem:[%s6185_s0 + $0x140] sm:$0xff]   ;;  %v4561_v36 = vld [vmem:[%s6185_s0 + $0x148] sm:$0xff]   ;;  %v4569_v46 = vld [vmem:[%s6185_s0 + $0x150] sm:$0xff]  }
  0x23   :  { %954 = vxpose.xlu1.c.b16.start [1/8] %v4442_v42, 128  ;;  %v4554_v35 = vld [vmem:[%s6185_s0 + $0x100] sm:$0xff]   ;;  %v4562_v37 = vld [vmem:[%s6185_s0 + $0x108] sm:$0xff]   ;;  %v4570_v47 = vld [vmem:[%s6185_s0 + $0x110] sm:$0xff]  }
  0x24   :  { %2345 = vmatpush1.bf16.msra.mxu0 %v4447_v50  ;;  %2797 = vmatpush1.bf16.msra.mxu1 %v4448_v51  ;;  %v4514_v39 = vld [vmem:[%s6186_s1 + $0x208] ss:$16 sps:$4 sm:$0xff]   ;;  %v4519_v40 = vld [vmem:[%s6186_s1 + $0x224] ss:$16 sps:$4 sm:$0xff]   ;;  %v4522_v42 = vld [vmem:[%s6186_s1 + $0x22c] ss:$16 sps:$4 sm:$0xff]  }
  0x25   :  { %2346 = vmatprep.subr.bf16.mxu0 %v4451_v52  ;;  %2798 = vmatprep.subr.bf16.mxu1 %v4453_v53  ;;  %v4517_v44 = vld [vmem:[%s6186_s1 + $0x220] ss:$16 sps:$4 sm:$0xff]   ;;  %v4520_v45 = vld [vmem:[%s6186_s1 + $0x228] ss:$16 sps:$4 sm:$0xff]   ;;  %v4528_v50 = vld [vmem:[%s6186_s1 + $0x24c] ss:$16 sps:$4 sm:$0xff]  }
  0x26   :  { %971 = vxpose.xlu0.c.b16.cont [2/8] %v4449_v48, 128  ;;  %v4525_v48 = vld [vmem:[%s6186_s1 + $0x244] ss:$16 sps:$4 sm:$0xff]   ;;  %v4523_v51 = vld [vmem:[%s6186_s1 + $0x240] ss:$16 sps:$4 sm:$0xff]   ;;  %v4526_v52 = vld [vmem:[%s6186_s1 + $0x248] ss:$16 sps:$4 sm:$0xff]  }
  0x27   :  { %955 = vxpose.xlu1.c.b16.cont [2/8] %v4450_v49, 128 }
  0x28   :  { %2347 = vmatpush1.bf16.msra.mxu0 %v4455_v56  ;;  %2799 = vmatpush1.bf16.msra.mxu1 %v4456_v57  ;;  %v4529_v56 = vld [vmem:[%s6186_s1 + $0x260] ss:$16 sps:$4 sm:$0xff]   ;;  %v4577_v57 = vld [vmem:[%s6185_s0 + $0x158] sm:$0xff]  }
  0x29   :  { %2348 = vmatprep.subr.bf16.mxu0 %v4459_v58  ;;  %2800 = vmatprep.subr.bf16.mxu1 %v4461_v59  ;;  %v4578_v59 = vld [vmem:[%s6185_s0 + $0x118] sm:$0xff]  }
  0x2a   :  { %972 = vxpose.xlu0.c.b16.cont [3/8] %v4457_v54, 128  ;;  %v4531_v54 = vld [vmem:[%s6186_s1 + $0x264] ss:$16 sps:$4 sm:$0xff]  }
  0x2b   :  { %956 = vxpose.xlu1.c.b16.cont [3/8] %v4458_v55, 128  ;;  %v4534_v55 = vld [vmem:[%s6186_s1 + $0x26c] ss:$16 sps:$4 sm:$0xff]  }
  0x2c   :  { %2349 = vmatpush1.bf16.msra.mxu0 %v4463_v62  ;;  %2801 = vmatpush1.bf16.msra.mxu1 %v4464_v63  ;;  %v4540_v62 = vld [vmem:[%s6186_s1 + $0x28c] ss:$16 sps:$4 sm:$0xff]   ;;  %v4535_v63 = vld [vmem:[%s6186_s1 + $0x280] ss:$16 sps:$4 sm:$0xff]  }
  0x2d   :  { %2350 = vmatprep.subr.bf16.mxu0 %v4467_v0  ;;  %2802 = vmatprep.subr.bf16.mxu1 %v4469_v1  ;;  %v4538_v0 = vld [vmem:[%s6186_s1 + $0x288] ss:$16 sps:$4 sm:$0xff]  }
  0x2e   :  { %973 = vxpose.xlu0.c.b16.cont [4/8] %v4465_v60, 128  ;;  %v4532_v60 = vld [vmem:[%s6186_s1 + $0x268] ss:$16 sps:$4 sm:$0xff]  }
  0x2f   :  { %957 = vxpose.xlu1.c.b16.cont [4/8] %v4466_v61, 128  ;;  %v4537_v61 = vld [vmem:[%s6186_s1 + $0x284] ss:$16 sps:$4 sm:$0xff]  }
  0x30   :  { %2351 = vmatpush1.bf16.msra.mxu0 %v4471_v2  ;;  %2803 = vmatpush1.bf16.msra.mxu1 %v4472_v5  ;;  %v4543_v2 = vld [vmem:[%s6186_s1 + $0x2a4] ss:$16 sps:$4 sm:$0xff]  }
  0x31   :  { %2352 = vmatprep.subr.bf16.mxu0 %v4475_v6  ;;  %2804 = vmatprep.subr.bf16.mxu1 %v4477_v7  ;;  %v4585_v5 = vld [vmem:[%s6185_s0 + $0x160] sm:$0xff]  }
  0x32   :  { %974 = vxpose.xlu0.c.b16.cont [5/8] %v4473_v3, 128  ;;  %v4546_v3 = vld [vmem:[%s6186_s1 + $0x2ac] ss:$16 sps:$4 sm:$0xff]   ;;  %v4586_v7 = vld [vmem:[%s6185_s0 + $0x120] sm:$0xff]  }
  0x33   :  { %958 = vxpose.xlu1.c.b16.cont [5/8] %v4474_v4, 128  ;;  %v4541_v4 = vld [vmem:[%s6186_s1 + $0x2a0] ss:$16 sps:$4 sm:$0xff]  }
  0x34   :  { %2353 = vmatpush1.bf16.msra.mxu0 %v4479_v8  ;;  %2805 = vmatpush1.bf16.msra.mxu1 %v4480_v9  ;;  %v4544_v8 = vld [vmem:[%s6186_s1 + $0x2a8] ss:$16 sps:$4 sm:$0xff]   ;;  %v4549_v9 = vld [vmem:[%s6186_s1 + $0x2c4] ss:$16 sps:$4 sm:$0xff]  }
  0x35   :  { %2354 = vmatprep.subr.bf16.mxu0 %v4483_v12  ;;  %2806 = vmatprep.subr.bf16.mxu1 %v4485_v13  ;;  %v4550_v12 = vld [vmem:[%s6186_s1 + $0x2c8] ss:$16 sps:$4 sm:$0xff]  }
  0x36   :  { %975 = vxpose.xlu0.c.b16.cont [6/8] %v4481_v10, 128  ;;  %v4552_v10 = vld [vmem:[%s6186_s1 + $0x2cc] ss:$16 sps:$4 sm:$0xff]  }
  0x37   :  { %959 = vxpose.xlu1.c.b16.cont [6/8] %v4482_v11, 128  ;;  %v4547_v11 = vld [vmem:[%s6186_s1 + $0x2c0] ss:$16 sps:$4 sm:$0xff]  }
  0x38   :  { %2355 = vmatpush1.bf16.msra.mxu0 %v4487_v14  ;;  %2807 = vmatpush1.bf16.msra.mxu1 %v4488_v15  ;;  %v4557_v14 = vld [vmem:[%s6186_s1 + $0x2e4] ss:$16 sps:$4 sm:$0xff]   ;;  %v4560_v15 = vld [vmem:[%s6186_s1 + $0x2ec] ss:$16 sps:$4 sm:$0xff]  }
  0x39   :  { %2356 = vmatprep.subr.bf16.mxu0 %v4491_v18  ;;  %2808 = vmatprep.subr.bf16.mxu1 %v4493_v19  ;;  %v4593_v18 = vld [vmem:[%s6185_s0 + $0x168] sm:$0xff]  }
  0x3a   :  { %976 = vxpose.xlu0.c.b16.cont [7/8] %v4489_v16, 128  ;;  %v4555_v16 = vld [vmem:[%s6186_s1 + $0x2e0] ss:$16 sps:$4 sm:$0xff]   ;;  %v4594_v19 = vld [vmem:[%s6185_s0 + $0x128] sm:$0xff]  }
  0x3b   :  { %960 = vxpose.xlu1.c.b16.cont [7/8] %v4490_v17, 128 }
  0x3c   :  { %2357 = vmatpush1.bf16.msra.mxu0 %v4495_v20  ;;  %2809 = vmatpush1.bf16.msra.mxu1 %v4496_v21  ;;  %v4558_v20 = vld [vmem:[%s6186_s1 + $0x2e8] ss:$16 sps:$4 sm:$0xff]   ;;  %v4565_v21 = vld [vmem:[%s6186_s1 + $0x304] ss:$16 sps:$4 sm:$0xff]  }
  0x3d   :  { %2358 = vmatprep.subr.bf16.mxu0 %v4499_v24  ;;  %2810 = vmatprep.subr.bf16.mxu1 %v4501_v25  ;;  %v4566_v24 = vld [vmem:[%s6186_s1 + $0x308] ss:$16 sps:$4 sm:$0xff]  }
  0x3e   :  { %977 = vxpose.xlu0.c.b16.end [8/8] %v4497_v22, 128  ;;  %v4568_v22 = vld [vmem:[%s6186_s1 + $0x30c] ss:$16 sps:$4 sm:$0xff]  }
  0x3f   :  { %961 = vxpose.xlu1.c.b16.end [8/8] %v4498_v23, 128  ;;  %v4563_v23 = vld [vmem:[%s6186_s1 + $0x300] ss:$16 sps:$4 sm:$0xff]  }
  0x40   :  { %2359 = vmatpush1.bf16.msra.mxu0 %v4503_v26  ;;  %2811 = vmatpush1.bf16.msra.mxu1 %v4504_v27  ;;  %v4573_v26 = vld [vmem:[%s6186_s1 + $0x324] ss:$16 sps:$4 sm:$0xff]   ;;  %v4576_v27 = vld [vmem:[%s6186_s1 + $0x32c] ss:$16 sps:$4 sm:$0xff]  }
  0x41   :  { %2360 = vmatprep.subr.bf16.mxu0 %v4505_v28  ;;  %2812 = vmatprep.subr.bf16.mxu1 %v4507_v29  ;;  %v4571_v28 = vld [vmem:[%s6186_s1 + $0x320] ss:$16 sps:$4 sm:$0xff]  }
  0x42   :  { %1002 = vxpose.xlu0.c.b16.start [1/8] %v4553_v34, 128  ;;  %v4584_v34 = vld [vmem:[%s6186_s1 + $0x34c] ss:$16 sps:$4 sm:$0xff]  }
  0x43   :  { %986 = vxpose.xlu1.c.b16.start [1/8] %v4554_v35, 128  ;;  %v4579_v35 = vld [vmem:[%s6186_s1 + $0x340] ss:$16 sps:$4 sm:$0xff]  }
  0x44   :  { %2361 = vmatpush1.bf16.msra.mxu0 %v4509_v30  ;;  %2813 = vmatpush1.bf16.msra.mxu1 %v4510_v31  ;;  %v4601_v30 = vld [vmem:[%s6185_s0 + $0x170] sm:$0xff]  }
  0x45   :  { %2443 = vmatprep.subr.bf16.mxu0 %v4513_v32  ;;  %2895 = vmatprep.subr.bf16.mxu1 %v4516_v33  ;;  %v4602_v31 = vld [vmem:[%s6185_s0 + $0x130] sm:$0xff]   ;;  %v4574_v32 = vld [vmem:[%s6186_s1 + $0x328] ss:$16 sps:$4 sm:$0xff]  }
  0x46   :  { %1003 = vxpose.xlu0.c.b16.cont [2/8] %v4561_v36, 128  ;;  %v4581_v33 = vld [vmem:[%s6186_s1 + $0x344] ss:$16 sps:$4 sm:$0xff]   ;;  %v4582_v36 = vld [vmem:[%s6186_s1 + $0x348] ss:$16 sps:$4 sm:$0xff]  }
  0x47   :  { %987 = vxpose.xlu1.c.b16.cont [2/8] %v4562_v37, 128 }
  0x4a   :  { %1004 = vxpose.xlu0.c.b16.cont [3/8] %v4569_v46, 128  ;;  %v4600_v46 = vld [vmem:[%s6186_s1 + $0x38c] ss:$16 sps:$4 sm:$0xff]  }
  0x4b   :  { %988 = vxpose.xlu1.c.b16.cont [3/8] %v4570_v47, 128  ;;  %v4595_v47 = vld [vmem:[%s6186_s1 + $0x380] ss:$16 sps:$4 sm:$0xff]  }
  0x4e   :  { %1005 = vxpose.xlu0.c.b16.cont [4/8] %v4577_v57, 128  ;;  %v4613_v57 = vld [vmem:[%s6186_s1 + $0x3c4] ss:$16 sps:$4 sm:$0xff]  }
  0x4f   :  { %989 = vxpose.xlu1.c.b16.cont [4/8] %v4578_v59, 128  ;;  %v4611_v59 = vld [vmem:[%s6186_s1 + $0x3c0] ss:$16 sps:$4 sm:$0xff]  }
  0x52   :  { %1006 = vxpose.xlu0.c.b16.cont [5/8] %v4585_v5, 128  ;;  %v4625_v5 = vld [vmem:[%s6186_s1 + $0x404] ss:$16 sps:$4 sm:$0xff]  }
  0x53   :  { %990 = vxpose.xlu1.c.b16.cont [5/8] %v4586_v7, 128  ;;  %v4623_v7 = vld [vmem:[%s6186_s1 + $0x400] ss:$16 sps:$4 sm:$0xff]  }
  0x56   :  { %1007 = vxpose.xlu0.c.b16.cont [6/8] %v4593_v18, 128  ;;  %v4640_v18 = vld [vmem:[%s6186_s1 + $0x44c] ss:$16 sps:$4 sm:$0xff]  }
  0x57   :  { %991 = vxpose.xlu1.c.b16.cont [6/8] %v4594_v19, 128  ;;  %v4635_v19 = vld [vmem:[%s6186_s1 + $0x440] ss:$16 sps:$4 sm:$0xff]  }
  0x5a   :  { %1008 = vxpose.xlu0.c.b16.cont [7/8] %v4601_v30, 128  ;;  %v4652_v30 = vld [vmem:[%s6186_s1 + $0x48c] ss:$16 sps:$4 sm:$0xff]  }
  0x5b   :  { %992 = vxpose.xlu1.c.b16.cont [7/8] %v4602_v31, 128  ;;  %v4647_v31 = vld [vmem:[%s6186_s1 + $0x480] ss:$16 sps:$4 sm:$0xff]  }
  0x68   :  { %v946_v41 = vpop.trf.xlu0 }
  0x69   :  { %2362 = vmatprep.mubr.bf16.mxu0 %v946_v41  ;;  %2814 = vmatprep.mubr.bf16.mxu1 %v946_v41  ;;  %v930_v43 = vpop.trf.xlu1 }
  0x6a   :  { %2363 = vmatmul.mubr.bf16.vlgmr.msra.gmra.mrb[0].mxu0 %v930_v43  ;;  %2815 = vmatmul.mubr.bf16.vlgmr.msra.gmra.mrb[0].mxu1 %v930_v43  ;;  %v4610_v43 = vld [vmem:[%s6185_s0 + $0x138] sm:$0xff]  }
  0x6b   :  { %2444 = vmatpush1.bf16.msra.mxu0 %v4511_v38  ;;  %2896 = vmatpush1.bf16.msra.mxu1 %v4514_v39  ;;  %v4589_v38 = vld [vmem:[%s6186_s1 + $0x364] ss:$16 sps:$4 sm:$0xff]   ;;  %v4592_v39 = vld [vmem:[%s6186_s1 + $0x36c] ss:$16 sps:$4 sm:$0xff]  }
  0x6c   :  { %2445 = vmatprep.subr.bf16.mxu0 %v4519_v40  ;;  %2897 = vmatprep.subr.bf16.mxu1 %v4522_v42  ;;  %v947_v49 = vpop.trf.xlu0  ;;  %v4587_v40 = vld [vmem:[%s6186_s1 + $0x360] ss:$16 sps:$4 sm:$0xff]   ;;  %v4609_v42 = vld [vmem:[%s6185_s0 + $0x178] sm:$0xff]  }
  0x6d   :  { %2372 = vmatprep.mubr.bf16.mxu0 %v947_v49  ;;  %2824 = vmatprep.mubr.bf16.mxu1 %v947_v49  ;;  %v931_v53 = vpop.trf.xlu1 }
  0x6e   :  { %1009 = vxpose.xlu0.c.b16.end [8/8] %v4609_v42, 128  ;;  %993 = vxpose.xlu1.c.b16.end [8/8] %v4610_v43, 128  ;;  %v4664_v42 = vld [vmem:[%s6186_s1 + $0x4cc] ss:$16 sps:$4 sm:$0xff]   ;;  %v4659_v43 = vld [vmem:[%s6186_s1 + $0x4c0] ss:$16 sps:$4 sm:$0xff]  }
  0x6f   :  { %2446 = vmatpush1.bf16.msra.mxu0 %v4517_v44  ;;  %2898 = vmatpush1.bf16.msra.mxu1 %v4520_v45  ;;  %v4590_v44 = vld [vmem:[%s6186_s1 + $0x368] ss:$16 sps:$4 sm:$0xff]   ;;  %v4597_v45 = vld [vmem:[%s6186_s1 + $0x384] ss:$16 sps:$4 sm:$0xff]  }
  0x70   :  { %2447 = vmatprep.subr.bf16.mxu0 %v4525_v48  ;;  %2899 = vmatprep.subr.bf16.mxu1 %v4528_v50  ;;  %v948_v58 = vpop.trf.xlu0  ;;  %v4598_v48 = vld [vmem:[%s6186_s1 + $0x388] ss:$16 sps:$4 sm:$0xff]   ;;  %v4605_v50 = vld [vmem:[%s6186_s1 + $0x3a4] ss:$16 sps:$4 sm:$0xff]  }
  0x71   :  { %v932_v1 = vpop.trf.xlu1 }
  0x72   :  { %2373 = vmatmul.mubr.bf16.gmra.mrb[4].mxu0 %v931_v53  ;;  %2825 = vmatmul.mubr.bf16.gmra.mrb[4].mxu1 %v931_v53  ;;  %v4665_v53 = vld [vmem:[%s6185_s0 + $0x1c0] sm:$0xff]  }
  0x73   :  { %2448 = vmatpush1.bf16.msra.mxu0 %v4523_v51  ;;  %2900 = vmatpush1.bf16.msra.mxu1 %v4526_v52  ;;  %v4608_v51 = vld [vmem:[%s6186_s1 + $0x3ac] ss:$16 sps:$4 sm:$0xff]   ;;  %v4603_v52 = vld [vmem:[%s6186_s1 + $0x3a0] ss:$16 sps:$4 sm:$0xff]  }
  0x74   :  { %2449 = vmatprep.subr.bf16.mxu0 %v4531_v54  ;;  %2901 = vmatprep.subr.bf16.mxu1 %v4534_v55  ;;  %v949_v6 = vpop.trf.xlu0  ;;  %v4666_v55 = vld [vmem:[%s6185_s0 + $0x180] sm:$0xff]  }
  0x75   :  { %2382 = vmatprep.mubr.bf16.mxu0 %v948_v58  ;;  %2834 = vmatprep.mubr.bf16.mxu1 %v948_v58  ;;  %v933_v13 = vpop.trf.xlu1  ;;  %v4616_v58 = vld [vmem:[%s6186_s1 + $0x3cc] ss:$16 sps:$4 sm:$0xff]  }
  0x76   :  { %1034 = vxpose.xlu0.c.b16.start [1/8] %v4665_v53, 128  ;;  %1018 = vxpose.xlu1.c.b16.start [1/8] %v4666_v55, 128  ;;  %v4677_v53 = vld [vmem:[%s6186_s1 + $0x504] ss:$16 sps:$4 sm:$0xff]   ;;  %v4675_v55 = vld [vmem:[%s6186_s1 + $0x500] ss:$16 sps:$4 sm:$0xff]  }
  0x77   :  { %2450 = vmatpush1.bf16.msra.mxu0 %v4529_v56  ;;  %2902 = vmatpush1.bf16.msra.mxu1 %v4532_v60  ;;  %v4606_v56 = vld [vmem:[%s6186_s1 + $0x3a8] ss:$16 sps:$4 sm:$0xff]  }
  0x78   :  { %2451 = vmatprep.subr.bf16.mxu0 %v4537_v61  ;;  %2903 = vmatprep.subr.bf16.mxu1 %v4540_v62  ;;  %v950_v17 = vpop.trf.xlu0  ;;  %v4614_v60 = vld [vmem:[%s6186_s1 + $0x3c8] ss:$16 sps:$4 sm:$0xff]   ;;  %v4619_v62 = vld [vmem:[%s6186_s1 + $0x3e4] ss:$16 sps:$4 sm:$0xff]  }
  0x79   :  { %v934_v25 = vpop.trf.xlu1 }
  0x7a   :  { %2383 = vmatmul.mubr.bf16.gmra.mrb[8].mxu0 %v932_v1  ;;  %2835 = vmatmul.mubr.bf16.gmra.mrb[8].mxu1 %v932_v1  ;;  %v4673_v1 = vld [vmem:[%s6185_s0 + $0x1c8] sm:$0xff]  }
  0x7b   :  { %2452 = vmatpush1.bf16.msra.mxu0 %v4535_v63  ;;  %2904 = vmatpush1.bf16.msra.mxu1 %v4538_v0  ;;  %v4622_v63 = vld [vmem:[%s6186_s1 + $0x3ec] ss:$16 sps:$4 sm:$0xff]   ;;  %v4617_v0 = vld [vmem:[%s6186_s1 + $0x3e0] ss:$16 sps:$4 sm:$0xff]  }
  0x7c   :  { %2453 = vmatprep.subr.bf16.mxu0 %v4543_v2  ;;  %2905 = vmatprep.subr.bf16.mxu1 %v4546_v3  ;;  %v951_v29 = vpop.trf.xlu0  ;;  %v4674_v3 = vld [vmem:[%s6185_s0 + $0x188] sm:$0xff]  }
  0x7d   :  { %2392 = vmatprep.mubr.bf16.mxu0 %v949_v6  ;;  %2844 = vmatprep.mubr.bf16.mxu1 %v949_v6  ;;  %v935_v37 = vpop.trf.xlu1  ;;  %v4628_v6 = vld [vmem:[%s6186_s1 + $0x40c] ss:$16 sps:$4 sm:$0xff]  }
  0x7e   :  { %1035 = vxpose.xlu0.c.b16.cont [2/8] %v4673_v1, 128  ;;  %1019 = vxpose.xlu1.c.b16.cont [2/8] %v4674_v3, 128  ;;  %v4693_v1 = vld [vmem:[%s6186_s1 + $0x544] ss:$16 sps:$4 sm:$0xff]   ;;  %v4691_v3 = vld [vmem:[%s6186_s1 + $0x540] ss:$16 sps:$4 sm:$0xff]  }
  0x7f   :  { %2454 = vmatpush1.bf16.msra.mxu0 %v4541_v4  ;;  %2906 = vmatpush1.bf16.msra.mxu1 %v4544_v8  ;;  %v4620_v4 = vld [vmem:[%s6186_s1 + $0x3e8] ss:$16 sps:$4 sm:$0xff]  }
  0x80   :  { %2455 = vmatprep.subr.bf16.mxu0 %v4549_v9  ;;  %2907 = vmatprep.subr.bf16.mxu1 %v4552_v10  ;;  %v952_v41 = vpop.trf.xlu0  ;;  %v4626_v8 = vld [vmem:[%s6186_s1 + $0x408] ss:$16 sps:$4 sm:$0xff]   ;;  %v4631_v10 = vld [vmem:[%s6186_s1 + $0x424] ss:$16 sps:$4 sm:$0xff]  }
  0x81   :  { %v936_v49 = vpop.trf.xlu1 }
  0x82   :  { %2393 = vmatmul.mubr.bf16.gmra.mrb[12].mxu0 %v933_v13  ;;  %2845 = vmatmul.mubr.bf16.gmra.mrb[12].mxu1 %v933_v13  ;;  %v4632_v13 = vld [vmem:[%s6186_s1 + $0x428] ss:$16 sps:$4 sm:$0xff]  }
  0x83   :  { %2456 = vmatpush1.bf16.msra.mxu0 %v4547_v11  ;;  %2908 = vmatpush1.bf16.msra.mxu1 %v4550_v12  ;;  %v4634_v11 = vld [vmem:[%s6186_s1 + $0x42c] ss:$16 sps:$4 sm:$0xff]   ;;  %v4629_v12 = vld [vmem:[%s6186_s1 + $0x420] ss:$16 sps:$4 sm:$0xff]  }
  0x84   :  { %2457 = vmatprep.subr.bf16.mxu0 %v4557_v14  ;;  %2909 = vmatprep.subr.bf16.mxu1 %v4560_v15  ;;  %v953_v54 = vpop.trf.xlu0  ;;  %v4681_v15 = vld [vmem:[%s6185_s0 + $0x1d0] sm:$0xff]  }
  0x85   :  { %2402 = vmatprep.mubr.bf16.mxu0 %v950_v17  ;;  %2854 = vmatprep.mubr.bf16.mxu1 %v950_v17  ;;  %v937_v61 = vpop.trf.xlu1  ;;  %v4637_v17 = vld [vmem:[%s6186_s1 + $0x444] ss:$16 sps:$4 sm:$0xff]  }
  0x86   :  { %1036 = vxpose.xlu0.c.b16.cont [3/8] %v4681_v15, 128  ;;  %v4707_v15 = vld [vmem:[%s6186_s1 + $0x580] ss:$16 sps:$4 sm:$0xff]  }
  0x87   :  { %2458 = vmatpush1.bf16.msra.mxu0 %v4555_v16  ;;  %2910 = vmatpush1.bf16.msra.mxu1 %v4558_v20  ;;  %v4682_v16 = vld [vmem:[%s6185_s0 + $0x190] sm:$0xff]   ;;  %v4638_v20 = vld [vmem:[%s6186_s1 + $0x448] ss:$16 sps:$4 sm:$0xff]  }
  0x88   :  { %2459 = vmatprep.subr.bf16.mxu0 %v4565_v21  ;;  %2911 = vmatprep.subr.bf16.mxu1 %v4568_v22  ;;  %v978_v2 = vpop.trf.xlu0  ;;  %v4643_v22 = vld [vmem:[%s6186_s1 + $0x464] ss:$16 sps:$4 sm:$0xff]  }
  0x89   :  { %v962_v9 = vpop.trf.xlu1  ;;  %1020 = vxpose.xlu1.c.b16.cont [3/8] %v4682_v16, 128  ;;  %v4710_v16 = vld [vmem:[%s6186_s1 + $0x588] ss:$16 sps:$4 sm:$0xff]  }
  0x8a   :  { %2403 = vmatmul.mubr.bf16.gmra.mrb[16].mxu0 %v934_v25  ;;  %2855 = vmatmul.mubr.bf16.gmra.mrb[16].mxu1 %v934_v25 }
  0x8b   :  { %2460 = vmatpush1.bf16.msra.mxu0 %v4563_v23  ;;  %2912 = vmatpush1.bf16.msra.mxu1 %v4566_v24  ;;  %v4646_v23 = vld [vmem:[%s6186_s1 + $0x46c] ss:$16 sps:$4 sm:$0xff]   ;;  %v4641_v24 = vld [vmem:[%s6186_s1 + $0x460] ss:$16 sps:$4 sm:$0xff]  }
  0x8c   :  { %2461 = vmatprep.subr.bf16.mxu0 %v4573_v26  ;;  %2913 = vmatprep.subr.bf16.mxu1 %v4576_v27  ;;  %v979_v14 = vpop.trf.xlu0  ;;  %v4689_v26 = vld [vmem:[%s6185_s0 + $0x1d8] sm:$0xff]  }
  0x8d   :  { %2412 = vmatprep.mubr.bf16.mxu0 %v951_v29  ;;  %2864 = vmatprep.mubr.bf16.mxu1 %v951_v29  ;;  %v963_v21 = vpop.trf.xlu1  ;;  %v4690_v27 = vld [vmem:[%s6185_s0 + $0x198] sm:$0xff]   ;;  %v4649_v29 = vld [vmem:[%s6186_s1 + $0x484] ss:$16 sps:$4 sm:$0xff]  }
  0x8e   :  { %1037 = vxpose.xlu0.c.b16.cont [4/8] %v4689_v26, 128  ;;  %1021 = vxpose.xlu1.c.b16.cont [4/8] %v4690_v27, 128  ;;  %v4726_v26 = vld [vmem:[%s6186_s1 + $0x5c8] ss:$16 sps:$4 sm:$0xff]  }
  0x8f   :  { %2462 = vmatpush1.bf16.msra.mxu0 %v4571_v28  ;;  %2914 = vmatpush1.bf16.msra.mxu1 %v4574_v32  ;;  %v4644_v28 = vld [vmem:[%s6186_s1 + $0x468] ss:$16 sps:$4 sm:$0xff]  }
  0x90   :  { %2463 = vmatprep.subr.bf16.mxu0 %v4581_v33  ;;  %2915 = vmatprep.subr.bf16.mxu1 %v4584_v34  ;;  %v980_v25 = vpop.trf.xlu0  ;;  %v4650_v32 = vld [vmem:[%s6186_s1 + $0x488] ss:$16 sps:$4 sm:$0xff]   ;;  %v4655_v34 = vld [vmem:[%s6186_s1 + $0x4a4] ss:$16 sps:$4 sm:$0xff]  }
  0x91   :  { %v964_v33 = vpop.trf.xlu1 }
  0x92   :  { %2413 = vmatmul.mubr.bf16.gmra.mrb[20].mxu0 %v935_v37  ;;  %2865 = vmatmul.mubr.bf16.gmra.mrb[20].mxu1 %v935_v37  ;;  %v4697_v37 = vld [vmem:[%s6185_s0 + $0x1e0] sm:$0xff]  }
  0x93   :  { %2464 = vmatpush1.bf16.msra.mxu0 %v4579_v35  ;;  %2916 = vmatpush1.bf16.msra.mxu1 %v4582_v36  ;;  %v4658_v35 = vld [vmem:[%s6186_s1 + $0x4ac] ss:$16 sps:$4 sm:$0xff]   ;;  %v4653_v36 = vld [vmem:[%s6186_s1 + $0x4a0] ss:$16 sps:$4 sm:$0xff]  }
  0x94   :  { %2465 = vmatprep.subr.bf16.mxu0 %v4589_v38  ;;  %2917 = vmatprep.subr.bf16.mxu1 %v4592_v39  ;;  %v981_v38 = vpop.trf.xlu0  ;;  %v4698_v39 = vld [vmem:[%s6185_s0 + $0x1a0] sm:$0xff]  }
  0x95   :  { %2422 = vmatprep.mubr.bf16.mxu0 %v952_v41  ;;  %2874 = vmatprep.mubr.bf16.mxu1 %v952_v41  ;;  %v4661_v41 = vld [vmem:[%s6186_s1 + $0x4c4] ss:$16 sps:$4 sm:$0xff]  }
  0x96   :  { %1038 = vxpose.xlu0.c.b16.cont [5/8] %v4697_v37, 128  ;;  %1022 = vxpose.xlu1.c.b16.cont [5/8] %v4698_v39, 128  ;;  %v4738_v37 = vld [vmem:[%s6186_s1 + $0x608] ss:$16 sps:$4 sm:$0xff]   ;;  %v4743_v39 = vld [vmem:[%s6186_s1 + $0x624] ss:$16 sps:$4 sm:$0xff]  }
  0x97   :  { %2466 = vmatpush1.bf16.msra.mxu0 %v4587_v40  ;;  %2918 = vmatpush1.bf16.msra.mxu1 %v4590_v44  ;;  %v4656_v40 = vld [vmem:[%s6186_s1 + $0x4a8] ss:$16 sps:$4 sm:$0xff]  }
  0x98   :  { %2467 = vmatprep.subr.bf16.mxu0 %v4597_v45  ;;  %2919 = vmatprep.subr.bf16.mxu1 %v4600_v46  ;;  %v4662_v44 = vld [vmem:[%s6186_s1 + $0x4c8] ss:$16 sps:$4 sm:$0xff]   ;;  %v965_v45 = vpop.trf.xlu1  ;;  %v4669_v46 = vld [vmem:[%s6186_s1 + $0x4e4] ss:$16 sps:$4 sm:$0xff]  }
  0x9a   :  { %2423 = vmatmul.mubr.bf16.gmra.mrb[24].mxu0 %v936_v49  ;;  %2875 = vmatmul.mubr.bf16.gmra.mrb[24].mxu1 %v936_v49  ;;  %v982_v49 = vpop.trf.xlu0 }
  0x9b   :  { %2468 = vmatpush1.bf16.msra.mxu0 %v4595_v47  ;;  %2920 = vmatpush1.bf16.msra.mxu1 %v4598_v48  ;;  %v4672_v47 = vld [vmem:[%s6186_s1 + $0x4ec] ss:$16 sps:$4 sm:$0xff]   ;;  %v4667_v48 = vld [vmem:[%s6186_s1 + $0x4e0] ss:$16 sps:$4 sm:$0xff]  }
  0x9c   :  { %2469 = vmatprep.subr.bf16.mxu0 %v4605_v50  ;;  %2921 = vmatprep.subr.bf16.mxu1 %v4608_v51  ;;  %v4705_v50 = vld [vmem:[%s6185_s0 + $0x1e8] sm:$0xff]  }
  0x9d   :  { %2432 = vmatprep.mubr.bf16.mxu0 %v953_v54  ;;  %2884 = vmatprep.mubr.bf16.mxu1 %v953_v54  ;;  %v4706_v51 = vld [vmem:[%s6185_s0 + $0x1a8] sm:$0xff]  }
  0x9e   :  { %v4680_v54 = vld [vmem:[%s6186_s1 + $0x50c] ss:$16 sps:$4 sm:$0xff]   ;;  %1039 = vxpose.xlu0.c.b16.cont [6/8] %v4705_v50, 128  ;;  %1023 = vxpose.xlu1.c.b16.cont [6/8] %v4706_v51, 128  ;;  %v4755_v51 = vld [vmem:[%s6186_s1 + $0x664] ss:$16 sps:$4 sm:$0xff]  }
  0x9f   :  { %2470 = vmatpush1.bf16.msra.mxu0 %v4603_v52  ;;  %2922 = vmatpush1.bf16.msra.mxu1 %v4606_v56  ;;  %v4670_v52 = vld [vmem:[%s6186_s1 + $0x4e8] ss:$16 sps:$4 sm:$0xff]  }
  0xa0   :  { %2471 = vmatprep.subr.bf16.mxu0 %v4613_v57  ;;  %2923 = vmatprep.subr.bf16.mxu1 %v4616_v58  ;;  %v4678_v56 = vld [vmem:[%s6186_s1 + $0x508] ss:$16 sps:$4 sm:$0xff]   ;;  %v966_v57 = vpop.trf.xlu1  ;;  %v4685_v58 = vld [vmem:[%s6186_s1 + $0x524] ss:$16 sps:$4 sm:$0xff]  }
  0xa2   :  { %2433 = vmatmul.mubr.bf16.gmra.mrb[28].mxu0 %v937_v61  ;;  %2885 = vmatmul.mubr.bf16.gmra.mrb[28].mxu1 %v937_v61  ;;  %v983_v61 = vpop.trf.xlu0 }
  0xa3   :  { %2472 = vmatpush1.bf16.msra.mxu0 %v4611_v59  ;;  %2924 = vmatpush1.bf16.msra.mxu1 %v4614_v60  ;;  %v4688_v59 = vld [vmem:[%s6186_s1 + $0x52c] ss:$16 sps:$4 sm:$0xff]   ;;  %v4683_v60 = vld [vmem:[%s6186_s1 + $0x520] ss:$16 sps:$4 sm:$0xff]  }
  0xa4   :  { %2473 = vmatprep.subr.bf16.mxu0 %v4619_v62  ;;  %2925 = vmatprep.subr.bf16.mxu1 %v4622_v63  ;;  %v4713_v62 = vld [vmem:[%s6185_s0 + $0x1f0] sm:$0xff]  }
  0xa5   :  { %2475 = vmatprep.mubr.bf16.mxu0 %v978_v2  ;;  %2927 = vmatprep.mubr.bf16.mxu1 %v978_v2  ;;  %v4714_v63 = vld [vmem:[%s6185_s0 + $0x1b0] sm:$0xff]   ;;  %v4696_v2 = vld [vmem:[%s6186_s1 + $0x54c] ss:$16 sps:$4 sm:$0xff]  }
  0xa6   :  { %1040 = vxpose.xlu0.c.b16.cont [7/8] %v4713_v62, 128  ;;  %1024 = vxpose.xlu1.c.b16.cont [7/8] %v4714_v63, 128 }
  0xa7   :  { %2474 = vmatpush1.bf16.msra.mxu0 %v4617_v0  ;;  %2926 = vmatpush1.bf16.msra.mxu1 %v4620_v4  ;;  %v4686_v0 = vld [vmem:[%s6186_s1 + $0x528] ss:$16 sps:$4 sm:$0xff]  }
  0xa8   :  { %2556 = vmatprep.subr.bf16.mxu0 %v4625_v5  ;;  %3008 = vmatprep.subr.bf16.mxu1 %v4628_v6  ;;  %v4694_v4 = vld [vmem:[%s6186_s1 + $0x548] ss:$16 sps:$4 sm:$0xff]   ;;  %v967_v5 = vpop.trf.xlu1  ;;  %v4701_v6 = vld [vmem:[%s6186_s1 + $0x564] ss:$16 sps:$4 sm:$0xff]  }
  0xaa   :  { %2476 = vmatmul.mubr.bf16.vlgmr.msra.gmra.mrb[0].mxu0 %v962_v9  ;;  %2928 = vmatmul.mubr.bf16.vlgmr.msra.gmra.mrb[0].mxu1 %v962_v9  ;;  %v984_v9 = vpop.trf.xlu0 }
  0xab   :  { %2557 = vmatpush1.bf16.msra.mxu0 %v4623_v7  ;;  %3009 = vmatpush1.bf16.msra.mxu1 %v4626_v8  ;;  %v4704_v7 = vld [vmem:[%s6186_s1 + $0x56c] ss:$16 sps:$4 sm:$0xff]   ;;  %v4699_v8 = vld [vmem:[%s6186_s1 + $0x560] ss:$16 sps:$4 sm:$0xff]  }
  0xac   :  { %2558 = vmatprep.subr.bf16.mxu0 %v4631_v10  ;;  %3010 = vmatprep.subr.bf16.mxu1 %v4634_v11  ;;  %v4721_v10 = vld [vmem:[%s6185_s0 + $0x1f8] sm:$0xff]  }
  0xad   :  { %2485 = vmatprep.mubr.bf16.mxu0 %v979_v14  ;;  %2937 = vmatprep.mubr.bf16.mxu1 %v979_v14  ;;  %v4722_v11 = vld [vmem:[%s6185_s0 + $0x1b8] sm:$0xff]  }
  0xae   :  { %v4712_v14 = vld [vmem:[%s6186_s1 + $0x58c] ss:$16 sps:$4 sm:$0xff]   ;;  %1041 = vxpose.xlu0.c.b16.end [8/8] %v4721_v10, 128  ;;  %1025 = vxpose.xlu1.c.b16.end [8/8] %v4722_v11, 128 }
  0xaf   :  { %2559 = vmatpush1.bf16.msra.mxu0 %v4629_v12  ;;  %3011 = vmatpush1.bf16.msra.mxu1 %v4632_v13  ;;  %v4702_v12 = vld [vmem:[%s6186_s1 + $0x568] ss:$16 sps:$4 sm:$0xff]   ;;  %v4709_v13 = vld [vmem:[%s6186_s1 + $0x584] ss:$16 sps:$4 sm:$0xff]  }
  0xb0   :  { %2560 = vmatprep.subr.bf16.mxu0 %v4637_v17  ;;  %3012 = vmatprep.subr.bf16.mxu1 %v4640_v18  ;;  %v968_v17 = vpop.trf.xlu1  ;;  %v4717_v18 = vld [vmem:[%s6186_s1 + $0x5a4] ss:$16 sps:$4 sm:$0xff]  }
  0xb2   :  { %2486 = vmatmul.mubr.bf16.gmra.mrb[4].mxu0 %v963_v21  ;;  %2938 = vmatmul.mubr.bf16.gmra.mrb[4].mxu1 %v963_v21  ;;  %v985_v21 = vpop.trf.xlu0 }
  0xb3   :  { %2561 = vmatpush1.bf16.msra.mxu0 %v4635_v19  ;;  %3013 = vmatpush1.bf16.msra.mxu1 %v4638_v20  ;;  %v4720_v19 = vld [vmem:[%s6186_s1 + $0x5ac] ss:$16 sps:$4 sm:$0xff]   ;;  %v4715_v20 = vld [vmem:[%s6186_s1 + $0x5a0] ss:$16 sps:$4 sm:$0xff]  }
  0xb4   :  { %2562 = vmatprep.subr.bf16.mxu0 %v4643_v22  ;;  %3014 = vmatprep.subr.bf16.mxu1 %v4646_v23  ;;  %v4718_v22 = vld [vmem:[%s6186_s1 + $0x5a8] ss:$16 sps:$4 sm:$0xff]   ;;  %v4725_v23 = vld [vmem:[%s6186_s1 + $0x5c4] ss:$16 sps:$4 sm:$0xff]   ;;  %v969_v27 = vpop.trf.xlu1 }
  0xb5   :  { %2495 = vmatprep.mubr.bf16.mxu0 %v980_v25  ;;  %2947 = vmatprep.mubr.bf16.mxu1 %v980_v25  ;;  %v4723_v25 = vld [vmem:[%s6186_s1 + $0x5c0] ss:$16 sps:$4 sm:$0xff]  }
  0xb7   :  { %2563 = vmatpush1.bf16.msra.mxu0 %v4641_v24  ;;  %3015 = vmatpush1.bf16.msra.mxu1 %v4644_v28  ;;  %v4728_v24 = vld [vmem:[%s6186_s1 + $0x5cc] ss:$16 sps:$4 sm:$0xff]   ;;  %v4731_v28 = vld [vmem:[%s6186_s1 + $0x5e4] ss:$16 sps:$4 sm:$0xff]  }
  0xb8   :  { %2564 = vmatprep.subr.bf16.mxu0 %v4649_v29  ;;  %3016 = vmatprep.subr.bf16.mxu1 %v4652_v30  ;;  %v4734_v29 = vld [vmem:[%s6186_s1 + $0x5ec] ss:$16 sps:$4 sm:$0xff]   ;;  %v4729_v30 = vld [vmem:[%s6186_s1 + $0x5e0] ss:$16 sps:$4 sm:$0xff]  }
  0xba   :  { %2496 = vmatmul.mubr.bf16.gmra.mrb[8].mxu0 %v964_v33  ;;  %2948 = vmatmul.mubr.bf16.gmra.mrb[8].mxu1 %v964_v33  ;;  %v4737_v33 = vld [vmem:[%s6186_s1 + $0x604] ss:$16 sps:$4 sm:$0xff]  }
  0xbb   :  { %2565 = vmatpush1.bf16.msra.mxu0 %v4647_v31  ;;  %3017 = vmatpush1.bf16.msra.mxu1 %v4650_v32  ;;  %v1010_v31 = vpop.trf.xlu0  ;;  %v4732_v32 = vld [vmem:[%s6186_s1 + $0x5e8] ss:$16 sps:$4 sm:$0xff]  }
  0xbc   :  { %2566 = vmatprep.subr.bf16.mxu0 %v4655_v34  ;;  %3018 = vmatprep.subr.bf16.mxu1 %v4658_v35  ;;  %v4740_v34 = vld [vmem:[%s6186_s1 + $0x60c] ss:$16 sps:$4 sm:$0xff]   ;;  %v4735_v35 = vld [vmem:[%s6186_s1 + $0x600] ss:$16 sps:$4 sm:$0xff]  }
  0xbd   :  { %2505 = vmatprep.mubr.bf16.mxu0 %v981_v38  ;;  %2957 = vmatprep.mubr.bf16.mxu1 %v981_v38  ;;  %v994_v38 = vpop.trf.xlu1 }
  0xbf   :  { %2567 = vmatpush1.bf16.msra.mxu0 %v4653_v36  ;;  %3019 = vmatpush1.bf16.msra.mxu1 %v4656_v40  ;;  %v4855_v36 = vmov 0   ;;  %v4746_v40 = vld [vmem:[%s6186_s1 + $0x62c] ss:$16 sps:$4 sm:$0xff]  }
  0xc0   :  { %2568 = vmatprep.subr.bf16.mxu0 %v4661_v41  ;;  %3020 = vmatprep.subr.bf16.mxu1 %v4664_v42  ;;  %v4741_v41 = vld [vmem:[%s6186_s1 + $0x620] ss:$16 sps:$4 sm:$0xff]   ;;  %v1011_v42 = vpop.trf.xlu0 }
  0xc1   :  { %4382 = vset.pattern.permute.xlu1 %v4855_v36  ;;  %4381 = vset.pattern.permute.xlu0 %v4855_v36  ;;  %v995_v50 = vpop.trf.xlu1 }
  0xc2   :  { %2506 = vmatmul.mubr.bf16.gmra.mrb[12].mxu0 %v965_v45  ;;  %2958 = vmatmul.mubr.bf16.gmra.mrb[12].mxu1 %v965_v45  ;;  %v3430_v45 = vld [vmem:[%s6187_s2] sm:$0xff] }
  0xc3   :  { %2569 = vmatpush1.bf16.msra.mxu0 %v4659_v43  ;;  %3021 = vmatpush1.bf16.msra.mxu1 %v4662_v44  ;;  %v4744_v43 = vld [vmem:[%s6186_s1 + $0x628] ss:$16 sps:$4 sm:$0xff]  }
  0xc4   :  { %2570 = vmatprep.subr.bf16.mxu0 %v4669_v46  ;;  %3022 = vmatprep.subr.bf16.mxu1 %v4672_v47  ;;  %v3431_v44 = vld [vmem:[%s6187_s2 + $0x8] sm:$0xff]  ;;  %v4749_v46 = vld [vmem:[%s6186_s1 + $0x644] ss:$16 sps:$4 sm:$0xff]  }
  0xc5   :  { %2515 = vmatprep.mubr.bf16.mxu0 %v982_v49  ;;  %2967 = vmatprep.mubr.bf16.mxu1 %v982_v49  ;;  %v4752_v47 = vld [vmem:[%s6186_s1 + $0x64c] ss:$16 sps:$4 sm:$0xff]   ;;  %v4750_v49 = vld [vmem:[%s6186_s1 + $0x648] ss:$16 sps:$4 sm:$0xff]  }
  0xc6   :  { %3453 = vperm.xlu1 %4382, %v3431_v44   ;;  %3448 = vperm.xlu0 %4381, %v3430_v45  }
  0xc7   :  { %2571 = vmatpush1.bf16.msra.mxu0 %v4667_v48  ;;  %3023 = vmatpush1.bf16.msra.mxu1 %v4670_v52  ;;  %v4747_v48 = vld [vmem:[%s6186_s1 + $0x640] ss:$16 sps:$4 sm:$0xff]   ;;  %v4758_v52 = vld [vmem:[%s6186_s1 + $0x66c] ss:$16 sps:$4 sm:$0xff]  }
  0xc8   :  { %2572 = vmatprep.subr.bf16.mxu0 %v4677_v53  ;;  %3024 = vmatprep.subr.bf16.mxu1 %v4680_v54 }
  0xca   :  { %2516 = vmatmul.mubr.bf16.gmra.mrb[16].mxu0 %v966_v57  ;;  %2968 = vmatmul.mubr.bf16.gmra.mrb[16].mxu1 %v966_v57 }
  0xcb   :  { %2573 = vmatpush1.bf16.msra.mxu0 %v4675_v55  ;;  %3025 = vmatpush1.bf16.msra.mxu1 %v4678_v56 }
  0xcc   :  { %2574 = vmatprep.subr.bf16.mxu0 %v4685_v58  ;;  %3026 = vmatprep.subr.bf16.mxu1 %v4688_v59 }
  0xcd   :  { %2525 = vmatprep.mubr.bf16.mxu0 %v983_v61  ;;  %2977 = vmatprep.mubr.bf16.mxu1 %v983_v61 }
  0xcf   :  { %2575 = vmatpush1.bf16.msra.mxu0 %v4683_v60  ;;  %3027 = vmatpush1.bf16.msra.mxu1 %v4686_v0 }
  0xd0   :  { %2576 = vmatprep.subr.bf16.mxu0 %v4693_v1  ;;  %3028 = vmatprep.subr.bf16.mxu1 %v4696_v2 }
  0xd2   :  { %2526 = vmatmul.mubr.bf16.gmra.mrb[20].mxu0 %v967_v5  ;;  %2978 = vmatmul.mubr.bf16.gmra.mrb[20].mxu1 %v967_v5 }
  0xd3   :  { %2577 = vmatpush1.bf16.msra.mxu0 %v4691_v3  ;;  %3029 = vmatpush1.bf16.msra.mxu1 %v4694_v4 }
  0xd4   :  { %2578 = vmatprep.subr.bf16.mxu0 %v4701_v6  ;;  %3030 = vmatprep.subr.bf16.mxu1 %v4704_v7 }
  0xd5   :  { %2535 = vmatprep.mubr.bf16.mxu0 %v984_v9  ;;  %2987 = vmatprep.mubr.bf16.mxu1 %v984_v9 }
  0xd7   :  { %2579 = vmatpush1.bf16.msra.mxu0 %v4699_v8  ;;  %3031 = vmatpush1.bf16.msra.mxu1 %v4702_v12 }
  0xd8   :  { %2580 = vmatprep.subr.bf16.mxu0 %v4709_v13  ;;  %3032 = vmatprep.subr.bf16.mxu1 %v4712_v14 }
  0xda   :  { %2536 = vmatmul.mubr.bf16.gmra.mrb[24].mxu0 %v968_v17  ;;  %2988 = vmatmul.mubr.bf16.gmra.mrb[24].mxu1 %v968_v17 }
  0xdb   :  { %2581 = vmatpush1.bf16.msra.mxu0 %v4707_v15  ;;  %3033 = vmatpush1.bf16.msra.mxu1 %v4710_v16 }
  0xdc   :  { %2582 = vmatprep.subr.bf16.mxu0 %v4717_v18  ;;  %3034 = vmatprep.subr.bf16.mxu1 %v4720_v19 }
  0xdd   :  { %2545 = vmatprep.mubr.bf16.mxu0 %v985_v21  ;;  %2997 = vmatprep.mubr.bf16.mxu1 %v985_v21 }
  0xdf   :  { %2583 = vmatpush1.bf16.msra.mxu0 %v4715_v20  ;;  %3035 = vmatpush1.bf16.msra.mxu1 %v4718_v22 }
  0xe0   :  { %2584 = vmatprep.subr.bf16.mxu0 %v4725_v23  ;;  %3036 = vmatprep.subr.bf16.mxu1 %v4728_v24 }
  0xe2   :  { %2546 = vmatmul.mubr.bf16.gmra.mrb[28].mxu0 %v969_v27  ;;  %2998 = vmatmul.mubr.bf16.gmra.mrb[28].mxu1 %v969_v27 }
  0xe3   :  { %2585 = vmatpush1.bf16.msra.mxu0 %v4723_v25  ;;  %3037 = vmatpush1.bf16.msra.mxu1 %v4726_v26 }
  0xe4   :  { %2586 = vmatprep.subr.bf16.mxu0 %v4731_v28  ;;  %3038 = vmatprep.subr.bf16.mxu1 %v4734_v29 }
  0xe5   :  { %2588 = vmatprep.mubr.bf16.mxu0 %v1010_v31  ;;  %3040 = vmatprep.mubr.bf16.mxu1 %v1010_v31 }
  0xe7   :  { %2587 = vmatpush1.bf16.msra.mxu0 %v4729_v30  ;;  %3039 = vmatpush1.bf16.msra.mxu1 %v4732_v32 }
  0xe8   :  { %2669 = vmatprep.subr.bf16.mxu0 %v4737_v33  ;;  %3121 = vmatprep.subr.bf16.mxu1 %v4740_v34 }
  0xea   :  { %2589 = vmatmul.mubr.bf16.vlgmr.msra.gmra.mrb[0].mxu0 %v994_v38  ;;  %3041 = vmatmul.mubr.bf16.vlgmr.msra.gmra.mrb[0].mxu1 %v994_v38 }
  0xeb   :  { %2670 = vmatpush1.bf16.msra.mxu0 %v4735_v35  ;;  %3122 = vmatpush1.bf16.msra.mxu1 %v4738_v37 }
  0xec   :  { %2671 = vmatprep.subr.bf16.mxu0 %v4743_v39  ;;  %3123 = vmatprep.subr.bf16.mxu1 %v4746_v40 }
  0xed   :  { %2598 = vmatprep.mubr.bf16.mxu0 %v1011_v42  ;;  %3050 = vmatprep.mubr.bf16.mxu1 %v1011_v42 }
  0xef   :  { %2672 = vmatpush1.bf16.msra.mxu0 %v4741_v41  ;;  %3124 = vmatpush1.bf16.msra.mxu1 %v4744_v43 }
  0xf0   :  { %2673 = vmatprep.subr.bf16.mxu0 %v4749_v46  ;;  %3125 = vmatprep.subr.bf16.mxu1 %v4752_v47 }
  0xf1   :  { %10 = vsyncpa [#allocation4], 0  ;;  %v4753_v53 = vld [vmem:[%s6186_s1 + $0x660] ss:$16 sps:$4 sm:$0xff]   ;;  %v1012_v54 = vpop.trf.xlu0  ;;  %v4756_v55 = vld [vmem:[%s6186_s1 + $0x668] ss:$16 sps:$4 sm:$0xff]   ;;  %v996_v62 = vpop.trf.xlu1 }
  0xf2   :  { %2599 = vmatmul.mubr.bf16.gmra.mrb[4].mxu0 %v995_v50  ;;  %3051 = vmatmul.mubr.bf16.gmra.mrb[4].mxu1 %v995_v50  ;;  %v3432_v56 = vld [vmem:[%s6187_s2 + $0x10] sm:$0xff]  ;;  %v3434_v57 = vld [vmem:[%s6187_s2 + $0x20] sm:$0xff]  ;;  %v4764_v59 = vld [vmem:[%s6186_s1 + $0x68c] ss:$16 sps:$4 sm:$0xff]   ;;  %vm28_vm0 = vcmask 785408  }
  0xf3   :  { %2674 = vmatpush1.bf16.msra.mxu0 %v4747_v48  ;;  %3126 = vmatpush1.bf16.msra.mxu1 %v4750_v49  ;;  %v4761_v58 = vld [vmem:[%s6186_s1 + $0x684] ss:$16 sps:$4 sm:$0xff]   ;;  %v4759_v60 = vld [vmem:[%s6186_s1 + $0x680] ss:$16 sps:$4 sm:$0xff]   ;;  %v4762_v61 = vld [vmem:[%s6186_s1 + $0x688] ss:$16 sps:$4 sm:$0xff]  }
  0xf4   :  { %2675 = vmatprep.subr.bf16.mxu0 %v4755_v51  ;;  %3127 = vmatprep.subr.bf16.mxu1 %v4758_v52  ;;  %v4767_v63 = vld [vmem:[%s6186_s1 + $0x6a4] ss:$16 sps:$4 sm:$0xff]   ;;  %v4770_v0 = vld [vmem:[%s6186_s1 + $0x6ac] ss:$16 sps:$4 sm:$0xff]   ;;  %v4765_v1 = vld [vmem:[%s6186_s1 + $0x6a0] ss:$16 sps:$4 sm:$0xff]  }
  0xf5   :  { %2608 = vmatprep.mubr.bf16.mxu0 %v1012_v54  ;;  %3060 = vmatprep.mubr.bf16.mxu1 %v1012_v54  ;;  %v1013_v2 = vpop.trf.xlu0  ;;  %v4768_v3 = vld [vmem:[%s6186_s1 + $0x6a8] ss:$16 sps:$4 sm:$0xff]   ;;  %v3436_v5 = vld [vmem:[%s6187_s2 + $0x30] sm:$0xff]  ;;  %v4776_v7 = vld [vmem:[%s6186_s1 + $0x6cc] ss:$16 sps:$4 sm:$0xff]   ;;  %v997_v10 = vpop.trf.xlu1 }
  0xf6   :  { %3458 = vperm.xlu1 %4382, %v3432_v56   ;;  %3468 = vperm.xlu0 %4381, %v3434_v57   ;;  %v3433_v4 = vld [vmem:[%s6187_s2 + $0x18] sm:$0xff]  ;;  %v4773_v6 = vld [vmem:[%s6186_s1 + $0x6c4] ss:$16 sps:$4 sm:$0xff]   ;;  %v4771_v8 = vld [vmem:[%s6186_s1 + $0x6c0] ss:$16 sps:$4 sm:$0xff]  }
  0xf7   :  { %2676 = vmatpush1.bf16.msra.mxu0 %v4753_v53  ;;  %3128 = vmatpush1.bf16.msra.mxu1 %v4756_v55  ;;  %v4774_v9 = vld [vmem:[%s6186_s1 + $0x6c8] ss:$16 sps:$4 sm:$0xff]   ;;  %v4779_v11 = vld [vmem:[%s6186_s1 + $0x6e4] ss:$16 sps:$4 sm:$0xff]   ;;  %v4782_v12 = vld [vmem:[%s6186_s1 + $0x6ec] ss:$16 sps:$4 sm:$0xff]  }
  0xf8   :  { %2677 = vmatprep.subr.bf16.mxu0 %v4761_v58  ;;  %3129 = vmatprep.subr.bf16.mxu1 %v4764_v59  ;;  %v4777_v13 = vld [vmem:[%s6186_s1 + $0x6e0] ss:$16 sps:$4 sm:$0xff]   ;;  %v4780_v15 = vld [vmem:[%s6186_s1 + $0x6e8] ss:$16 sps:$4 sm:$0xff]   ;;  %v4785_v18 = vld [vmem:[%s6186_s1 + $0x704] ss:$16 sps:$4 sm:$0xff]  }
  0xf9   :  { %v1014_v14 = vpop.trf.xlu0  ;;  %v3435_v16 = vld [vmem:[%s6187_s2 + $0x28] sm:$0xff]  ;;  %v3438_v17 = vld [vmem:[%s6187_s2 + $0x40] sm:$0xff]  ;;  %v998_v22 = vpop.trf.xlu1  ;;  %v3437_v28 = vld [vmem:[%s6187_s2 + $0x38] sm:$0xff] }
  0xfa   :  { %2609 = vmatmul.mubr.bf16.gmra.mrb[8].mxu0 %v996_v62  ;;  %3061 = vmatmul.mubr.bf16.gmra.mrb[8].mxu1 %v996_v62  ;;  %v4788_v19 = vld [vmem:[%s6186_s1 + $0x70c] ss:$16 sps:$4 sm:$0xff]   ;;  %v4783_v20 = vld [vmem:[%s6186_s1 + $0x700] ss:$16 sps:$4 sm:$0xff]   ;;  %v4786_v21 = vld [vmem:[%s6186_s1 + $0x708] ss:$16 sps:$4 sm:$0xff]  }
  0xfb   :  { %2678 = vmatpush1.bf16.msra.mxu0 %v4759_v60  ;;  %3130 = vmatpush1.bf16.msra.mxu1 %v4762_v61  ;;  %v4791_v23 = vld [vmem:[%s6186_s1 + $0x724] ss:$16 sps:$4 sm:$0xff]   ;;  %v4794_v24 = vld [vmem:[%s6186_s1 + $0x72c] ss:$16 sps:$4 sm:$0xff]   ;;  %v4789_v25 = vld [vmem:[%s6186_s1 + $0x720] ss:$16 sps:$4 sm:$0xff]  }
  0xfc   :  { %2679 = vmatprep.subr.bf16.mxu0 %v4767_v63  ;;  %3131 = vmatprep.subr.bf16.mxu1 %v4770_v0  ;;  %v4792_v27 = vld [vmem:[%s6186_s1 + $0x728] ss:$16 sps:$4 sm:$0xff]   ;;  %v3440_v29 = vld [vmem:[%s6187_s2 + $0x50] sm:$0xff]  ;;  %v4800_v31 = vld [vmem:[%s6186_s1 + $0x74c] ss:$16 sps:$4 sm:$0xff]  }
  0xfd   :  { %2618 = vmatprep.mubr.bf16.mxu0 %v1013_v2  ;;  %3070 = vmatprep.mubr.bf16.mxu1 %v1013_v2  ;;  %v1015_v26 = vpop.trf.xlu0  ;;  %v4797_v30 = vld [vmem:[%s6186_s1 + $0x744] ss:$16 sps:$4 sm:$0xff]   ;;  %v4795_v32 = vld [vmem:[%s6186_s1 + $0x740] ss:$16 sps:$4 sm:$0xff]   ;;  %v4798_v33 = vld [vmem:[%s6186_s1 + $0x748] ss:$16 sps:$4 sm:$0xff]   ;;  %v999_v34 = vpop.trf.xlu1 }
  0xfe   :  { %3463 = vperm.xlu1 %4382, %v3433_v4   ;;  %3478 = vperm.xlu0 %4381, %v3436_v5   ;;  %v4803_v35 = vld [vmem:[%s6186_s1 + $0x764] ss:$16 sps:$4 sm:$0xff]   ;;  %v4806_v36 = vld [vmem:[%s6186_s1 + $0x76c] ss:$16 sps:$4 sm:$0xff]   ;;  %v4801_v37 = vld [vmem:[%s6186_s1 + $0x760] ss:$16 sps:$4 sm:$0xff]  }
  0xff   :  { %2680 = vmatpush1.bf16.msra.mxu0 %v4765_v1  ;;  %3132 = vmatpush1.bf16.msra.mxu1 %v4768_v3  ;;  %v4804_v39 = vld [vmem:[%s6186_s1 + $0x768] ss:$16 sps:$4 sm:$0xff]   ;;  %v3442_v41 = vld [vmem:[%s6187_s2 + $0x60] sm:$0xff]  ;;  %v4812_v43 = vld [vmem:[%s6186_s1 + $0x78c] ss:$16 sps:$4 sm:$0xff]  }
 0x100   :  { %2681 = vmatprep.subr.bf16.mxu0 %v4773_v6  ;;  %3133 = vmatprep.subr.bf16.mxu1 %v4776_v7  ;;  %v3439_v40 = vld [vmem:[%s6187_s2 + $0x48] sm:$0xff]  ;;  %v4809_v42 = vld [vmem:[%s6186_s1 + $0x784] ss:$16 sps:$4 sm:$0xff]   ;;  %v4807_v44 = vld [vmem:[%s6186_s1 + $0x780] ss:$16 sps:$4 sm:$0xff]  }
 0x101   :  { %v1016_v38 = vpop.trf.xlu0  ;;  %v4810_v45 = vld [vmem:[%s6186_s1 + $0x788] ss:$16 sps:$4 sm:$0xff]   ;;  %v1000_v46 = vpop.trf.xlu1  ;;  %v4815_v47 = vld [vmem:[%s6186_s1 + $0x7a4] ss:$16 sps:$4 sm:$0xff]   ;;  %v4818_v48 = vld [vmem:[%s6186_s1 + $0x7ac] ss:$16 sps:$4 sm:$0xff]  }
 0x102   :  { %2619 = vmatmul.mubr.bf16.gmra.mrb[12].mxu0 %v997_v10  ;;  %3071 = vmatmul.mubr.bf16.gmra.mrb[12].mxu1 %v997_v10  ;;  %v4813_v49 = vld [vmem:[%s6186_s1 + $0x7a0] ss:$16 sps:$4 sm:$0xff]   ;;  %v4816_v51 = vld [vmem:[%s6186_s1 + $0x7a8] ss:$16 sps:$4 sm:$0xff]   ;;  %v4821_v54 = vld [vmem:[%s6186_s1 + $0x7c4] ss:$16 sps:$4 sm:$0xff]  }
 0x103   :  { %2682 = vmatpush1.bf16.msra.mxu0 %v4771_v8  ;;  %3134 = vmatpush1.bf16.msra.mxu1 %v4774_v9  ;;  %v3441_v52 = vld [vmem:[%s6187_s2 + $0x58] sm:$0xff]  ;;  %v3444_v53 = vld [vmem:[%s6187_s2 + $0x70] sm:$0xff]  ;;  %v3443_v0 = vld [vmem:[%s6187_s2 + $0x68] sm:$0xff] }
 0x104   :  { %2683 = vmatprep.subr.bf16.mxu0 %v4779_v11  ;;  %3135 = vmatprep.subr.bf16.mxu1 %v4782_v12  ;;  %v4824_v55 = vld [vmem:[%s6186_s1 + $0x7cc] ss:$16 sps:$4 sm:$0xff]   ;;  %v4819_v56 = vld [vmem:[%s6186_s1 + $0x7c0] ss:$16 sps:$4 sm:$0xff]   ;;  %v4822_v57 = vld [vmem:[%s6186_s1 + $0x7c8] ss:$16 sps:$4 sm:$0xff]  }
 0x105   :  { %2628 = vmatprep.mubr.bf16.mxu0 %v1014_v14  ;;  %3080 = vmatprep.mubr.bf16.mxu1 %v1014_v14  ;;  %v1017_v50 = vpop.trf.xlu0  ;;  %v1001_v58 = vpop.trf.xlu1  ;;  %v4827_v59 = vld [vmem:[%s6186_s1 + $0x7e4] ss:$16 sps:$4 sm:$0xff]   ;;  %v4830_v60 = vld [vmem:[%s6186_s1 + $0x7ec] ss:$16 sps:$4 sm:$0xff]   ;;  %v4825_v62 = vld [vmem:[%s6186_s1 + $0x7e0] ss:$16 sps:$4 sm:$0xff]  }
 0x106   :  { %3473 = vperm.xlu1 %4382, %v3435_v16   ;;  %3488 = vperm.xlu0 %4381, %v3438_v17   ;;  %v4828_v63 = vld [vmem:[%s6186_s1 + $0x7e8] ss:$16 sps:$4 sm:$0xff]   ;;  %v4856_v17 = vmov 0.0  }
 0x107   :  { %2684 = vmatpush1.bf16.msra.mxu0 %v4777_v13  ;;  %3136 = vmatpush1.bf16.msra.mxu1 %v4780_v15  ;;  %v3445_v3 = vld [vmem:[%s6187_s2 + $0x78] sm:$0xff]  ;;  %29 = vst.msk [vmem:[#allocation2 + $0x18] sm:$0xff] %vm28_vm0, %v4856_v17  ;;  %33 = vst.msk [vmem:[#allocation2 + $0x38] sm:$0xff] %vm28_vm0, %v4856_v17 }
 0x108   :  { %2685 = vmatprep.subr.bf16.mxu0 %v4785_v18  ;;  %3137 = vmatprep.subr.bf16.mxu1 %v4788_v19  ;;  %37 = vst.msk [vmem:[#allocation2 + $0x58] sm:$0xff] %vm28_vm0, %v4856_v17  ;;  %41 = vst.msk [vmem:[#allocation2 + $0x78] sm:$0xff] %vm28_vm0, %v4856_v17  ;;  %v3592_v18 = vlaneseq }
 0x109   :  { %v1042_v61 = vpop.trf.xlu0  ;;  %v1026_v1 = vpop.trf.xlu1  ;;  %45 = vst.msk [vmem:[#allocation2 + $0x98] sm:$0xff] %vm28_vm0, %v4856_v17  ;;  %49 = vst.msk [vmem:[#allocation2 + $0xb8] sm:$0xff] %vm28_vm0, %v4856_v17 }
 0x10a   :  { %2629 = vmatmul.mubr.bf16.gmra.mrb[16].mxu0 %v998_v22  ;;  %3081 = vmatmul.mubr.bf16.gmra.mrb[16].mxu1 %v998_v22  ;;  %53 = vst.msk [vmem:[#allocation2 + $0xd8] sm:$0xff] %vm28_vm0, %v4856_v17  ;;  %57 = vst.msk [vmem:[#allocation2 + $0xf8] sm:$0xff] %vm28_vm0, %v4856_v17  ;;  %v3593_v19 = vshrl.u32 %v3592_v18, 7 }
 0x10b   :  { %2686 = vmatpush1.bf16.msra.mxu0 %v4783_v20  ;;  %3138 = vmatpush1.bf16.msra.mxu1 %v4786_v21  ;;  %61 = vst.msk [vmem:[#allocation2 + $0x118] sm:$0xff] %vm28_vm0, %v4856_v17  ;;  %65 = vst.msk [vmem:[#allocation2 + $0x138] sm:$0xff] %vm28_vm0, %v4856_v17 }
 0x10c   :  { %2687 = vmatprep.subr.bf16.mxu0 %v4791_v23  ;;  %3139 = vmatprep.subr.bf16.mxu1 %v4794_v24  ;;  %69 = vst.msk [vmem:[#allocation2 + $0x158] sm:$0xff] %vm28_vm0, %v4856_v17  ;;  %73 = vst.msk [vmem:[#allocation2 + $0x178] sm:$0xff] %vm28_vm0, %v4856_v17  ;;  %v3594_v21 = vsub.s32 0, %v3593_v19  ;;  %v3602_v22 = vsub.s32 2, %v3593_v19  ;;  %v3590_v23 = vld [vmem:[%s6189_s4] sm:$0xf] }
 0x10d   :  { %2638 = vmatprep.mubr.bf16.mxu0 %v1015_v26  ;;  %3090 = vmatprep.mubr.bf16.mxu1 %v1015_v26  ;;  %v1043_v2 = vpop.trf.xlu0  ;;  %v1027_v4 = vpop.trf.xlu1  ;;  %77 = vst.msk [vmem:[#allocation2 + $0x198] sm:$0xff] %vm28_vm0, %v4856_v17  ;;  %81 = vst.msk [vmem:[#allocation2 + $0x1b8] sm:$0xff] %vm28_vm0, %v4856_v17  ;;  %v3598_v24 = vsub.s32 1, %v3593_v19 }
 0x10e   :  { %3483 = vperm.xlu1 %4382, %v3437_v28   ;;  %3498 = vperm.xlu0 %4381, %v3440_v29   ;;  %85 = vst.msk [vmem:[#allocation2 + $0x1d8] sm:$0xff] %vm28_vm0, %v4856_v17  ;;  %89 = vst.msk [vmem:[#allocation2 + $0x1f8] sm:$0xff] %vm28_vm0, %v4856_v17  ;;  %v93_v26 = vld [vmem:[#allocation2 + $0x18] sm:$0xff] }
 0x10f   :  { %2688 = vmatpush1.bf16.msra.mxu0 %v4789_v25  ;;  %3140 = vmatpush1.bf16.msra.mxu1 %v4792_v27  ;;  %v3676_v25 = vld [vmem:[%s6188_s3] sm:$0xf] }
 0x110   :  { %2689 = vmatprep.subr.bf16.mxu0 %v4797_v30  ;;  %3141 = vmatprep.subr.bf16.mxu1 %v4800_v31  ;;  %v5926_v31 = vrot.slane %v3590_v23, %v3594_v21 }
 0x111   :  { %v1044_v5 = vpop.trf.xlu0  ;;  %v1028_v6 = vpop.trf.xlu1 }
 0x112   :  { %2639 = vmatmul.mubr.bf16.gmra.mrb[20].mxu0 %v999_v34  ;;  %3091 = vmatmul.mubr.bf16.gmra.mrb[20].mxu1 %v999_v34 }
 0x113   :  { %2690 = vmatpush1.bf16.msra.mxu0 %v4795_v32  ;;  %3142 = vmatpush1.bf16.msra.mxu1 %v4798_v33  ;;  %v5928_v32 = vrot.slane %v3590_v23, %v3602_v22  ;;  %v3606_v33 = vsub.s32 3, %v3593_v19 }
 0x114   :  { %2691 = vmatprep.subr.bf16.mxu0 %v4803_v35  ;;  %3143 = vmatprep.subr.bf16.mxu1 %v4806_v36  ;;  %v97_v36 = vld [vmem:[#allocation2 + $0x38] sm:$0xff] }
 0x115   :  { %2648 = vmatprep.mubr.bf16.mxu0 %v1016_v38  ;;  %3100 = vmatprep.mubr.bf16.mxu1 %v1016_v38  ;;  %v1045_v7 = vpop.trf.xlu0  ;;  %v1029_v8 = vpop.trf.xlu1  ;;  %v5932_v38 = vrot.slane %v3676_v25, %v3594_v21 }
 0x116   :  { %3493 = vperm.xlu1 %4382, %v3439_v40   ;;  %3508 = vperm.xlu0 %4381, %v3442_v41  }
 0x117   :  { %2692 = vmatpush1.bf16.msra.mxu0 %v4801_v37  ;;  %3144 = vmatpush1.bf16.msra.mxu1 %v4804_v39  ;;  %v5930_v37 = vrot.slane %v3590_v23, %v3598_v24 }
 0x118   :  { %2693 = vmatprep.subr.bf16.mxu0 %v4809_v42  ;;  %3145 = vmatprep.subr.bf16.mxu1 %v4812_v43  ;;  %v5934_v42 = vrot.slane %v3676_v25, %v3598_v24  ;;  %v5936_v43 = vrot.slane %v3676_v25, %v3602_v22 }
 0x119   :  { %v1046_v9 = vpop.trf.xlu0  ;;  %v1030_v10 = vpop.trf.xlu1 }
 0x11a   :  { %2649 = vmatmul.mubr.bf16.gmra.mrb[24].mxu0 %v1000_v46  ;;  %3101 = vmatmul.mubr.bf16.gmra.mrb[24].mxu1 %v1000_v46 }
 0x11b   :  { %2694 = vmatpush1.bf16.msra.mxu0 %v4807_v44  ;;  %3146 = vmatpush1.bf16.msra.mxu1 %v4810_v45 }
 0x11c   :  { %2695 = vmatprep.subr.bf16.mxu0 %v4815_v47  ;;  %3147 = vmatprep.subr.bf16.mxu1 %v4818_v48  ;;  %v3677_v48 = vld [vmem:[%s6188_s3 + $0x4] sm:$0xf]  ;;  %s4857_s3 = smov [#allocation3]  }
 0x11d   :  { %2658 = vmatprep.mubr.bf16.mxu0 %v1017_v50  ;;  %3110 = vmatprep.mubr.bf16.mxu1 %v1017_v50  ;;  %v1047_v11 = vpop.trf.xlu0  ;;  %v1031_v12 = vpop.trf.xlu1  ;;  %v5944_v50 = vrot.slane %v3590_v23, %v3606_v33  ;;  %v5973_v17 = vrot.slane %v3677_v48, %v3606_v33  ;;  %s3853_s10 = sshll.u32 %s4857_s3, 4  ;;  %s3854_s10 = int_to_ptr.vmem [resolvable:$true] %s3853_s10 }
 0x11e   :  { %3503 = vperm.xlu1 %4382, %v3441_v52   ;;  %3518 = vperm.xlu0 %4381, %v3444_v53   ;;  %s4831_s11 = scalar_lea.vmem %s3854_s10, 8192  ;;  %p4836_p1 = scmp.lt.s32.totalorder %s3854_s10, %s3854_s10 }
 0x11f   :  { %2696 = vmatpush1.bf16.msra.mxu0 %v4813_v49  ;;  %3148 = vmatpush1.bf16.msra.mxu1 %v4816_v51  ;;  %p4832_p0 = scmp.ne.s32.totalorder %s3854_s10, %s4831_s11  ;;  %p4837_p2 = scmp.lt.s32.totalorder %s4831_s11, %s4831_s11 }
 0x120   :  { %2697 = vmatprep.subr.bf16.mxu0 %v4821_v54  ;;  %3149 = vmatprep.subr.bf16.mxu1 %v4824_v55 }
 0x121   :  { %v1048_v13 = vpop.trf.xlu0  ;;  %v1032_v14 = vpop.trf.xlu1  ;;  %p4838_p3 = por %p4837_p2, %p4836_p1 }
 0x122   :  { %2659 = vmatmul.mubr.bf16.gmra.mrb[28].mxu0 %v1001_v58  ;;  %3111 = vmatmul.mubr.bf16.gmra.mrb[28].mxu1 %v1001_v58 }
 0x123   :  { %2698 = vmatpush1.bf16.msra.mxu0 %v4819_v56  ;;  %3150 = vmatpush1.bf16.msra.mxu1 %v4822_v57  ;;  %v5952_v56 = vrot.slane %v3676_v25, %v3606_v33  ;;  %p4839_p4 = pnand %p4838_p3, %p4832_p0 }
 0x124   :  { %2699 = vmatprep.subr.bf16.mxu0 %v4827_v59  ;;  %3151 = vmatprep.subr.bf16.mxu1 %v4830_v60  ;;  %v5956_v59 = vrot.slane %v3677_v48, %v3594_v21 }
 0x125   :  { %2701 = vmatprep.mubr.bf16.mxu0 %v1042_v61  ;;  %3153 = vmatprep.mubr.bf16.mxu1 %v1042_v61  ;;  %v1049_v15 = vpop.trf.xlu0  ;;  %v1033_v16 = vpop.trf.xlu1 }
 0x126   :  { %3513 = vperm.xlu1 %4382, %v3443_v0  }
 0x127   :  { %2700 = vmatpush1.bf16.msra.mxu0 %v4825_v62  ;;  %3152 = vmatpush1.bf16.msra.mxu1 %v4828_v63  ;;  %v101_v62 = vld [vmem:[#allocation2 + $0x58] sm:$0xff] }
 0x12a   :  { %2702 = vmatmul.mubr.bf16.vlgmr.msra.gmra.mrb[0].mxu0 %v1026_v1  ;;  %3154 = vmatmul.mubr.bf16.vlgmr.msra.gmra.mrb[0].mxu1 %v1026_v1 }
 0x12b   :  { %2711 = vmatprep.mubr.bf16.mxu0 %v1043_v2  ;;  %3163 = vmatprep.mubr.bf16.mxu1 %v1043_v2 }
 0x12c   :  { %3523 = vperm.xlu1 %4382, %v3445_v3  }
 0x132   :  { %2712 = vmatmul.mubr.bf16.gmra.mrb[4].mxu0 %v1027_v4  ;;  %3164 = vmatmul.mubr.bf16.gmra.mrb[4].mxu1 %v1027_v4 }
 0x133   :  { %2721 = vmatprep.mubr.bf16.mxu0 %v1044_v5  ;;  %3173 = vmatprep.mubr.bf16.mxu1 %v1044_v5 }
 0x13a   :  { %2722 = vmatmul.mubr.bf16.gmra.mrb[8].mxu0 %v1028_v6  ;;  %3174 = vmatmul.mubr.bf16.gmra.mrb[8].mxu1 %v1028_v6  ;;  %v5966_v6 = vrot.slane %v3677_v48, %v3598_v24 }
 0x13b   :  { %2731 = vmatprep.mubr.bf16.mxu0 %v1045_v7  ;;  %3183 = vmatprep.mubr.bf16.mxu1 %v1045_v7  ;;  %v5968_v7 = vrot.slane %v3677_v48, %v3602_v22 }
 0x142   :  { %2732 = vmatmul.mubr.bf16.gmra.mrb[12].mxu0 %v1029_v8  ;;  %3184 = vmatmul.mubr.bf16.gmra.mrb[12].mxu1 %v1029_v8 }
 0x143   :  { %2741 = vmatprep.mubr.bf16.mxu0 %v1046_v9  ;;  %3193 = vmatprep.mubr.bf16.mxu1 %v1046_v9 }
 0x145   :  { %v5914_v20 = vpop.permute.xlu1 %3453  ;;  %v5924_v28 = vpop.permute.xlu0 %3448 }
 0x14a   :  { %2742 = vmatmul.mubr.bf16.gmra.mrb[16].mxu0 %v1030_v10  ;;  %3194 = vmatmul.mubr.bf16.gmra.mrb[16].mxu1 %v1030_v10 }
 0x14b   :  { %2751 = vmatprep.mubr.bf16.mxu0 %v1047_v11  ;;  %3203 = vmatprep.mubr.bf16.mxu1 %v1047_v11 }
 0x152   :  { %2752 = vmatmul.mubr.bf16.gmra.mrb[20].mxu0 %v1031_v12  ;;  %3204 = vmatmul.mubr.bf16.gmra.mrb[20].mxu1 %v1031_v12  ;;  %v105_v12 = vld [vmem:[#allocation2 + $0x78] sm:$0xff] }
 0x153   :  { %2761 = vmatprep.mubr.bf16.mxu0 %v1048_v13  ;;  %3213 = vmatprep.mubr.bf16.mxu1 %v1048_v13 }
 0x15a   :  { %2762 = vmatmul.mubr.bf16.gmra.mrb[24].mxu0 %v1032_v14  ;;  %3214 = vmatmul.mubr.bf16.gmra.mrb[24].mxu1 %v1032_v14 }
 0x15b   :  { %2771 = vmatprep.mubr.bf16.mxu0 %v1049_v15  ;;  %3223 = vmatprep.mubr.bf16.mxu1 %v1049_v15 }
 0x162   :  { %2772 = vmatmul.mubr.bf16.gmra.mrb[28].mxu0 %v1033_v16  ;;  %3224 = vmatmul.mubr.bf16.gmra.mrb[28].mxu1 %v1033_v16 }
 0x175   :  { %v5922_v27 = vpop.permute.xlu1 %3458  ;;  %v5993_v48 = vpop.permute.xlu0 %3468 }
 0x17d   :  { %v5962_v1 = vpop.permute.xlu1 %3463 }
 0x1fd   :  { %v2703_v29 = vpop.f32.mrb[0].mxu0  ;;  %v3155_v30 = vpop.f32.mrb[0].mxu1 }
 0x1fe   :  { %v2705_v34 = vpop.f32.mrb[1].mxu0  ;;  %v3157_v35 = vpop.f32.mrb[1].mxu1  ;;  %v3526_v46 = vmul.f32 %v5924_v28, %v2703_v29  ;;  %v3528_v47 = vmul.f32 %v5924_v28, %v3155_v30 }
 0x1ff   :  { %v3237_v39 = vadd.f32 %v3157_v35, %v93_v26  ;;  %v2707_v40 = vpop.f32.mrb[2].mxu0  ;;  %v3159_v41 = vpop.f32.mrb[2].mxu1  ;;  %v3527_v51 = vmul.f32 %v5924_v28, %v2705_v34 }
 0x200   :  { %v2709_v44 = vpop.f32.mrb[3].mxu0  ;;  %v3161_v45 = vpop.f32.mrb[3].mxu1  ;;  %v3530_v52 = vmul.f32 %v5914_v20, %v2707_v40  ;;  %v3532_v53 = vmul.f32 %v5914_v20, %v3159_v41  ;;  %v3612_v54 = vadd.f32 %v5926_v31, %v3526_v46  ;;  %v3614_v55 = vadd.f32 %v5928_v32, %v3528_v47  ;;  %v109_v47 = vld [vmem:[#allocation2 + $0x98] sm:$0xff] }
 0x201   :  { %3302 = vst.msk [vmem:[#allocation2 + $0x18] sm:$0xff] %vm28_vm0, %v3237_v39  ;;  %v3241_v49 = vadd.f32 %v3161_v45, %v97_v36  ;;  %v3531_v57 = vmul.f32 %v5914_v20, %v2709_v44  ;;  %v3613_v58 = vadd.f32 %v5930_v37, %v3527_v51 }
 0x202   :  { %v3616_v60 = vadd.f32 %v5926_v31, %v3530_v52  ;;  %v3618_v61 = vadd.f32 %v5928_v32, %v3532_v53  ;;  %v3720_v63 = vadd.f32 %v5932_v38, %v3612_v54  ;;  %v3722_v0 = vadd.f32 %v5936_v43, %v3614_v55 }
 0x203   :  { %3306 = vst.msk [vmem:[#allocation2 + $0x38] sm:$0xff] %vm28_vm0, %v3241_v49  ;;  %v3617_v2 = vadd.f32 %v5930_v37, %v3531_v57  ;;  %v3721_v5 = vadd.f32 %v5934_v42, %v3613_v58 }
 0x204   :  { %v3724_v8 = vadd.f32 %v5932_v38, %v3616_v60  ;;  %v3726_v9 = vadd.f32 %v5936_v43, %v3618_v61  ;;  %3784 = vst [vmem:[#allocation3] sm:$0xff] %v3720_v63  ;;  %3786 = vst [vmem:[#allocation3 + $0x10] sm:$0xff] %v3722_v0  ;;  %v113_v61 = vld [vmem:[#allocation2 + $0xb8] sm:$0xff] }
 0x205   :  { %v2713_v3 = vpop.f32.mrb[4].mxu0  ;;  %v3165_v4 = vpop.f32.mrb[4].mxu1  ;;  %v3725_v13 = vadd.f32 %v5934_v42, %v3617_v2  ;;  %3785 = vst [vmem:[#allocation3 + $0x8] sm:$0xff] %v3721_v5 }
 0x206   :  { %v2715_v10 = vpop.f32.mrb[5].mxu0  ;;  %v3167_v11 = vpop.f32.mrb[5].mxu1  ;;  %3788 = vst [vmem:[#allocation3 + $0x20] sm:$0xff] %v3724_v8  ;;  %3790 = vst [vmem:[#allocation3 + $0x30] sm:$0xff] %v3726_v9  ;;  %v3534_v18 = vmul.f32 %v5922_v27, %v2713_v3  ;;  %v3536_v19 = vmul.f32 %v5922_v27, %v3165_v4 }
 0x207   :  { %v3245_v14 = vadd.f32 %v3167_v11, %v101_v62  ;;  %v2717_v15 = vpop.f32.mrb[6].mxu0  ;;  %v3169_v16 = vpop.f32.mrb[6].mxu1  ;;  %3789 = vst [vmem:[#allocation3 + $0x28] sm:$0xff] %v3725_v13  ;;  %v3535_v24 = vmul.f32 %v5922_v27, %v2715_v10 }
 0x208   :  { %v3369_v21 = vld [vmem:[#allocation2 + $0x18] sm:$0xff]  ;;  %v2719_v22 = vpop.f32.mrb[7].mxu0  ;;  %v3171_v23 = vpop.f32.mrb[7].mxu1  ;;  %v3620_v30 = vadd.f32 %v5926_v31, %v3534_v18  ;;  %v3622_v33 = vadd.f32 %v5928_v32, %v3536_v19  ;;  %v3538_v34 = vmul.f32 %v5962_v1, %v2717_v15  ;;  %v3540_v35 = vmul.f32 %v5962_v1, %v3169_v16 }
 0x209   :  { %3310 = vst.msk [vmem:[#allocation2 + $0x58] sm:$0xff] %vm28_vm0, %v3245_v14  ;;  %v3529_v25 = vmul.f32 %v5924_v28, %v3369_v21  ;;  %v3249_v26 = vadd.f32 %v3171_v23, %v105_v12  ;;  %v3621_v39 = vadd.f32 %v5930_v37, %v3535_v24  ;;  %v3539_v28 = vmul.f32 %v5962_v1, %v2719_v22  ;;  %v3474_v12 = vpop.permute.xlu1 %3473 }
 0x20a   :  { %v3373_v29 = vld [vmem:[#allocation2 + $0x38] sm:$0xff]  ;;  %v3728_v41 = vadd.f32 %v5932_v38, %v3620_v30  ;;  %v3730_v44 = vadd.f32 %v5936_v43, %v3622_v33  ;;  %v3624_v45 = vadd.f32 %v5926_v31, %v3538_v34  ;;  %v3626_v46 = vadd.f32 %v5928_v32, %v3540_v35  ;;  %v6020_v34 = vpop.permute.xlu0 %3478 }
 0x20b   :  { %v3533_v36 = vmul.f32 %v5914_v20, %v3373_v29  ;;  %v3615_v40 = vadd.f32 %v5944_v50, %v3529_v25  ;;  %3314 = vst.msk [vmem:[#allocation2 + $0x78] sm:$0xff] %vm28_vm0, %v3249_v26  ;;  %v3729_v49 = vadd.f32 %v5934_v42, %v3621_v39  ;;  %v3625_v52 = vadd.f32 %v5930_v37, %v3539_v28  ;;  %v117_v33 = vld [vmem:[#allocation2 + $0xd8] sm:$0xff] }
 0x20c   :  { %3792 = vst [vmem:[#allocation3 + $0x40] sm:$0xff] %v3728_v41  ;;  %3794 = vst [vmem:[#allocation3 + $0x50] sm:$0xff] %v3730_v44  ;;  %v3732_v55 = vadd.f32 %v5932_v38, %v3624_v45  ;;  %v3734_v57 = vadd.f32 %v5936_v43, %v3626_v46 }
 0x20d   :  { %v3619_v20 = vadd.f32 %v5944_v50, %v3533_v36  ;;  %v3723_v51 = vadd.f32 %v5952_v56, %v3615_v40  ;;  %v2723_v53 = vpop.f32.mrb[8].mxu0  ;;  %v3175_v54 = vpop.f32.mrb[8].mxu1  ;;  %3793 = vst [vmem:[#allocation3 + $0x48] sm:$0xff] %v3729_v49  ;;  %v3733_v63 = vadd.f32 %v5934_v42, %v3625_v52 }
 0x20e   :  { %v2725_v58 = vpop.f32.mrb[9].mxu0  ;;  %v3177_v60 = vpop.f32.mrb[9].mxu1  ;;  %3796 = vst [vmem:[#allocation3 + $0x60] sm:$0xff] %v3732_v55  ;;  %3798 = vst [vmem:[#allocation3 + $0x70] sm:$0xff] %v3734_v57  ;;  %v3542_v9 = vmul.f32 %v5993_v48, %v2723_v53  ;;  %v3544_v10 = vmul.f32 %v5993_v48, %v3175_v54 }
 0x20f   :  { %v3727_v62 = vadd.f32 %v5952_v56, %v3619_v20  ;;  %3787 = vst.msk [vmem:[#allocation3 + $0x18] sm:$0xff] %vm28_vm0, %v3723_v51  ;;  %v3253_v0 = vadd.f32 %v3177_v60, %v109_v47  ;;  %v2727_v2 = vpop.f32.mrb[10].mxu0  ;;  %v3179_v3 = vpop.f32.mrb[10].mxu1  ;;  %3797 = vst [vmem:[#allocation3 + $0x68] sm:$0xff] %v3733_v63  ;;  %v3543_v14 = vmul.f32 %v5993_v48, %v2725_v58  ;;  %v121_v47 = vld [vmem:[#allocation2 + $0xf8] sm:$0xff] }
 0x210   :  { %v3377_v4 = vld [vmem:[#allocation2 + $0x58] sm:$0xff]  ;;  %v2729_v5 = vpop.f32.mrb[11].mxu0  ;;  %v3181_v8 = vpop.f32.mrb[11].mxu1  ;;  %v3546_v16 = vmul.f32 %v3474_v12, %v2727_v2  ;;  %v3548_v18 = vmul.f32 %v3474_v12, %v3179_v3  ;;  %v3628_v19 = vadd.f32 %v5926_v31, %v3542_v9  ;;  %v3630_v21 = vadd.f32 %v5928_v32, %v3544_v10 }
 0x211   :  { %3791 = vst.msk [vmem:[#allocation3 + $0x38] sm:$0xff] %vm28_vm0, %v3727_v62  ;;  %v3537_v11 = vmul.f32 %v5922_v27, %v3377_v4  ;;  %3318 = vst.msk [vmem:[#allocation2 + $0x98] sm:$0xff] %vm28_vm0, %v3253_v0  ;;  %v3257_v13 = vadd.f32 %v3181_v8, %v113_v61  ;;  %v3547_v24 = vmul.f32 %v3474_v12, %v2729_v5  ;;  %v3484_v61 = vpop.permute.xlu1 %3483 }
 0x212   :  { %v3381_v15 = vld [vmem:[#allocation2 + $0x78] sm:$0xff]  ;;  %v3629_v27 = vadd.f32 %v5930_v37, %v3543_v14  ;;  %v3632_v25 = vadd.f32 %v5926_v31, %v3546_v16  ;;  %v3634_v26 = vadd.f32 %v5928_v32, %v3548_v18  ;;  %v3736_v29 = vadd.f32 %v5932_v38, %v3628_v19  ;;  %v6046_v18 = vpop.permute.xlu0 %3488 }
 0x213   :  { %v3623_v22 = vadd.f32 %v5944_v50, %v3537_v11  ;;  %v3541_v23 = vmul.f32 %v5962_v1, %v3381_v15  ;;  %3322 = vst.msk [vmem:[#allocation2 + $0xb8] sm:$0xff] %vm28_vm0, %v3257_v13  ;;  %v3738_v30 = vadd.f32 %v5936_v43, %v3630_v21  ;;  %v3633_v36 = vadd.f32 %v5930_v37, %v3547_v24  ;;  %v125_v19 = vld [vmem:[#allocation2 + $0x118] sm:$0xff] }
 0x214   :  { %v3737_v28 = vadd.f32 %v5934_v42, %v3629_v27  ;;  %v3740_v41 = vadd.f32 %v5932_v38, %v3632_v25  ;;  %v3742_v44 = vadd.f32 %v5936_v43, %v3634_v26  ;;  %3800 = vst [vmem:[#allocation3 + $0x80] sm:$0xff] %v3736_v29 }
 0x215   :  { %v3731_v35 = vadd.f32 %v5952_v56, %v3623_v22  ;;  %v3627_v1 = vadd.f32 %v5944_v50, %v3541_v23  ;;  %v2733_v39 = vpop.f32.mrb[12].mxu0  ;;  %v3185_v40 = vpop.f32.mrb[12].mxu1  ;;  %3802 = vst [vmem:[#allocation3 + $0x90] sm:$0xff] %v3738_v30  ;;  %v3741_v49 = vadd.f32 %v5934_v42, %v3633_v36 }
 0x216   :  { %v2735_v45 = vpop.f32.mrb[13].mxu0  ;;  %v3187_v46 = vpop.f32.mrb[13].mxu1  ;;  %3801 = vst [vmem:[#allocation3 + $0x88] sm:$0xff] %v3737_v28  ;;  %3804 = vst [vmem:[#allocation3 + $0xa0] sm:$0xff] %v3740_v41  ;;  %v3550_v58 = vmul.f32 %v6020_v34, %v2733_v39  ;;  %v3552_v60 = vmul.f32 %v6020_v34, %v3185_v40 }
 0x217   :  { %3795 = vst.msk [vmem:[#allocation3 + $0x58] sm:$0xff] %vm28_vm0, %v3731_v35  ;;  %v3735_v20 = vadd.f32 %v5952_v56, %v3627_v1  ;;  %v3261_v51 = vadd.f32 %v3187_v46, %v117_v33  ;;  %v2737_v52 = vpop.f32.mrb[14].mxu0  ;;  %v3189_v53 = vpop.f32.mrb[14].mxu1  ;;  %3806 = vst [vmem:[#allocation3 + $0xb0] sm:$0xff] %v3742_v44  ;;  %v3551_v0 = vmul.f32 %v6020_v34, %v2735_v45  ;;  %v129_v33 = vld [vmem:[#allocation2 + $0x138] sm:$0xff] }
 0x218   :  { %v3385_v54 = vld [vmem:[#allocation2 + $0x98] sm:$0xff]  ;;  %v2739_v55 = vpop.f32.mrb[15].mxu0  ;;  %v3191_v57 = vpop.f32.mrb[15].mxu1  ;;  %3805 = vst [vmem:[#allocation3 + $0xa8] sm:$0xff] %v3741_v49  ;;  %v3554_v3 = vmul.f32 %v3484_v61, %v2737_v52  ;;  %v3556_v4 = vmul.f32 %v3484_v61, %v3189_v53  ;;  %v3636_v5 = vadd.f32 %v5926_v31, %v3550_v58  ;;  %v3638_v8 = vadd.f32 %v5928_v32, %v3552_v60 }
 0x219   :  { %3799 = vst.msk [vmem:[#allocation3 + $0x78] sm:$0xff] %vm28_vm0, %v3735_v20  ;;  %v3545_v62 = vmul.f32 %v5993_v48, %v3385_v54  ;;  %3326 = vst.msk [vmem:[#allocation2 + $0xd8] sm:$0xff] %vm28_vm0, %v3261_v51  ;;  %v3265_v63 = vadd.f32 %v3191_v57, %v121_v47  ;;  %v3555_v11 = vmul.f32 %v3484_v61, %v2739_v55  ;;  %v3494_v45 = vpop.permute.xlu1 %3493 }
 0x21a   :  { %v3389_v2 = vld [vmem:[#allocation2 + $0xb8] sm:$0xff]  ;;  %v3637_v48 = vadd.f32 %v5930_v37, %v3551_v0  ;;  %v3640_v13 = vadd.f32 %v5926_v31, %v3554_v3  ;;  %v3642_v14 = vadd.f32 %v5928_v32, %v3556_v4  ;;  %v3744_v15 = vadd.f32 %v5932_v38, %v3636_v5  ;;  %v6072_v0 = vpop.permute.xlu0 %3498 }
 0x21b   :  { %v3549_v9 = vmul.f32 %v3474_v12, %v3389_v2  ;;  %v3631_v10 = vadd.f32 %v5944_v50, %v3545_v62  ;;  %3330 = vst.msk [vmem:[#allocation2 + $0xf8] sm:$0xff] %vm28_vm0, %v3265_v63  ;;  %v3746_v16 = vadd.f32 %v5936_v43, %v3638_v8  ;;  %v3641_v22 = vadd.f32 %v5930_v37, %v3555_v11  ;;  %v133_v2 = vld [vmem:[#allocation2 + $0x158] sm:$0xff] }
 0x21c   :  { %v3745_v23 = vadd.f32 %v5934_v42, %v3637_v48  ;;  %v3748_v25 = vadd.f32 %v5932_v38, %v3640_v13  ;;  %v3750_v26 = vadd.f32 %v5936_v43, %v3642_v14  ;;  %3808 = vst [vmem:[#allocation3 + $0xc0] sm:$0xff] %v3744_v15  ;;  %v137_v14 = vld [vmem:[#allocation2 + $0x178] sm:$0xff] }
 0x21d   :  { %v3635_v12 = vadd.f32 %v5944_v50, %v3549_v9  ;;  %v3739_v21 = vadd.f32 %v5952_v56, %v3631_v10  ;;  %v2743_v24 = vpop.f32.mrb[16].mxu0  ;;  %v3195_v27 = vpop.f32.mrb[16].mxu1  ;;  %3810 = vst [vmem:[#allocation3 + $0xd0] sm:$0xff] %v3746_v16  ;;  %v3749_v1 = vadd.f32 %v5934_v42, %v3641_v22 }
 0x21e   :  { %v2745_v29 = vpop.f32.mrb[17].mxu0  ;;  %v3197_v30 = vpop.f32.mrb[17].mxu1  ;;  %3809 = vst [vmem:[#allocation3 + $0xc8] sm:$0xff] %v3745_v23  ;;  %3812 = vst [vmem:[#allocation3 + $0xe0] sm:$0xff] %v3748_v25  ;;  %v3558_v43 = vmul.f32 %v6046_v18, %v2743_v24  ;;  %v3560_v28 = vmul.f32 %v6046_v18, %v3195_v27 }
 0x21f   :  { %v3743_v35 = vadd.f32 %v5952_v56, %v3635_v12  ;;  %3803 = vst.msk [vmem:[#allocation3 + $0x98] sm:$0xff] %vm28_vm0, %v3739_v21  ;;  %v3269_v36 = vadd.f32 %v3197_v30, %v125_v19  ;;  %v2747_v39 = vpop.f32.mrb[18].mxu0  ;;  %v3199_v40 = vpop.f32.mrb[18].mxu1  ;;  %3814 = vst [vmem:[#allocation3 + $0xf0] sm:$0xff] %v3750_v26  ;;  %v3559_v42 = vmul.f32 %v6046_v18, %v2745_v29 }
 0x220   :  { %v3393_v38 = vld [vmem:[#allocation2 + $0xd8] sm:$0xff]  ;;  %v2749_v41 = vpop.f32.mrb[19].mxu0  ;;  %v3201_v44 = vpop.f32.mrb[19].mxu1  ;;  %3813 = vst [vmem:[#allocation3 + $0xe8] sm:$0xff] %v3749_v1  ;;  %v3644_v49 = vadd.f32 %v5926_v31, %v3558_v43  ;;  %v3646_v51 = vadd.f32 %v5928_v32, %v3560_v28  ;;  %v3562_v52 = vmul.f32 %v3494_v45, %v2747_v39  ;;  %v3564_v53 = vmul.f32 %v3494_v45, %v3199_v40 }
 0x221   :  { %3807 = vst.msk [vmem:[#allocation3 + $0xb8] sm:$0xff] %vm28_vm0, %v3743_v35  ;;  %v3553_v46 = vmul.f32 %v6020_v34, %v3393_v38  ;;  %3334 = vst.msk [vmem:[#allocation2 + $0x118] sm:$0xff] %vm28_vm0, %v3269_v36  ;;  %v3273_v47 = vadd.f32 %v3201_v44, %v129_v33  ;;  %v3645_v57 = vadd.f32 %v5930_v37, %v3559_v42  ;;  %v6096_v44 = vpop.permute.xlu0 %3508 }
 0x222   :  { %v3397_v20 = vld [vmem:[#allocation2 + $0xf8] sm:$0xff]  ;;  %v3563_v58 = vmul.f32 %v3494_v45, %v2749_v41  ;;  %v3752_v34 = vadd.f32 %v5956_v59, %v3644_v49  ;;  %v3754_v60 = vadd.f32 %v5968_v7, %v3646_v51  ;;  %v3648_v62 = vadd.f32 %v5926_v31, %v3562_v52 }
 0x223   :  { %v3557_v54 = vmul.f32 %v3484_v61, %v3397_v20  ;;  %v3639_v55 = vadd.f32 %v5944_v50, %v3553_v46  ;;  %3338 = vst.msk [vmem:[#allocation2 + $0x138] sm:$0xff] %vm28_vm0, %v3273_v47  ;;  %v3650_v63 = vadd.f32 %v5928_v32, %v3564_v53  ;;  %v3753_v4 = vadd.f32 %v5966_v6, %v3645_v57  ;;  %v141_v47 = vld [vmem:[#allocation2 + $0x198] sm:$0xff] }
 0x224   :  { %v3649_v5 = vadd.f32 %v5930_v37, %v3563_v58  ;;  %3816 = vst [vmem:[#allocation3 + $0x100] sm:$0xff] %v3752_v34  ;;  %3818 = vst [vmem:[#allocation3 + $0x110] sm:$0xff] %v3754_v60  ;;  %v3756_v10 = vadd.f32 %v5956_v59, %v3648_v62  ;;  %v145_v34 = vld [vmem:[#allocation2 + $0x1b8] sm:$0xff] }
 0x225   :  { %v3643_v61 = vadd.f32 %v5944_v50, %v3557_v54  ;;  %v3747_v3 = vadd.f32 %v5952_v56, %v3639_v55  ;;  %v2753_v8 = vpop.f32.mrb[20].mxu0  ;;  %v3205_v9 = vpop.f32.mrb[20].mxu1  ;;  %v3758_v11 = vadd.f32 %v5968_v7, %v3650_v63  ;;  %3817 = vst [vmem:[#allocation3 + $0x108] sm:$0xff] %v3753_v4 }
 0x226   :  { %v2755_v48 = vpop.f32.mrb[21].mxu0  ;;  %v3207_v13 = vpop.f32.mrb[21].mxu1  ;;  %v3757_v16 = vadd.f32 %v5966_v6, %v3649_v5  ;;  %3820 = vst [vmem:[#allocation3 + $0x120] sm:$0xff] %v3756_v10  ;;  %v3566_v23 = vmul.f32 %v6072_v0, %v2753_v8  ;;  %v3568_v24 = vmul.f32 %v6072_v0, %v3205_v9 }
 0x227   :  { %v3751_v15 = vadd.f32 %v5952_v56, %v3643_v61  ;;  %3811 = vst.msk [vmem:[#allocation3 + $0xd8] sm:$0xff] %vm28_vm0, %v3747_v3  ;;  %v3277_v19 = vadd.f32 %v3207_v13, %v133_v2  ;;  %v2757_v12 = vpop.f32.mrb[22].mxu0  ;;  %v3209_v21 = vpop.f32.mrb[22].mxu1  ;;  %3822 = vst [vmem:[#allocation3 + $0x130] sm:$0xff] %v3758_v11  ;;  %v3567_v29 = vmul.f32 %v6072_v0, %v2755_v48 }
 0x228   :  { %v3401_v22 = vld [vmem:[#allocation2 + $0x118] sm:$0xff]  ;;  %v2759_v27 = vpop.f32.mrb[23].mxu0  ;;  %v3211_v25 = vpop.f32.mrb[23].mxu1  ;;  %3821 = vst [vmem:[#allocation3 + $0x128] sm:$0xff] %v3757_v16  ;;  %v3652_v35 = vadd.f32 %v5926_v31, %v3566_v23  ;;  %v3654_v1 = vadd.f32 %v5928_v32, %v3568_v24 }
 0x229   :  { %3815 = vst.msk [vmem:[#allocation3 + $0xf8] sm:$0xff] %vm28_vm0, %v3751_v15  ;;  %v3504_v56 = vpop.permute.xlu1 %3503  ;;  %v3561_v26 = vmul.f32 %v6046_v18, %v3401_v22  ;;  %3342 = vst.msk [vmem:[#allocation2 + $0x158] sm:$0xff] %vm28_vm0, %v3277_v19  ;;  %v3281_v30 = vadd.f32 %v3211_v25, %v137_v14  ;;  %v3653_v43 = vadd.f32 %v5930_v37, %v3567_v29  ;;  %v6125_v24 = vpop.permute.xlu0 %3518 }
 0x22a   :  { %v3405_v33 = vld [vmem:[#allocation2 + $0x138] sm:$0xff]  ;;  %v3570_v36 = vmul.f32 %v3504_v56, %v2757_v12  ;;  %v3572_v39 = vmul.f32 %v3504_v56, %v3209_v21  ;;  %v3571_v28 = vmul.f32 %v3504_v56, %v2759_v27  ;;  %v3760_v18 = vadd.f32 %v5956_v59, %v3652_v35 }
 0x22b   :  { %v3647_v40 = vadd.f32 %v5944_v50, %v3561_v26  ;;  %v3565_v38 = vmul.f32 %v3494_v45, %v3405_v33  ;;  %3346 = vst.msk [vmem:[#allocation2 + $0x178] sm:$0xff] %vm28_vm0, %v3281_v30  ;;  %v3762_v41 = vadd.f32 %v5968_v7, %v3654_v1  ;;  %v3761_v49 = vadd.f32 %v5966_v6, %v3653_v43  ;;  %v149_v30 = vld [vmem:[#allocation2 + $0x1d8] sm:$0xff] }
 0x22c   :  { %v3656_v46 = vadd.f32 %v5926_v31, %v3570_v36  ;;  %v3658_v42 = vadd.f32 %v5928_v32, %v3572_v39  ;;  %v3657_v51 = vadd.f32 %v5930_v37, %v3571_v28  ;;  %3824 = vst [vmem:[#allocation3 + $0x140] sm:$0xff] %v3760_v18  ;;  %v153_v18 = vld [vmem:[#allocation2 + $0x1f8] sm:$0xff] }
 0x22d   :  { %v3755_v20 = vadd.f32 %v5973_v17, %v3647_v40  ;;  %v3651_v45 = vadd.f32 %v5944_v50, %v3565_v38  ;;  %v2763_v52 = vpop.f32.mrb[24].mxu0  ;;  %v3215_v53 = vpop.f32.mrb[24].mxu1  ;;  %3826 = vst [vmem:[#allocation3 + $0x150] sm:$0xff] %v3762_v41  ;;  %3825 = vst [vmem:[#allocation3 + $0x148] sm:$0xff] %v3761_v49 }
 0x22e   :  { %v3764_v54 = vadd.f32 %v5956_v59, %v3656_v46  ;;  %v3766_v55 = vadd.f32 %v5968_v7, %v3658_v42  ;;  %v2765_v57 = vpop.f32.mrb[25].mxu0  ;;  %v3217_v58 = vpop.f32.mrb[25].mxu1  ;;  %v3765_v62 = vadd.f32 %v5966_v6, %v3657_v51  ;;  %v3574_v4 = vmul.f32 %v6096_v44, %v2763_v52 }
 0x22f   :  { %3819 = vst.msk [vmem:[#allocation3 + $0x118] sm:$0xff] %vm28_vm0, %v3755_v20  ;;  %v3759_v60 = vadd.f32 %v5973_v17, %v3651_v45  ;;  %v3285_v63 = vadd.f32 %v3217_v58, %v141_v47  ;;  %v2767_v2 = vpop.f32.mrb[26].mxu0  ;;  %v3219_v61 = vpop.f32.mrb[26].mxu1  ;;  %v3576_v5 = vmul.f32 %v6096_v44, %v3215_v53  ;;  %v3575_v48 = vmul.f32 %v6096_v44, %v2765_v57 }
 0x230   :  { %v3409_v3 = vld [vmem:[#allocation2 + $0x158] sm:$0xff]  ;;  %3828 = vst [vmem:[#allocation3 + $0x160] sm:$0xff] %v3764_v54  ;;  %3830 = vst [vmem:[#allocation3 + $0x170] sm:$0xff] %v3766_v55  ;;  %v2769_v8 = vpop.f32.mrb[27].mxu0  ;;  %v3221_v9 = vpop.f32.mrb[27].mxu1  ;;  %v3660_v15 = vadd.f32 %v5926_v31, %v3574_v4 }
 0x231   :  { %v6111_v10 = vpop.permute.xlu1 %3513  ;;  %3823 = vst.msk [vmem:[#allocation3 + $0x138] sm:$0xff] %vm28_vm0, %v3759_v60  ;;  %v3569_v11 = vmul.f32 %v6072_v0, %v3409_v3  ;;  %3829 = vst [vmem:[#allocation3 + $0x168] sm:$0xff] %v3765_v62  ;;  %v3289_v13 = vadd.f32 %v3221_v9, %v145_v34  ;;  %v3662_v16 = vadd.f32 %v5928_v32, %v3576_v5 }
 0x232   :  { %3350 = vst.msk [vmem:[#allocation2 + $0x198] sm:$0xff] %vm28_vm0, %v3285_v63  ;;  %v3413_v14 = vld [vmem:[#allocation2 + $0x178] sm:$0xff]  ;;  %v3578_v19 = vmul.f32 %v6111_v10, %v2767_v2  ;;  %v3580_v12 = vmul.f32 %v6111_v10, %v3219_v61  ;;  %v3661_v0 = vadd.f32 %v5930_v37, %v3575_v48  ;;  %v3579_v23 = vmul.f32 %v6111_v10, %v2769_v8 }
 0x233   :  { %v3655_v21 = vadd.f32 %v5944_v50, %v3569_v11  ;;  %v3573_v22 = vmul.f32 %v3504_v56, %v3413_v14  ;;  %3354 = vst.msk [vmem:[#allocation2 + $0x1b8] sm:$0xff] %vm28_vm0, %v3289_v13  ;;  %v3768_v27 = vadd.f32 %v5956_v59, %v3660_v15  ;;  %v3770_v25 = vadd.f32 %v5968_v7, %v3662_v16 }
 0x234   :  { %v3664_v26 = vadd.f32 %v5926_v31, %v3578_v19  ;;  %v3666_v29 = vadd.f32 %v5928_v32, %v3580_v12  ;;  %v3769_v35 = vadd.f32 %v5966_v6, %v3661_v0  ;;  %v3665_v1 = vadd.f32 %v5930_v37, %v3579_v23 }
 0x235   :  { %v3763_v33 = vadd.f32 %v5973_v17, %v3655_v21  ;;  %v3659_v56 = vadd.f32 %v5944_v50, %v3573_v22  ;;  %v2773_v36 = vpop.f32.mrb[28].mxu0  ;;  %v3225_v39 = vpop.f32.mrb[28].mxu1  ;;  %3832 = vst [vmem:[#allocation3 + $0x180] sm:$0xff] %v3768_v27  ;;  %3834 = vst [vmem:[#allocation3 + $0x190] sm:$0xff] %v3770_v25 }
 0x236   :  { %v3772_v40 = vadd.f32 %v5956_v59, %v3664_v26  ;;  %v3774_v38 = vadd.f32 %v5968_v7, %v3666_v29  ;;  %v2775_v43 = vpop.f32.mrb[29].mxu0  ;;  %v3227_v28 = vpop.f32.mrb[29].mxu1  ;;  %3833 = vst [vmem:[#allocation3 + $0x188] sm:$0xff] %v3769_v35  ;;  %v3773_v46 = vadd.f32 %v5966_v6, %v3665_v1  ;;  %v3582_v49 = vmul.f32 %v6125_v24, %v2773_v36 }
 0x237   :  { %3827 = vst.msk [vmem:[#allocation3 + $0x158] sm:$0xff] %vm28_vm0, %v3763_v33  ;;  %v3767_v41 = vadd.f32 %v5973_v17, %v3659_v56  ;;  %v3293_v42 = vadd.f32 %v3227_v28, %v149_v30  ;;  %v2777_v47 = vpop.f32.mrb[30].mxu0  ;;  %v3229_v20 = vpop.f32.mrb[30].mxu1  ;;  %v3584_v51 = vmul.f32 %v6125_v24, %v3225_v39  ;;  %v3583_v57 = vmul.f32 %v6125_v24, %v2775_v43 }
 0x238   :  { %3836 = vst [vmem:[#allocation3 + $0x1a0] sm:$0xff] %v3772_v40  ;;  %3838 = vst [vmem:[#allocation3 + $0x1b0] sm:$0xff] %v3774_v38  ;;  %v2779_v52 = vpop.f32.mrb[31].mxu0  ;;  %v3231_v53 = vpop.f32.mrb[31].mxu1  ;;  %v3668_v60 = vadd.f32 %v5926_v31, %v3582_v49 }
 0x239   :  { %v3417_v45 = vld [vmem:[#allocation2 + $0x198] sm:$0xff]  ;;  %v3524_v54 = vpop.permute.xlu1 %3523  ;;  %3831 = vst.msk [vmem:[#allocation3 + $0x178] sm:$0xff] %vm28_vm0, %v3767_v41  ;;  %3837 = vst [vmem:[#allocation3 + $0x1a8] sm:$0xff] %v3773_v46  ;;  %v3297_v58 = vadd.f32 %v3231_v53, %v153_v18  ;;  %v3670_v62 = vadd.f32 %v5928_v32, %v3584_v51  ;;  %v3669_v4 = vadd.f32 %v5930_v37, %v3583_v57 }
 0x23a   :  { %v3577_v55 = vmul.f32 %v6096_v44, %v3417_v45  ;;  %3358 = vst.msk [vmem:[#allocation2 + $0x1d8] sm:$0xff] %vm28_vm0, %v3293_v42  ;;  %v3421_v34 = vld [vmem:[#allocation2 + $0x1b8] sm:$0xff]  ;;  %v3586_v63 = vmul.f32 %v3524_v54, %v2777_v47  ;;  %v3588_v2 = vmul.f32 %v3524_v54, %v3229_v20  ;;  %v3587_v44 = vmul.f32 %v3524_v54, %v2779_v52 }
 0x23b   :  { %v3581_v3 = vmul.f32 %v6111_v10, %v3421_v34  ;;  %3362 = vst.msk [vmem:[#allocation2 + $0x1f8] sm:$0xff] %vm28_vm0, %v3297_v58  ;;  %v3776_v5 = vadd.f32 %v5956_v59, %v3668_v60  ;;  %v3778_v8 = vadd.f32 %v5968_v7, %v3670_v62  ;;  %v3777_v14 = vadd.f32 %v5966_v6, %v3669_v4 }
 0x23c   :  { %v3663_v61 = vadd.f32 %v5944_v50, %v3577_v55  ;;  %v3672_v9 = vadd.f32 %v5926_v31, %v3586_v63  ;;  %v3674_v11 = vadd.f32 %v5928_v32, %v3588_v2  ;;  %v3673_v10 = vadd.f32 %v5930_v37, %v3587_v44 }
 0x23d   :  { %v3667_v13 = vadd.f32 %v5944_v50, %v3581_v3  ;;  %3840 = vst [vmem:[#allocation3 + $0x1c0] sm:$0xff] %v3776_v5  ;;  %3842 = vst [vmem:[#allocation3 + $0x1d0] sm:$0xff] %v3778_v8 }
 0x23e   :  { %v3771_v48 = vadd.f32 %v5973_v17, %v3663_v61  ;;  %v3780_v15 = vadd.f32 %v5956_v59, %v3672_v9  ;;  %v3782_v16 = vadd.f32 %v5968_v7, %v3674_v11  ;;  %3841 = vst [vmem:[#allocation3 + $0x1c8] sm:$0xff] %v3777_v14  ;;  %v3781_v32 = vadd.f32 %v5966_v6, %v3673_v10 }
 0x23f   :  { %v3775_v31 = vadd.f32 %v5973_v17, %v3667_v13 }
 0x240   :  { %3835 = vst.msk [vmem:[#allocation3 + $0x198] sm:$0xff] %vm28_vm0, %v3771_v48  ;;  %3844 = vst [vmem:[#allocation3 + $0x1e0] sm:$0xff] %v3780_v15 }
 0x241   :  { %v3425_v19 = vld [vmem:[#allocation2 + $0x1d8] sm:$0xff]  ;;  %3846 = vst [vmem:[#allocation3 + $0x1f0] sm:$0xff] %v3782_v16  ;;  %3839 = vst.msk [vmem:[#allocation3 + $0x1b8] sm:$0xff] %vm28_vm0, %v3775_v31 }
 0x242   :  { %v3585_v37 = vmul.f32 %v6125_v24, %v3425_v19  ;;  %3845 = vst [vmem:[#allocation3 + $0x1e8] sm:$0xff] %v3781_v32  ;;  %v3429_v12 = vld [vmem:[#allocation2 + $0x1f8] sm:$0xff] }
 0x243   :  { %v3589_v21 = vmul.f32 %v3524_v54, %v3429_v12 }
 0x244   :  { %v3671_v59 = vadd.f32 %v5944_v50, %v3585_v37 }
 0x245   :  { %v3675_v22 = vadd.f32 %v5944_v50, %v3589_v21 }
 0x246   :  { %v3779_v7 = vadd.f32 %v5973_v17, %v3671_v59 }
 0x247   :  { %v3783_v6 = vadd.f32 %v5973_v17, %v3675_v22 }
 0x248   :  { %3843 = vst.msk [vmem:[#allocation3 + $0x1d8] sm:$0xff] %vm28_vm0, %v3779_v7 }
 0x249   :  { %3847 = vst.msk [vmem:[#allocation3 + $0x1f8] sm:$0xff] %vm28_vm0, %v3783_v6 }
 0x24a   :  { %4842 = shalt.err (!%p4839_p4)
}
 0x24b   :  { %s4843_s14 = scalar_lea.hbm %s6190_s5, 8192 }
 0x24c   :  { %p4844_p5 = scmp.ne.s32.totalorder %s6190_s5, %s4843_s14  ;;  %p4847_p6 = scmp.lt.u32.totalorder %s4843_s14, %s6190_s5 }
 0x24e   :  { %p4849_p7 = pnand %p4847_p6, %p4844_p5 }
 0x250   :  { %4852 = shalt.err (!%p4849_p7)
}
 0x251   :  { %s4858_s19 = smov 512   ;;  %s4859_s20 = smov 32  }
 0x252   :  { %3859 = dma.vmem_to_hbm [thread:$0]  %s3854_s10, 8192, %s6190_s5, [#allocation4], %s4858_s19, %s4858_s19, %s4859_s20  }
 0x253   :  { %4853 = dma.done.wait [#allocation4], 8192  }
 0x254   :  { %4854 = vsyncadd [#allocation4], 4294959104 }
 0x255   :  { %3863 = vsyncpa [#allocation4], 1 }

</bundles_post_ra>
